<compile_context>
chip_gen: v7x
topology: tpu7x:2x2x1
jax: 0.10.0
libtpu: 0.0.40
codegen_flags: <defaults>
</compile_context>

<pallas_src>
import functools

import jax
import jax.numpy as jnp
from jax.experimental import pallas as pl
from jax.experimental.pallas import tpu as pltpu


def _round_up(x, m):
    return (x + m - 1) // m * m


# ---------------- Pallas MXU matmul (conv core) ----------------

def _matmul_bias_kernel(a_ref, b_ref, bias_ref, o_ref, *, activation):
    k = pl.program_id(2)

    @pl.when(k == 0)
    def _():
        o_ref[...] = jnp.zeros_like(o_ref)

    o_ref[...] += jnp.dot(a_ref[...], b_ref[...],
                          preferred_element_type=jnp.float32)

    @pl.when(k == pl.num_programs(2) - 1)
    def _():
        y = o_ref[...] + bias_ref[...]
        if activation == "tanh":
            y = jnp.tanh(y)          # EUP; essentially free in the epilogue
        o_ref[...] = y


def matmul_bias(a, b, bias, activation=None, bm=512, bn=256, bk=512):
    """(M,K)@(K,N)+bias[N] (optionally tanh), (M,N,K)-tiled on the MXU.

    A/B are cast to bf16 (f32 accumulation in the VMEM-resident f32 output
    block).  M/N grid axes are "parallel" so both TensorCores of a v7x chip
    get work; K is the innermost "arbitrary" reduction axis.
    """
    M, K = a.shape
    K2, N = b.shape
    assert K2 == K
    tm = min(bm, _round_up(M, 8))
    tn = min(bn, _round_up(N, 128))
    tk = min(bk, _round_up(K, 128))
    Mp, Np, Kp = _round_up(M, tm), _round_up(N, tn), _round_up(K, tk)

    a = a.astype(jnp.bfloat16)
    b = b.astype(jnp.bfloat16)
    if (Mp, Kp) != (M, K):
        a = jnp.zeros((Mp, Kp), jnp.bfloat16).at[:M, :K].set(a)
    if (Kp, Np) != (K, N):
        b = jnp.zeros((Kp, Np), jnp.bfloat16).at[:K, :N].set(b)
    bias_p = jnp.zeros((1, Np), jnp.float32).at[0, :N].set(
        bias.astype(jnp.float32))

    cost = pl.CostEstimate(
        flops=2 * M * N * K,
        transcendentals=(M * N if activation == "tanh" else 0),
        bytes_accessed=2 * Mp * Kp + 2 * Kp * Np + 4 * Mp * Np + 4 * Np)

    out = pl.pallas_call(
        functools.partial(_matmul_bias_kernel, activation=activation),
        out_shape=jax.ShapeDtypeStruct((Mp, Np), jnp.float32),
        grid_spec=pltpu.PrefetchScalarGridSpec(
            num_scalar_prefetch=0,
            grid=(Mp // tm, Np // tn, Kp // tk),
            in_specs=[pl.BlockSpec((tm, tk), lambda i, j, k: (i, k)),
                      pl.BlockSpec((tk, tn), lambda i, j, k: (k, j)),
                      pl.BlockSpec((1, tn), lambda i, j, k: (0, j))],
            out_specs=pl.BlockSpec((tm, tn), lambda i, j, k: (i, j))),
        compiler_params=pltpu.CompilerParams(
            dimension_semantics=("parallel", "parallel", "arbitrary"),
            vmem_limit_bytes=48 * 1024 * 1024),
        cost_estimate=cost,
    )(a, b, bias_p)
    if (Mp, Np) != (M, N):
        out = out[:M, :N]            # lane-dense padded slab, sliced outside
    return out


# ---------------- fused InstanceNorm (+ReLU) (+residual) ----------------

def _instnorm_kernel(*refs, relu, residual):
    if residual:
        x_ref, r_ref, o_ref = refs
    else:
        x_ref, o_ref = refs
    x = x_ref[...]                                    # (1, H*W, tc)
    mean = jnp.mean(x, axis=1, keepdims=True)
    xc = x - mean
    var = jnp.mean(xc * xc, axis=1, keepdims=True)    # biased var (PyTorch IN)
    y = xc * jax.lax.rsqrt(var + 1e-5)
    if relu:
        y = jnp.maximum(y, 0.0)
    if residual:
        y = y + r_ref[...]                            # fused x + block(x)
    o_ref[...] = y


def instance_norm(x, relu=False, residual=None):
    """InstanceNorm2d(affine=False) over NHWC, optionally fused ReLU/residual."""
    N, H, W, C = x.shape
    HW = H * W
    tc = 128 if (C > 128 and C % 128 == 0) else C
    spec = pl.BlockSpec((1, HW, tc), lambda n, c: (n, 0, c))
    args = [x.reshape(N, HW, C)]
    in_specs = [spec]
    if residual is not None:
        args.append(residual.reshape(N, HW, C))
        in_specs.append(spec)
    out = pl.pallas_call(
        functools.partial(_instnorm_kernel, relu=relu,
                          residual=residual is not None),
        out_shape=jax.ShapeDtypeStruct((N, HW, C), jnp.float32),
        grid_spec=pltpu.PrefetchScalarGridSpec(
            num_scalar_prefetch=0,
            grid=(N, C // tc),
            in_specs=in_specs,
            out_specs=spec),
        compiler_params=pltpu.CompilerParams(
            dimension_semantics=("parallel", "parallel")),
    )(*args)
    return out.reshape(N, H, W, C)


# ---------------- conv / upsample glue (NHWC) ----------------

def _im2col_nhwc(x, k, stride):
    """NHWC im2col -> (N*Ho*Wo, k*k*C) bf16 patches."""
    N, H, W, C = x.shape
    Ho = (H - k) // stride + 1
    Wo = (W - k) // stride + 1
    x = x.astype(jnp.bfloat16)                       # halve patch HBM traffic
    cols = []
    for i in range(k):
        for j in range(k):
            cols.append(x[:, i:i + stride * (Ho - 1) + 1:stride,
                             j:j + stride * (Wo - 1) + 1:stride, :])
    patches = jnp.stack(cols, axis=3)                # (N, Ho, Wo, k*k, C)
    return patches.reshape(N * Ho * Wo, k * k * C), Ho, Wo


def conv2d(x, w_mat, bias, ksize, stride=1, zero_pad=0, reflect_pad=0,
           activation=None):
    """NHWC conv via im2col + Pallas MXU matmul; returns NHWC f32."""
    if reflect_pad:
        p = reflect_pad
        x = jnp.pad(x, ((0, 0), (p, p), (p, p), (0, 0)), mode="reflect")
    if zero_pad:
        p = zero_pad
        x = jnp.pad(x, ((0, 0), (p, p), (p, p), (0, 0)))
    N = x.shape[0]
    patches, Ho, Wo = _im2col_nhwc(x, ksize, stride)
    out = matmul_bias(patches, w_mat, bias, activation=activation)
    return out.reshape(N, Ho, Wo, -1)


def upsample_nearest_2x(x):
    # nn.Upsample(scale_factor=2) (nearest), NHWC index replication.
    return jnp.repeat(jnp.repeat(x, 2, axis=1), 2, axis=2)


# ---------------- parameters ----------------

def init_params(key, in_ch=3):
    def conv_p(k, cout, cin, ksz):
        kw_, kb_ = jax.random.split(k)
        bound = 1.0 / jnp.sqrt(cin * ksz * ksz)      # PyTorch default init range
        return {"W": jax.random.uniform(kw_, (cout, cin, ksz, ksz),
                                        jnp.float32, -bound, bound),
                "b": jax.random.uniform(kb_, (cout,), jnp.float32,
                                        -bound, bound)}
    keys = jax.random.split(key, 15)
    return {
        "c_in":  conv_p(keys[0], 64, in_ch, 7),
        "down1": conv_p(keys[1], 128, 64, 3),
        "down2": conv_p(keys[2], 256, 128, 3),
        "res":   [conv_p(keys[3 + i], 256, 256, 3) for i in range(9)],
        "up1":   conv_p(keys[12], 128, 256, 3),
        "up2":   conv_p(keys[13], 64, 128, 3),
        "c_out": conv_p(keys[14], in_ch, 64, 7),
    }


def prepare_params(params):
    """Pre-transpose / reshape / cast conv weights ONCE, outside the forward.

    PyTorch layout (Cout, Cin, kh, kw) -> im2col layout (kh*kw*Cin, Cout) bf16.
    """
    def prep(p):
        W, b = p["W"], p["b"]
        cout, cin, kh, kw = W.shape
        w_mat = W.transpose(2, 3, 1, 0).reshape(kh * kw * cin, cout)
        return {"w": w_mat.astype(jnp.bfloat16), "b": b.astype(jnp.float32)}
    out = {k: prep(v) for k, v in params.items() if k != "res"}
    out["res"] = [prep(p) for p in params["res"]]
    return out


# ---------------- Generator forward ----------------

def generator_forward(prep, x, in_ch=3):
    h = jnp.transpose(x, (0, 2, 3, 1))               # NCHW -> NHWC (once)
    # ReflectionPad2d(in_ch) + Conv 7x7 -> 64 + InstanceNorm + ReLU
    h = conv2d(h, prep["c_in"]["w"], prep["c_in"]["b"], 7, reflect_pad=in_ch)
    h = instance_norm(h, relu=True)
    # Downsampling blocks (k=3, s=2, p=1)
    h = conv2d(h, prep["down1"]["w"], prep["down1"]["b"], 3, stride=2, zero_pad=1)
    h = instance_norm(h, relu=True)
    h = conv2d(h, prep["down2"]["w"], prep["down2"]["b"], 3, stride=2, zero_pad=1)
    h = instance_norm(h, relu=True)
    # 9 residual blocks.  NOTE: the PyTorch block reuses the SAME self.conv
    # twice inside block(), so each block has exactly one conv weight here too.
    for rp in prep["res"]:
        r = conv2d(h, rp["w"], rp["b"], 3, reflect_pad=1)
        r = instance_norm(r, relu=True)
        r = conv2d(r, rp["w"], rp["b"], 3, reflect_pad=1)
        h = instance_norm(r, relu=False, residual=h)  # fused IN + residual add
    # Upsampling: nearest 2x + SamplingBlock(k=3, s=1, p=1)
    h = upsample_nearest_2x(h)
    h = conv2d(h, prep["up1"]["w"], prep["up1"]["b"], 3, zero_pad=1)
    h = instance_norm(h, relu=True)
    h = upsample_nearest_2x(h)
    h = conv2d(h, prep["up2"]["w"], prep["up2"]["b"], 3, zero_pad=1)
    h = instance_norm(h, relu=True)
    # Output: ReflectionPad2d(in_ch) + Conv 7x7 -> in_ch, tanh fused in epilogue
    h = conv2d(h, prep["c_out"]["w"], prep["c_out"]["b"], 7,
               reflect_pad=in_ch, activation="tanh")
    return jnp.transpose(h, (0, 3, 1, 2))            # NHWC -> NCHW


if __name__ == "__main__":
    in_ch = 3   # Generator(input_shape=3): 3-channel images, pad=3 keeps H,W under the 7x7 conv
    key = jax.random.PRNGKey(0)
    kx, kp = jax.random.split(key)
    x = jax.random.normal(kx, (2, in_ch, 16, 16), jnp.float32)
    params = init_params(kp, in_ch)
    prep = prepare_params(params)                    # weight prep done once, outside forward

    fwd = jax.jit(functools.partial(generator_forward, in_ch=in_ch))
    out = fwd(prep, x)
    jax.block_until_ready(out)
    assert out.shape == (2, in_ch, 16, 16), out.shape
    assert bool(jnp.all(jnp.isfinite(out)))
    print("KERNEL_OK")
</pallas_src>

<mosaic_0001>
module attributes {stable_mosaic.version = 11 : i64} {
  func.func @_instnorm_kernel(%arg0: i32, %arg1: i32, %arg2: memref<1x256x64xf32, #tpu.memory_space<vmem>>, %arg3: memref<1x256x64xf32, #tpu.memory_space<vmem>>) attributes {dimension_semantics = [#tpu.dimension_semantics<parallel>, #tpu.dimension_semantics<parallel>], iteration_bounds = array<i64: 2, 1>, scalar_prefetch = 0 : i64, scratch_operands = 0 : i64, tpu.core_type = #tpu.core_type<tc>, window_params = [{transform_indices = @transform_0, window_bounds = array<i64: 1, 256, 64>}, {transform_indices = @transform_1, window_bounds = array<i64: 1, 256, 64>}]} {
    %c0 = arith.constant 0 : index
    %c0_0 = arith.constant 0 : index
    %c0_1 = arith.constant 0 : index
    %0 = vector.load %arg2[%c0, %c0_0, %c0_1] : memref<1x256x64xf32, #tpu.memory_space<vmem>>, vector<1x256x64xf32>
    %cst = arith.constant dense<0.000000e+00> : vector<1x64xf32>
    %1 = vector.multi_reduction <add>, %0, %cst [1] : vector<1x256x64xf32> to vector<1x64xf32>
    %2 = vector.shape_cast %1 : vector<1x64xf32> to vector<1x1x64xf32>
    %cst_2 = arith.constant 2.560000e+02 : f32
    %3 = vector.broadcast %cst_2 : f32 to vector<1x1x64xf32>
    %4 = arith.divf %2, %3 : vector<1x1x64xf32>
    %5 = vector.broadcast %4 : vector<1x1x64xf32> to vector<1x256x64xf32>
    %6 = arith.subf %0, %5 : vector<1x256x64xf32>
    %7 = arith.mulf %6, %6 : vector<1x256x64xf32>
    %cst_3 = arith.constant dense<0.000000e+00> : vector<1x64xf32>
    %8 = vector.multi_reduction <add>, %7, %cst_3 [1] : vector<1x256x64xf32> to vector<1x64xf32>
    %9 = vector.shape_cast %8 : vector<1x64xf32> to vector<1x1x64xf32>
    %cst_4 = arith.constant 2.560000e+02 : f32
    %10 = vector.broadcast %cst_4 : f32 to vector<1x1x64xf32>
    %11 = arith.divf %9, %10 : vector<1x1x64xf32>
    %cst_5 = arith.constant 9.99999974E-6 : f32
    %12 = vector.broadcast %cst_5 : f32 to vector<1x1x64xf32>
    %13 = arith.addf %11, %12 : vector<1x1x64xf32>
    %14 = math.rsqrt %13 : vector<1x1x64xf32>
    %15 = vector.broadcast %14 : vector<1x1x64xf32> to vector<1x256x64xf32>
    %16 = arith.mulf %6, %15 : vector<1x256x64xf32>
    %cst_6 = arith.constant 0.000000e+00 : f32
    %17 = vector.broadcast %cst_6 : f32 to vector<1x256x64xf32>
    %18 = arith.maximumf %16, %17 : vector<1x256x64xf32>
    %c0_7 = arith.constant 0 : index
    %c0_8 = arith.constant 0 : index
    %c0_9 = arith.constant 0 : index
    %19 = vector.load %arg3[%c0_7, %c0_8, %c0_9] : memref<1x256x64xf32, #tpu.memory_space<vmem>>, vector<1x256x64xf32>
    tpu.vector_store %arg3[%c0_7, %c0_8, %c0_9], %18 {strides = array<i32>} : memref<1x256x64xf32, #tpu.memory_space<vmem>>, vector<1x256x64xf32>,
    return
  }
  func.func @transform_0(%arg0: i32, %arg1: i32) -> (i32, i32, i32) {
    %c0_i32 = arith.constant 0 : i32
    %c0_i32_0 = arith.constant 0 : i32
    return %arg0, %c0_i32, %arg1 : i32, i32, i32
  }
  func.func @transform_1(%arg0: i32, %arg1: i32) -> (i32, i32, i32) {
    %c0_i32 = arith.constant 0 : i32
    %c0_i32_0 = arith.constant 0 : i32
    return %arg0, %c0_i32, %arg1 : i32, i32, i32
  }
}

module attributes {stable_mosaic.version = 11 : i64} {
  func.func @_matmul_bias_kernel(%arg0: i32, %arg1: i32, %arg2: i32, %arg3: memref<512x256xbf16, #tpu.memory_space<vmem>>, %arg4: memref<256x128xbf16, #tpu.memory_space<vmem>>, %arg5: memref<1x128xf32, #tpu.memory_space<vmem>>, %arg6: memref<512x128xf32, #tpu.memory_space<vmem>>) attributes {dimension_semantics = [#tpu.dimension_semantics<parallel>, #tpu.dimension_semantics<parallel>, #tpu.dimension_semantics<arbitrary>], iteration_bounds = array<i64: 1, 1, 1>, scalar_prefetch = 0 : i64, scratch_operands = 0 : i64, tpu.core_type = #tpu.core_type<tc>, window_params = [{transform_indices = @transform_0, window_bounds = array<i64: 512, 256>}, {transform_indices = @transform_1, window_bounds = array<i64: 256, 128>}, {transform_indices = @transform_2, window_bounds = array<i64: 1, 128>}, {transform_indices = @transform_3, window_bounds = array<i64: 512, 128>}]} {
    %c0_i32 = arith.constant 0 : i32
    %0 = arith.cmpi eq, %arg2, %c0_i32 : i32
    %1 = arith.extui %0 : i1 to i32
    %c0_i32_0 = arith.constant 0 : i32
    %2 = arith.cmpi ne, %1, %c0_i32_0 : i32
    scf.if %2 {
      %cst_10 = arith.constant 0.000000e+00 : f32
      %12 = vector.broadcast %cst_10 : f32 to vector<512x128xf32>
      %c0_11 = arith.constant 0 : index
      %c0_12 = arith.constant 0 : index
      %13 = vector.load %arg6[%c0_11, %c0_12] : memref<512x128xf32, #tpu.memory_space<vmem>>, vector<512x128xf32>
      tpu.vector_store %arg6[%c0_11, %c0_12], %12 {strides = array<i32>} : memref<512x128xf32, #tpu.memory_space<vmem>>, vector<512x128xf32>,
    } else {
    }
    %c0 = arith.constant 0 : index
    %c0_1 = arith.constant 0 : index
    %3 = vector.load %arg6[%c0, %c0_1] : memref<512x128xf32, #tpu.memory_space<vmem>>, vector<512x128xf32>
    %c0_2 = arith.constant 0 : index
    %c0_3 = arith.constant 0 : index
    %4 = vector.load %arg3[%c0_2, %c0_3] : memref<512x256xbf16, #tpu.memory_space<vmem>>, vector<512x256xbf16>
    %c0_4 = arith.constant 0 : index
    %c0_5 = arith.constant 0 : index
    %5 = vector.load %arg4[%c0_4, %c0_5] : memref<256x128xbf16, #tpu.memory_space<vmem>>, vector<256x128xbf16>
    %cst = arith.constant dense<0.000000e+00> : vector<512x128xf32>
    %6 = tpu.matmul %4, %5, %cst {dimension_numbers = #tpu.dot_dimension_numbers<[1], [0], [0], [1], [0, 0, 1, 1], [], []>} : vector<512x256xbf16>, vector<256x128xbf16>, vector<512x128xf32> -> vector<512x128xf32>
    %7 = arith.addf %3, %6 : vector<512x128xf32>
    %c0_6 = arith.constant 0 : index
    %c0_7 = arith.constant 0 : index
    %8 = vector.load %arg6[%c0_6, %c0_7] : memref<512x128xf32, #tpu.memory_space<vmem>>, vector<512x128xf32>
    tpu.vector_store %arg6[%c0_6, %c0_7], %7 {strides = array<i32>} : memref<512x128xf32, #tpu.memory_space<vmem>>, vector<512x128xf32>,
    %c0_i32_8 = arith.constant 0 : i32
    %9 = arith.cmpi eq, %arg2, %c0_i32_8 : i32
    %10 = arith.extui %9 : i1 to i32
    %c0_i32_9 = arith.constant 0 : i32
    %11 = arith.cmpi ne, %10, %c0_i32_9 : i32
    scf.if %11 {
      %c0_10 = arith.constant 0 : index
      %c0_11 = arith.constant 0 : index
      %12 = vector.load %arg6[%c0_10, %c0_11] : memref<512x128xf32, #tpu.memory_space<vmem>>, vector<512x128xf32>
      %c0_12 = arith.constant 0 : index
      %c0_13 = arith.constant 0 : index
      %13 = vector.load %arg5[%c0_12, %c0_13] : memref<1x128xf32, #tpu.memory_space<vmem>>, vector<1x128xf32>
      %14 = vector.broadcast %13 : vector<1x128xf32> to vector<512x128xf32>
      %15 = arith.addf %12, %14 : vector<512x128xf32>
      %c0_14 = arith.constant 0 : index
      %c0_15 = arith.constant 0 : index
      %16 = vector.load %arg6[%c0_14, %c0_15] : memref<512x128xf32, #tpu.memory_space<vmem>>, vector<512x128xf32>
      tpu.vector_store %arg6[%c0_14, %c0_15], %15 {strides = array<i32>} : memref<512x128xf32, #tpu.memory_space<vmem>>, vector<512x128xf32>,
    } else {
    }
    return
  }
  func.func @transform_0(%arg0: i32, %arg1: i32, %arg2: i32) -> (i32, i32) {
    %c0_i32 = arith.constant 0 : i32
    return %arg0, %arg2 : i32, i32
  }
  func.func @transform_1(%arg0: i32, %arg1: i32, %arg2: i32) -> (i32, i32) {
    %c0_i32 = arith.constant 0 : i32
    return %arg2, %arg1 : i32, i32
  }
  func.func @transform_2(%arg0: i32, %arg1: i32, %arg2: i32) -> (i32, i32) {
    %c0_i32 = arith.constant 0 : i32
    %c0_i32_0 = arith.constant 0 : i32
    return %c0_i32, %arg1 : i32, i32
  }
  func.func @transform_3(%arg0: i32, %arg1: i32, %arg2: i32) -> (i32, i32) {
    %c0_i32 = arith.constant 0 : i32
    return %arg0, %arg1 : i32, i32
  }
}

module attributes {stable_mosaic.version = 11 : i64} {
  func.func @_matmul_bias_kernel(%arg0: i32, %arg1: i32, %arg2: i32, %arg3: memref<128x512xbf16, #tpu.memory_space<vmem>>, %arg4: memref<512x128xbf16, #tpu.memory_space<vmem>>, %arg5: memref<1x128xf32, #tpu.memory_space<vmem>>, %arg6: memref<128x128xf32, #tpu.memory_space<vmem>>) attributes {dimension_semantics = [#tpu.dimension_semantics<parallel>, #tpu.dimension_semantics<parallel>, #tpu.dimension_semantics<arbitrary>], iteration_bounds = array<i64: 1, 1, 2>, scalar_prefetch = 0 : i64, scratch_operands = 0 : i64, tpu.core_type = #tpu.core_type<tc>, window_params = [{transform_indices = @transform_0, window_bounds = array<i64: 128, 512>}, {transform_indices = @transform_1, window_bounds = array<i64: 512, 128>}, {transform_indices = @transform_2, window_bounds = array<i64: 1, 128>}, {transform_indices = @transform_3, window_bounds = array<i64: 128, 128>}]} {
    %c0_i32 = arith.constant 0 : i32
    %0 = arith.cmpi eq, %arg2, %c0_i32 : i32
    %1 = arith.extui %0 : i1 to i32
    %c0_i32_0 = arith.constant 0 : i32
    %2 = arith.cmpi ne, %1, %c0_i32_0 : i32
    scf.if %2 {
      %cst_9 = arith.constant 0.000000e+00 : f32
      %12 = vector.broadcast %cst_9 : f32 to vector<128x128xf32>
      %c0_10 = arith.constant 0 : index
      %c0_11 = arith.constant 0 : index
      %13 = vector.load %arg6[%c0_10, %c0_11] : memref<128x128xf32, #tpu.memory_space<vmem>>, vector<128x128xf32>
      tpu.vector_store %arg6[%c0_10, %c0_11], %12 {strides = array<i32>} : memref<128x128xf32, #tpu.memory_space<vmem>>, vector<128x128xf32>,
    } else {
    }
    %c0 = arith.constant 0 : index
    %c0_1 = arith.constant 0 : index
    %3 = vector.load %arg6[%c0, %c0_1] : memref<128x128xf32, #tpu.memory_space<vmem>>, vector<128x128xf32>
    %c0_2 = arith.constant 0 : index
    %c0_3 = arith.constant 0 : index
    %4 = vector.load %arg3[%c0_2, %c0_3] : memref<128x512xbf16, #tpu.memory_space<vmem>>, vector<128x512xbf16>
    %c0_4 = arith.constant 0 : index
    %c0_5 = arith.constant 0 : index
    %5 = vector.load %arg4[%c0_4, %c0_5] : memref<512x128xbf16, #tpu.memory_space<vmem>>, vector<512x128xbf16>
    %cst = arith.constant dense<0.000000e+00> : vector<128x128xf32>
    %6 = tpu.matmul %4, %5, %cst {dimension_numbers = #tpu.dot_dimension_numbers<[1], [0], [0], [1], [0, 0, 1, 1], [], []>} : vector<128x512xbf16>, vector<512x128xbf16>, vector<128x128xf32> -> vector<128x128xf32>
    %7 = arith.addf %3, %6 : vector<128x128xf32>
    %c0_6 = arith.constant 0 : index
    %c0_7 = arith.constant 0 : index
    %8 = vector.load %arg6[%c0_6, %c0_7] : memref<128x128xf32, #tpu.memory_space<vmem>>, vector<128x128xf32>
    tpu.vector_store %arg6[%c0_6, %c0_7], %7 {strides = array<i32>} : memref<128x128xf32, #tpu.memory_space<vmem>>, vector<128x128xf32>,
    %c1_i32 = arith.constant 1 : i32
    %9 = arith.cmpi eq, %arg2, %c1_i32 : i32
    %10 = arith.extui %9 : i1 to i32
    %c0_i32_8 = arith.constant 0 : i32
    %11 = arith.cmpi ne, %10, %c0_i32_8 : i32
    scf.if %11 {
      %c0_9 = arith.constant 0 : index
      %c0_10 = arith.constant 0 : index
      %12 = vector.load %arg6[%c0_9, %c0_10] : memref<128x128xf32, #tpu.memory_space<vmem>>, vector<128x128xf32>
      %c0_11 = arith.constant 0 : index
      %c0_12 = arith.constant 0 : index
      %13 = vector.load %arg5[%c0_11, %c0_12] : memref<1x128xf32, #tpu.memory_space<vmem>>, vector<1x128xf32>
      %14 = vector.broadcast %13 : vector<1x128xf32> to vector<128x128xf32>
      %15 = arith.addf %12, %14 : vector<128x128xf32>
      %c0_13 = arith.constant 0 : index
      %c0_14 = arith.constant 0 : index
      %16 = vector.load %arg6[%c0_13, %c0_14] : memref<128x128xf32, #tpu.memory_space<vmem>>, vector<128x128xf32>
      tpu.vector_store %arg6[%c0_13, %c0_14], %15 {strides = array<i32>} : memref<128x128xf32, #tpu.memory_space<vmem>>, vector<128x128xf32>,
    } else {
    }
    return
  }
  func.func @transform_0(%arg0: i32, %arg1: i32, %arg2: i32) -> (i32, i32) {
    %c0_i32 = arith.constant 0 : i32
    return %arg0, %arg2 : i32, i32
  }
  func.func @transform_1(%arg0: i32, %arg1: i32, %arg2: i32) -> (i32, i32) {
    %c0_i32 = arith.constant 0 : i32
    return %arg2, %arg1 : i32, i32
  }
  func.func @transform_2(%arg0: i32, %arg1: i32, %arg2: i32) -> (i32, i32) {
    %c0_i32 = arith.constant 0 : i32
    %c0_i32_0 = arith.constant 0 : i32
    return %c0_i32, %arg1 : i32, i32
  }
  func.func @transform_3(%arg0: i32, %arg1: i32, %arg2: i32) -> (i32, i32) {
    %c0_i32 = arith.constant 0 : i32
    return %arg0, %arg1 : i32, i32
  }
}

module attributes {stable_mosaic.version = 11 : i64} {
  func.func @_instnorm_kernel(%arg0: i32, %arg1: i32, %arg2: memref<1x64x128xf32, #tpu.memory_space<vmem>>, %arg3: memref<1x64x128xf32, #tpu.memory_space<vmem>>) attributes {dimension_semantics = [#tpu.dimension_semantics<parallel>, #tpu.dimension_semantics<parallel>], iteration_bounds = array<i64: 2, 1>, scalar_prefetch = 0 : i64, scratch_operands = 0 : i64, tpu.core_type = #tpu.core_type<tc>, window_params = [{transform_indices = @transform_0, window_bounds = array<i64: 1, 64, 128>}, {transform_indices = @transform_1, window_bounds = array<i64: 1, 64, 128>}]} {
    %c0 = arith.constant 0 : index
    %c0_0 = arith.constant 0 : index
    %c0_1 = arith.constant 0 : index
    %0 = vector.load %arg2[%c0, %c0_0, %c0_1] : memref<1x64x128xf32, #tpu.memory_space<vmem>>, vector<1x64x128xf32>
    %cst = arith.constant dense<0.000000e+00> : vector<1x128xf32>
    %1 = vector.multi_reduction <add>, %0, %cst [1] : vector<1x64x128xf32> to vector<1x128xf32>
    %2 = vector.shape_cast %1 : vector<1x128xf32> to vector<1x1x128xf32>
    %cst_2 = arith.constant 6.400000e+01 : f32
    %3 = vector.broadcast %cst_2 : f32 to vector<1x1x128xf32>
    %4 = arith.divf %2, %3 : vector<1x1x128xf32>
    %5 = vector.broadcast %4 : vector<1x1x128xf32> to vector<1x64x128xf32>
    %6 = arith.subf %0, %5 : vector<1x64x128xf32>
    %7 = arith.mulf %6, %6 : vector<1x64x128xf32>
    %cst_3 = arith.constant dense<0.000000e+00> : vector<1x128xf32>
    %8 = vector.multi_reduction <add>, %7, %cst_3 [1] : vector<1x64x128xf32> to vector<1x128xf32>
    %9 = vector.shape_cast %8 : vector<1x128xf32> to vector<1x1x128xf32>
    %cst_4 = arith.constant 6.400000e+01 : f32
    %10 = vector.broadcast %cst_4 : f32 to vector<1x1x128xf32>
    %11 = arith.divf %9, %10 : vector<1x1x128xf32>
    %cst_5 = arith.constant 9.99999974E-6 : f32
    %12 = vector.broadcast %cst_5 : f32 to vector<1x1x128xf32>
    %13 = arith.addf %11, %12 : vector<1x1x128xf32>
    %14 = math.rsqrt %13 : vector<1x1x128xf32>
    %15 = vector.broadcast %14 : vector<1x1x128xf32> to vector<1x64x128xf32>
    %16 = arith.mulf %6, %15 : vector<1x64x128xf32>
    %cst_6 = arith.constant 0.000000e+00 : f32
    %17 = vector.broadcast %cst_6 : f32 to vector<1x64x128xf32>
    %18 = arith.maximumf %16, %17 : vector<1x64x128xf32>
    %c0_7 = arith.constant 0 : index
    %c0_8 = arith.constant 0 : index
    %c0_9 = arith.constant 0 : index
    %19 = vector.load %arg3[%c0_7, %c0_8, %c0_9] : memref<1x64x128xf32, #tpu.memory_space<vmem>>, vector<1x64x128xf32>
    tpu.vector_store %arg3[%c0_7, %c0_8, %c0_9], %18 {strides = array<i32>} : memref<1x64x128xf32, #tpu.memory_space<vmem>>, vector<1x64x128xf32>,
    return
  }
  func.func @transform_0(%arg0: i32, %arg1: i32) -> (i32, i32, i32) {
    %c0_i32 = arith.constant 0 : i32
    %c0_i32_0 = arith.constant 0 : i32
    return %arg0, %c0_i32, %arg1 : i32, i32, i32
  }
  func.func @transform_1(%arg0: i32, %arg1: i32) -> (i32, i32, i32) {
    %c0_i32 = arith.constant 0 : i32
    %c0_i32_0 = arith.constant 0 : i32
    return %arg0, %c0_i32, %arg1 : i32, i32, i32
  }
}

module attributes {stable_mosaic.version = 11 : i64} {
  func.func @_instnorm_kernel(%arg0: i32, %arg1: i32, %arg2: memref<1x16x128xf32, #tpu.memory_space<vmem>>, %arg3: memref<1x16x128xf32, #tpu.memory_space<vmem>>) attributes {dimension_semantics = [#tpu.dimension_semantics<parallel>, #tpu.dimension_semantics<parallel>], iteration_bounds = array<i64: 2, 2>, scalar_prefetch = 0 : i64, scratch_operands = 0 : i64, tpu.core_type = #tpu.core_type<tc>, window_params = [{transform_indices = @transform_0, window_bounds = array<i64: 1, 16, 128>}, {transform_indices = @transform_1, window_bounds = array<i64: 1, 16, 128>}]} {
    %c0 = arith.constant 0 : index
    %c0_0 = arith.constant 0 : index
    %c0_1 = arith.constant 0 : index
    %0 = vector.load %arg2[%c0, %c0_0, %c0_1] : memref<1x16x128xf32, #tpu.memory_space<vmem>>, vector<1x16x128xf32>
    %cst = arith.constant dense<0.000000e+00> : vector<1x128xf32>
    %1 = vector.multi_reduction <add>, %0, %cst [1] : vector<1x16x128xf32> to vector<1x128xf32>
    %2 = vector.shape_cast %1 : vector<1x128xf32> to vector<1x1x128xf32>
    %cst_2 = arith.constant 1.600000e+01 : f32
    %3 = vector.broadcast %cst_2 : f32 to vector<1x1x128xf32>
    %4 = arith.divf %2, %3 : vector<1x1x128xf32>
    %5 = vector.broadcast %4 : vector<1x1x128xf32> to vector<1x16x128xf32>
    %6 = arith.subf %0, %5 : vector<1x16x128xf32>
    %7 = arith.mulf %6, %6 : vector<1x16x128xf32>
    %cst_3 = arith.constant dense<0.000000e+00> : vector<1x128xf32>
    %8 = vector.multi_reduction <add>, %7, %cst_3 [1] : vector<1x16x128xf32> to vector<1x128xf32>
    %9 = vector.shape_cast %8 : vector<1x128xf32> to vector<1x1x128xf32>
    %cst_4 = arith.constant 1.600000e+01 : f32
    %10 = vector.broadcast %cst_4 : f32 to vector<1x1x128xf32>
    %11 = arith.divf %9, %10 : vector<1x1x128xf32>
    %cst_5 = arith.constant 9.99999974E-6 : f32
    %12 = vector.broadcast %cst_5 : f32 to vector<1x1x128xf32>
    %13 = arith.addf %11, %12 : vector<1x1x128xf32>
    %14 = math.rsqrt %13 : vector<1x1x128xf32>
    %15 = vector.broadcast %14 : vector<1x1x128xf32> to vector<1x16x128xf32>
    %16 = arith.mulf %6, %15 : vector<1x16x128xf32>
    %cst_6 = arith.constant 0.000000e+00 : f32
    %17 = vector.broadcast %cst_6 : f32 to vector<1x16x128xf32>
    %18 = arith.maximumf %16, %17 : vector<1x16x128xf32>
    %c0_7 = arith.constant 0 : index
    %c0_8 = arith.constant 0 : index
    %c0_9 = arith.constant 0 : index
    %19 = vector.load %arg3[%c0_7, %c0_8, %c0_9] : memref<1x16x128xf32, #tpu.memory_space<vmem>>, vector<1x16x128xf32>
    tpu.vector_store %arg3[%c0_7, %c0_8, %c0_9], %18 {strides = array<i32>} : memref<1x16x128xf32, #tpu.memory_space<vmem>>, vector<1x16x128xf32>,
    return
  }
  func.func @transform_0(%arg0: i32, %arg1: i32) -> (i32, i32, i32) {
    %c0_i32 = arith.constant 0 : i32
    %c0_i32_0 = arith.constant 0 : i32
    return %arg0, %c0_i32, %arg1 : i32, i32, i32
  }
  func.func @transform_1(%arg0: i32, %arg1: i32) -> (i32, i32, i32) {
    %c0_i32 = arith.constant 0 : i32
    %c0_i32_0 = arith.constant 0 : i32
    return %arg0, %c0_i32, %arg1 : i32, i32, i32
  }
}

module attributes {stable_mosaic.version = 11 : i64} {
  func.func @_matmul_bias_kernel(%arg0: i32, %arg1: i32, %arg2: i32, %arg3: memref<32x512xbf16, #tpu.memory_space<vmem>>, %arg4: memref<512x256xbf16, #tpu.memory_space<vmem>>, %arg5: memref<1x256xf32, #tpu.memory_space<vmem>>, %arg6: memref<32x256xf32, #tpu.memory_space<vmem>>) attributes {dimension_semantics = [#tpu.dimension_semantics<parallel>, #tpu.dimension_semantics<parallel>, #tpu.dimension_semantics<arbitrary>], iteration_bounds = array<i64: 1, 1, 3>, scalar_prefetch = 0 : i64, scratch_operands = 0 : i64, tpu.core_type = #tpu.core_type<tc>, window_params = [{transform_indices = @transform_0, window_bounds = array<i64: 32, 512>}, {transform_indices = @transform_1, window_bounds = array<i64: 512, 256>}, {transform_indices = @transform_2, window_bounds = array<i64: 1, 256>}, {transform_indices = @transform_3, window_bounds = array<i64: 32, 256>}]} {
    %c0_i32 = arith.constant 0 : i32
    %0 = arith.cmpi eq, %arg2, %c0_i32 : i32
    %1 = arith.extui %0 : i1 to i32
    %c0_i32_0 = arith.constant 0 : i32
    %2 = arith.cmpi ne, %1, %c0_i32_0 : i32
    scf.if %2 {
      %cst_9 = arith.constant 0.000000e+00 : f32
      %12 = vector.broadcast %cst_9 : f32 to vector<32x256xf32>
      %c0_10 = arith.constant 0 : index
      %c0_11 = arith.constant 0 : index
      %13 = vector.load %arg6[%c0_10, %c0_11] : memref<32x256xf32, #tpu.memory_space<vmem>>, vector<32x256xf32>
      tpu.vector_store %arg6[%c0_10, %c0_11], %12 {strides = array<i32>} : memref<32x256xf32, #tpu.memory_space<vmem>>, vector<32x256xf32>,
    } else {
    }
    %c0 = arith.constant 0 : index
    %c0_1 = arith.constant 0 : index
    %3 = vector.load %arg6[%c0, %c0_1] : memref<32x256xf32, #tpu.memory_space<vmem>>, vector<32x256xf32>
    %c0_2 = arith.constant 0 : index
    %c0_3 = arith.constant 0 : index
    %4 = vector.load %arg3[%c0_2, %c0_3] : memref<32x512xbf16, #tpu.memory_space<vmem>>, vector<32x512xbf16>
    %c0_4 = arith.constant 0 : index
    %c0_5 = arith.constant 0 : index
    %5 = vector.load %arg4[%c0_4, %c0_5] : memref<512x256xbf16, #tpu.memory_space<vmem>>, vector<512x256xbf16>
    %cst = arith.constant dense<0.000000e+00> : vector<32x256xf32>
    %6 = tpu.matmul %4, %5, %cst {dimension_numbers = #tpu.dot_dimension_numbers<[1], [0], [0], [1], [0, 0, 1, 1], [], []>} : vector<32x512xbf16>, vector<512x256xbf16>, vector<32x256xf32> -> vector<32x256xf32>
    %7 = arith.addf %3, %6 : vector<32x256xf32>
    %c0_6 = arith.constant 0 : index
    %c0_7 = arith.constant 0 : index
    %8 = vector.load %arg6[%c0_6, %c0_7] : memref<32x256xf32, #tpu.memory_space<vmem>>, vector<32x256xf32>
    tpu.vector_store %arg6[%c0_6, %c0_7], %7 {strides = array<i32>} : memref<32x256xf32, #tpu.memory_space<vmem>>, vector<32x256xf32>,
    %c2_i32 = arith.constant 2 : i32
    %9 = arith.cmpi eq, %arg2, %c2_i32 : i32
    %10 = arith.extui %9 : i1 to i32
    %c0_i32_8 = arith.constant 0 : i32
    %11 = arith.cmpi ne, %10, %c0_i32_8 : i32
    scf.if %11 {
      %c0_9 = arith.constant 0 : index
      %c0_10 = arith.constant 0 : index
      %12 = vector.load %arg6[%c0_9, %c0_10] : memref<32x256xf32, #tpu.memory_space<vmem>>, vector<32x256xf32>
      %c0_11 = arith.constant 0 : index
      %c0_12 = arith.constant 0 : index
      %13 = vector.load %arg5[%c0_11, %c0_12] : memref<1x256xf32, #tpu.memory_space<vmem>>, vector<1x256xf32>
      %14 = vector.broadcast %13 : vector<1x256xf32> to vector<32x256xf32>
      %15 = arith.addf %12, %14 : vector<32x256xf32>
      %c0_13 = arith.constant 0 : index
      %c0_14 = arith.constant 0 : index
      %16 = vector.load %arg6[%c0_13, %c0_14] : memref<32x256xf32, #tpu.memory_space<vmem>>, vector<32x256xf32>
      tpu.vector_store %arg6[%c0_13, %c0_14], %15 {strides = array<i32>} : memref<32x256xf32, #tpu.memory_space<vmem>>, vector<32x256xf32>,
    } else {
    }
    return
  }
  func.func @transform_0(%arg0: i32, %arg1: i32, %arg2: i32) -> (i32, i32) {
    %c0_i32 = arith.constant 0 : i32
    return %arg0, %arg2 : i32, i32
  }
  func.func @transform_1(%arg0: i32, %arg1: i32, %arg2: i32) -> (i32, i32) {
    %c0_i32 = arith.constant 0 : i32
    return %arg2, %arg1 : i32, i32
  }
  func.func @transform_2(%arg0: i32, %arg1: i32, %arg2: i32) -> (i32, i32) {
    %c0_i32 = arith.constant 0 : i32
    %c0_i32_0 = arith.constant 0 : i32
    return %c0_i32, %arg1 : i32, i32
  }
  func.func @transform_3(%arg0: i32, %arg1: i32, %arg2: i32) -> (i32, i32) {
    %c0_i32 = arith.constant 0 : i32
    return %arg0, %arg1 : i32, i32
  }
}

module attributes {stable_mosaic.version = 11 : i64} {
  func.func @_matmul_bias_kernel(%arg0: i32, %arg1: i32, %arg2: i32, %arg3: memref<32x512xbf16, #tpu.memory_space<vmem>>, %arg4: memref<512x256xbf16, #tpu.memory_space<vmem>>, %arg5: memref<1x256xf32, #tpu.memory_space<vmem>>, %arg6: memref<32x256xf32, #tpu.memory_space<vmem>>) attributes {dimension_semantics = [#tpu.dimension_semantics<parallel>, #tpu.dimension_semantics<parallel>, #tpu.dimension_semantics<arbitrary>], iteration_bounds = array<i64: 1, 1, 5>, scalar_prefetch = 0 : i64, scratch_operands = 0 : i64, tpu.core_type = #tpu.core_type<tc>, window_params = [{transform_indices = @transform_0, window_bounds = array<i64: 32, 512>}, {transform_indices = @transform_1, window_bounds = array<i64: 512, 256>}, {transform_indices = @transform_2, window_bounds = array<i64: 1, 256>}, {transform_indices = @transform_3, window_bounds = array<i64: 32, 256>}]} {
    %c0_i32 = arith.constant 0 : i32
    %0 = arith.cmpi eq, %arg2, %c0_i32 : i32
    %1 = arith.extui %0 : i1 to i32
    %c0_i32_0 = arith.constant 0 : i32
    %2 = arith.cmpi ne, %1, %c0_i32_0 : i32
    scf.if %2 {
      %cst_9 = arith.constant 0.000000e+00 : f32
      %12 = vector.broadcast %cst_9 : f32 to vector<32x256xf32>
      %c0_10 = arith.constant 0 : index
      %c0_11 = arith.constant 0 : index
      %13 = vector.load %arg6[%c0_10, %c0_11] : memref<32x256xf32, #tpu.memory_space<vmem>>, vector<32x256xf32>
      tpu.vector_store %arg6[%c0_10, %c0_11], %12 {strides = array<i32>} : memref<32x256xf32, #tpu.memory_space<vmem>>, vector<32x256xf32>,
    } else {
    }
    %c0 = arith.constant 0 : index
    %c0_1 = arith.constant 0 : index
    %3 = vector.load %arg6[%c0, %c0_1] : memref<32x256xf32, #tpu.memory_space<vmem>>, vector<32x256xf32>
    %c0_2 = arith.constant 0 : index
    %c0_3 = arith.constant 0 : index
    %4 = vector.load %arg3[%c0_2, %c0_3] : memref<32x512xbf16, #tpu.memory_space<vmem>>, vector<32x512xbf16>
    %c0_4 = arith.constant 0 : index
    %c0_5 = arith.constant 0 : index
    %5 = vector.load %arg4[%c0_4, %c0_5] : memref<512x256xbf16, #tpu.memory_space<vmem>>, vector<512x256xbf16>
    %cst = arith.constant dense<0.000000e+00> : vector<32x256xf32>
    %6 = tpu.matmul %4, %5, %cst {dimension_numbers = #tpu.dot_dimension_numbers<[1], [0], [0], [1], [0, 0, 1, 1], [], []>} : vector<32x512xbf16>, vector<512x256xbf16>, vector<32x256xf32> -> vector<32x256xf32>
    %7 = arith.addf %3, %6 : vector<32x256xf32>
    %c0_6 = arith.constant 0 : index
    %c0_7 = arith.constant 0 : index
    %8 = vector.load %arg6[%c0_6, %c0_7] : memref<32x256xf32, #tpu.memory_space<vmem>>, vector<32x256xf32>
    tpu.vector_store %arg6[%c0_6, %c0_7], %7 {strides = array<i32>} : memref<32x256xf32, #tpu.memory_space<vmem>>, vector<32x256xf32>,
    %c4_i32 = arith.constant 4 : i32
    %9 = arith.cmpi eq, %arg2, %c4_i32 : i32
    %10 = arith.extui %9 : i1 to i32
    %c0_i32_8 = arith.constant 0 : i32
    %11 = arith.cmpi ne, %10, %c0_i32_8 : i32
    scf.if %11 {
      %c0_9 = arith.constant 0 : index
      %c0_10 = arith.constant 0 : index
      %12 = vector.load %arg6[%c0_9, %c0_10] : memref<32x256xf32, #tpu.memory_space<vmem>>, vector<32x256xf32>
      %c0_11 = arith.constant 0 : index
      %c0_12 = arith.constant 0 : index
      %13 = vector.load %arg5[%c0_11, %c0_12] : memref<1x256xf32, #tpu.memory_space<vmem>>, vector<1x256xf32>
      %14 = vector.broadcast %13 : vector<1x256xf32> to vector<32x256xf32>
      %15 = arith.addf %12, %14 : vector<32x256xf32>
      %c0_13 = arith.constant 0 : index
      %c0_14 = arith.constant 0 : index
      %16 = vector.load %arg6[%c0_13, %c0_14] : memref<32x256xf32, #tpu.memory_space<vmem>>, vector<32x256xf32>
      tpu.vector_store %arg6[%c0_13, %c0_14], %15 {strides = array<i32>} : memref<32x256xf32, #tpu.memory_space<vmem>>, vector<32x256xf32>,
    } else {
    }
    return
  }
  func.func @transform_0(%arg0: i32, %arg1: i32, %arg2: i32) -> (i32, i32) {
    %c0_i32 = arith.constant 0 : i32
    return %arg0, %arg2 : i32, i32
  }
  func.func @transform_1(%arg0: i32, %arg1: i32, %arg2: i32) -> (i32, i32) {
    %c0_i32 = arith.constant 0 : i32
    return %arg2, %arg1 : i32, i32
  }
  func.func @transform_2(%arg0: i32, %arg1: i32, %arg2: i32) -> (i32, i32) {
    %c0_i32 = arith.constant 0 : i32
    %c0_i32_0 = arith.constant 0 : i32
    return %c0_i32, %arg1 : i32, i32
  }
  func.func @transform_3(%arg0: i32, %arg1: i32, %arg2: i32) -> (i32, i32) {
    %c0_i32 = arith.constant 0 : i32
    return %arg0, %arg1 : i32, i32
  }
}

module attributes {stable_mosaic.version = 11 : i64} {
  func.func @_instnorm_kernel(%arg0: i32, %arg1: i32, %arg2: memref<1x16x128xf32, #tpu.memory_space<vmem>>, %arg3: memref<1x16x128xf32, #tpu.memory_space<vmem>>, %arg4: memref<1x16x128xf32, #tpu.memory_space<vmem>>) attributes {dimension_semantics = [#tpu.dimension_semantics<parallel>, #tpu.dimension_semantics<parallel>], iteration_bounds = array<i64: 2, 2>, scalar_prefetch = 0 : i64, scratch_operands = 0 : i64, tpu.core_type = #tpu.core_type<tc>, window_params = [{transform_indices = @transform_0, window_bounds = array<i64: 1, 16, 128>}, {transform_indices = @transform_1, window_bounds = array<i64: 1, 16, 128>}, {transform_indices = @transform_2, window_bounds = array<i64: 1, 16, 128>}]} {
    %c0 = arith.constant 0 : index
    %c0_0 = arith.constant 0 : index
    %c0_1 = arith.constant 0 : index
    %0 = vector.load %arg2[%c0, %c0_0, %c0_1] : memref<1x16x128xf32, #tpu.memory_space<vmem>>, vector<1x16x128xf32>
    %cst = arith.constant dense<0.000000e+00> : vector<1x128xf32>
    %1 = vector.multi_reduction <add>, %0, %cst [1] : vector<1x16x128xf32> to vector<1x128xf32>
    %2 = vector.shape_cast %1 : vector<1x128xf32> to vector<1x1x128xf32>
    %cst_2 = arith.constant 1.600000e+01 : f32
    %3 = vector.broadcast %cst_2 : f32 to vector<1x1x128xf32>
    %4 = arith.divf %2, %3 : vector<1x1x128xf32>
    %5 = vector.broadcast %4 : vector<1x1x128xf32> to vector<1x16x128xf32>
    %6 = arith.subf %0, %5 : vector<1x16x128xf32>
    %7 = arith.mulf %6, %6 : vector<1x16x128xf32>
    %cst_3 = arith.constant dense<0.000000e+00> : vector<1x128xf32>
    %8 = vector.multi_reduction <add>, %7, %cst_3 [1] : vector<1x16x128xf32> to vector<1x128xf32>
    %9 = vector.shape_cast %8 : vector<1x128xf32> to vector<1x1x128xf32>
    %cst_4 = arith.constant 1.600000e+01 : f32
    %10 = vector.broadcast %cst_4 : f32 to vector<1x1x128xf32>
    %11 = arith.divf %9, %10 : vector<1x1x128xf32>
    %cst_5 = arith.constant 9.99999974E-6 : f32
    %12 = vector.broadcast %cst_5 : f32 to vector<1x1x128xf32>
    %13 = arith.addf %11, %12 : vector<1x1x128xf32>
    %14 = math.rsqrt %13 : vector<1x1x128xf32>
    %15 = vector.broadcast %14 : vector<1x1x128xf32> to vector<1x16x128xf32>
    %16 = arith.mulf %6, %15 : vector<1x16x128xf32>
    %c0_6 = arith.constant 0 : index
    %c0_7 = arith.constant 0 : index
    %c0_8 = arith.constant 0 : index
    %17 = vector.load %arg3[%c0_6, %c0_7, %c0_8] : memref<1x16x128xf32, #tpu.memory_space<vmem>>, vector<1x16x128xf32>
    %18 = arith.addf %16, %17 : vector<1x16x128xf32>
    %c0_9 = arith.constant 0 : index
    %c0_10 = arith.constant 0 : index
    %c0_11 = arith.constant 0 : index
    %19 = vector.load %arg4[%c0_9, %c0_10, %c0_11] : memref<1x16x128xf32, #tpu.memory_space<vmem>>, vector<1x16x128xf32>
    tpu.vector_store %arg4[%c0_9, %c0_10, %c0_11], %18 {strides = array<i32>} : memref<1x16x128xf32, #tpu.memory_space<vmem>>, vector<1x16x128xf32>,
    return
  }
  func.func @transform_0(%arg0: i32, %arg1: i32) -> (i32, i32, i32) {
    %c0_i32 = arith.constant 0 : i32
    %c0_i32_0 = arith.constant 0 : i32
    return %arg0, %c0_i32, %arg1 : i32, i32, i32
  }
  func.func @transform_1(%arg0: i32, %arg1: i32) -> (i32, i32, i32) {
    %c0_i32 = arith.constant 0 : i32
    %c0_i32_0 = arith.constant 0 : i32
    return %arg0, %c0_i32, %arg1 : i32, i32, i32
  }
  func.func @transform_2(%arg0: i32, %arg1: i32) -> (i32, i32, i32) {
    %c0_i32 = arith.constant 0 : i32
    %c0_i32_0 = arith.constant 0 : i32
    return %arg0, %c0_i32, %arg1 : i32, i32, i32
  }
}

module attributes {stable_mosaic.version = 11 : i64} {
  func.func @_matmul_bias_kernel(%arg0: i32, %arg1: i32, %arg2: i32, %arg3: memref<128x512xbf16, #tpu.memory_space<vmem>>, %arg4: memref<512x128xbf16, #tpu.memory_space<vmem>>, %arg5: memref<1x128xf32, #tpu.memory_space<vmem>>, %arg6: memref<128x128xf32, #tpu.memory_space<vmem>>) attributes {dimension_semantics = [#tpu.dimension_semantics<parallel>, #tpu.dimension_semantics<parallel>, #tpu.dimension_semantics<arbitrary>], iteration_bounds = array<i64: 1, 1, 5>, scalar_prefetch = 0 : i64, scratch_operands = 0 : i64, tpu.core_type = #tpu.core_type<tc>, window_params = [{transform_indices = @transform_0, window_bounds = array<i64: 128, 512>}, {transform_indices = @transform_1, window_bounds = array<i64: 512, 128>}, {transform_indices = @transform_2, window_bounds = array<i64: 1, 128>}, {transform_indices = @transform_3, window_bounds = array<i64: 128, 128>}]} {
    %c0_i32 = arith.constant 0 : i32
    %0 = arith.cmpi eq, %arg2, %c0_i32 : i32
    %1 = arith.extui %0 : i1 to i32
    %c0_i32_0 = arith.constant 0 : i32
    %2 = arith.cmpi ne, %1, %c0_i32_0 : i32
    scf.if %2 {
      %cst_9 = arith.constant 0.000000e+00 : f32
      %12 = vector.broadcast %cst_9 : f32 to vector<128x128xf32>
      %c0_10 = arith.constant 0 : index
      %c0_11 = arith.constant 0 : index
      %13 = vector.load %arg6[%c0_10, %c0_11] : memref<128x128xf32, #tpu.memory_space<vmem>>, vector<128x128xf32>
      tpu.vector_store %arg6[%c0_10, %c0_11], %12 {strides = array<i32>} : memref<128x128xf32, #tpu.memory_space<vmem>>, vector<128x128xf32>,
    } else {
    }
    %c0 = arith.constant 0 : index
    %c0_1 = arith.constant 0 : index
    %3 = vector.load %arg6[%c0, %c0_1] : memref<128x128xf32, #tpu.memory_space<vmem>>, vector<128x128xf32>
    %c0_2 = arith.constant 0 : index
    %c0_3 = arith.constant 0 : index
    %4 = vector.load %arg3[%c0_2, %c0_3] : memref<128x512xbf16, #tpu.memory_space<vmem>>, vector<128x512xbf16>
    %c0_4 = arith.constant 0 : index
    %c0_5 = arith.constant 0 : index
    %5 = vector.load %arg4[%c0_4, %c0_5] : memref<512x128xbf16, #tpu.memory_space<vmem>>, vector<512x128xbf16>
    %cst = arith.constant dense<0.000000e+00> : vector<128x128xf32>
    %6 = tpu.matmul %4, %5, %cst {dimension_numbers = #tpu.dot_dimension_numbers<[1], [0], [0], [1], [0, 0, 1, 1], [], []>} : vector<128x512xbf16>, vector<512x128xbf16>, vector<128x128xf32> -> vector<128x128xf32>
    %7 = arith.addf %3, %6 : vector<128x128xf32>
    %c0_6 = arith.constant 0 : index
    %c0_7 = arith.constant 0 : index
    %8 = vector.load %arg6[%c0_6, %c0_7] : memref<128x128xf32, #tpu.memory_space<vmem>>, vector<128x128xf32>
    tpu.vector_store %arg6[%c0_6, %c0_7], %7 {strides = array<i32>} : memref<128x128xf32, #tpu.memory_space<vmem>>, vector<128x128xf32>,
    %c4_i32 = arith.constant 4 : i32
    %9 = arith.cmpi eq, %arg2, %c4_i32 : i32
    %10 = arith.extui %9 : i1 to i32
    %c0_i32_8 = arith.constant 0 : i32
    %11 = arith.cmpi ne, %10, %c0_i32_8 : i32
    scf.if %11 {
      %c0_9 = arith.constant 0 : index
      %c0_10 = arith.constant 0 : index
      %12 = vector.load %arg6[%c0_9, %c0_10] : memref<128x128xf32, #tpu.memory_space<vmem>>, vector<128x128xf32>
      %c0_11 = arith.constant 0 : index
      %c0_12 = arith.constant 0 : index
      %13 = vector.load %arg5[%c0_11, %c0_12] : memref<1x128xf32, #tpu.memory_space<vmem>>, vector<1x128xf32>
      %14 = vector.broadcast %13 : vector<1x128xf32> to vector<128x128xf32>
      %15 = arith.addf %12, %14 : vector<128x128xf32>
      %c0_13 = arith.constant 0 : index
      %c0_14 = arith.constant 0 : index
      %16 = vector.load %arg6[%c0_13, %c0_14] : memref<128x128xf32, #tpu.memory_space<vmem>>, vector<128x128xf32>
      tpu.vector_store %arg6[%c0_13, %c0_14], %15 {strides = array<i32>} : memref<128x128xf32, #tpu.memory_space<vmem>>, vector<128x128xf32>,
    } else {
    }
    return
  }
  func.func @transform_0(%arg0: i32, %arg1: i32, %arg2: i32) -> (i32, i32) {
    %c0_i32 = arith.constant 0 : i32
    return %arg0, %arg2 : i32, i32
  }
  func.func @transform_1(%arg0: i32, %arg1: i32, %arg2: i32) -> (i32, i32) {
    %c0_i32 = arith.constant 0 : i32
    return %arg2, %arg1 : i32, i32
  }
  func.func @transform_2(%arg0: i32, %arg1: i32, %arg2: i32) -> (i32, i32) {
    %c0_i32 = arith.constant 0 : i32
    %c0_i32_0 = arith.constant 0 : i32
    return %c0_i32, %arg1 : i32, i32
  }
  func.func @transform_3(%arg0: i32, %arg1: i32, %arg2: i32) -> (i32, i32) {
    %c0_i32 = arith.constant 0 : i32
    return %arg0, %arg1 : i32, i32
  }
}

module attributes {stable_mosaic.version = 11 : i64} {
  func.func @_matmul_bias_kernel(%arg0: i32, %arg1: i32, %arg2: i32, %arg3: memref<512x512xbf16, #tpu.memory_space<vmem>>, %arg4: memref<512x128xbf16, #tpu.memory_space<vmem>>, %arg5: memref<1x128xf32, #tpu.memory_space<vmem>>, %arg6: memref<512x128xf32, #tpu.memory_space<vmem>>) attributes {dimension_semantics = [#tpu.dimension_semantics<parallel>, #tpu.dimension_semantics<parallel>, #tpu.dimension_semantics<arbitrary>], iteration_bounds = array<i64: 1, 1, 3>, scalar_prefetch = 0 : i64, scratch_operands = 0 : i64, tpu.core_type = #tpu.core_type<tc>, window_params = [{transform_indices = @transform_0, window_bounds = array<i64: 512, 512>}, {transform_indices = @transform_1, window_bounds = array<i64: 512, 128>}, {transform_indices = @transform_2, window_bounds = array<i64: 1, 128>}, {transform_indices = @transform_3, window_bounds = array<i64: 512, 128>}]} {
    %c0_i32 = arith.constant 0 : i32
    %0 = arith.cmpi eq, %arg2, %c0_i32 : i32
    %1 = arith.extui %0 : i1 to i32
    %c0_i32_0 = arith.constant 0 : i32
    %2 = arith.cmpi ne, %1, %c0_i32_0 : i32
    scf.if %2 {
      %cst_9 = arith.constant 0.000000e+00 : f32
      %12 = vector.broadcast %cst_9 : f32 to vector<512x128xf32>
      %c0_10 = arith.constant 0 : index
      %c0_11 = arith.constant 0 : index
      %13 = vector.load %arg6[%c0_10, %c0_11] : memref<512x128xf32, #tpu.memory_space<vmem>>, vector<512x128xf32>
      tpu.vector_store %arg6[%c0_10, %c0_11], %12 {strides = array<i32>} : memref<512x128xf32, #tpu.memory_space<vmem>>, vector<512x128xf32>,
    } else {
    }
    %c0 = arith.constant 0 : index
    %c0_1 = arith.constant 0 : index
    %3 = vector.load %arg6[%c0, %c0_1] : memref<512x128xf32, #tpu.memory_space<vmem>>, vector<512x128xf32>
    %c0_2 = arith.constant 0 : index
    %c0_3 = arith.constant 0 : index
    %4 = vector.load %arg3[%c0_2, %c0_3] : memref<512x512xbf16, #tpu.memory_space<vmem>>, vector<512x512xbf16>
    %c0_4 = arith.constant 0 : index
    %c0_5 = arith.constant 0 : index
    %5 = vector.load %arg4[%c0_4, %c0_5] : memref<512x128xbf16, #tpu.memory_space<vmem>>, vector<512x128xbf16>
    %cst = arith.constant dense<0.000000e+00> : vector<512x128xf32>
    %6 = tpu.matmul %4, %5, %cst {dimension_numbers = #tpu.dot_dimension_numbers<[1], [0], [0], [1], [0, 0, 1, 1], [], []>} : vector<512x512xbf16>, vector<512x128xbf16>, vector<512x128xf32> -> vector<512x128xf32>
    %7 = arith.addf %3, %6 : vector<512x128xf32>
    %c0_6 = arith.constant 0 : index
    %c0_7 = arith.constant 0 : index
    %8 = vector.load %arg6[%c0_6, %c0_7] : memref<512x128xf32, #tpu.memory_space<vmem>>, vector<512x128xf32>
    tpu.vector_store %arg6[%c0_6, %c0_7], %7 {strides = array<i32>} : memref<512x128xf32, #tpu.memory_space<vmem>>, vector<512x128xf32>,
    %c2_i32 = arith.constant 2 : i32
    %9 = arith.cmpi eq, %arg2, %c2_i32 : i32
    %10 = arith.extui %9 : i1 to i32
    %c0_i32_8 = arith.constant 0 : i32
    %11 = arith.cmpi ne, %10, %c0_i32_8 : i32
    scf.if %11 {
      %c0_9 = arith.constant 0 : index
      %c0_10 = arith.constant 0 : index
      %12 = vector.load %arg6[%c0_9, %c0_10] : memref<512x128xf32, #tpu.memory_space<vmem>>, vector<512x128xf32>
      %c0_11 = arith.constant 0 : index
      %c0_12 = arith.constant 0 : index
      %13 = vector.load %arg5[%c0_11, %c0_12] : memref<1x128xf32, #tpu.memory_space<vmem>>, vector<1x128xf32>
      %14 = vector.broadcast %13 : vector<1x128xf32> to vector<512x128xf32>
      %15 = arith.addf %12, %14 : vector<512x128xf32>
      %c0_13 = arith.constant 0 : index
      %c0_14 = arith.constant 0 : index
      %16 = vector.load %arg6[%c0_13, %c0_14] : memref<512x128xf32, #tpu.memory_space<vmem>>, vector<512x128xf32>
      tpu.vector_store %arg6[%c0_13, %c0_14], %15 {strides = array<i32>} : memref<512x128xf32, #tpu.memory_space<vmem>>, vector<512x128xf32>,
    } else {
    }
    return
  }
  func.func @transform_0(%arg0: i32, %arg1: i32, %arg2: i32) -> (i32, i32) {
    %c0_i32 = arith.constant 0 : i32
    return %arg0, %arg2 : i32, i32
  }
  func.func @transform_1(%arg0: i32, %arg1: i32, %arg2: i32) -> (i32, i32) {
    %c0_i32 = arith.constant 0 : i32
    return %arg2, %arg1 : i32, i32
  }
  func.func @transform_2(%arg0: i32, %arg1: i32, %arg2: i32) -> (i32, i32) {
    %c0_i32 = arith.constant 0 : i32
    %c0_i32_0 = arith.constant 0 : i32
    return %c0_i32, %arg1 : i32, i32
  }
  func.func @transform_3(%arg0: i32, %arg1: i32, %arg2: i32) -> (i32, i32) {
    %c0_i32 = arith.constant 0 : i32
    return %arg0, %arg1 : i32, i32
  }
}

module attributes {stable_mosaic.version = 11 : i64} {
  func.func @_matmul_bias_kernel(%arg0: i32, %arg1: i32, %arg2: i32, %arg3: memref<512x512xbf16, #tpu.memory_space<vmem>>, %arg4: memref<512x128xbf16, #tpu.memory_space<vmem>>, %arg5: memref<1x128xf32, #tpu.memory_space<vmem>>, %arg6: memref<512x128xf32, #tpu.memory_space<vmem>>) attributes {dimension_semantics = [#tpu.dimension_semantics<parallel>, #tpu.dimension_semantics<parallel>, #tpu.dimension_semantics<arbitrary>], iteration_bounds = array<i64: 1, 1, 7>, scalar_prefetch = 0 : i64, scratch_operands = 0 : i64, tpu.core_type = #tpu.core_type<tc>, window_params = [{transform_indices = @transform_0, window_bounds = array<i64: 512, 512>}, {transform_indices = @transform_1, window_bounds = array<i64: 512, 128>}, {transform_indices = @transform_2, window_bounds = array<i64: 1, 128>}, {transform_indices = @transform_3, window_bounds = array<i64: 512, 128>}]} {
    %c0_i32 = arith.constant 0 : i32
    %0 = arith.cmpi eq, %arg2, %c0_i32 : i32
    %1 = arith.extui %0 : i1 to i32
    %c0_i32_0 = arith.constant 0 : i32
    %2 = arith.cmpi ne, %1, %c0_i32_0 : i32
    scf.if %2 {
      %cst_9 = arith.constant 0.000000e+00 : f32
      %12 = vector.broadcast %cst_9 : f32 to vector<512x128xf32>
      %c0_10 = arith.constant 0 : index
      %c0_11 = arith.constant 0 : index
      %13 = vector.load %arg6[%c0_10, %c0_11] : memref<512x128xf32, #tpu.memory_space<vmem>>, vector<512x128xf32>
      tpu.vector_store %arg6[%c0_10, %c0_11], %12 {strides = array<i32>} : memref<512x128xf32, #tpu.memory_space<vmem>>, vector<512x128xf32>,
    } else {
    }
    %c0 = arith.constant 0 : index
    %c0_1 = arith.constant 0 : index
    %3 = vector.load %arg6[%c0, %c0_1] : memref<512x128xf32, #tpu.memory_space<vmem>>, vector<512x128xf32>
    %c0_2 = arith.constant 0 : index
    %c0_3 = arith.constant 0 : index
    %4 = vector.load %arg3[%c0_2, %c0_3] : memref<512x512xbf16, #tpu.memory_space<vmem>>, vector<512x512xbf16>
    %c0_4 = arith.constant 0 : index
    %c0_5 = arith.constant 0 : index
    %5 = vector.load %arg4[%c0_4, %c0_5] : memref<512x128xbf16, #tpu.memory_space<vmem>>, vector<512x128xbf16>
    %cst = arith.constant dense<0.000000e+00> : vector<512x128xf32>
    %6 = tpu.matmul %4, %5, %cst {dimension_numbers = #tpu.dot_dimension_numbers<[1], [0], [0], [1], [0, 0, 1, 1], [], []>} : vector<512x512xbf16>, vector<512x128xbf16>, vector<512x128xf32> -> vector<512x128xf32>
    %7 = arith.addf %3, %6 : vector<512x128xf32>
    %c0_6 = arith.constant 0 : index
    %c0_7 = arith.constant 0 : index
    %8 = vector.load %arg6[%c0_6, %c0_7] : memref<512x128xf32, #tpu.memory_space<vmem>>, vector<512x128xf32>
    tpu.vector_store %arg6[%c0_6, %c0_7], %7 {strides = array<i32>} : memref<512x128xf32, #tpu.memory_space<vmem>>, vector<512x128xf32>,
    %c6_i32 = arith.constant 6 : i32
    %9 = arith.cmpi eq, %arg2, %c6_i32 : i32
    %10 = arith.extui %9 : i1 to i32
    %c0_i32_8 = arith.constant 0 : i32
    %11 = arith.cmpi ne, %10, %c0_i32_8 : i32
    scf.if %11 {
      %c0_9 = arith.constant 0 : index
      %c0_10 = arith.constant 0 : index
      %12 = vector.load %arg6[%c0_9, %c0_10] : memref<512x128xf32, #tpu.memory_space<vmem>>, vector<512x128xf32>
      %c0_11 = arith.constant 0 : index
      %c0_12 = arith.constant 0 : index
      %13 = vector.load %arg5[%c0_11, %c0_12] : memref<1x128xf32, #tpu.memory_space<vmem>>, vector<1x128xf32>
      %14 = vector.broadcast %13 : vector<1x128xf32> to vector<512x128xf32>
      %15 = arith.addf %12, %14 : vector<512x128xf32>
      %16 = math.tanh %15 : vector<512x128xf32>
      %c0_13 = arith.constant 0 : index
      %c0_14 = arith.constant 0 : index
      %17 = vector.load %arg6[%c0_13, %c0_14] : memref<512x128xf32, #tpu.memory_space<vmem>>, vector<512x128xf32>
      tpu.vector_store %arg6[%c0_13, %c0_14], %16 {strides = array<i32>} : memref<512x128xf32, #tpu.memory_space<vmem>>, vector<512x128xf32>,
    } else {
    }
    return
  }
  func.func @transform_0(%arg0: i32, %arg1: i32, %arg2: i32) -> (i32, i32) {
    %c0_i32 = arith.constant 0 : i32
    return %arg0, %arg2 : i32, i32
  }
  func.func @transform_1(%arg0: i32, %arg1: i32, %arg2: i32) -> (i32, i32) {
    %c0_i32 = arith.constant 0 : i32
    return %arg2, %arg1 : i32, i32
  }
  func.func @transform_2(%arg0: i32, %arg1: i32, %arg2: i32) -> (i32, i32) {
    %c0_i32 = arith.constant 0 : i32
    %c0_i32_0 = arith.constant 0 : i32
    return %c0_i32, %arg1 : i32, i32
  }
  func.func @transform_3(%arg0: i32, %arg1: i32, %arg2: i32) -> (i32, i32) {
    %c0_i32 = arith.constant 0 : i32
    return %arg0, %arg1 : i32, i32
  }
}

</mosaic_0001>

<bundles_post_ra>
// kernel: generator_forward.48
= control target key start
LH: loop header
LB: loop body
LE: loop exit
PB: predicated region body
PF: predicated region fallthrough
CT: control target
= control target key end

     0   :  { %s640_s6 = smov 0   ;;  %s642_s7 = smov 0   ;;  %s1200_s0 = inlined_call_operand.vmem [shape: f32[2,256,64], index: 0, kind: input, shape index: {}]   ;;  %s1201_s1 = inlined_call_operand.vmem [shape: f32[2,256,64], index: 1, kind: output, shape index: {}]  }
   0x1   :  { %s644_s8 = smov 0  }
   0x2 LB: > { %s23_s9 = sadd.s32 1, %s624_s7  ;;  %p571_p0 = scmp.ge.s32.totalorder %s628_s8, 1  ;;  %s628_s8 = sphi %s644_s8, %s11_s8   ;;  %s624_s7 = sphi %s642_s7, %s1203_s7   ;;  %s620_s6 = sphi %s640_s6, %s1202_s6  }
   0x3   : > { %p25_p1 = scmp.ge.s32.totalorder %s23_s9, 2  ;;  %p106_p2 = scmp.lt.s32.totalorder %s628_s8, 3 }
   0x5   : > { %s1205_s9 = smov (%p25_p1, %s23_s9), 0  ;;  %p107_p3 = pnand %p571_p0, %p106_p2 }
   0x6   : > { %p132_p4 = scmp.lt.s32.totalorder (!%p107_p3), %s620_s6, 1  ;;  %vm180_vm0 = vcmask (!%p107_p3), 523264  }
   0x7   : > { %110 = sbr.rel (%p107_p3) target bundleno = 210 (0xd2), region = 24 }
   0xe   : > { %s1207_s6 = smov (!%p132_p4, %s620_s6), 1 }
   0xf   : > { %s578_s10 = sshll.u32 %s1207_s6, 8 }
  0x10   : > { %s666_s13 = scalar_lea.vmem %s1200_s0, %s578_s10  ;;  %s1069_s16 = scalar_lea.vmem %s1201_s1, %s578_s10 }
  0x11   : > { %v669_v0 = vld [vmem:[%s666_s13] sm:$0xff]  ;;  %v672_v1 = vld [vmem:[%s666_s13 + $0x8] sm:$0xff]  ;;  %v675_v2 = vld [vmem:[%s666_s13 + $0x10] sm:$0xff] }
  0x12   : > { %v678_v3 = vld [vmem:[%s666_s13 + $0x18] sm:$0xff]  ;;  %v181_v4 = vsel %vm180_vm0, %v669_v0, 0.0  ;;  %v182_v5 = vsel %vm180_vm0, %v672_v1, 0.0  ;;  %v184_v6 = vsel %vm180_vm0, %v675_v2, 0.0  ;;  %v687_v7 = vld [vmem:[%s666_s13 + $0x20] sm:$0xff]  ;;  %v692_v10 = vld [vmem:[%s666_s13 + $0x28] sm:$0xff] }
  0x13   : > { %v183_v8 = vadd.f32 %v182_v5, %v181_v4  ;;  %v186_v9 = vsel %vm180_vm0, %v678_v3, 0.0  ;;  %v188_v12 = vsel %vm180_vm0, %v687_v7, 0.0  ;;  %v697_v13 = vld [vmem:[%s666_s13 + $0x30] sm:$0xff]  ;;  %v190_v15 = vsel %vm180_vm0, %v692_v10, 0.0  ;;  %v702_v16 = vld [vmem:[%s666_s13 + $0x38] sm:$0xff]  ;;  %v707_v19 = vld [vmem:[%s666_s13 + $0x40] sm:$0xff] }
  0x14   : > { %v192_v18 = vsel %vm180_vm0, %v697_v13, 0.0  ;;  %v194_v21 = vsel %vm180_vm0, %v702_v16, 0.0  ;;  %v712_v22 = vld [vmem:[%s666_s13 + $0x48] sm:$0xff]  ;;  %v196_v24 = vsel %vm180_vm0, %v707_v19, 0.0  ;;  %v717_v25 = vld [vmem:[%s666_s13 + $0x50] sm:$0xff]  ;;  %v722_v28 = vld [vmem:[%s666_s13 + $0x58] sm:$0xff] }
  0x15   : > { %v185_v11 = vadd.f32 %v184_v6, %v183_v8  ;;  %v198_v27 = vsel %vm180_vm0, %v712_v22, 0.0  ;;  %v200_v30 = vsel %vm180_vm0, %v717_v25, 0.0  ;;  %v727_v31 = vld [vmem:[%s666_s13 + $0x60] sm:$0xff]  ;;  %v202_v33 = vsel %vm180_vm0, %v722_v28, 0.0  ;;  %v732_v34 = vld [vmem:[%s666_s13 + $0x68] sm:$0xff]  ;;  %v737_v37 = vld [vmem:[%s666_s13 + $0x70] sm:$0xff] }
  0x16   : > { %v204_v36 = vsel %vm180_vm0, %v727_v31, 0.0  ;;  %v206_v39 = vsel %vm180_vm0, %v732_v34, 0.0  ;;  %v742_v40 = vld [vmem:[%s666_s13 + $0x78] sm:$0xff]  ;;  %v208_v42 = vsel %vm180_vm0, %v737_v37, 0.0  ;;  %v747_v43 = vld [vmem:[%s666_s13 + $0x80] sm:$0xff]  ;;  %v752_v46 = vld [vmem:[%s666_s13 + $0x88] sm:$0xff] }
  0x17   : > { %v187_v14 = vadd.f32 %v186_v9, %v185_v11  ;;  %v210_v45 = vsel %vm180_vm0, %v742_v40, 0.0  ;;  %v212_v48 = vsel %vm180_vm0, %v747_v43, 0.0  ;;  %v757_v49 = vld [vmem:[%s666_s13 + $0x90] sm:$0xff]  ;;  %v214_v51 = vsel %vm180_vm0, %v752_v46, 0.0  ;;  %v762_v52 = vld [vmem:[%s666_s13 + $0x98] sm:$0xff]  ;;  %v767_v55 = vld [vmem:[%s666_s13 + $0xa0] sm:$0xff] }
  0x18   : > { %v216_v54 = vsel %vm180_vm0, %v757_v49, 0.0  ;;  %v218_v57 = vsel %vm180_vm0, %v762_v52, 0.0  ;;  %v772_v58 = vld [vmem:[%s666_s13 + $0xa8] sm:$0xff]  ;;  %v220_v60 = vsel %vm180_vm0, %v767_v55, 0.0  ;;  %v777_v61 = vld [vmem:[%s666_s13 + $0xb0] sm:$0xff]  ;;  %v782_v4 = vld [vmem:[%s666_s13 + $0xb8] sm:$0xff] }
  0x19   : > { %v189_v17 = vadd.f32 %v188_v12, %v187_v14  ;;  %v222_v63 = vsel %vm180_vm0, %v772_v58, 0.0  ;;  %v224_v6 = vsel %vm180_vm0, %v777_v61, 0.0  ;;  %v787_v8 = vld [vmem:[%s666_s13 + $0xc0] sm:$0xff]  ;;  %v226_v11 = vsel %vm180_vm0, %v782_v4, 0.0  ;;  %v792_v12 = vld [vmem:[%s666_s13 + $0xc8] sm:$0xff] }
  0x1b   : > { %v191_v20 = vadd.f32 %v190_v15, %v189_v17  ;;  %v228_v15 = vsel %vm180_vm0, %v787_v8, 0.0  ;;  %v797_v17 = vld [vmem:[%s666_s13 + $0xd0] sm:$0xff] }
  0x1d   : > { %v193_v23 = vadd.f32 %v192_v18, %v191_v20  ;;  %v230_v20 = vsel %vm180_vm0, %v792_v12, 0.0 }
  0x1f   : > { %v195_v26 = vadd.f32 %v194_v21, %v193_v23  ;;  %v802_v21 = vld [vmem:[%s666_s13 + $0xd8] sm:$0xff] }
  0x21   : > { %v197_v29 = vadd.f32 %v196_v24, %v195_v26  ;;  %v232_v24 = vsel %vm180_vm0, %v797_v17, 0.0  ;;  %v807_v26 = vld [vmem:[%s666_s13 + $0xe0] sm:$0xff] }
  0x23   : > { %v199_v32 = vadd.f32 %v198_v27, %v197_v29  ;;  %v234_v29 = vsel %vm180_vm0, %v802_v21, 0.0 }
  0x25   : > { %v201_v35 = vadd.f32 %v200_v30, %v199_v32  ;;  %v812_v30 = vld [vmem:[%s666_s13 + $0xe8] sm:$0xff] }
  0x27   : > { %v203_v38 = vadd.f32 %v202_v33, %v201_v35  ;;  %v236_v33 = vsel %vm180_vm0, %v807_v26, 0.0  ;;  %v817_v35 = vld [vmem:[%s666_s13 + $0xf0] sm:$0xff] }
  0x29   : > { %v205_v41 = vadd.f32 %v204_v36, %v203_v38  ;;  %v238_v38 = vsel %vm180_vm0, %v812_v30, 0.0 }
  0x2b   : > { %v207_v44 = vadd.f32 %v206_v39, %v205_v41  ;;  %v822_v39 = vld [vmem:[%s666_s13 + $0xf8] sm:$0xff] }
  0x2d   : > { %v209_v47 = vadd.f32 %v208_v42, %v207_v44  ;;  %v240_v42 = vsel %vm180_vm0, %v817_v35, 0.0 }
  0x2f   : > { %v211_v50 = vadd.f32 %v210_v45, %v209_v47  ;;  %v242_v45 = vsel %vm180_vm0, %v822_v39, 0.0 }
  0x31   : > { %v213_v53 = vadd.f32 %v212_v48, %v211_v50 }
  0x33   : > { %v215_v56 = vadd.f32 %v214_v51, %v213_v53 }
  0x35   : > { %v217_v59 = vadd.f32 %v216_v54, %v215_v56 }
  0x37   : > { %v219_v62 = vadd.f32 %v218_v57, %v217_v59 }
  0x39   : > { %v221_v5 = vadd.f32 %v220_v60, %v219_v62 }
  0x3b   : > { %v223_v9 = vadd.f32 %v222_v63, %v221_v5 }
  0x3d   : > { %v225_v14 = vadd.f32 %v224_v6, %v223_v9 }
  0x3f   : > { %v227_v18 = vadd.f32 %v226_v11, %v225_v14 }
  0x41   : > { %v229_v23 = vadd.f32 %v228_v15, %v227_v18 }
  0x43   : > { %v231_v27 = vadd.f32 %v230_v20, %v229_v23 }
  0x45   : > { %v233_v32 = vadd.f32 %v232_v24, %v231_v27 }
  0x47   : > { %v235_v36 = vadd.f32 %v234_v29, %v233_v32 }
  0x49   : > { %v237_v41 = vadd.f32 %v236_v33, %v235_v36 }
  0x4b   : > { %v239_v44 = vadd.f32 %v238_v38, %v237_v41 }
  0x4d   : > { %v241_v47 = vadd.f32 %v240_v42, %v239_v44 }
  0x4f   : > { %v243_v48 = vadd.f32 %v242_v45, %v241_v47 }
  0x51   : > { %v244_v50 = vrot.slane %v243_v48, 4 }
  0x53   : > { %v245_v51 = vadd.f32 %v244_v50, %v243_v48 }
  0x55   : > { %v246_v53 = vrot.slane %v245_v51, 2 }
  0x57   : > { %v247_v54 = vadd.f32 %v246_v53, %v245_v51 }
  0x59   : > { %v248_v56 = vrot.slane %v247_v54, 1 }
  0x5b   : > { %v249_v57 = vadd.f32 %v248_v56, %v247_v54 }
  0x5d   : > { %v828_v59 = vmul.f32 0.00390625, %v249_v57 }
  0x5f   : > { %v832_v60 = vsub.f32 %v669_v0, %v828_v59  ;;  %v836_v62 = vsub.f32 %v672_v1, %v828_v59  ;;  %v840_v63 = vsub.f32 %v675_v2, %v828_v59  ;;  %v844_v5 = vsub.f32 %v678_v3, %v828_v59 }
  0x60   : > { %v848_v6 = vsub.f32 %v687_v7, %v828_v59  ;;  %v858_v2 = vsub.f32 %v692_v10, %v828_v59  ;;  %v864_v7 = vsub.f32 %v697_v13, %v828_v59  ;;  %v873_v10 = vsub.f32 %v702_v16, %v828_v59 }
  0x61   : > { %v284_v0 = vmul.f32 %v832_v60, %v832_v60  ;;  %v285_v9 = vmul.f32 %v836_v62, %v836_v62  ;;  %v286_v1 = vmul.f32 %v840_v63, %v840_v63  ;;  %v287_v3 = vmul.f32 %v844_v5, %v844_v5 }
  0x62   : > { %v288_v11 = vmul.f32 %v848_v6, %v848_v6  ;;  %v289_v23 = vmul.f32 %v858_v2, %v858_v2  ;;  %v880_v27 = vsub.f32 %v707_v19, %v828_v59  ;;  %v290_v29 = vmul.f32 %v864_v7, %v864_v7 }
  0x63   : > { %v316_v14 = vsel %vm180_vm0, %v284_v0, 0.0  ;;  %v317_v15 = vsel %vm180_vm0, %v285_v9, 0.0  ;;  %v319_v18 = vsel %vm180_vm0, %v286_v1, 0.0  ;;  %v321_v13 = vsel %vm180_vm0, %v287_v3, 0.0 }
  0x64   : > { %v318_v20 = vadd.f32 %v317_v15, %v316_v14  ;;  %v323_v32 = vsel %vm180_vm0, %v288_v11, 0.0  ;;  %v887_v16 = vsub.f32 %v712_v22, %v828_v59  ;;  %v291_v36 = vmul.f32 %v873_v10, %v873_v10 }
  0x65   : > { %v325_v38 = vsel %vm180_vm0, %v289_v23, 0.0  ;;  %v894_v19 = vsub.f32 %v717_v25, %v828_v59  ;;  %v292_v42 = vmul.f32 %v880_v27, %v880_v27  ;;  %v327_v44 = vsel %vm180_vm0, %v290_v29, 0.0 }
  0x66   : > { %v320_v24 = vadd.f32 %v319_v18, %v318_v20  ;;  %v901_v22 = vsub.f32 %v722_v28, %v828_v59  ;;  %v293_v47 = vmul.f32 %v887_v16, %v887_v16  ;;  %v329_v48 = vsel %vm180_vm0, %v291_v36, 0.0 }
  0x67   : > { %v908_v25 = vsub.f32 %v727_v31, %v828_v59  ;;  %v294_v51 = vmul.f32 %v894_v19, %v894_v19  ;;  %v331_v53 = vsel %vm180_vm0, %v292_v42, 0.0  ;;  %v915_v28 = vsub.f32 %v732_v34, %v828_v59 }
  0x68   : > { %v322_v33 = vadd.f32 %v321_v13, %v320_v24  ;;  %v295_v56 = vmul.f32 %v901_v22, %v901_v22  ;;  %v333_v57 = vsel %vm180_vm0, %v293_v47, 0.0  ;;  %v922_v31 = vsub.f32 %v737_v37, %v828_v59 }
  0x69   : > { %v296_v9 = vmul.f32 %v908_v25, %v908_v25  ;;  %v335_v1 = vsel %vm180_vm0, %v294_v51, 0.0  ;;  %v929_v34 = vsub.f32 %v742_v40, %v828_v59  ;;  %v297_v11 = vmul.f32 %v915_v28, %v915_v28 }
  0x6a   : > { %v324_v41 = vadd.f32 %v323_v32, %v322_v33  ;;  %v337_v14 = vsel %vm180_vm0, %v295_v56, 0.0  ;;  %v936_v37 = vsub.f32 %v747_v43, %v828_v59  ;;  %v298_v18 = vmul.f32 %v922_v31, %v922_v31 }
  0x6b   : > { %v339_v20 = vsel %vm180_vm0, %v296_v9, 0.0  ;;  %v943_v40 = vsub.f32 %v752_v46, %v828_v59  ;;  %v299_v13 = vmul.f32 %v929_v34, %v929_v34  ;;  %v341_v24 = vsel %vm180_vm0, %v297_v11, 0.0 }
  0x6c   : > { %v326_v45 = vadd.f32 %v325_v38, %v324_v41  ;;  %v950_v43 = vsub.f32 %v757_v49, %v828_v59  ;;  %v300_v32 = vmul.f32 %v936_v37, %v936_v37  ;;  %v343_v33 = vsel %vm180_vm0, %v298_v18, 0.0 }
  0x6d   : > { %v957_v46 = vsub.f32 %v762_v52, %v828_v59  ;;  %v301_v38 = vmul.f32 %v943_v40, %v943_v40  ;;  %v345_v41 = vsel %vm180_vm0, %v299_v13, 0.0  ;;  %v964_v49 = vsub.f32 %v767_v55, %v828_v59 }
  0x6e   : > { %v328_v50 = vadd.f32 %v327_v44, %v326_v45  ;;  %v302_v44 = vmul.f32 %v950_v43, %v950_v43  ;;  %v347_v45 = vsel %vm180_vm0, %v300_v32, 0.0  ;;  %v971_v52 = vsub.f32 %v772_v58, %v828_v59 }
  0x6f   : > { %v978_v55 = vsub.f32 %v777_v61, %v828_v59  ;;  %v985_v58 = vsub.f32 %v782_v4, %v828_v59  ;;  %v992_v61 = vsub.f32 %v787_v8, %v828_v59  ;;  %v999_v4 = vsub.f32 %v792_v12, %v828_v59 }
  0x70   : > { %v330_v54 = vadd.f32 %v329_v48, %v328_v50  ;;  %v303_v48 = vmul.f32 %v957_v46, %v957_v46  ;;  %v349_v50 = vsel %vm180_vm0, %v301_v38, 0.0  ;;  %v1006_v8 = vsub.f32 %v797_v17, %v828_v59 }
  0x71   : > { %v1013_v12 = vsub.f32 %v802_v21, %v828_v59  ;;  %v1020_v17 = vsub.f32 %v807_v26, %v828_v59  ;;  %v1027_v21 = vsub.f32 %v812_v30, %v828_v59  ;;  %v1034_v26 = vsub.f32 %v817_v35, %v828_v59 }
  0x72   : > { %v332_v0 = vadd.f32 %v331_v53, %v330_v54  ;;  %v304_v53 = vmul.f32 %v964_v49, %v964_v49  ;;  %v351_v54 = vsel %vm180_vm0, %v302_v44, 0.0  ;;  %v1041_v30 = vsub.f32 %v822_v39, %v828_v59 }
  0x73   : > { %v314_v35 = vmul.f32 %v1034_v26, %v1034_v26 }
  0x74   : > { %v334_v3 = vadd.f32 %v333_v57, %v332_v0  ;;  %v305_v57 = vmul.f32 %v971_v52, %v971_v52  ;;  %v353_v0 = vsel %vm180_vm0, %v303_v48, 0.0 }
  0x75   : > { %v375_v39 = vsel %vm180_vm0, %v314_v35, 0.0 }
  0x76   : > { %v336_v15 = vadd.f32 %v335_v1, %v334_v3  ;;  %v306_v1 = vmul.f32 %v978_v55, %v978_v55  ;;  %v355_v3 = vsel %vm180_vm0, %v304_v53, 0.0 }
  0x78   : > { %v338_v23 = vadd.f32 %v337_v14, %v336_v15  ;;  %v307_v14 = vmul.f32 %v985_v58, %v985_v58  ;;  %v357_v15 = vsel %vm180_vm0, %v305_v57, 0.0  ;;  %v315_v57 = vmul.f32 %v1041_v30, %v1041_v30 }
  0x7a   : > { %v340_v29 = vadd.f32 %v339_v20, %v338_v23  ;;  %v308_v20 = vmul.f32 %v992_v61, %v992_v61  ;;  %v359_v23 = vsel %vm180_vm0, %v306_v1, 0.0  ;;  %v377_v1 = vsel %vm180_vm0, %v315_v57, 0.0 }
  0x7c   : > { %v342_v36 = vadd.f32 %v341_v24, %v340_v29  ;;  %v309_v24 = vmul.f32 %v999_v4, %v999_v4  ;;  %v361_v29 = vsel %vm180_vm0, %v307_v14, 0.0 }
  0x7e   : > { %v344_v42 = vadd.f32 %v343_v33, %v342_v36  ;;  %v310_v33 = vmul.f32 %v1006_v8, %v1006_v8  ;;  %v363_v36 = vsel %vm180_vm0, %v308_v20, 0.0 }
  0x80   : > { %v346_v47 = vadd.f32 %v345_v41, %v344_v42  ;;  %v311_v41 = vmul.f32 %v1013_v12, %v1013_v12  ;;  %v365_v42 = vsel %vm180_vm0, %v309_v24, 0.0 }
  0x82   : > { %v348_v51 = vadd.f32 %v347_v45, %v346_v47  ;;  %v312_v45 = vmul.f32 %v1020_v17, %v1020_v17  ;;  %v367_v47 = vsel %vm180_vm0, %v310_v33, 0.0 }
  0x84   : > { %v350_v56 = vadd.f32 %v349_v50, %v348_v51  ;;  %v313_v50 = vmul.f32 %v1027_v21, %v1027_v21  ;;  %v369_v51 = vsel %vm180_vm0, %v311_v41, 0.0 }
  0x86   : > { %v352_v9 = vadd.f32 %v351_v54, %v350_v56  ;;  %v371_v54 = vsel %vm180_vm0, %v312_v45, 0.0 }
  0x88   : > { %v354_v11 = vadd.f32 %v353_v0, %v352_v9  ;;  %v373_v0 = vsel %vm180_vm0, %v313_v50, 0.0 }
  0x8a   : > { %v356_v18 = vadd.f32 %v355_v3, %v354_v11 }
  0x8c   : > { %v358_v13 = vadd.f32 %v357_v15, %v356_v18 }
  0x8e   : > { %v360_v32 = vadd.f32 %v359_v23, %v358_v13 }
  0x90   : > { %v362_v38 = vadd.f32 %v361_v29, %v360_v32 }
  0x92   : > { %v364_v44 = vadd.f32 %v363_v36, %v362_v38 }
  0x94   : > { %v366_v48 = vadd.f32 %v365_v42, %v364_v44 }
  0x96   : > { %v368_v53 = vadd.f32 %v367_v47, %v366_v48 }
  0x98   : > { %v370_v56 = vadd.f32 %v369_v51, %v368_v53 }
  0x9a   : > { %v372_v9 = vadd.f32 %v371_v54, %v370_v56 }
  0x9c   : > { %v374_v59 = vadd.f32 %v373_v0, %v372_v9 }
  0x9e   : > { %v376_v3 = vadd.f32 %v375_v39, %v374_v59 }
  0xa0   : > { %v378_v11 = vadd.f32 %v377_v1, %v376_v3 }
  0xa2   : > { %v379_v14 = vrot.slane %v378_v11, 4 }
  0xa4   : > { %v380_v15 = vadd.f32 %v379_v14, %v378_v11 }
  0xa6   : > { %v381_v18 = vrot.slane %v380_v15, 2 }
  0xa8   : > { %v382_v20 = vadd.f32 %v381_v18, %v380_v15 }
  0xaa   : > { %v383_v23 = vrot.slane %v382_v20, 1 }
  0xac   : > { %v384_v13 = vadd.f32 %v383_v23, %v382_v20 }
  0xae   : > { %v385_v24 = vmul.f32 0.00390625, %v384_v13 }
  0xb0   : > { %v386_v29 = vadd.f32 1e-05, %v385_v24 }
  0xb2   : > { %604 = vrsqrt.f32 %v386_v29 }
  0xbc   : > { %v1054_v32 = vpop.eup %604 }
  0xbd   : > { %v388_v33 = vmul.f32 %v1054_v32, %v832_v60  ;;  %v389_v36 = vmul.f32 %v1054_v32, %v836_v62  ;;  %v390_v38 = vmul.f32 %v1054_v32, %v840_v63  ;;  %v391_v41 = vmul.f32 %v1054_v32, %v844_v5 }
  0xbe   : > { %v392_v60 = vmul.f32 %v1054_v32, %v848_v6  ;;  %v393_v62 = vmul.f32 %v1054_v32, %v858_v2  ;;  %v394_v63 = vmul.f32 %v1054_v32, %v864_v7  ;;  %v395_v5 = vmul.f32 %v1054_v32, %v873_v10 }
  0xbf   : > { %v420_v42 = vmax.f32 %v388_v33, 0.0  ;;  %v421_v44 = vmax.f32 %v389_v36, 0.0  ;;  %v422_v45 = vmax.f32 %v390_v38, 0.0  ;;  %v423_v47 = vmax.f32 %v391_v41, 0.0 }
  0xc0   : > { %v424_v48 = vmax.f32 %v392_v60, 0.0  ;;  %v425_v50 = vmax.f32 %v393_v62, 0.0  ;;  %v426_v6 = vmax.f32 %v394_v63, 0.0  ;;  %v427_v51 = vmax.f32 %v395_v5, 0.0 }
  0xc1   : > { %452 = vst.msk [vmem:[%s1069_s16] sm:$0xff] %vm180_vm0, %v420_v42  ;;  %453 = vst.msk [vmem:[%s1069_s16 + $0x8] sm:$0xff] %vm180_vm0, %v421_v44  ;;  %v396_v2 = vmul.f32 %v1054_v32, %v880_v27  ;;  %v397_v7 = vmul.f32 %v1054_v32, %v887_v16  ;;  %v398_v10 = vmul.f32 %v1054_v32, %v894_v19 }
  0xc2   : > { %454 = vst.msk [vmem:[%s1069_s16 + $0x10] sm:$0xff] %vm180_vm0, %v422_v45  ;;  %455 = vst.msk [vmem:[%s1069_s16 + $0x18] sm:$0xff] %vm180_vm0, %v423_v47  ;;  %v399_v53 = vmul.f32 %v1054_v32, %v901_v22  ;;  %v400_v27 = vmul.f32 %v1054_v32, %v908_v25  ;;  %v401_v16 = vmul.f32 %v1054_v32, %v915_v28 }
  0xc3   : > { %456 = vst.msk [vmem:[%s1069_s16 + $0x20] sm:$0xff] %vm180_vm0, %v424_v48  ;;  %457 = vst.msk [vmem:[%s1069_s16 + $0x28] sm:$0xff] %vm180_vm0, %v425_v50  ;;  %v402_v19 = vmul.f32 %v1054_v32, %v922_v31  ;;  %v403_v22 = vmul.f32 %v1054_v32, %v929_v34  ;;  %v428_v35 = vmax.f32 %v396_v2, 0.0  ;;  %v429_v54 = vmax.f32 %v397_v7, 0.0 }
  0xc4   : > { %458 = vst.msk [vmem:[%s1069_s16 + $0x30] sm:$0xff] %vm180_vm0, %v426_v6  ;;  %459 = vst.msk [vmem:[%s1069_s16 + $0x38] sm:$0xff] %vm180_vm0, %v427_v51  ;;  %v430_v56 = vmax.f32 %v398_v10, 0.0  ;;  %v431_v57 = vmax.f32 %v399_v53, 0.0  ;;  %v432_v0 = vmax.f32 %v400_v27, 0.0  ;;  %v433_v9 = vmax.f32 %v401_v16, 0.0 }
  0xc5   : > { %v434_v25 = vmax.f32 %v402_v19, 0.0  ;;  %v435_v39 = vmax.f32 %v403_v22, 0.0  ;;  %460 = vst.msk [vmem:[%s1069_s16 + $0x40] sm:$0xff] %vm180_vm0, %v428_v35  ;;  %461 = vst.msk [vmem:[%s1069_s16 + $0x48] sm:$0xff] %vm180_vm0, %v429_v54  ;;  %v404_v28 = vmul.f32 %v1054_v32, %v936_v37  ;;  %v405_v31 = vmul.f32 %v1054_v32, %v943_v40 }
  0xc6   : > { %462 = vst.msk [vmem:[%s1069_s16 + $0x50] sm:$0xff] %vm180_vm0, %v430_v56  ;;  %463 = vst.msk [vmem:[%s1069_s16 + $0x58] sm:$0xff] %vm180_vm0, %v431_v57  ;;  %v406_v34 = vmul.f32 %v1054_v32, %v950_v43  ;;  %v407_v59 = vmul.f32 %v1054_v32, %v957_v46  ;;  %v408_v37 = vmul.f32 %v1054_v32, %v964_v49 }
  0xc7   : > { %464 = vst.msk [vmem:[%s1069_s16 + $0x60] sm:$0xff] %vm180_vm0, %v432_v0  ;;  %465 = vst.msk [vmem:[%s1069_s16 + $0x68] sm:$0xff] %vm180_vm0, %v433_v9  ;;  %v409_v40 = vmul.f32 %v1054_v32, %v971_v52  ;;  %v410_v43 = vmul.f32 %v1054_v32, %v978_v55  ;;  %v411_v46 = vmul.f32 %v1054_v32, %v985_v58  ;;  %v436_v1 = vmax.f32 %v404_v28, 0.0 }
  0xc8   : > { %466 = vst.msk [vmem:[%s1069_s16 + $0x70] sm:$0xff] %vm180_vm0, %v434_v25  ;;  %467 = vst.msk [vmem:[%s1069_s16 + $0x78] sm:$0xff] %vm180_vm0, %v435_v39  ;;  %v437_v3 = vmax.f32 %v405_v31, 0.0  ;;  %v438_v11 = vmax.f32 %v406_v34, 0.0  ;;  %v439_v14 = vmax.f32 %v407_v59, 0.0  ;;  %v440_v15 = vmax.f32 %v408_v37, 0.0 }
  0xc9   : > { %v441_v18 = vmax.f32 %v409_v40, 0.0  ;;  %v442_v49 = vmax.f32 %v410_v43, 0.0  ;;  %v443_v20 = vmax.f32 %v411_v46, 0.0  ;;  %468 = vst.msk [vmem:[%s1069_s16 + $0x80] sm:$0xff] %vm180_vm0, %v436_v1  ;;  %v412_v52 = vmul.f32 %v1054_v32, %v992_v61 }
  0xca   : > { %469 = vst.msk [vmem:[%s1069_s16 + $0x88] sm:$0xff] %vm180_vm0, %v437_v3  ;;  %470 = vst.msk [vmem:[%s1069_s16 + $0x90] sm:$0xff] %vm180_vm0, %v438_v11  ;;  %v413_v55 = vmul.f32 %v1054_v32, %v999_v4  ;;  %v414_v58 = vmul.f32 %v1054_v32, %v1006_v8  ;;  %v415_v23 = vmul.f32 %v1054_v32, %v1013_v12 }
  0xcb   : > { %471 = vst.msk [vmem:[%s1069_s16 + $0x98] sm:$0xff] %vm180_vm0, %v439_v14  ;;  %472 = vst.msk [vmem:[%s1069_s16 + $0xa0] sm:$0xff] %vm180_vm0, %v440_v15  ;;  %v416_v61 = vmul.f32 %v1054_v32, %v1020_v17  ;;  %v417_v4 = vmul.f32 %v1054_v32, %v1027_v21  ;;  %v418_v8 = vmul.f32 %v1054_v32, %v1034_v26  ;;  %v444_v13 = vmax.f32 %v412_v52, 0.0 }
  0xcc   : > { %473 = vst.msk [vmem:[%s1069_s16 + $0xa8] sm:$0xff] %vm180_vm0, %v441_v18  ;;  %474 = vst.msk [vmem:[%s1069_s16 + $0xb0] sm:$0xff] %vm180_vm0, %v442_v49  ;;  %v419_v12 = vmul.f32 %v1054_v32, %v1041_v30  ;;  %v445_v24 = vmax.f32 %v413_v55, 0.0  ;;  %v446_v29 = vmax.f32 %v414_v58, 0.0  ;;  %v447_v33 = vmax.f32 %v415_v23, 0.0 }
  0xcd   : > { %475 = vst.msk [vmem:[%s1069_s16 + $0xb8] sm:$0xff] %vm180_vm0, %v443_v20  ;;  %v448_v36 = vmax.f32 %v416_v61, 0.0  ;;  %v449_v38 = vmax.f32 %v417_v4, 0.0  ;;  %v450_v17 = vmax.f32 %v418_v8, 0.0  ;;  %476 = vst.msk [vmem:[%s1069_s16 + $0xc0] sm:$0xff] %vm180_vm0, %v444_v13 }
  0xce   : > { %v451_v41 = vmax.f32 %v419_v12, 0.0  ;;  %477 = vst.msk [vmem:[%s1069_s16 + $0xc8] sm:$0xff] %vm180_vm0, %v445_v24  ;;  %478 = vst.msk [vmem:[%s1069_s16 + $0xd0] sm:$0xff] %vm180_vm0, %v446_v29 }
  0xcf   : > { %479 = vst.msk [vmem:[%s1069_s16 + $0xd8] sm:$0xff] %vm180_vm0, %v447_v33  ;;  %480 = vst.msk [vmem:[%s1069_s16 + $0xe0] sm:$0xff] %vm180_vm0, %v448_v36 }
  0xd0   : > { %481 = vst.msk [vmem:[%s1069_s16 + $0xe8] sm:$0xff] %vm180_vm0, %v449_v38  ;;  %482 = vst.msk [vmem:[%s1069_s16 + $0xf0] sm:$0xff] %vm180_vm0, %v450_v17 }
  0xd1   : > { %483 = vst.msk [vmem:[%s1069_s16 + $0xf8] sm:$0xff] %vm180_vm0, %v451_v41 }
  0xd2 PF: > { %s11_s8 = sadd.s32 1, %s628_s8   ;;  %s1202_s6 = smov %s624_s7 }
  0xd3   : > { %p8_p5 = scmp.ge.s32.totalorder %s11_s8, 4   ;;  %s1203_s7 = smov %s1205_s9 }
  0xd5   :  { %10 = sbr.rel (!%p8_p5) target bundleno = 2 (0x2), region = 54 }

// kernel: generator_forward.47
= control target key start
LH: loop header
LB: loop body
LE: loop exit
PB: predicated region body
PF: predicated region fallthrough
CT: control target
= control target key end

     0   :  { %v1509_v0 = vmov 0   ;;  %s2063_s1 = inlined_call_operand.vmem [shape: bf16[256,128], index: 1, kind: input, shape index: {}]   ;;  %s2064_s0 = inlined_call_operand.vmem [shape: bf16[512,256], index: 0, kind: input, shape index: {}]   ;;  %s2065_s2 = inlined_call_operand.vmem [shape: f32[1,128], index: 2, kind: input, shape index: {}]   ;;  %s2066_s3 = inlined_call_operand.vmem [shape: f32[512,128], index: 3, kind: output, shape index: {}]  }
   0x1   :  { %659 = vmatprep.subr.bf16.mxu0 %v1509_v0  ;;  %1363 = vmatprep.subr.bf16.mxu1 %v1509_v0  ;;  %v1397_v1 = vld [vmem:[%s2063_s1] sm:$0xff]   ;;  %v1398_v2 = vld [vmem:[%s2063_s1 + $0x8] sm:$0xff]   ;;  %v1399_v3 = vld [vmem:[%s2063_s1 + $0x10] sm:$0xff]  }
   0x2   :  { %660 = vmatpush1.bf16.msra.mxu0 %v1397_v1  ;;  %1379 = vmatpush1.bf16.msra.mxu1 %v1397_v1  ;;  %v1400_v4 = vld [vmem:[%s2063_s1 + $0x18] sm:$0xff]   ;;  %v1401_v5 = vld [vmem:[%s2063_s1 + $0x20] sm:$0xff]   ;;  %v1402_v7 = vld [vmem:[%s2063_s1 + $0x28] sm:$0xff]  }
   0x3   :  { %661 = vmatprep.subr.bf16.mxu0 %v1509_v0  ;;  %1364 = vmatprep.subr.bf16.mxu1 %v1509_v0  ;;  %v1415_v6 = vld [vmem:[%s2064_s0 + $0x4] ss:$8 sps:$4 sm:$0xff]   ;;  %v1403_v9 = vld [vmem:[%s2063_s1 + $0x30] sm:$0xff]   ;;  %v1404_v10 = vld [vmem:[%s2063_s1 + $0x38] sm:$0xff]  }
   0x4   :  { %v1418_v8 = vld [vmem:[%s2064_s0 + $0x104] ss:$8 sps:$4 sm:$0xff]   ;;  %691 = vmatprep.mubr.bf16.mxu0 %v1415_v6  ;;  %v1407_v13 = vld [vmem:[%s2063_s1 + $0x50] sm:$0xff]   ;;  %v1408_v14 = vld [vmem:[%s2063_s1 + $0x58] sm:$0xff]  }
   0x5   :  { %819 = vmatprep.mubr.bf16.mxu1 %v1418_v8  ;;  %v1405_v11 = vld [vmem:[%s2063_s1 + $0x40] sm:$0xff]   ;;  %v1406_v12 = vld [vmem:[%s2063_s1 + $0x48] sm:$0xff]   ;;  %v1411_v17 = vld [vmem:[%s2063_s1 + $0x70] sm:$0xff]  }
   0x6   :  { %662 = vmatpush1.bf16.msra.mxu0 %v1398_v2  ;;  %1380 = vmatpush1.bf16.msra.mxu1 %v1398_v2  ;;  %v1409_v15 = vld [vmem:[%s2063_s1 + $0x60] sm:$0xff]   ;;  %v1410_v16 = vld [vmem:[%s2063_s1 + $0x68] sm:$0xff]   ;;  %v1412_v18 = vld [vmem:[%s2063_s1 + $0x78] sm:$0xff]  }
   0x7   :  { %663 = vmatprep.subr.bf16.mxu0 %v1509_v0  ;;  %1365 = vmatprep.subr.bf16.mxu1 %v1509_v0  ;;  %v1413_v19 = vld [vmem:[%s2064_s0] ss:$8 sps:$4 sm:$0xff]   ;;  %v1419_v21 = vld [vmem:[%s2064_s0 + $0x14] ss:$8 sps:$4 sm:$0xff]   ;;  %v1423_v23 = vld [vmem:[%s2064_s0 + $0x10] ss:$8 sps:$4 sm:$0xff]  }
   0x8   :  { %v1416_v20 = vld [vmem:[%s2064_s0 + $0x100] ss:$8 sps:$4 sm:$0xff]   ;;  %v1421_v22 = vld [vmem:[%s2064_s0 + $0x114] ss:$8 sps:$4 sm:$0xff]   ;;  %v1424_v24 = vld [vmem:[%s2064_s0 + $0x110] ss:$8 sps:$4 sm:$0xff]  }
   0x9   :  { %v1425_v25 = vld [vmem:[%s2064_s0 + $0x24] ss:$8 sps:$4 sm:$0xff]   ;;  %v1429_v27 = vld [vmem:[%s2064_s0 + $0x20] ss:$8 sps:$4 sm:$0xff]   ;;  %v1431_v29 = vld [vmem:[%s2064_s0 + $0x34] ss:$8 sps:$4 sm:$0xff]  }
   0xa   :  { %664 = vmatpush1.bf16.msra.mxu0 %v1399_v3  ;;  %1381 = vmatpush1.bf16.msra.mxu1 %v1399_v3  ;;  %v1427_v26 = vld [vmem:[%s2064_s0 + $0x124] ss:$8 sps:$4 sm:$0xff]   ;;  %v1430_v28 = vld [vmem:[%s2064_s0 + $0x120] ss:$8 sps:$4 sm:$0xff]   ;;  %v1433_v30 = vld [vmem:[%s2064_s0 + $0x134] ss:$8 sps:$4 sm:$0xff]  }
   0xb   :  { %665 = vmatprep.subr.bf16.mxu0 %v1509_v0  ;;  %1366 = vmatprep.subr.bf16.mxu1 %v1509_v0  ;;  %v1435_v31 = vld [vmem:[%s2064_s0 + $0x30] ss:$8 sps:$4 sm:$0xff]   ;;  %v1437_v33 = vld [vmem:[%s2064_s0 + $0x44] ss:$8 sps:$4 sm:$0xff]   ;;  %v1441_v35 = vld [vmem:[%s2064_s0 + $0x40] ss:$8 sps:$4 sm:$0xff]  }
   0xc   :  { %v1436_v32 = vld [vmem:[%s2064_s0 + $0x130] ss:$8 sps:$4 sm:$0xff]   ;;  %v1439_v34 = vld [vmem:[%s2064_s0 + $0x144] ss:$8 sps:$4 sm:$0xff]   ;;  %v1442_v36 = vld [vmem:[%s2064_s0 + $0x140] ss:$8 sps:$4 sm:$0xff]  }
   0xd   :  { %v1443_v37 = vld [vmem:[%s2064_s0 + $0x54] ss:$8 sps:$4 sm:$0xff]   ;;  %v1447_v39 = vld [vmem:[%s2064_s0 + $0x50] ss:$8 sps:$4 sm:$0xff]   ;;  %v1449_v41 = vld [vmem:[%s2064_s0 + $0x64] ss:$8 sps:$4 sm:$0xff]  }
   0xe   :  { %666 = vmatpush1.bf16.msra.mxu0 %v1400_v4  ;;  %1382 = vmatpush1.bf16.msra.mxu1 %v1400_v4  ;;  %v1445_v38 = vld [vmem:[%s2064_s0 + $0x154] ss:$8 sps:$4 sm:$0xff]   ;;  %v1448_v40 = vld [vmem:[%s2064_s0 + $0x150] ss:$8 sps:$4 sm:$0xff]   ;;  %v1451_v42 = vld [vmem:[%s2064_s0 + $0x164] ss:$8 sps:$4 sm:$0xff]  }
   0xf   :  { %667 = vmatprep.subr.bf16.mxu0 %v1509_v0  ;;  %1367 = vmatprep.subr.bf16.mxu1 %v1509_v0  ;;  %v1453_v43 = vld [vmem:[%s2064_s0 + $0x60] ss:$8 sps:$4 sm:$0xff]   ;;  %v1455_v45 = vld [vmem:[%s2064_s0 + $0x74] ss:$8 sps:$4 sm:$0xff]   ;;  %v1459_v47 = vld [vmem:[%s2064_s0 + $0x70] ss:$8 sps:$4 sm:$0xff]  }
  0x10   :  { %v1454_v44 = vld [vmem:[%s2064_s0 + $0x160] ss:$8 sps:$4 sm:$0xff]   ;;  %v1457_v46 = vld [vmem:[%s2064_s0 + $0x174] ss:$8 sps:$4 sm:$0xff]   ;;  %v1460_v48 = vld [vmem:[%s2064_s0 + $0x170] ss:$8 sps:$4 sm:$0xff]  }
  0x11   :  { %v1461_v49 = vld [vmem:[%s2064_s0 + $0x84] ss:$8 sps:$4 sm:$0xff]   ;;  %v1465_v51 = vld [vmem:[%s2064_s0 + $0x80] ss:$8 sps:$4 sm:$0xff]   ;;  %v1467_v53 = vld [vmem:[%s2064_s0 + $0x94] ss:$8 sps:$4 sm:$0xff]  }
  0x12   :  { %668 = vmatpush1.bf16.msra.mxu0 %v1401_v5  ;;  %1383 = vmatpush1.bf16.msra.mxu1 %v1401_v5  ;;  %v1463_v50 = vld [vmem:[%s2064_s0 + $0x184] ss:$8 sps:$4 sm:$0xff]   ;;  %v1466_v52 = vld [vmem:[%s2064_s0 + $0x180] ss:$8 sps:$4 sm:$0xff]   ;;  %v1469_v54 = vld [vmem:[%s2064_s0 + $0x194] ss:$8 sps:$4 sm:$0xff]  }
  0x13   :  { %669 = vmatprep.subr.bf16.mxu0 %v1509_v0  ;;  %1368 = vmatprep.subr.bf16.mxu1 %v1509_v0  ;;  %v1471_v55 = vld [vmem:[%s2064_s0 + $0x90] ss:$8 sps:$4 sm:$0xff]   ;;  %v1473_v57 = vld [vmem:[%s2064_s0 + $0xa4] ss:$8 sps:$4 sm:$0xff]   ;;  %v1477_v59 = vld [vmem:[%s2064_s0 + $0xa0] ss:$8 sps:$4 sm:$0xff]  }
  0x14   :  { %v1472_v56 = vld [vmem:[%s2064_s0 + $0x190] ss:$8 sps:$4 sm:$0xff]   ;;  %v1475_v58 = vld [vmem:[%s2064_s0 + $0x1a4] ss:$8 sps:$4 sm:$0xff]   ;;  %v1478_v60 = vld [vmem:[%s2064_s0 + $0x1a0] ss:$8 sps:$4 sm:$0xff]  }
  0x15   :  { %v1479_v61 = vld [vmem:[%s2064_s0 + $0xb4] ss:$8 sps:$4 sm:$0xff]   ;;  %v1483_v63 = vld [vmem:[%s2064_s0 + $0xb0] ss:$8 sps:$4 sm:$0xff]   ;;  %v1485_v1 = vld [vmem:[%s2064_s0 + $0xc4] ss:$8 sps:$4 sm:$0xff]  }
  0x16   :  { %670 = vmatpush1.bf16.msra.mxu0 %v1402_v7  ;;  %1384 = vmatpush1.bf16.msra.mxu1 %v1402_v7  ;;  %v1481_v62 = vld [vmem:[%s2064_s0 + $0x1b4] ss:$8 sps:$4 sm:$0xff]   ;;  %v1487_v2 = vld [vmem:[%s2064_s0 + $0x1c4] ss:$8 sps:$4 sm:$0xff]   ;;  %v1489_v3 = vld [vmem:[%s2064_s0 + $0xc0] ss:$8 sps:$4 sm:$0xff]  }
  0x17   :  { %671 = vmatprep.subr.bf16.mxu0 %v1509_v0  ;;  %1369 = vmatprep.subr.bf16.mxu1 %v1509_v0  ;;  %v1490_v4 = vld [vmem:[%s2064_s0 + $0x1c0] ss:$8 sps:$4 sm:$0xff]   ;;  %v1491_v5 = vld [vmem:[%s2064_s0 + $0xd4] ss:$8 sps:$4 sm:$0xff]   ;;  %v1495_v7 = vld [vmem:[%s2064_s0 + $0xd0] ss:$8 sps:$4 sm:$0xff]  }
  0x18   :  { %v1493_v6 = vld [vmem:[%s2064_s0 + $0x1d4] ss:$8 sps:$4 sm:$0xff]   ;;  %v1496_v8 = vld [vmem:[%s2064_s0 + $0x1d0] ss:$8 sps:$4 sm:$0xff]  }
  0x1a   :  { %672 = vmatpush1.bf16.msra.mxu0 %v1403_v9  ;;  %1385 = vmatpush1.bf16.msra.mxu1 %v1403_v9  ;;  %v1497_v9 = vld [vmem:[%s2064_s0 + $0xe4] ss:$8 sps:$4 sm:$0xff]  }
  0x1b   :  { %673 = vmatprep.subr.bf16.mxu0 %v1509_v0  ;;  %1370 = vmatprep.subr.bf16.mxu1 %v1509_v0 }
  0x1e   :  { %674 = vmatpush1.bf16.msra.mxu0 %v1404_v10  ;;  %1386 = vmatpush1.bf16.msra.mxu1 %v1404_v10  ;;  %v1499_v10 = vld [vmem:[%s2064_s0 + $0x1e4] ss:$8 sps:$4 sm:$0xff]  }
  0x1f   :  { %675 = vmatprep.subr.bf16.mxu0 %v1509_v0  ;;  %1371 = vmatprep.subr.bf16.mxu1 %v1509_v0 }
  0x22   :  { %676 = vmatpush1.bf16.msra.mxu0 %v1405_v11  ;;  %1387 = vmatpush1.bf16.msra.mxu1 %v1405_v11  ;;  %v1501_v11 = vld [vmem:[%s2064_s0 + $0xe0] ss:$8 sps:$4 sm:$0xff]  }
  0x23   :  { %677 = vmatprep.subr.bf16.mxu0 %v1509_v0  ;;  %1372 = vmatprep.subr.bf16.mxu1 %v1509_v0 }
  0x26   :  { %678 = vmatpush1.bf16.msra.mxu0 %v1406_v12  ;;  %1388 = vmatpush1.bf16.msra.mxu1 %v1406_v12  ;;  %v1502_v12 = vld [vmem:[%s2064_s0 + $0x1e0] ss:$8 sps:$4 sm:$0xff]  }
  0x27   :  { %679 = vmatprep.subr.bf16.mxu0 %v1509_v0  ;;  %1373 = vmatprep.subr.bf16.mxu1 %v1509_v0 }
  0x2a   :  { %680 = vmatpush1.bf16.msra.mxu0 %v1407_v13  ;;  %1389 = vmatpush1.bf16.msra.mxu1 %v1407_v13  ;;  %v1503_v13 = vld [vmem:[%s2064_s0 + $0xf4] ss:$8 sps:$4 sm:$0xff]  }
  0x2b   :  { %681 = vmatprep.subr.bf16.mxu0 %v1509_v0  ;;  %1374 = vmatprep.subr.bf16.mxu1 %v1509_v0 }
  0x2e   :  { %682 = vmatpush1.bf16.msra.mxu0 %v1408_v14  ;;  %1390 = vmatpush1.bf16.msra.mxu1 %v1408_v14  ;;  %v1505_v14 = vld [vmem:[%s2064_s0 + $0x1f4] ss:$8 sps:$4 sm:$0xff]  }
  0x2f   :  { %683 = vmatprep.subr.bf16.mxu0 %v1509_v0  ;;  %1375 = vmatprep.subr.bf16.mxu1 %v1509_v0 }
  0x32   :  { %684 = vmatpush1.bf16.msra.mxu0 %v1409_v15  ;;  %1391 = vmatpush1.bf16.msra.mxu1 %v1409_v15  ;;  %v1507_v15 = vld [vmem:[%s2064_s0 + $0xf0] ss:$8 sps:$4 sm:$0xff]  }
  0x33   :  { %685 = vmatprep.subr.bf16.mxu0 %v1509_v0  ;;  %1376 = vmatprep.subr.bf16.mxu1 %v1509_v0 }
  0x36   :  { %686 = vmatpush1.bf16.msra.mxu0 %v1410_v16  ;;  %1392 = vmatpush1.bf16.msra.mxu1 %v1410_v16  ;;  %v1508_v16 = vld [vmem:[%s2064_s0 + $0x1f0] ss:$8 sps:$4 sm:$0xff]  }
  0x37   :  { %687 = vmatprep.subr.bf16.mxu0 %v1509_v0  ;;  %1377 = vmatprep.subr.bf16.mxu1 %v1509_v0 }
  0x3a   :  { %688 = vmatpush1.bf16.msra.mxu0 %v1411_v17  ;;  %1393 = vmatpush1.bf16.msra.mxu1 %v1411_v17 }
  0x3b   :  { %689 = vmatprep.subr.bf16.mxu0 %v1509_v0  ;;  %1378 = vmatprep.subr.bf16.mxu1 %v1509_v0  ;;  %v1484_v0 = vld [vmem:[%s2064_s0 + $0x1b0] ss:$8 sps:$4 sm:$0xff]  }
  0x3e   :  { %690 = vmatpush1.bf16.msra.mxu0 %v1412_v18  ;;  %1394 = vmatpush1.bf16.msra.mxu1 %v1412_v18  ;;  %v1805_v18 = vld [vmem:[%s2065_s2] ss:$0 sm:$0xff] }
  0x41   :  { %692 = vmatmul.mubr.bf16.vlgmr.msra.gmra.mrb[0].mxu0 %v1413_v19  ;;  %820 = vmatmul.mubr.bf16.vlgmr.msra.gmra.mrb[0].mxu1 %v1416_v20 }
  0x42   :  { %699 = vmatprep.mubr.bf16.mxu0 %v1419_v21  ;;  %827 = vmatprep.mubr.bf16.mxu1 %v1421_v22 }
  0x49   :  { %700 = vmatmul.mubr.bf16.gmra.mrb[4].mxu0 %v1423_v23  ;;  %828 = vmatmul.mubr.bf16.gmra.mrb[4].mxu1 %v1424_v24 }
  0x4a   :  { %707 = vmatprep.mubr.bf16.mxu0 %v1425_v25  ;;  %835 = vmatprep.mubr.bf16.mxu1 %v1427_v26 }
  0x51   :  { %708 = vmatmul.mubr.bf16.gmra.mrb[8].mxu0 %v1429_v27  ;;  %836 = vmatmul.mubr.bf16.gmra.mrb[8].mxu1 %v1430_v28 }
  0x52   :  { %715 = vmatprep.mubr.bf16.mxu0 %v1431_v29  ;;  %843 = vmatprep.mubr.bf16.mxu1 %v1433_v30 }
  0x59   :  { %716 = vmatmul.mubr.bf16.gmra.mrb[12].mxu0 %v1435_v31  ;;  %844 = vmatmul.mubr.bf16.gmra.mrb[12].mxu1 %v1436_v32 }
  0x5a   :  { %723 = vmatprep.mubr.bf16.mxu0 %v1437_v33  ;;  %851 = vmatprep.mubr.bf16.mxu1 %v1439_v34 }
  0x61   :  { %724 = vmatmul.mubr.bf16.gmra.mrb[16].mxu0 %v1441_v35  ;;  %852 = vmatmul.mubr.bf16.gmra.mrb[16].mxu1 %v1442_v36 }
  0x62   :  { %731 = vmatprep.mubr.bf16.mxu0 %v1443_v37  ;;  %859 = vmatprep.mubr.bf16.mxu1 %v1445_v38 }
  0x69   :  { %732 = vmatmul.mubr.bf16.gmra.mrb[20].mxu0 %v1447_v39  ;;  %860 = vmatmul.mubr.bf16.gmra.mrb[20].mxu1 %v1448_v40 }
  0x6a   :  { %739 = vmatprep.mubr.bf16.mxu0 %v1449_v41  ;;  %867 = vmatprep.mubr.bf16.mxu1 %v1451_v42 }
  0x71   :  { %740 = vmatmul.mubr.bf16.gmra.mrb[24].mxu0 %v1453_v43  ;;  %868 = vmatmul.mubr.bf16.gmra.mrb[24].mxu1 %v1454_v44 }
  0x72   :  { %747 = vmatprep.mubr.bf16.mxu0 %v1455_v45  ;;  %875 = vmatprep.mubr.bf16.mxu1 %v1457_v46 }
  0x79   :  { %748 = vmatmul.mubr.bf16.gmra.mrb[28].mxu0 %v1459_v47  ;;  %876 = vmatmul.mubr.bf16.gmra.mrb[28].mxu1 %v1460_v48 }
  0x7a   :  { %755 = vmatprep.mubr.bf16.mxu0 %v1461_v49  ;;  %883 = vmatprep.mubr.bf16.mxu1 %v1463_v50 }
  0x81   :  { %756 = vmatmul.mubr.bf16.gmra.mrb[32].mxu0 %v1465_v51  ;;  %884 = vmatmul.mubr.bf16.gmra.mrb[32].mxu1 %v1466_v52 }
  0x82   :  { %763 = vmatprep.mubr.bf16.mxu0 %v1467_v53  ;;  %891 = vmatprep.mubr.bf16.mxu1 %v1469_v54 }
  0x89   :  { %764 = vmatmul.mubr.bf16.gmra.mrb[36].mxu0 %v1471_v55  ;;  %892 = vmatmul.mubr.bf16.gmra.mrb[36].mxu1 %v1472_v56 }
  0x8a   :  { %771 = vmatprep.mubr.bf16.mxu0 %v1473_v57  ;;  %899 = vmatprep.mubr.bf16.mxu1 %v1475_v58 }
  0x91   :  { %772 = vmatmul.mubr.bf16.gmra.mrb[40].mxu0 %v1477_v59  ;;  %900 = vmatmul.mubr.bf16.gmra.mrb[40].mxu1 %v1478_v60 }
  0x92   :  { %779 = vmatprep.mubr.bf16.mxu0 %v1479_v61  ;;  %907 = vmatprep.mubr.bf16.mxu1 %v1481_v62 }
  0x99   :  { %780 = vmatmul.mubr.bf16.gmra.mrb[44].mxu0 %v1483_v63  ;;  %908 = vmatmul.mubr.bf16.gmra.mrb[44].mxu1 %v1484_v0 }
  0x9a   :  { %787 = vmatprep.mubr.bf16.mxu0 %v1485_v1  ;;  %915 = vmatprep.mubr.bf16.mxu1 %v1487_v2 }
  0xa1   :  { %788 = vmatmul.mubr.bf16.gmra.mrb[48].mxu0 %v1489_v3  ;;  %916 = vmatmul.mubr.bf16.gmra.mrb[48].mxu1 %v1490_v4 }
  0xa2   :  { %795 = vmatprep.mubr.bf16.mxu0 %v1491_v5  ;;  %923 = vmatprep.mubr.bf16.mxu1 %v1493_v6 }
  0xa9   :  { %796 = vmatmul.mubr.bf16.gmra.mrb[52].mxu0 %v1495_v7  ;;  %924 = vmatmul.mubr.bf16.gmra.mrb[52].mxu1 %v1496_v8 }
  0xaa   :  { %803 = vmatprep.mubr.bf16.mxu0 %v1497_v9  ;;  %931 = vmatprep.mubr.bf16.mxu1 %v1499_v10 }
  0xb1   :  { %804 = vmatmul.mubr.bf16.gmra.mrb[56].mxu0 %v1501_v11  ;;  %932 = vmatmul.mubr.bf16.gmra.mrb[56].mxu1 %v1502_v12 }
  0xb2   :  { %811 = vmatprep.mubr.bf16.mxu0 %v1503_v13  ;;  %939 = vmatprep.mubr.bf16.mxu1 %v1505_v14 }
  0xb9   :  { %812 = vmatmul.mubr.bf16.gmra.mrb[60].mxu0 %v1507_v15  ;;  %940 = vmatmul.mubr.bf16.gmra.mrb[60].mxu1 %v1508_v16 }
 0x114   :  { %v693_v17 = vpop.f32.mrb[0].mxu0  ;;  %v821_v19 = vpop.f32.mrb[0].mxu1 }
 0x115   :  { %v695_v20 = vpop.f32.mrb[1].mxu0  ;;  %v823_v21 = vpop.f32.mrb[1].mxu1  ;;  %v1150_v24 = vadd.f32 %v1805_v18, %v693_v17  ;;  %v1182_v25 = vadd.f32 %v1805_v18, %v821_v19 }
 0x116   :  { %v696_v22 = vpop.f32.mrb[2].mxu0  ;;  %v824_v23 = vpop.f32.mrb[2].mxu1 }
 0x117   :  { %v698_v26 = vpop.f32.mrb[3].mxu0  ;;  %v826_v27 = vpop.f32.mrb[3].mxu1  ;;  %1214 = vst [vmem:[%s2066_s3] sm:$0xff] %v1150_v24  ;;  %1246 = vst [vmem:[%s2066_s3 + $0x100] sm:$0xff] %v1182_v25  ;;  %v1151_v28 = vadd.f32 %v1805_v18, %v696_v22  ;;  %v1183_v29 = vadd.f32 %v1805_v18, %v824_v23 }
 0x119   :  { %1215 = vst [vmem:[%s2066_s3 + $0x8] sm:$0xff] %v1151_v28  ;;  %1247 = vst [vmem:[%s2066_s3 + $0x108] sm:$0xff] %v1183_v29 }
 0x11c   :  { %v701_v30 = vpop.f32.mrb[4].mxu0  ;;  %v829_v31 = vpop.f32.mrb[4].mxu1 }
 0x11d   :  { %v703_v32 = vpop.f32.mrb[5].mxu0  ;;  %v831_v33 = vpop.f32.mrb[5].mxu1  ;;  %v1152_v36 = vadd.f32 %v1805_v18, %v701_v30  ;;  %v1184_v37 = vadd.f32 %v1805_v18, %v829_v31 }
 0x11e   :  { %v704_v34 = vpop.f32.mrb[6].mxu0  ;;  %v832_v35 = vpop.f32.mrb[6].mxu1 }
 0x11f   :  { %v706_v38 = vpop.f32.mrb[7].mxu0  ;;  %v834_v39 = vpop.f32.mrb[7].mxu1  ;;  %1216 = vst [vmem:[%s2066_s3 + $0x10] sm:$0xff] %v1152_v36  ;;  %1248 = vst [vmem:[%s2066_s3 + $0x110] sm:$0xff] %v1184_v37  ;;  %v1153_v40 = vadd.f32 %v1805_v18, %v704_v34  ;;  %v1185_v41 = vadd.f32 %v1805_v18, %v832_v35 }
 0x121   :  { %1217 = vst [vmem:[%s2066_s3 + $0x18] sm:$0xff] %v1153_v40  ;;  %1249 = vst [vmem:[%s2066_s3 + $0x118] sm:$0xff] %v1185_v41 }
 0x124   :  { %v709_v42 = vpop.f32.mrb[8].mxu0  ;;  %v837_v43 = vpop.f32.mrb[8].mxu1 }
 0x125   :  { %v711_v44 = vpop.f32.mrb[9].mxu0  ;;  %v839_v45 = vpop.f32.mrb[9].mxu1  ;;  %v1154_v48 = vadd.f32 %v1805_v18, %v709_v42  ;;  %v1186_v49 = vadd.f32 %v1805_v18, %v837_v43 }
 0x126   :  { %v712_v46 = vpop.f32.mrb[10].mxu0  ;;  %v840_v47 = vpop.f32.mrb[10].mxu1 }
 0x127   :  { %v714_v50 = vpop.f32.mrb[11].mxu0  ;;  %v842_v51 = vpop.f32.mrb[11].mxu1  ;;  %1218 = vst [vmem:[%s2066_s3 + $0x20] sm:$0xff] %v1154_v48  ;;  %1250 = vst [vmem:[%s2066_s3 + $0x120] sm:$0xff] %v1186_v49  ;;  %v1155_v52 = vadd.f32 %v1805_v18, %v712_v46  ;;  %v1187_v53 = vadd.f32 %v1805_v18, %v840_v47 }
 0x129   :  { %1219 = vst [vmem:[%s2066_s3 + $0x28] sm:$0xff] %v1155_v52  ;;  %1251 = vst [vmem:[%s2066_s3 + $0x128] sm:$0xff] %v1187_v53 }
 0x12c   :  { %v717_v54 = vpop.f32.mrb[12].mxu0  ;;  %v845_v55 = vpop.f32.mrb[12].mxu1 }
 0x12d   :  { %v719_v56 = vpop.f32.mrb[13].mxu0  ;;  %v847_v57 = vpop.f32.mrb[13].mxu1  ;;  %v1156_v60 = vadd.f32 %v1805_v18, %v717_v54  ;;  %v1188_v61 = vadd.f32 %v1805_v18, %v845_v55 }
 0x12e   :  { %v720_v58 = vpop.f32.mrb[14].mxu0  ;;  %v848_v59 = vpop.f32.mrb[14].mxu1 }
 0x12f   :  { %v722_v62 = vpop.f32.mrb[15].mxu0  ;;  %v850_v63 = vpop.f32.mrb[15].mxu1  ;;  %1220 = vst [vmem:[%s2066_s3 + $0x30] sm:$0xff] %v1156_v60  ;;  %1252 = vst [vmem:[%s2066_s3 + $0x130] sm:$0xff] %v1188_v61  ;;  %v1157_v0 = vadd.f32 %v1805_v18, %v720_v58  ;;  %v1189_v1 = vadd.f32 %v1805_v18, %v848_v59 }
 0x131   :  { %1221 = vst [vmem:[%s2066_s3 + $0x38] sm:$0xff] %v1157_v0  ;;  %1253 = vst [vmem:[%s2066_s3 + $0x138] sm:$0xff] %v1189_v1 }
 0x134   :  { %v725_v2 = vpop.f32.mrb[16].mxu0  ;;  %v853_v3 = vpop.f32.mrb[16].mxu1 }
 0x135   :  { %v727_v4 = vpop.f32.mrb[17].mxu0  ;;  %v855_v5 = vpop.f32.mrb[17].mxu1  ;;  %v1158_v8 = vadd.f32 %v1805_v18, %v725_v2  ;;  %v1190_v9 = vadd.f32 %v1805_v18, %v853_v3 }
 0x136   :  { %v728_v6 = vpop.f32.mrb[18].mxu0  ;;  %v856_v7 = vpop.f32.mrb[18].mxu1 }
 0x137   :  { %v730_v10 = vpop.f32.mrb[19].mxu0  ;;  %v858_v11 = vpop.f32.mrb[19].mxu1  ;;  %1222 = vst [vmem:[%s2066_s3 + $0x40] sm:$0xff] %v1158_v8  ;;  %1254 = vst [vmem:[%s2066_s3 + $0x140] sm:$0xff] %v1190_v9  ;;  %v1159_v12 = vadd.f32 %v1805_v18, %v728_v6  ;;  %v1191_v13 = vadd.f32 %v1805_v18, %v856_v7 }
 0x139   :  { %1223 = vst [vmem:[%s2066_s3 + $0x48] sm:$0xff] %v1159_v12  ;;  %1255 = vst [vmem:[%s2066_s3 + $0x148] sm:$0xff] %v1191_v13 }
 0x13c   :  { %v733_v14 = vpop.f32.mrb[20].mxu0  ;;  %v861_v15 = vpop.f32.mrb[20].mxu1 }
 0x13d   :  { %v735_v16 = vpop.f32.mrb[21].mxu0  ;;  %v863_v17 = vpop.f32.mrb[21].mxu1  ;;  %v1160_v21 = vadd.f32 %v1805_v18, %v733_v14  ;;  %v1192_v22 = vadd.f32 %v1805_v18, %v861_v15 }
 0x13e   :  { %v736_v19 = vpop.f32.mrb[22].mxu0  ;;  %v864_v20 = vpop.f32.mrb[22].mxu1 }
 0x13f   :  { %v738_v23 = vpop.f32.mrb[23].mxu0  ;;  %v866_v24 = vpop.f32.mrb[23].mxu1  ;;  %1224 = vst [vmem:[%s2066_s3 + $0x50] sm:$0xff] %v1160_v21  ;;  %1256 = vst [vmem:[%s2066_s3 + $0x150] sm:$0xff] %v1192_v22  ;;  %v1161_v25 = vadd.f32 %v1805_v18, %v736_v19  ;;  %v1193_v26 = vadd.f32 %v1805_v18, %v864_v20 }
 0x141   :  { %1225 = vst [vmem:[%s2066_s3 + $0x58] sm:$0xff] %v1161_v25  ;;  %1257 = vst [vmem:[%s2066_s3 + $0x158] sm:$0xff] %v1193_v26 }
 0x144   :  { %v741_v27 = vpop.f32.mrb[24].mxu0  ;;  %v869_v28 = vpop.f32.mrb[24].mxu1 }
 0x145   :  { %v743_v29 = vpop.f32.mrb[25].mxu0  ;;  %v871_v30 = vpop.f32.mrb[25].mxu1  ;;  %v1162_v33 = vadd.f32 %v1805_v18, %v741_v27  ;;  %v1194_v34 = vadd.f32 %v1805_v18, %v869_v28 }
 0x146   :  { %v744_v31 = vpop.f32.mrb[26].mxu0  ;;  %v872_v32 = vpop.f32.mrb[26].mxu1 }
 0x147   :  { %v746_v35 = vpop.f32.mrb[27].mxu0  ;;  %v874_v36 = vpop.f32.mrb[27].mxu1  ;;  %1226 = vst [vmem:[%s2066_s3 + $0x60] sm:$0xff] %v1162_v33  ;;  %1258 = vst [vmem:[%s2066_s3 + $0x160] sm:$0xff] %v1194_v34  ;;  %v1163_v37 = vadd.f32 %v1805_v18, %v744_v31  ;;  %v1195_v38 = vadd.f32 %v1805_v18, %v872_v32 }
 0x149   :  { %1227 = vst [vmem:[%s2066_s3 + $0x68] sm:$0xff] %v1163_v37  ;;  %1259 = vst [vmem:[%s2066_s3 + $0x168] sm:$0xff] %v1195_v38 }
 0x14c   :  { %v749_v39 = vpop.f32.mrb[28].mxu0  ;;  %v877_v40 = vpop.f32.mrb[28].mxu1 }
 0x14d   :  { %v751_v41 = vpop.f32.mrb[29].mxu0  ;;  %v879_v42 = vpop.f32.mrb[29].mxu1  ;;  %v1164_v45 = vadd.f32 %v1805_v18, %v749_v39  ;;  %v1196_v46 = vadd.f32 %v1805_v18, %v877_v40 }
 0x14e   :  { %v752_v43 = vpop.f32.mrb[30].mxu0  ;;  %v880_v44 = vpop.f32.mrb[30].mxu1 }
 0x14f   :  { %v754_v47 = vpop.f32.mrb[31].mxu0  ;;  %v882_v48 = vpop.f32.mrb[31].mxu1  ;;  %1228 = vst [vmem:[%s2066_s3 + $0x70] sm:$0xff] %v1164_v45  ;;  %1260 = vst [vmem:[%s2066_s3 + $0x170] sm:$0xff] %v1196_v46  ;;  %v1165_v49 = vadd.f32 %v1805_v18, %v752_v43  ;;  %v1197_v50 = vadd.f32 %v1805_v18, %v880_v44 }
 0x151   :  { %1229 = vst [vmem:[%s2066_s3 + $0x78] sm:$0xff] %v1165_v49  ;;  %1261 = vst [vmem:[%s2066_s3 + $0x178] sm:$0xff] %v1197_v50 }
 0x154   :  { %v757_v51 = vpop.f32.mrb[32].mxu0  ;;  %v885_v52 = vpop.f32.mrb[32].mxu1 }
 0x155   :  { %v759_v53 = vpop.f32.mrb[33].mxu0  ;;  %v887_v54 = vpop.f32.mrb[33].mxu1  ;;  %v1166_v57 = vadd.f32 %v1805_v18, %v757_v51  ;;  %v1198_v58 = vadd.f32 %v1805_v18, %v885_v52 }
 0x156   :  { %v760_v55 = vpop.f32.mrb[34].mxu0  ;;  %v888_v56 = vpop.f32.mrb[34].mxu1 }
 0x157   :  { %v762_v59 = vpop.f32.mrb[35].mxu0  ;;  %v890_v60 = vpop.f32.mrb[35].mxu1  ;;  %1230 = vst [vmem:[%s2066_s3 + $0x80] sm:$0xff] %v1166_v57  ;;  %1262 = vst [vmem:[%s2066_s3 + $0x180] sm:$0xff] %v1198_v58  ;;  %v1167_v61 = vadd.f32 %v1805_v18, %v760_v55  ;;  %v1199_v62 = vadd.f32 %v1805_v18, %v888_v56 }
 0x159   :  { %1231 = vst [vmem:[%s2066_s3 + $0x88] sm:$0xff] %v1167_v61  ;;  %1263 = vst [vmem:[%s2066_s3 + $0x188] sm:$0xff] %v1199_v62 }
 0x15c   :  { %v765_v63 = vpop.f32.mrb[36].mxu0  ;;  %v893_v0 = vpop.f32.mrb[36].mxu1 }
 0x15d   :  { %v767_v1 = vpop.f32.mrb[37].mxu0  ;;  %v895_v2 = vpop.f32.mrb[37].mxu1  ;;  %v1168_v5 = vadd.f32 %v1805_v18, %v765_v63  ;;  %v1200_v6 = vadd.f32 %v1805_v18, %v893_v0 }
 0x15e   :  { %v768_v3 = vpop.f32.mrb[38].mxu0  ;;  %v896_v4 = vpop.f32.mrb[38].mxu1 }
 0x15f   :  { %v770_v7 = vpop.f32.mrb[39].mxu0  ;;  %v898_v8 = vpop.f32.mrb[39].mxu1  ;;  %1232 = vst [vmem:[%s2066_s3 + $0x90] sm:$0xff] %v1168_v5  ;;  %1264 = vst [vmem:[%s2066_s3 + $0x190] sm:$0xff] %v1200_v6  ;;  %v1169_v9 = vadd.f32 %v1805_v18, %v768_v3  ;;  %v1201_v10 = vadd.f32 %v1805_v18, %v896_v4 }
 0x161   :  { %1233 = vst [vmem:[%s2066_s3 + $0x98] sm:$0xff] %v1169_v9  ;;  %1265 = vst [vmem:[%s2066_s3 + $0x198] sm:$0xff] %v1201_v10 }
 0x164   :  { %v773_v11 = vpop.f32.mrb[40].mxu0  ;;  %v901_v12 = vpop.f32.mrb[40].mxu1 }
 0x165   :  { %v775_v13 = vpop.f32.mrb[41].mxu0  ;;  %v903_v14 = vpop.f32.mrb[41].mxu1  ;;  %v1170_v17 = vadd.f32 %v1805_v18, %v773_v11  ;;  %v1202_v19 = vadd.f32 %v1805_v18, %v901_v12 }
 0x166   :  { %v776_v15 = vpop.f32.mrb[42].mxu0  ;;  %v904_v16 = vpop.f32.mrb[42].mxu1 }
 0x167   :  { %v778_v20 = vpop.f32.mrb[43].mxu0  ;;  %v906_v21 = vpop.f32.mrb[43].mxu1  ;;  %1234 = vst [vmem:[%s2066_s3 + $0xa0] sm:$0xff] %v1170_v17  ;;  %1266 = vst [vmem:[%s2066_s3 + $0x1a0] sm:$0xff] %v1202_v19  ;;  %v1171_v22 = vadd.f32 %v1805_v18, %v776_v15  ;;  %v1203_v23 = vadd.f32 %v1805_v18, %v904_v16 }
 0x169   :  { %1235 = vst [vmem:[%s2066_s3 + $0xa8] sm:$0xff] %v1171_v22  ;;  %1267 = vst [vmem:[%s2066_s3 + $0x1a8] sm:$0xff] %v1203_v23 }
 0x16c   :  { %v781_v24 = vpop.f32.mrb[44].mxu0  ;;  %v909_v25 = vpop.f32.mrb[44].mxu1 }
 0x16d   :  { %v783_v26 = vpop.f32.mrb[45].mxu0  ;;  %v911_v27 = vpop.f32.mrb[45].mxu1  ;;  %v1172_v30 = vadd.f32 %v1805_v18, %v781_v24  ;;  %v1204_v31 = vadd.f32 %v1805_v18, %v909_v25 }
 0x16e   :  { %v784_v28 = vpop.f32.mrb[46].mxu0  ;;  %v912_v29 = vpop.f32.mrb[46].mxu1 }
 0x16f   :  { %v786_v32 = vpop.f32.mrb[47].mxu0  ;;  %v914_v33 = vpop.f32.mrb[47].mxu1  ;;  %1236 = vst [vmem:[%s2066_s3 + $0xb0] sm:$0xff] %v1172_v30  ;;  %1268 = vst [vmem:[%s2066_s3 + $0x1b0] sm:$0xff] %v1204_v31  ;;  %v1173_v34 = vadd.f32 %v1805_v18, %v784_v28  ;;  %v1205_v35 = vadd.f32 %v1805_v18, %v912_v29 }
 0x171   :  { %1237 = vst [vmem:[%s2066_s3 + $0xb8] sm:$0xff] %v1173_v34  ;;  %1269 = vst [vmem:[%s2066_s3 + $0x1b8] sm:$0xff] %v1205_v35 }
 0x174   :  { %v789_v36 = vpop.f32.mrb[48].mxu0  ;;  %v917_v37 = vpop.f32.mrb[48].mxu1 }
 0x175   :  { %v791_v38 = vpop.f32.mrb[49].mxu0  ;;  %v919_v39 = vpop.f32.mrb[49].mxu1  ;;  %v1174_v42 = vadd.f32 %v1805_v18, %v789_v36  ;;  %v1206_v43 = vadd.f32 %v1805_v18, %v917_v37 }
 0x176   :  { %v792_v40 = vpop.f32.mrb[50].mxu0  ;;  %v920_v41 = vpop.f32.mrb[50].mxu1 }
 0x177   :  { %v794_v44 = vpop.f32.mrb[51].mxu0  ;;  %v922_v45 = vpop.f32.mrb[51].mxu1  ;;  %1238 = vst [vmem:[%s2066_s3 + $0xc0] sm:$0xff] %v1174_v42  ;;  %1270 = vst [vmem:[%s2066_s3 + $0x1c0] sm:$0xff] %v1206_v43  ;;  %v1175_v46 = vadd.f32 %v1805_v18, %v792_v40  ;;  %v1207_v47 = vadd.f32 %v1805_v18, %v920_v41 }
 0x179   :  { %1239 = vst [vmem:[%s2066_s3 + $0xc8] sm:$0xff] %v1175_v46  ;;  %1271 = vst [vmem:[%s2066_s3 + $0x1c8] sm:$0xff] %v1207_v47 }
 0x17c   :  { %v797_v48 = vpop.f32.mrb[52].mxu0  ;;  %v925_v49 = vpop.f32.mrb[52].mxu1 }
 0x17d   :  { %v799_v50 = vpop.f32.mrb[53].mxu0  ;;  %v927_v51 = vpop.f32.mrb[53].mxu1  ;;  %v1176_v54 = vadd.f32 %v1805_v18, %v797_v48  ;;  %v1208_v55 = vadd.f32 %v1805_v18, %v925_v49 }
 0x17e   :  { %v800_v52 = vpop.f32.mrb[54].mxu0  ;;  %v928_v53 = vpop.f32.mrb[54].mxu1 }
 0x17f   :  { %v802_v56 = vpop.f32.mrb[55].mxu0  ;;  %v930_v57 = vpop.f32.mrb[55].mxu1  ;;  %1240 = vst [vmem:[%s2066_s3 + $0xd0] sm:$0xff] %v1176_v54  ;;  %1272 = vst [vmem:[%s2066_s3 + $0x1d0] sm:$0xff] %v1208_v55  ;;  %v1177_v58 = vadd.f32 %v1805_v18, %v800_v52  ;;  %v1209_v59 = vadd.f32 %v1805_v18, %v928_v53 }
 0x181   :  { %1241 = vst [vmem:[%s2066_s3 + $0xd8] sm:$0xff] %v1177_v58  ;;  %1273 = vst [vmem:[%s2066_s3 + $0x1d8] sm:$0xff] %v1209_v59 }
 0x184   :  { %v805_v60 = vpop.f32.mrb[56].mxu0  ;;  %v933_v61 = vpop.f32.mrb[56].mxu1 }
 0x185   :  { %v807_v62 = vpop.f32.mrb[57].mxu0  ;;  %v935_v63 = vpop.f32.mrb[57].mxu1  ;;  %v1178_v2 = vadd.f32 %v1805_v18, %v805_v60  ;;  %v1210_v3 = vadd.f32 %v1805_v18, %v933_v61 }
 0x186   :  { %v808_v0 = vpop.f32.mrb[58].mxu0  ;;  %v936_v1 = vpop.f32.mrb[58].mxu1 }
 0x187   :  { %v810_v4 = vpop.f32.mrb[59].mxu0  ;;  %v938_v5 = vpop.f32.mrb[59].mxu1  ;;  %1242 = vst [vmem:[%s2066_s3 + $0xe0] sm:$0xff] %v1178_v2  ;;  %1274 = vst [vmem:[%s2066_s3 + $0x1e0] sm:$0xff] %v1210_v3  ;;  %v1179_v6 = vadd.f32 %v1805_v18, %v808_v0  ;;  %v1211_v7 = vadd.f32 %v1805_v18, %v936_v1 }
 0x189   :  { %1243 = vst [vmem:[%s2066_s3 + $0xe8] sm:$0xff] %v1179_v6  ;;  %1275 = vst [vmem:[%s2066_s3 + $0x1e8] sm:$0xff] %v1211_v7 }
 0x18c   :  { %v813_v8 = vpop.f32.mrb[60].mxu0  ;;  %v941_v9 = vpop.f32.mrb[60].mxu1 }
 0x18d   :  { %v815_v10 = vpop.f32.mrb[61].mxu0  ;;  %v943_v11 = vpop.f32.mrb[61].mxu1  ;;  %v1180_v14 = vadd.f32 %v1805_v18, %v813_v8  ;;  %v1212_v15 = vadd.f32 %v1805_v18, %v941_v9 }
 0x18e   :  { %v816_v12 = vpop.f32.mrb[62].mxu0  ;;  %v944_v13 = vpop.f32.mrb[62].mxu1 }
 0x18f   :  { %v818_v16 = vpop.f32.mrb[63].mxu0  ;;  %v946_v17 = vpop.f32.mrb[63].mxu1  ;;  %1244 = vst [vmem:[%s2066_s3 + $0xf0] sm:$0xff] %v1180_v14  ;;  %1276 = vst [vmem:[%s2066_s3 + $0x1f0] sm:$0xff] %v1212_v15  ;;  %v1181_v19 = vadd.f32 %v1805_v18, %v816_v12  ;;  %v1213_v20 = vadd.f32 %v1805_v18, %v944_v13 }
 0x191   :  { %1245 = vst [vmem:[%s2066_s3 + $0xf8] sm:$0xff] %v1181_v19  ;;  %1277 = vst [vmem:[%s2066_s3 + $0x1f8] sm:$0xff] %v1213_v20 }

// kernel: generator_forward.49
= control target key start
LH: loop header
LB: loop body
LE: loop exit
PB: predicated region body
PF: predicated region fallthrough
CT: control target
= control target key end

     0   :  { %s1609_s12 = smov 0   ;;  %s1611_s13 = smov 0   ;;  %s2055_s0 = inlined_call_operand.vmem [shape: bf16[128,1024], index: 0, kind: input, shape index: {}]   ;;  %s2056_s1 = inlined_call_operand.vmem [shape: bf16[1024,128], index: 1, kind: input, shape index: {}]   ;;  %s2057_s2 = inlined_call_operand.vmem [shape: f32[1,128], index: 2, kind: input, shape index: {}]   ;;  %s2058_s3 = inlined_call_operand.vmem [shape: f32[128,128], index: 3, kind: output, shape index: {}]  }
   0x1   :  { %s1613_s14 = smov 0   ;;  %s1615_s15 = smov 0  }
   0x2   :  { %s1617_s16 = smov 0  }
   0x3 LB: > { %s25_s17 = sadd.s32 1, %s1582_s15  ;;  %p48_p1 = scmp.ne.s32.totalorder %s1574_s13, %s1570_s12  ;;  %s1586_s16 = sphi %s1617_s16, %s13_s16   ;;  %s1582_s15 = sphi %s1615_s15, %s2062_s15   ;;  %s1578_s14 = sphi %s1613_s14, %s2061_s14   ;;  %s1574_s13 = sphi %s1611_s13, %s2060_s13   ;;  %s1570_s12 = sphi %s1609_s12, %s2059_s12  }
   0x4   : > { %p26_p0 = scmp.ge.s32.totalorder %s25_s17, 2  ;;  %p49_p2 = scmp.eq.s32.totalorder %s1586_s16, 0 }
   0x5   : > { %s41_s19 = sadd.s32 1, %s1574_s13  ;;  %p1219_p5 = scmp.ge.s32.totalorder %s1586_s16, 2 }
   0x6   : > { %s2064_s17 = smov (%p26_p0, %s25_s17), 0  ;;  %p50_p3 = por %p49_p2, %p48_p1 }
   0x7   : > { %s37_s18 = ssub.s32 %s1582_s15, %s2064_s17  ;;  %162 = sbr.rel (%p1219_p5) target bundleno = 34 (0x22), region = 20 }
   0x8   : > { %p39_p4 = scmp.eq.s32.totalorder %s37_s18, 0 }
   0xa   : > { %s1644_s20 = scalar_select %p39_p4, %s1574_s13, %s41_s19  }
   0xe   : > { %165 = sbr.rel (!%p50_p3) target bundleno = 34 (0x22), region = 24  ;;  %s167_s21 = sand.u32 (%p50_p3), 1, %s1574_s13  }
   0xf   : > { %s1298_s22 = sshll.u32 (%p50_p3), %s1582_s15, 4  ;;  %s1220_s23 = sshll.u32 (%p50_p3), %s167_s21, 8 }
  0x10   : > { %s1652_s26 = scalar_lea.vmem (%p50_p3), %s2055_s0, %s1298_s22  ;;  %s1657_s27 = scalar_lea.vmem (%p50_p3), [#allocation2], %s1220_s23 }
  0x11   : > { %v188_v0 = vld [vmem:[%s1652_s26] sm:$0xff] (%p50_p3)  ;;  %v190_v1 = vld [vmem:[%s1652_s26 + $0x8] sm:$0xff] (%p50_p3) }
  0x12   : > { %v192_v2 = vld [vmem:[%s1652_s26 + $0x20] sm:$0xff] (%p50_p3)  ;;  %189 = vst [vmem:[%s1657_s27] sm:$0xff] (%p50_p3), %v188_v0  ;;  %191 = vst [vmem:[%s1657_s27 + $0x8] sm:$0xff] (%p50_p3), %v190_v1  ;;  %v194_v3 = vld [vmem:[%s1652_s26 + $0x28] sm:$0xff] (%p50_p3) }
  0x13   : > { %193 = vst [vmem:[%s1657_s27 + $0x10] sm:$0xff] (%p50_p3), %v192_v2  ;;  %v196_v4 = vld [vmem:[%s1652_s26 + $0x40] sm:$0xff] (%p50_p3)  ;;  %v198_v5 = vld [vmem:[%s1652_s26 + $0x48] sm:$0xff] (%p50_p3)  ;;  %195 = vst [vmem:[%s1657_s27 + $0x18] sm:$0xff] (%p50_p3), %v194_v3 }
  0x14   : > { %197 = vst [vmem:[%s1657_s27 + $0x20] sm:$0xff] (%p50_p3), %v196_v4  ;;  %199 = vst [vmem:[%s1657_s27 + $0x28] sm:$0xff] (%p50_p3), %v198_v5  ;;  %v200_v6 = vld [vmem:[%s1652_s26 + $0x60] sm:$0xff] (%p50_p3)  ;;  %v202_v7 = vld [vmem:[%s1652_s26 + $0x68] sm:$0xff] (%p50_p3) }
  0x15   : > { %v204_v8 = vld [vmem:[%s1652_s26 + $0x80] sm:$0xff]  ;;  %201 = vst [vmem:[%s1657_s27 + $0x30] sm:$0xff] %v200_v6  ;;  %203 = vst [vmem:[%s1657_s27 + $0x38] sm:$0xff] %v202_v7  ;;  %v206_v9 = vld [vmem:[%s1652_s26 + $0x88] sm:$0xff] }
  0x16   : > { %205 = vst [vmem:[%s1657_s27 + $0x40] sm:$0xff] %v204_v8  ;;  %v208_v10 = vld [vmem:[%s1652_s26 + $0xa0] sm:$0xff]  ;;  %v210_v11 = vld [vmem:[%s1652_s26 + $0xa8] sm:$0xff]  ;;  %207 = vst [vmem:[%s1657_s27 + $0x48] sm:$0xff] %v206_v9 }
  0x17   : > { %209 = vst [vmem:[%s1657_s27 + $0x50] sm:$0xff] %v208_v10  ;;  %211 = vst [vmem:[%s1657_s27 + $0x58] sm:$0xff] %v210_v11  ;;  %v212_v12 = vld [vmem:[%s1652_s26 + $0xc0] sm:$0xff]  ;;  %v214_v13 = vld [vmem:[%s1652_s26 + $0xc8] sm:$0xff] }
  0x18   : > { %v216_v14 = vld [vmem:[%s1652_s26 + $0xe0] sm:$0xff]  ;;  %213 = vst [vmem:[%s1657_s27 + $0x60] sm:$0xff] %v212_v12  ;;  %215 = vst [vmem:[%s1657_s27 + $0x68] sm:$0xff] %v214_v13  ;;  %v218_v15 = vld [vmem:[%s1652_s26 + $0xe8] sm:$0xff] }
  0x19   : > { %217 = vst [vmem:[%s1657_s27 + $0x70] sm:$0xff] %v216_v14  ;;  %v220_v16 = vld [vmem:[%s1652_s26 + $0x100] sm:$0xff]  ;;  %v222_v17 = vld [vmem:[%s1652_s26 + $0x108] sm:$0xff]  ;;  %219 = vst [vmem:[%s1657_s27 + $0x78] sm:$0xff] %v218_v15 }
  0x1a   : > { %221 = vst [vmem:[%s1657_s27 + $0x80] sm:$0xff] %v220_v16  ;;  %223 = vst [vmem:[%s1657_s27 + $0x88] sm:$0xff] %v222_v17  ;;  %v224_v18 = vld [vmem:[%s1652_s26 + $0x120] sm:$0xff]  ;;  %v226_v19 = vld [vmem:[%s1652_s26 + $0x128] sm:$0xff] }
  0x1b   : > { %v228_v20 = vld [vmem:[%s1652_s26 + $0x140] sm:$0xff]  ;;  %225 = vst [vmem:[%s1657_s27 + $0x90] sm:$0xff] %v224_v18  ;;  %227 = vst [vmem:[%s1657_s27 + $0x98] sm:$0xff] %v226_v19  ;;  %v230_v21 = vld [vmem:[%s1652_s26 + $0x148] sm:$0xff] }
  0x1c   : > { %229 = vst [vmem:[%s1657_s27 + $0xa0] sm:$0xff] %v228_v20  ;;  %v232_v22 = vld [vmem:[%s1652_s26 + $0x160] sm:$0xff]  ;;  %v234_v23 = vld [vmem:[%s1652_s26 + $0x168] sm:$0xff]  ;;  %231 = vst [vmem:[%s1657_s27 + $0xa8] sm:$0xff] %v230_v21 }
  0x1d   : > { %233 = vst [vmem:[%s1657_s27 + $0xb0] sm:$0xff] %v232_v22  ;;  %235 = vst [vmem:[%s1657_s27 + $0xb8] sm:$0xff] %v234_v23  ;;  %v236_v24 = vld [vmem:[%s1652_s26 + $0x180] sm:$0xff]  ;;  %v238_v25 = vld [vmem:[%s1652_s26 + $0x188] sm:$0xff] }
  0x1e   : > { %v240_v26 = vld [vmem:[%s1652_s26 + $0x1a0] sm:$0xff]  ;;  %237 = vst [vmem:[%s1657_s27 + $0xc0] sm:$0xff] %v236_v24  ;;  %239 = vst [vmem:[%s1657_s27 + $0xc8] sm:$0xff] %v238_v25  ;;  %v242_v27 = vld [vmem:[%s1652_s26 + $0x1a8] sm:$0xff] }
  0x1f   : > { %241 = vst [vmem:[%s1657_s27 + $0xd0] sm:$0xff] %v240_v26  ;;  %v244_v28 = vld [vmem:[%s1652_s26 + $0x1c0] sm:$0xff]  ;;  %v246_v29 = vld [vmem:[%s1652_s26 + $0x1c8] sm:$0xff]  ;;  %243 = vst [vmem:[%s1657_s27 + $0xd8] sm:$0xff] %v242_v27 }
  0x20   : > { %245 = vst [vmem:[%s1657_s27 + $0xe0] sm:$0xff] %v244_v28  ;;  %247 = vst [vmem:[%s1657_s27 + $0xe8] sm:$0xff] %v246_v29  ;;  %v248_v30 = vld [vmem:[%s1652_s26 + $0x1e0] sm:$0xff]  ;;  %v250_v31 = vld [vmem:[%s1652_s26 + $0x1e8] sm:$0xff] }
  0x21   : > { %249 = vst [vmem:[%s1657_s27 + $0xf0] sm:$0xff] %v248_v30  ;;  %251 = vst [vmem:[%s1657_s27 + $0xf8] sm:$0xff] %v250_v31 }
  0x22 PF: > { %p1223_p6 = scmp.ge.s32.totalorder %s1586_s16, 1  ;;  %p268_p7 = scmp.lt.s32.totalorder %s1586_s16, 3 }
  0x24   : > { %p269_p8 = pnand %p1223_p6, %p268_p7 }
  0x25   : > { %s275_s28 = sand.u32 (!%p269_p8), 1, %s1570_s12   ;;  %s1225_s29 = sshll.u32 (!%p269_p8), %s1578_s14, 6 }
  0x26   : > { %272 = sbr.rel (%p269_p8) target bundleno = 378 (0x17a), region = 51  ;;  %s1224_s30 = sshll.u32 (!%p269_p8), %s275_s28, 8 }
  0x27   : > { %p315_p9 = scmp.lt.s32.totalorder (!%p269_p8), %s1225_s29, 127  ;;  %s1729_s8 = scalar_lea.vmem (!%p269_p8), [#allocation2], %s1224_s30 }
  0x28   : > { %p1227_p10 = scmp.ne.s32.totalorder (!%p269_p8), %s1578_s14, 0 }
  0x2d   : > { %s2066_s29 = smov (!%p315_p9, %s1225_s29), 127  ;;  %339 = sbr.rel (%p1227_p10) target bundleno = 55 (0x37), region = 59 }
  0x2e   : > { %s1226_s4 = sshll.u32 %s2066_s29, 2  ;;  %v1588_v32 = vmov (!%p1227_p10), 0.0  }
  0x2f   : > { %s1727_s7 = scalar_lea.vmem %s2056_s1, %s1226_s4  ;;  %340 = vst [vmem:[%s2058_s3] sm:$0xff] (!%p1227_p10), %v1588_v32  ;;  %341 = vst [vmem:[%s2058_s3 + $0x8] sm:$0xff] (!%p1227_p10), %v1588_v32 }
  0x30   : > { %342 = vst [vmem:[%s2058_s3 + $0x10] sm:$0xff] (!%p1227_p10), %v1588_v32  ;;  %343 = vst [vmem:[%s2058_s3 + $0x18] sm:$0xff] (!%p1227_p10), %v1588_v32 }
  0x31   : > { %344 = vst [vmem:[%s2058_s3 + $0x20] sm:$0xff] (!%p1227_p10), %v1588_v32  ;;  %345 = vst [vmem:[%s2058_s3 + $0x28] sm:$0xff] (!%p1227_p10), %v1588_v32 }
  0x32   : > { %346 = vst [vmem:[%s2058_s3 + $0x30] sm:$0xff] (!%p1227_p10), %v1588_v32  ;;  %347 = vst [vmem:[%s2058_s3 + $0x38] sm:$0xff] (!%p1227_p10), %v1588_v32 }
  0x33   : > { %348 = vst [vmem:[%s2058_s3 + $0x40] sm:$0xff] (!%p1227_p10), %v1588_v32  ;;  %349 = vst [vmem:[%s2058_s3 + $0x48] sm:$0xff] (!%p1227_p10), %v1588_v32 }
  0x34   : > { %350 = vst [vmem:[%s2058_s3 + $0x50] sm:$0xff] %v1588_v32  ;;  %351 = vst [vmem:[%s2058_s3 + $0x58] sm:$0xff] %v1588_v32 }
  0x35   : > { %352 = vst [vmem:[%s2058_s3 + $0x60] sm:$0xff] %v1588_v32  ;;  %353 = vst [vmem:[%s2058_s3 + $0x68] sm:$0xff] %v1588_v32 }
  0x36   : > { %354 = vst [vmem:[%s2058_s3 + $0x70] sm:$0xff] %v1588_v32  ;;  %355 = vst [vmem:[%s2058_s3 + $0x78] sm:$0xff] %v1588_v32 }
  0x37 PF: > { %v1468_v33 = vld [vmem:[%s1727_s7 + $0x40] sm:$0xff]   ;;  %v1472_v37 = vld [vmem:[%s1727_s7 + $0x48] sm:$0xff]   ;;  %v1476_v41 = vld [vmem:[%s1727_s7 + $0x50] sm:$0xff]   ;;  %p1292_p11 = scmp.ne.s32.totalorder %s1578_s14, 1 }
  0x38   : > { %v1469_v34 = vld [vmem:[%s1727_s7 + $0xc0] sm:$0xff]   ;;  %1299 = vmatprep.subr.bf16.mxu0 %v1468_v33  ;;  %v1473_v38 = vld [vmem:[%s1727_s7 + $0xc8] sm:$0xff]   ;;  %v1477_v42 = vld [vmem:[%s1727_s7 + $0xd0] sm:$0xff]  }
  0x39   : > { %v1470_v35 = vld [vmem:[%s1727_s7] sm:$0xff]   ;;  %1363 = vmatprep.subr.bf16.mxu1 %v1469_v34  ;;  %v1474_v39 = vld [vmem:[%s1727_s7 + $0x8] sm:$0xff]   ;;  %v1478_v43 = vld [vmem:[%s1727_s7 + $0x10] sm:$0xff]  }
  0x3a   : > { %v1471_v36 = vld [vmem:[%s1727_s7 + $0x80] sm:$0xff]   ;;  %1300 = vmatpush3.bf16.msra.mxu0 %v1470_v35  ;;  %v1475_v40 = vld [vmem:[%s1727_s7 + $0x88] sm:$0xff]   ;;  %v1479_v44 = vld [vmem:[%s1727_s7 + $0x90] sm:$0xff]  }
  0x3b   : > { %1364 = vmatpush3.bf16.msra.mxu1 %v1471_v36  ;;  %1301 = vmatprep.subr.bf16.mxu0 %v1472_v37  ;;  %v1480_v45 = vld [vmem:[%s1727_s7 + $0x58] sm:$0xff]   ;;  %v1484_v49 = vld [vmem:[%s1727_s7 + $0x60] sm:$0xff]   ;;  %v1488_v53 = vld [vmem:[%s1727_s7 + $0x68] sm:$0xff]  }
  0x3c   : > { %1365 = vmatprep.subr.bf16.mxu1 %v1473_v38  ;;  %v1481_v46 = vld [vmem:[%s1727_s7 + $0xd8] sm:$0xff]   ;;  %v1485_v50 = vld [vmem:[%s1727_s7 + $0xe0] sm:$0xff]   ;;  %v1489_v54 = vld [vmem:[%s1727_s7 + $0xe8] sm:$0xff]  }
  0x3d   : > { %v1482_v47 = vld [vmem:[%s1727_s7 + $0x18] sm:$0xff]   ;;  %v1486_v51 = vld [vmem:[%s1727_s7 + $0x20] sm:$0xff]   ;;  %v1490_v55 = vld [vmem:[%s1727_s7 + $0x28] sm:$0xff]  }
  0x3e   : > { %1302 = vmatpush3.bf16.msra.mxu0 %v1474_v39  ;;  %v1483_v48 = vld [vmem:[%s1727_s7 + $0x98] sm:$0xff]   ;;  %v1487_v52 = vld [vmem:[%s1727_s7 + $0xa0] sm:$0xff]   ;;  %v1491_v56 = vld [vmem:[%s1727_s7 + $0xa8] sm:$0xff]  }
  0x3f   : > { %1366 = vmatpush3.bf16.msra.mxu1 %v1475_v40  ;;  %1303 = vmatprep.subr.bf16.mxu0 %v1476_v41  ;;  %v1492_v57 = vld [vmem:[%s1727_s7 + $0x70] sm:$0xff]   ;;  %v1496_v61 = vld [vmem:[%s1727_s7 + $0x78] sm:$0xff]  }
  0x40   : > { %1367 = vmatprep.subr.bf16.mxu1 %v1477_v42  ;;  %v1493_v58 = vld [vmem:[%s1727_s7 + $0xf0] sm:$0xff]   ;;  %v1497_v62 = vld [vmem:[%s1727_s7 + $0xf8] sm:$0xff]   ;;  %v356_v42 = vld [vmem:[%s2058_s3] sm:$0xff] }
  0x41   : > { %v1494_v59 = vld [vmem:[%s1727_s7 + $0x30] sm:$0xff]   ;;  %v1498_v63 = vld [vmem:[%s1727_s7 + $0x38] sm:$0xff]  }
  0x42   : > { %1304 = vmatpush3.bf16.msra.mxu0 %v1478_v43  ;;  %v1495_v60 = vld [vmem:[%s1727_s7 + $0xb0] sm:$0xff]   ;;  %v1499_v0 = vld [vmem:[%s1727_s7 + $0xb8] sm:$0xff]  }
  0x43   : > { %1368 = vmatpush3.bf16.msra.mxu1 %v1479_v44  ;;  %1305 = vmatprep.subr.bf16.mxu0 %v1480_v45  ;;  %v1500_v1 = vld [vmem:[%s1729_s8] ss:$16 sps:$4 sm:$0xff]   ;;  %v1502_v2 = vld [vmem:[%s1729_s8 + $0x4] ss:$16 sps:$4 sm:$0xff]   ;;  %v1503_v3 = vld [vmem:[%s1729_s8 + $0x8] ss:$16 sps:$4 sm:$0xff]  }
  0x44   : > { %1369 = vmatprep.subr.bf16.mxu1 %v1481_v46  ;;  %v1505_v4 = vld [vmem:[%s1729_s8 + $0xc] ss:$16 sps:$4 sm:$0xff]   ;;  %852 = vmatprep.mubr.bf16.mxu0 %v1502_v2  ;;  %v1506_v5 = vld [vmem:[%s1729_s8 + $0x24] ss:$16 sps:$4 sm:$0xff]   ;;  %v1510_v7 = vld [vmem:[%s1729_s8 + $0x20] ss:$16 sps:$4 sm:$0xff]  }
  0x45   : > { %949 = vmatprep.mubr.bf16.mxu1 %v1505_v4  ;;  %v1508_v6 = vld [vmem:[%s1729_s8 + $0x2c] ss:$16 sps:$4 sm:$0xff]   ;;  %v1511_v8 = vld [vmem:[%s1729_s8 + $0x28] ss:$16 sps:$4 sm:$0xff]   ;;  %v1512_v9 = vld [vmem:[%s1729_s8 + $0x44] ss:$16 sps:$4 sm:$0xff]  }
  0x46   : > { %1306 = vmatpush3.bf16.msra.mxu0 %v1482_v47  ;;  %v1514_v10 = vld [vmem:[%s1729_s8 + $0x4c] ss:$16 sps:$4 sm:$0xff]   ;;  %v1516_v11 = vld [vmem:[%s1729_s8 + $0x40] ss:$16 sps:$4 sm:$0xff]   ;;  %v1517_v12 = vld [vmem:[%s1729_s8 + $0x48] ss:$16 sps:$4 sm:$0xff]  }
  0x47   : > { %1370 = vmatpush3.bf16.msra.mxu1 %v1483_v48  ;;  %1307 = vmatprep.subr.bf16.mxu0 %v1484_v49  ;;  %v1518_v13 = vld [vmem:[%s1729_s8 + $0x64] ss:$16 sps:$4 sm:$0xff]   ;;  %v1520_v14 = vld [vmem:[%s1729_s8 + $0x6c] ss:$16 sps:$4 sm:$0xff]   ;;  %v1522_v15 = vld [vmem:[%s1729_s8 + $0x60] ss:$16 sps:$4 sm:$0xff]  }
  0x48   : > { %1371 = vmatprep.subr.bf16.mxu1 %v1485_v50  ;;  %v1523_v16 = vld [vmem:[%s1729_s8 + $0x68] ss:$16 sps:$4 sm:$0xff]   ;;  %v1524_v17 = vld [vmem:[%s1729_s8 + $0x84] ss:$16 sps:$4 sm:$0xff]   ;;  %v1526_v18 = vld [vmem:[%s1729_s8 + $0x8c] ss:$16 sps:$4 sm:$0xff]  }
  0x49   : > { %v1528_v19 = vld [vmem:[%s1729_s8 + $0x80] ss:$16 sps:$4 sm:$0xff]   ;;  %v1529_v20 = vld [vmem:[%s1729_s8 + $0x88] ss:$16 sps:$4 sm:$0xff]   ;;  %v1530_v21 = vld [vmem:[%s1729_s8 + $0xa4] ss:$16 sps:$4 sm:$0xff]  }
  0x4a   : > { %1308 = vmatpush3.bf16.msra.mxu0 %v1486_v51  ;;  %v1532_v22 = vld [vmem:[%s1729_s8 + $0xac] ss:$16 sps:$4 sm:$0xff]   ;;  %v1534_v23 = vld [vmem:[%s1729_s8 + $0xa0] ss:$16 sps:$4 sm:$0xff]   ;;  %v1535_v24 = vld [vmem:[%s1729_s8 + $0xa8] ss:$16 sps:$4 sm:$0xff]  }
  0x4b   : > { %1372 = vmatpush3.bf16.msra.mxu1 %v1487_v52  ;;  %1309 = vmatprep.subr.bf16.mxu0 %v1488_v53  ;;  %v1536_v25 = vld [vmem:[%s1729_s8 + $0xc4] ss:$16 sps:$4 sm:$0xff]   ;;  %v1538_v26 = vld [vmem:[%s1729_s8 + $0xcc] ss:$16 sps:$4 sm:$0xff]   ;;  %v1540_v27 = vld [vmem:[%s1729_s8 + $0xc0] ss:$16 sps:$4 sm:$0xff]  }
  0x4c   : > { %1373 = vmatprep.subr.bf16.mxu1 %v1489_v54  ;;  %v1541_v28 = vld [vmem:[%s1729_s8 + $0xc8] ss:$16 sps:$4 sm:$0xff]   ;;  %v1542_v29 = vld [vmem:[%s1729_s8 + $0xe4] ss:$16 sps:$4 sm:$0xff]   ;;  %v1544_v30 = vld [vmem:[%s1729_s8 + $0xec] ss:$16 sps:$4 sm:$0xff]  }
  0x4d   : > { %v1546_v31 = vld [vmem:[%s1729_s8 + $0xe0] ss:$16 sps:$4 sm:$0xff]   ;;  %v1547_v32 = vld [vmem:[%s1729_s8 + $0xe8] ss:$16 sps:$4 sm:$0xff]  }
  0x4e   : > { %1310 = vmatpush3.bf16.msra.mxu0 %v1490_v55  ;;  %v357_v47 = vld [vmem:[%s2058_s3 + $0x8] sm:$0xff] }
  0x4f   : > { %1374 = vmatpush3.bf16.msra.mxu1 %v1491_v56  ;;  %1311 = vmatprep.subr.bf16.mxu0 %v1492_v57 }
  0x50   : > { %1375 = vmatprep.subr.bf16.mxu1 %v1493_v58 }
  0x52   : > { %1312 = vmatpush3.bf16.msra.mxu0 %v1494_v59 }
  0x53   : > { %1376 = vmatpush3.bf16.msra.mxu1 %v1495_v60  ;;  %1313 = vmatprep.subr.bf16.mxu0 %v1496_v61  ;;  %v358_v60 = vld [vmem:[%s2058_s3 + $0x10] sm:$0xff] }
  0x54   : > { %1377 = vmatprep.subr.bf16.mxu1 %v1497_v62 }
  0x56   : > { %1314 = vmatpush3.bf16.msra.mxu0 %v1498_v63 }
  0x57   : > { %1378 = vmatpush3.bf16.msra.mxu1 %v1499_v0 }
  0x59   : > { %853 = vmatmul.mubr.bf16.vlgmr.msra.gmra.mrb[0].mxu0 %v1500_v1  ;;  %v359_v1 = vld [vmem:[%s2058_s3 + $0x18] sm:$0xff] }
  0x5a   : > { %950 = vmatmul.mubr.bf16.vlgmr.msra.gmra.mrb[0].mxu1 %v1503_v3  ;;  %860 = vmatprep.mubr.bf16.mxu0 %v1506_v5 }
  0x5b   : > { %957 = vmatprep.mubr.bf16.mxu1 %v1508_v6 }
  0x61   : > { %861 = vmatmul.mubr.bf16.gmra.mrb[4].mxu0 %v1510_v7 }
  0x62   : > { %958 = vmatmul.mubr.bf16.gmra.mrb[4].mxu1 %v1511_v8  ;;  %868 = vmatprep.mubr.bf16.mxu0 %v1512_v9 }
  0x63   : > { %965 = vmatprep.mubr.bf16.mxu1 %v1514_v10 }
  0x69   : > { %869 = vmatmul.mubr.bf16.gmra.mrb[8].mxu0 %v1516_v11 }
  0x6a   : > { %966 = vmatmul.mubr.bf16.gmra.mrb[8].mxu1 %v1517_v12  ;;  %876 = vmatprep.mubr.bf16.mxu0 %v1518_v13 }
  0x6b   : > { %973 = vmatprep.mubr.bf16.mxu1 %v1520_v14  ;;  %v360_v14 = vld [vmem:[%s2058_s3 + $0x20] sm:$0xff] }
  0x71   : > { %877 = vmatmul.mubr.bf16.gmra.mrb[12].mxu0 %v1522_v15 }
  0x72   : > { %974 = vmatmul.mubr.bf16.gmra.mrb[12].mxu1 %v1523_v16  ;;  %884 = vmatprep.mubr.bf16.mxu0 %v1524_v17 }
  0x73   : > { %981 = vmatprep.mubr.bf16.mxu1 %v1526_v18 }
  0x79   : > { %885 = vmatmul.mubr.bf16.gmra.mrb[16].mxu0 %v1528_v19  ;;  %v361_v19 = vld [vmem:[%s2058_s3 + $0x28] sm:$0xff] }
  0x7a   : > { %982 = vmatmul.mubr.bf16.gmra.mrb[16].mxu1 %v1529_v20  ;;  %892 = vmatprep.mubr.bf16.mxu0 %v1530_v21 }
  0x7b   : > { %989 = vmatprep.mubr.bf16.mxu1 %v1532_v22 }
  0x81   : > { %893 = vmatmul.mubr.bf16.gmra.mrb[20].mxu0 %v1534_v23 }
  0x82   : > { %990 = vmatmul.mubr.bf16.gmra.mrb[20].mxu1 %v1535_v24  ;;  %900 = vmatprep.mubr.bf16.mxu0 %v1536_v25 }
  0x83   : > { %997 = vmatprep.mubr.bf16.mxu1 %v1538_v26 }
  0x89   : > { %901 = vmatmul.mubr.bf16.gmra.mrb[24].mxu0 %v1540_v27 }
  0x8a   : > { %998 = vmatmul.mubr.bf16.gmra.mrb[24].mxu1 %v1541_v28  ;;  %908 = vmatprep.mubr.bf16.mxu0 %v1542_v29 }
  0x8b   : > { %1005 = vmatprep.mubr.bf16.mxu1 %v1544_v30 }
  0x91   : > { %909 = vmatmul.mubr.bf16.gmra.mrb[28].mxu0 %v1546_v31 }
  0x92   : > { %1006 = vmatmul.mubr.bf16.gmra.mrb[28].mxu1 %v1547_v32  ;;  %v362_v32 = vld [vmem:[%s2058_s3 + $0x30] sm:$0xff] }
 0x12c   : > { %v1315_v33 = vpop.f32.mrb[0].mxu0 }
 0x12d   : > { %v1379_v34 = vpop.f32.mrb[0].mxu1  ;;  %v1316_v35 = vpop.f32.mrb[1].mxu0 }
 0x12e   : > { %v1317_v36 = vadd.f32 %v1316_v35, %v1315_v33  ;;  %v1380_v37 = vpop.f32.mrb[1].mxu1  ;;  %v1318_v38 = vpop.f32.mrb[2].mxu0 }
 0x12f   : > { %v1381_v39 = vadd.f32 %v1380_v37, %v1379_v34  ;;  %v1382_v40 = vpop.f32.mrb[2].mxu1  ;;  %v1319_v41 = vpop.f32.mrb[3].mxu0  ;;  %v363_v37 = vld [vmem:[%s2058_s3 + $0x38] sm:$0xff] }
 0x130   : > { %v1320_v43 = vadd.f32 %v1319_v41, %v1318_v38  ;;  %v1383_v44 = vpop.f32.mrb[3].mxu1 }
 0x131   : > { %v952_v45 = vadd.f32 %v1381_v39, %v1317_v36  ;;  %v1384_v46 = vadd.f32 %v1383_v44, %v1382_v40 }
 0x133   : > { %v1014_v48 = vadd.f32 %v952_v45, %v356_v42  ;;  %v955_v49 = vadd.f32 %v1384_v46, %v1320_v43 }
 0x134   : > { %v1321_v50 = vpop.f32.mrb[4].mxu0 }
 0x135   : > { %1030 = vst [vmem:[%s2058_s3] sm:$0xff] %v1014_v48  ;;  %v1015_v51 = vadd.f32 %v955_v49, %v357_v47  ;;  %v1385_v52 = vpop.f32.mrb[4].mxu1  ;;  %v1322_v53 = vpop.f32.mrb[5].mxu0 }
 0x136   : > { %v1323_v54 = vadd.f32 %v1322_v53, %v1321_v50  ;;  %v1386_v55 = vpop.f32.mrb[5].mxu1  ;;  %v1324_v56 = vpop.f32.mrb[6].mxu0  ;;  %v364_v50 = vld [vmem:[%s2058_s3 + $0x40] sm:$0xff] }
 0x137   : > { %1031 = vst [vmem:[%s2058_s3 + $0x8] sm:$0xff] %v1015_v51  ;;  %v1387_v57 = vadd.f32 %v1386_v55, %v1385_v52  ;;  %v1388_v58 = vpop.f32.mrb[6].mxu1  ;;  %v1325_v59 = vpop.f32.mrb[7].mxu0  ;;  %v365_v55 = vld [vmem:[%s2058_s3 + $0x48] sm:$0xff] }
 0x138   : > { %v1326_v61 = vadd.f32 %v1325_v59, %v1324_v56  ;;  %v1389_v62 = vpop.f32.mrb[7].mxu1 }
 0x139   : > { %v960_v63 = vadd.f32 %v1387_v57, %v1323_v54  ;;  %v1390_v0 = vadd.f32 %v1389_v62, %v1388_v58 }
 0x13b   : > { %v1016_v2 = vadd.f32 %v960_v63, %v358_v60  ;;  %v963_v3 = vadd.f32 %v1390_v0, %v1326_v61 }
 0x13c   : > { %v1327_v4 = vpop.f32.mrb[8].mxu0 }
 0x13d   : > { %1032 = vst [vmem:[%s2058_s3 + $0x10] sm:$0xff] %v1016_v2  ;;  %v1017_v5 = vadd.f32 %v963_v3, %v359_v1  ;;  %v1391_v6 = vpop.f32.mrb[8].mxu1  ;;  %v1328_v7 = vpop.f32.mrb[9].mxu0 }
 0x13e   : > { %v1329_v8 = vadd.f32 %v1328_v7, %v1327_v4  ;;  %v1392_v9 = vpop.f32.mrb[9].mxu1  ;;  %v1330_v10 = vpop.f32.mrb[10].mxu0  ;;  %v366_v4 = vld [vmem:[%s2058_s3 + $0x50] sm:$0xff] }
 0x13f   : > { %1033 = vst [vmem:[%s2058_s3 + $0x18] sm:$0xff] %v1017_v5  ;;  %v1393_v11 = vadd.f32 %v1392_v9, %v1391_v6  ;;  %v1394_v12 = vpop.f32.mrb[10].mxu1  ;;  %v1331_v13 = vpop.f32.mrb[11].mxu0  ;;  %v367_v9 = vld [vmem:[%s2058_s3 + $0x58] sm:$0xff] }
 0x140   : > { %v1332_v15 = vadd.f32 %v1331_v13, %v1330_v10  ;;  %v1395_v16 = vpop.f32.mrb[11].mxu1 }
 0x141   : > { %v968_v17 = vadd.f32 %v1393_v11, %v1329_v8  ;;  %v1396_v18 = vadd.f32 %v1395_v16, %v1394_v12 }
 0x143   : > { %v1018_v20 = vadd.f32 %v968_v17, %v360_v14  ;;  %v971_v21 = vadd.f32 %v1396_v18, %v1332_v15 }
 0x144   : > { %v1333_v22 = vpop.f32.mrb[12].mxu0 }
 0x145   : > { %1034 = vst [vmem:[%s2058_s3 + $0x20] sm:$0xff] %v1018_v20  ;;  %v1019_v23 = vadd.f32 %v971_v21, %v361_v19  ;;  %v1397_v24 = vpop.f32.mrb[12].mxu1  ;;  %v1334_v25 = vpop.f32.mrb[13].mxu0 }
 0x146   : > { %v1335_v26 = vadd.f32 %v1334_v25, %v1333_v22  ;;  %v1398_v27 = vpop.f32.mrb[13].mxu1  ;;  %v1336_v28 = vpop.f32.mrb[14].mxu0  ;;  %v368_v22 = vld [vmem:[%s2058_s3 + $0x60] sm:$0xff] }
 0x147   : > { %1035 = vst [vmem:[%s2058_s3 + $0x28] sm:$0xff] %v1019_v23  ;;  %v1399_v29 = vadd.f32 %v1398_v27, %v1397_v24  ;;  %v1400_v30 = vpop.f32.mrb[14].mxu1  ;;  %v1337_v31 = vpop.f32.mrb[15].mxu0  ;;  %v369_v27 = vld [vmem:[%s2058_s3 + $0x68] sm:$0xff] }
 0x148   : > { %v1338_v33 = vadd.f32 %v1337_v31, %v1336_v28  ;;  %v1401_v34 = vpop.f32.mrb[15].mxu1 }
 0x149   : > { %v976_v35 = vadd.f32 %v1399_v29, %v1335_v26  ;;  %v1402_v36 = vadd.f32 %v1401_v34, %v1400_v30 }
 0x14b   : > { %v1020_v38 = vadd.f32 %v976_v35, %v362_v32  ;;  %v979_v39 = vadd.f32 %v1402_v36, %v1338_v33 }
 0x14c   : > { %v1339_v40 = vpop.f32.mrb[16].mxu0 }
 0x14d   : > { %1036 = vst [vmem:[%s2058_s3 + $0x30] sm:$0xff] %v1020_v38  ;;  %v1021_v41 = vadd.f32 %v979_v39, %v363_v37  ;;  %v1403_v42 = vpop.f32.mrb[16].mxu1  ;;  %v1340_v43 = vpop.f32.mrb[17].mxu0 }
 0x14e   : > { %v1341_v44 = vadd.f32 %v1340_v43, %v1339_v40  ;;  %v1404_v45 = vpop.f32.mrb[17].mxu1  ;;  %v1342_v46 = vpop.f32.mrb[18].mxu0  ;;  %v370_v40 = vld [vmem:[%s2058_s3 + $0x70] sm:$0xff] }
 0x14f   : > { %1037 = vst [vmem:[%s2058_s3 + $0x38] sm:$0xff] %v1021_v41  ;;  %v1405_v47 = vadd.f32 %v1404_v45, %v1403_v42  ;;  %v1406_v48 = vpop.f32.mrb[18].mxu1  ;;  %v1343_v49 = vpop.f32.mrb[19].mxu0  ;;  %v371_v45 = vld [vmem:[%s2058_s3 + $0x78] sm:$0xff] }
 0x150   : > { %v1344_v51 = vadd.f32 %v1343_v49, %v1342_v46  ;;  %v1407_v52 = vpop.f32.mrb[19].mxu1  ;;  %v1050_v49 = vld [vmem:[%s2058_s3] sm:$0xff] (!%p1292_p11) }
 0x151   : > { %v984_v53 = vadd.f32 %v1405_v47, %v1341_v44  ;;  %v1408_v54 = vadd.f32 %v1407_v52, %v1406_v48 }
 0x153   : > { %v1022_v56 = vadd.f32 %v984_v53, %v364_v50  ;;  %v987_v57 = vadd.f32 %v1408_v54, %v1344_v51  ;;  %v1293_v50 = vld [vmem:[%s2057_s2] ss:$0 sm:$0xff] (!%p1292_p11)  ;;  %v1051_v51 = vld [vmem:[%s2058_s3 + $0x8] sm:$0xff] (!%p1292_p11)  ;;  %v1052_v54 = vld [vmem:[%s2058_s3 + $0x10] sm:$0xff] (!%p1292_p11) }
 0x154   : > { %v1345_v58 = vpop.f32.mrb[20].mxu0  ;;  %v1073_v52 = vadd.f32 (!%p1292_p11), %v1293_v50, %v1050_v49  ;;  %v1074_v53 = vadd.f32 (!%p1292_p11), %v1293_v50, %v1051_v51 }
 0x155   : > { %1038 = vst [vmem:[%s2058_s3 + $0x40] sm:$0xff] %v1022_v56  ;;  %v1023_v59 = vadd.f32 %v987_v57, %v365_v55  ;;  %v1409_v60 = vpop.f32.mrb[20].mxu1  ;;  %v1346_v61 = vpop.f32.mrb[21].mxu0  ;;  %v1053_v55 = vld [vmem:[%s2058_s3 + $0x18] sm:$0xff] (!%p1292_p11)  ;;  %v1054_v56 = vld [vmem:[%s2058_s3 + $0x20] sm:$0xff] (!%p1292_p11)  ;;  %v1075_v57 = vadd.f32 (!%p1292_p11), %v1293_v50, %v1052_v54 }
 0x156   : > { %v1347_v62 = vadd.f32 %v1346_v61, %v1345_v58  ;;  %v1410_v63 = vpop.f32.mrb[21].mxu1  ;;  %v1348_v0 = vpop.f32.mrb[22].mxu0  ;;  %v1076_v58 = vadd.f32 (!%p1292_p11), %v1293_v50, %v1053_v55  ;;  %v1056_v61 = vld [vmem:[%s2058_s3 + $0x30] sm:$0xff] (!%p1292_p11)  ;;  %1089 = vst [vmem:[%s2058_s3] sm:$0xff] (!%p1292_p11), %v1073_v52  ;;  %1090 = vst [vmem:[%s2058_s3 + $0x8] sm:$0xff] (!%p1292_p11), %v1074_v53 }
 0x157   : > { %1039 = vst [vmem:[%s2058_s3 + $0x48] sm:$0xff] %v1023_v59  ;;  %v1411_v1 = vadd.f32 %v1410_v63, %v1409_v60  ;;  %v1412_v2 = vpop.f32.mrb[22].mxu1  ;;  %v1349_v3 = vpop.f32.mrb[23].mxu0  ;;  %v1077_v59 = vadd.f32 (!%p1292_p11), %v1293_v50, %v1054_v56  ;;  %v1055_v60 = vld [vmem:[%s2058_s3 + $0x28] sm:$0xff] (!%p1292_p11)  ;;  %1091 = vst [vmem:[%s2058_s3 + $0x10] sm:$0xff] (!%p1292_p11), %v1075_v57 }
 0x158   : > { %v1350_v5 = vadd.f32 %v1349_v3, %v1348_v0  ;;  %v1413_v6 = vpop.f32.mrb[23].mxu1  ;;  %v1078_v63 = vadd.f32 (!%p1292_p11), %v1293_v50, %v1055_v60  ;;  %v1079_v0 = vadd.f32 (!%p1292_p11), %v1293_v50, %v1056_v61  ;;  %1092 = vst [vmem:[%s2058_s3 + $0x18] sm:$0xff] (!%p1292_p11), %v1076_v58 }
 0x159   : > { %v992_v7 = vadd.f32 %v1411_v1, %v1347_v62  ;;  %v1414_v8 = vadd.f32 %v1413_v6, %v1412_v2  ;;  %v1057_v62 = vld [vmem:[%s2058_s3 + $0x38] sm:$0xff] (!%p1292_p11)  ;;  %1093 = vst [vmem:[%s2058_s3 + $0x20] sm:$0xff] (!%p1292_p11), %v1077_v59 }
 0x15a   : > { %v1080_v1 = vadd.f32 (!%p1292_p11), %v1293_v50, %v1057_v62  ;;  %1094 = vst [vmem:[%s2058_s3 + $0x28] sm:$0xff] (!%p1292_p11), %v1078_v63  ;;  %1095 = vst [vmem:[%s2058_s3 + $0x30] sm:$0xff] (!%p1292_p11), %v1079_v0 }
 0x15b   : > { %v1024_v10 = vadd.f32 %v992_v7, %v366_v4  ;;  %v995_v11 = vadd.f32 %v1414_v8, %v1350_v5 }
 0x15c   : > { %v1351_v12 = vpop.f32.mrb[24].mxu0  ;;  %v1058_v2 = vld [vmem:[%s2058_s3 + $0x40] sm:$0xff] (!%p1292_p11)  ;;  %1096 = vst [vmem:[%s2058_s3 + $0x38] sm:$0xff] (!%p1292_p11), %v1080_v1 }
 0x15d   : > { %1040 = vst [vmem:[%s2058_s3 + $0x50] sm:$0xff] %v1024_v10  ;;  %v1025_v13 = vadd.f32 %v995_v11, %v367_v9  ;;  %v1415_v14 = vpop.f32.mrb[24].mxu1  ;;  %v1352_v15 = vpop.f32.mrb[25].mxu0  ;;  %v1081_v5 = vadd.f32 (!%p1292_p11), %v1293_v50, %v1058_v2 }
 0x15e   : > { %v1353_v16 = vadd.f32 %v1352_v15, %v1351_v12  ;;  %v1416_v17 = vpop.f32.mrb[25].mxu1  ;;  %v1354_v18 = vpop.f32.mrb[26].mxu0  ;;  %v1059_v3 = vld [vmem:[%s2058_s3 + $0x48] sm:$0xff] (!%p1292_p11) }
 0x15f   : > { %1041 = vst [vmem:[%s2058_s3 + $0x58] sm:$0xff] %v1025_v13  ;;  %v1417_v19 = vadd.f32 %v1416_v17, %v1415_v14  ;;  %v1418_v20 = vpop.f32.mrb[26].mxu1  ;;  %v1355_v21 = vpop.f32.mrb[27].mxu0  ;;  %v1082_v6 = vadd.f32 (!%p1292_p11), %v1293_v50, %v1059_v3  ;;  %1097 = vst [vmem:[%s2058_s3 + $0x40] sm:$0xff] (!%p1292_p11), %v1081_v5 }
 0x160   : > { %v1356_v23 = vadd.f32 %v1355_v21, %v1354_v18  ;;  %v1419_v24 = vpop.f32.mrb[27].mxu1 }
 0x161   : > { %v1000_v25 = vadd.f32 %v1417_v19, %v1353_v16  ;;  %v1420_v26 = vadd.f32 %v1419_v24, %v1418_v20  ;;  %1098 = vst [vmem:[%s2058_s3 + $0x48] sm:$0xff] (!%p1292_p11), %v1082_v6 }
 0x163   : > { %v1026_v28 = vadd.f32 %v1000_v25, %v368_v22  ;;  %v1003_v29 = vadd.f32 %v1420_v26, %v1356_v23 }
 0x164   : > { %v1357_v30 = vpop.f32.mrb[28].mxu0  ;;  %v1060_v4 = vld [vmem:[%s2058_s3 + $0x50] sm:$0xff] (!%p1292_p11) }
 0x165   : > { %1042 = vst [vmem:[%s2058_s3 + $0x60] sm:$0xff] %v1026_v28  ;;  %v1027_v31 = vadd.f32 %v1003_v29, %v369_v27  ;;  %v1421_v32 = vpop.f32.mrb[28].mxu1  ;;  %v1358_v33 = vpop.f32.mrb[29].mxu0  ;;  %v1083_v7 = vadd.f32 (!%p1292_p11), %v1293_v50, %v1060_v4 }
 0x166   : > { %v1359_v34 = vadd.f32 %v1358_v33, %v1357_v30  ;;  %v1422_v35 = vpop.f32.mrb[29].mxu1  ;;  %v1360_v36 = vpop.f32.mrb[30].mxu0  ;;  %v1061_v8 = vld [vmem:[%s2058_s3 + $0x58] sm:$0xff] (!%p1292_p11) }
 0x167   : > { %1043 = vst [vmem:[%s2058_s3 + $0x68] sm:$0xff] %v1027_v31  ;;  %v1423_v37 = vadd.f32 %v1422_v35, %v1421_v32  ;;  %v1424_v38 = vpop.f32.mrb[30].mxu1  ;;  %v1361_v39 = vpop.f32.mrb[31].mxu0  ;;  %v1084_v11 = vadd.f32 (!%p1292_p11), %v1293_v50, %v1061_v8  ;;  %1099 = vst [vmem:[%s2058_s3 + $0x50] sm:$0xff] (!%p1292_p11), %v1083_v7 }
 0x168   : > { %v1362_v41 = vadd.f32 %v1361_v39, %v1360_v36  ;;  %v1425_v42 = vpop.f32.mrb[31].mxu1 }
 0x169   : > { %v1008_v43 = vadd.f32 %v1423_v37, %v1359_v34  ;;  %v1426_v44 = vadd.f32 %v1425_v42, %v1424_v38  ;;  %1049 = sbr.rel (%p1292_p11) target bundleno = 378 (0x17a), region = 63  ;;  %1100 = vst [vmem:[%s2058_s3 + $0x58] sm:$0xff] (!%p1292_p11), %v1084_v11 }
 0x16b   : > { %v1028_v46 = vadd.f32 %v1008_v43, %v370_v40  ;;  %v1011_v47 = vadd.f32 %v1426_v44, %v1362_v41 }
 0x16c   : > { %v1062_v9 = vld [vmem:[%s2058_s3 + $0x60] sm:$0xff] (!%p1292_p11) }
 0x16d   : > { %1044 = vst [vmem:[%s2058_s3 + $0x70] sm:$0xff] %v1028_v46  ;;  %v1029_v48 = vadd.f32 %v1011_v47, %v371_v45  ;;  %v1085_v12 = vadd.f32 (!%p1292_p11), %v1293_v50, %v1062_v9 }
 0x16e   : > { %v1063_v10 = vld [vmem:[%s2058_s3 + $0x68] sm:$0xff] (!%p1292_p11) }
 0x16f   : > { %1045 = vst [vmem:[%s2058_s3 + $0x78] sm:$0xff] %v1029_v48  ;;  %v1086_v13 = vadd.f32 (!%p1292_p11), %v1293_v50, %v1063_v10  ;;  %1101 = vst [vmem:[%s2058_s3 + $0x60] sm:$0xff] (!%p1292_p11), %v1085_v12 }
 0x171   : > { %1102 = vst [vmem:[%s2058_s3 + $0x68] sm:$0xff] %v1086_v13 }
 0x174   : > { %v1064_v14 = vld [vmem:[%s2058_s3 + $0x70] sm:$0xff] }
 0x175   : > { %v1087_v16 = vadd.f32 %v1293_v50, %v1064_v14 }
 0x176   : > { %v1065_v15 = vld [vmem:[%s2058_s3 + $0x78] sm:$0xff] }
 0x177   : > { %v1088_v17 = vadd.f32 %v1293_v50, %v1065_v15  ;;  %1103 = vst [vmem:[%s2058_s3 + $0x70] sm:$0xff] %v1087_v16 }
 0x179   : > { %1104 = vst [vmem:[%s2058_s3 + $0x78] sm:$0xff] %v1088_v17 }
 0x17a PF: > { %s13_s16 = sadd.s32 1, %s1586_s16   ;;  %s2059_s12 = smov %s1574_s13 }
 0x17b   : > { %p10_p12 = scmp.ge.s32.totalorder %s13_s16, 4   ;;  %s2060_s13 = smov %s1644_s20 }
 0x17c   : > { %s2061_s14 = smov %s1582_s15  ;;  %s2062_s15 = smov %s2064_s17 }
 0x17d   :  { %12 = sbr.rel (!%p10_p12) target bundleno = 3 (0x3), region = 104 }

// kernel: generator_forward.50
= control target key start
LH: loop header
LB: loop body
LE: loop exit
PB: predicated region body
PF: predicated region fallthrough
CT: control target
= control target key end

     0   :  { %s383_s6 = smov 0   ;;  %s385_s7 = smov 0   ;;  %s423_s0 = inlined_call_operand.vmem [shape: f32[2,64,128], index: 0, kind: input, shape index: {}]   ;;  %s424_s1 = inlined_call_operand.vmem [shape: f32[2,64,128], index: 1, kind: output, shape index: {}]  }
   0x1   :  { %s387_s8 = smov 0  }
   0x2 LB: > { %s23_s9 = sadd.s32 1, %s367_s7  ;;  %p314_p0 = scmp.ge.s32.totalorder %s371_s8, 1  ;;  %s371_s8 = sphi %s387_s8, %s11_s8   ;;  %s367_s7 = sphi %s385_s7, %s426_s7   ;;  %s363_s6 = sphi %s383_s6, %s425_s6  }
   0x3   : > { %p25_p1 = scmp.ge.s32.totalorder %s23_s9, 2  ;;  %p106_p2 = scmp.lt.s32.totalorder %s371_s8, 3 }
   0x5   : > { %s428_s9 = smov (%p25_p1, %s23_s9), 0  ;;  %p107_p3 = pnand %p314_p0, %p106_p2 }
   0x6   : > { %p132_p4 = scmp.lt.s32.totalorder (!%p107_p3), %s363_s6, 1 }
   0x7   : > { %110 = sbr.rel (%p107_p3) target bundleno = 99 (0x63), region = 24 }
   0xe   : > { %s430_s6 = smov (!%p132_p4, %s363_s6), 1 }
   0xf   : > { %s321_s10 = sshll.u32 %s430_s6, 6 }
  0x10   : > { %s139_s13 = scalar_lea.vmem %s423_s0, %s321_s10  ;;  %s147_s16 = scalar_lea.vmem %s424_s1, %s321_s10 }
  0x11   : > { %v148_v0 = vld [vmem:[%s139_s13] sm:$0xff]  ;;  %v149_v1 = vld [vmem:[%s139_s13 + $0x8] sm:$0xff]  ;;  %v150_v2 = vld [vmem:[%s139_s13 + $0x10] sm:$0xff] }
  0x12   : > { %v156_v3 = vadd.f32 %v149_v1, %v148_v0  ;;  %v151_v4 = vld [vmem:[%s139_s13 + $0x18] sm:$0xff]  ;;  %v152_v6 = vld [vmem:[%s139_s13 + $0x20] sm:$0xff]  ;;  %v153_v8 = vld [vmem:[%s139_s13 + $0x28] sm:$0xff] }
  0x13   : > { %v154_v10 = vld [vmem:[%s139_s13 + $0x30] sm:$0xff]  ;;  %v155_v12 = vld [vmem:[%s139_s13 + $0x38] sm:$0xff] }
  0x14   : > { %v157_v5 = vadd.f32 %v156_v3, %v150_v2 }
  0x16   : > { %v158_v7 = vadd.f32 %v157_v5, %v151_v4 }
  0x18   : > { %v159_v9 = vadd.f32 %v158_v7, %v152_v6 }
  0x1a   : > { %v160_v11 = vadd.f32 %v159_v9, %v153_v8 }
  0x1c   : > { %v161_v13 = vadd.f32 %v160_v11, %v154_v10 }
  0x1e   : > { %v162_v14 = vadd.f32 %v161_v13, %v155_v12 }
  0x20   : > { %v163_v15 = vrot.slane %v162_v14, 4 }
  0x22   : > { %v164_v16 = vadd.f32 %v163_v15, %v162_v14 }
  0x24   : > { %v165_v17 = vrot.slane %v164_v16, 2 }
  0x26   : > { %v166_v18 = vadd.f32 %v165_v17, %v164_v16 }
  0x28   : > { %v167_v19 = vrot.slane %v166_v18, 1 }
  0x2a   : > { %v168_v20 = vadd.f32 %v167_v19, %v166_v18 }
  0x2c   : > { %v170_v21 = vmul.f32 0.015625, %v168_v20 }
  0x2e   : > { %v171_v22 = vsub.f32 %v148_v0, %v170_v21  ;;  %v172_v23 = vsub.f32 %v149_v1, %v170_v21  ;;  %v173_v24 = vsub.f32 %v150_v2, %v170_v21  ;;  %v174_v25 = vsub.f32 %v151_v4, %v170_v21 }
  0x2f   : > { %v175_v26 = vsub.f32 %v152_v6, %v170_v21  ;;  %v176_v30 = vsub.f32 %v153_v8, %v170_v21  ;;  %v177_v33 = vsub.f32 %v154_v10, %v170_v21  ;;  %v178_v36 = vsub.f32 %v155_v12, %v170_v21 }
  0x30   : > { %v179_v27 = vmul.f32 %v171_v22, %v171_v22  ;;  %v180_v28 = vmul.f32 %v172_v23, %v172_v23  ;;  %v181_v29 = vmul.f32 %v173_v24, %v173_v24  ;;  %v182_v31 = vmul.f32 %v174_v25, %v174_v25 }
  0x31   : > { %v183_v34 = vmul.f32 %v175_v26, %v175_v26  ;;  %v184_v37 = vmul.f32 %v176_v30, %v176_v30  ;;  %v185_v39 = vmul.f32 %v177_v33, %v177_v33  ;;  %v186_v41 = vmul.f32 %v178_v36, %v178_v36 }
  0x32   : > { %v187_v32 = vadd.f32 %v180_v28, %v179_v27 }
  0x34   : > { %v188_v35 = vadd.f32 %v187_v32, %v181_v29 }
  0x36   : > { %v189_v38 = vadd.f32 %v188_v35, %v182_v31 }
  0x38   : > { %v190_v40 = vadd.f32 %v189_v38, %v183_v34 }
  0x3a   : > { %v191_v42 = vadd.f32 %v190_v40, %v184_v37 }
  0x3c   : > { %v192_v43 = vadd.f32 %v191_v42, %v185_v39 }
  0x3e   : > { %v193_v44 = vadd.f32 %v192_v43, %v186_v41 }
  0x40   : > { %v194_v45 = vrot.slane %v193_v44, 4 }
  0x42   : > { %v195_v46 = vadd.f32 %v194_v45, %v193_v44 }
  0x44   : > { %v196_v47 = vrot.slane %v195_v46, 2 }
  0x46   : > { %v197_v48 = vadd.f32 %v196_v47, %v195_v46 }
  0x48   : > { %v198_v49 = vrot.slane %v197_v48, 1 }
  0x4a   : > { %v199_v50 = vadd.f32 %v198_v49, %v197_v48 }
  0x4c   : > { %v200_v51 = vmul.f32 0.015625, %v199_v50 }
  0x4e   : > { %v201_v52 = vadd.f32 1e-05, %v200_v51 }
  0x50   : > { %347 = vrsqrt.f32 %v201_v52 }
  0x5a   : > { %v348_v53 = vpop.eup %347 }
  0x5b   : > { %v203_v54 = vmul.f32 %v348_v53, %v171_v22  ;;  %v204_v55 = vmul.f32 %v348_v53, %v172_v23  ;;  %v205_v56 = vmul.f32 %v348_v53, %v173_v24  ;;  %v206_v57 = vmul.f32 %v348_v53, %v174_v25 }
  0x5c   : > { %v207_v58 = vmul.f32 %v348_v53, %v175_v26  ;;  %v208_v59 = vmul.f32 %v348_v53, %v176_v30  ;;  %v209_v60 = vmul.f32 %v348_v53, %v177_v33  ;;  %v210_v61 = vmul.f32 %v348_v53, %v178_v36 }
  0x5d   : > { %v211_v62 = vmax.f32 %v203_v54, 0.0  ;;  %v212_v63 = vmax.f32 %v204_v55, 0.0  ;;  %v213_v0 = vmax.f32 %v205_v56, 0.0  ;;  %v214_v1 = vmax.f32 %v206_v57, 0.0 }
  0x5e   : > { %v215_v2 = vmax.f32 %v207_v58, 0.0  ;;  %v216_v3 = vmax.f32 %v208_v59, 0.0  ;;  %v217_v4 = vmax.f32 %v209_v60, 0.0  ;;  %v218_v5 = vmax.f32 %v210_v61, 0.0 }
  0x5f   : > { %219 = vst [vmem:[%s147_s16] sm:$0xff] %v211_v62  ;;  %220 = vst [vmem:[%s147_s16 + $0x8] sm:$0xff] %v212_v63 }
  0x60   : > { %221 = vst [vmem:[%s147_s16 + $0x10] sm:$0xff] %v213_v0  ;;  %222 = vst [vmem:[%s147_s16 + $0x18] sm:$0xff] %v214_v1 }
  0x61   : > { %223 = vst [vmem:[%s147_s16 + $0x20] sm:$0xff] %v215_v2  ;;  %224 = vst [vmem:[%s147_s16 + $0x28] sm:$0xff] %v216_v3 }
  0x62   : > { %225 = vst [vmem:[%s147_s16 + $0x30] sm:$0xff] %v217_v4  ;;  %226 = vst [vmem:[%s147_s16 + $0x38] sm:$0xff] %v218_v5 }
  0x63 PF: > { %s11_s8 = sadd.s32 1, %s371_s8   ;;  %s425_s6 = smov %s367_s7 }
  0x64   : > { %p8_p5 = scmp.ge.s32.totalorder %s11_s8, 4   ;;  %s426_s7 = smov %s428_s9 }
  0x66   :  { %10 = sbr.rel (!%p8_p5) target bundleno = 2 (0x2), region = 54 }

// kernel: generator_forward.52
= control target key start
LH: loop header
LB: loop body
LE: loop exit
PB: predicated region body
PF: predicated region fallthrough
CT: control target
= control target key end

     0   :  { %s456_s6 = smov 0   ;;  %s458_s7 = smov 0   ;;  %s556_s0 = inlined_call_operand.vmem [shape: f32[2,16,256], index: 0, kind: input, shape index: {}]   ;;  %s557_s1 = inlined_call_operand.vmem [shape: f32[2,16,256], index: 1, kind: output, shape index: {}]  }
   0x1   :  { %s460_s8 = smov 0   ;;  %s462_s9 = smov 0  }
   0x2   :  { %s464_s10 = smov 0   ;;  %s466_s11 = smov 0  }
   0x3   :  { %s468_s12 = smov 0  }
   0x4 LB: > { %s20_s13 = sadd.s32 1, %s436_s10  ;;  %s23_s14 = sadd.s32 1, %s440_s11  ;;  %s444_s12 = sphi %s468_s12, %s11_s12   ;;  %s440_s11 = sphi %s466_s11, %s564_s11   ;;  %s436_s10 = sphi %s464_s10, %s563_s10   ;;  %s432_s9 = sphi %s462_s9, %s562_s9   ;;  %s428_s8 = sphi %s460_s8, %s561_s8   ;;  %s424_s7 = sphi %s458_s7, %s560_s7   ;;  %s420_s6 = sphi %s456_s6, %s559_s6  }
   0x5   : > { %p21_p0 = scmp.ge.s32.totalorder %s20_s13, 2  ;;  %s317_s15 = sadd.s32 4294967295, %s444_s12  }
   0x6   : > { %p39_p1 = scmp.ne.s32.totalorder %s424_s7, %s420_s6  ;;  %p40_p2 = scmp.eq.s32.totalorder %s444_s12, 0 }
   0x7   : > { %s566_s13 = smov (%p21_p0, %s20_s13), 0  ;;  %s568_s14 = smov (!%p21_p0, %s23_s14), %s440_s11 }
   0x8   : > { %p25_p3 = scmp.ge.s32.totalorder %s568_s14, 2  ;;  %p71_p4 = scmp.eq.s32.totalorder %s317_s15, 3 }
   0x9   : > { %s28_s16 = ssub.s32 %s436_s10, %s566_s13  ;;  %p41_p5 = por %p40_p2, %p39_p1 }
   0xa   : > { %s570_s14 = smov (%p25_p3, %s568_s14), 0  ;;  %p504_p6 = por %p71_p4, %p39_p1 }
   0xb   : > { %s27_s18 = ssub.s32 %s440_s11, %s570_s14  ;;  %s32_s20 = sadd.s32 1, %s424_s7 }
   0xc   : > { %s29_s19 = sor.u32 %s28_s16, %s27_s18  ;;  %p320_p8 = scmp.ge.s32.totalorder %s444_s12, 4 }
   0xd   : > { %p30_p7 = scmp.eq.s32.totalorder %s29_s19, 0 }
   0xe   : > { %93 = sbr.rel (%p320_p8) target bundleno = 28 (0x1c), region = 16 }
   0xf   : > { %s512_s21 = scalar_select %p30_p7, %s424_s7, %s32_s20  }
  0x15   : > { %96 = sbr.rel (!%p41_p5) target bundleno = 28 (0x1c), region = 20  ;;  %s98_s22 = sand.u32 (%p41_p5), 1, %s424_s7  }
  0x16   : > { %s322_s23 = sshll.u32 (%p41_p5), %s440_s11, 2  ;;  %s321_s24 = sshll.u32 (%p41_p5), %s98_s22, 4 }
  0x17   : > { %s102_s25 = sadd.s32 (%p41_p5), %s436_s10, %s322_s23  ;;  %s100_s30 = scalar_lea.vmem (%p41_p5), [#allocation2], %s321_s24 }
  0x18   : > { %s323_s26 = sshll.u32 (%p41_p5), %s102_s25, 3 }
  0x19   : > { %s104_s29 = scalar_lea.vmem (%p41_p5), %s556_s0, %s323_s26 }
  0x1a   : > { %v134_v0 = vld [vmem:[%s104_s29] sm:$0xff] (%p41_p5)  ;;  %v136_v1 = vld [vmem:[%s104_s29 + $0x10] sm:$0xff] (%p41_p5) }
  0x1b   : > { %135 = vst [vmem:[%s100_s30] sm:$0xff] (%p41_p5), %v134_v0  ;;  %137 = vst [vmem:[%s100_s30 + $0x8] sm:$0xff] (%p41_p5), %v136_v1 }
  0x1c PF: > { %p324_p9 = scmp.ge.s32.totalorder %s444_s12, 1  ;;  %p142_p10 = scmp.lt.s32.totalorder %s444_s12, 5 }
  0x1e   : > { %p143_p11 = pnand %p324_p9, %p142_p10 }
  0x1f   : > { %s149_s2 = sand.u32 (!%p143_p11), 1, %s420_s6  }
  0x20   : > { %146 = sbr.rel (%p143_p11) target bundleno = 97 (0x61), region = 58  ;;  %s524_s3 = sshll.u32 (!%p143_p11), %s149_s2, 4 }
  0x21   : > { %s151_s4 = scalar_lea.vmem (!%p143_p11), [#allocation2], %s524_s3  ;;  %s166_s5 = scalar_lea.vmem (!%p143_p11), [#allocation3], %s524_s3 }
  0x22   : > { %v167_v2 = vld [vmem:[%s151_s4] sm:$0xff] (!%p143_p11)  ;;  %v168_v3 = vld [vmem:[%s151_s4 + $0x8] sm:$0xff] (!%p143_p11) }
  0x23   : > { %v169_v4 = vadd.f32 (!%p143_p11), %v168_v3, %v167_v2 }
  0x25   : > { %v170_v5 = vrot.slane (!%p143_p11), %v169_v4, 4 }
  0x27   : > { %v171_v6 = vadd.f32 %v170_v5, %v169_v4  ;;  %s328_s6 = sshll.u32 (%p504_p6), %s432_s9, 2 }
  0x28   : > { %s206_s15 = sadd.s32 (%p504_p6), %s428_s8, %s328_s6 }
  0x29   : > { %v172_v7 = vrot.slane %v171_v6, 2  ;;  %s329_s16 = sshll.u32 (%p504_p6), %s206_s15, 3 }
  0x2a   : > { %s208_s20 = scalar_lea.vmem (%p504_p6), %s557_s1, %s329_s16 }
  0x2b   : > { %v173_v8 = vadd.f32 %v172_v7, %v171_v6 }
  0x2d   : > { %v174_v9 = vrot.slane %v173_v8, 1 }
  0x2f   : > { %v175_v10 = vadd.f32 %v174_v9, %v173_v8 }
  0x31   : > { %v177_v11 = vmul.f32 0.0625, %v175_v10 }
  0x33   : > { %v178_v12 = vsub.f32 %v167_v2, %v177_v11  ;;  %v179_v13 = vsub.f32 %v168_v3, %v177_v11 }
  0x35   : > { %v180_v14 = vmul.f32 %v178_v12, %v178_v12  ;;  %v181_v15 = vmul.f32 %v179_v13, %v179_v13 }
  0x37   : > { %v182_v16 = vadd.f32 %v181_v15, %v180_v14 }
  0x39   : > { %v183_v17 = vrot.slane %v182_v16, 4 }
  0x3b   : > { %v184_v18 = vadd.f32 %v183_v17, %v182_v16 }
  0x3d   : > { %v185_v19 = vrot.slane %v184_v18, 2 }
  0x3f   : > { %v186_v20 = vadd.f32 %v185_v19, %v184_v18 }
  0x41   : > { %v187_v21 = vrot.slane %v186_v20, 1 }
  0x43   : > { %v188_v22 = vadd.f32 %v187_v21, %v186_v20 }
  0x45   : > { %v189_v23 = vmul.f32 0.0625, %v188_v22 }
  0x47   : > { %v190_v24 = vadd.f32 1e-05, %v189_v23 }
  0x49   : > { %388 = vrsqrt.f32 %v190_v24 }
  0x52   : > { %204 = sbr.rel (!%p504_p6) target bundleno = 97 (0x61), region = 66 }
  0x53   : > { %v389_v25 = vpop.eup %388 }
  0x54   : > { %v192_v26 = vmul.f32 %v389_v25, %v178_v12  ;;  %v193_v27 = vmul.f32 %v389_v25, %v179_v13 }
  0x56   : > { %v194_v28 = vmax.f32 %v192_v26, 0.0  ;;  %v195_v29 = vmax.f32 %v193_v27, 0.0 }
  0x58   : > { %196 = vst [vmem:[%s166_s5] sm:$0xff] %v194_v28  ;;  %197 = vst [vmem:[%s166_s5 + $0x8] sm:$0xff] %v195_v29 }
  0x5f   : > { %v238_v30 = vld [vmem:[%s166_s5] sm:$0xff]  ;;  %v240_v31 = vld [vmem:[%s166_s5 + $0x8] sm:$0xff] }
  0x60   : > { %239 = vst [vmem:[%s208_s20] sm:$0xff] %v238_v30  ;;  %241 = vst [vmem:[%s208_s20 + $0x10] sm:$0xff] %v240_v31 }
  0x61 PF: > { %s11_s12 = sadd.s32 1, %s444_s12   ;;  %s559_s6 = smov %s424_s7 }
  0x62   : > { %p8_p12 = scmp.ge.s32.totalorder %s11_s12, 6   ;;  %s560_s7 = smov %s512_s21 }
  0x63   : > { %s561_s8 = smov %s436_s10  ;;  %s562_s9 = smov %s440_s11 }
  0x64   : > { %s563_s10 = smov %s566_s13  ;;  %s564_s11 = smov %s570_s14 }
  0x65   :  { %10 = sbr.rel (!%p8_p12) target bundleno = 4 (0x4), region = 135 }

// kernel: generator_forward.51
= control target key start
LH: loop header
LB: loop body
LE: loop exit
PB: predicated region body
PF: predicated region fallthrough
CT: control target
= control target key end

     0   :  { %s1352_s12 = smov 0   ;;  %s1354_s13 = smov 0   ;;  %s1618_s0 = inlined_call_operand.vmem [shape: bf16[32,1536], index: 0, kind: input, shape index: {}]   ;;  %s1619_s1 = inlined_call_operand.vmem [shape: bf16[1536,256], index: 1, kind: input, shape index: {}]   ;;  %s1620_s2 = inlined_call_operand.vmem [shape: f32[1,256], index: 2, kind: input, shape index: {}]   ;;  %s1621_s3 = inlined_call_operand.vmem [shape: f32[32,256], index: 3, kind: output, shape index: {}]  }
   0x1   :  { %s1356_s14 = smov 0   ;;  %s1358_s15 = smov 0  }
   0x2   :  { %s1360_s16 = smov 0  }
   0x3 LB: > { %s25_s17 = sadd.s32 1, %s1325_s15  ;;  %p48_p1 = scmp.ne.s32.totalorder %s1317_s13, %s1313_s12  ;;  %s1329_s16 = sphi %s1360_s16, %s13_s16   ;;  %s1325_s15 = sphi %s1358_s15, %s1625_s15   ;;  %s1321_s14 = sphi %s1356_s14, %s1624_s14   ;;  %s1317_s13 = sphi %s1354_s13, %s1623_s13   ;;  %s1313_s12 = sphi %s1352_s12, %s1622_s12  }
   0x4   : > { %p26_p0 = scmp.ge.s32.totalorder %s25_s17, 3  ;;  %p49_p2 = scmp.eq.s32.totalorder %s1329_s16, 0 }
   0x5   : > { %s41_s19 = sadd.s32 1, %s1317_s13  ;;  %p1045_p5 = scmp.ge.s32.totalorder %s1329_s16, 3 }
   0x6   : > { %s1627_s17 = smov (%p26_p0, %s25_s17), 0  ;;  %p50_p3 = por %p49_p2, %p48_p1 }
   0x7   : > { %s37_s18 = ssub.s32 %s1325_s15, %s1627_s17  ;;  %164 = sbr.rel (%p1045_p5) target bundleno = 22 (0x16), region = 20 }
   0x8   : > { %p39_p4 = scmp.eq.s32.totalorder %s37_s18, 0 }
   0xa   : > { %s1387_s20 = scalar_select %p39_p4, %s1317_s13, %s41_s19  }
   0xe   : > { %167 = sbr.rel (!%p50_p3) target bundleno = 22 (0x16), region = 24  ;;  %s169_s21 = sand.u32 (%p50_p3), 1, %s1317_s13  }
   0xf   : > { %s1132_s22 = sshll.u32 (%p50_p3), %s1325_s15, 4  ;;  %s1046_s23 = sshll.u32 (%p50_p3), %s169_s21, 6 }
  0x10   : > { %s177_s26 = scalar_lea.vmem (%p50_p3), %s1618_s0, %s1132_s22  ;;  %s171_s27 = scalar_lea.vmem (%p50_p3), [#allocation2], %s1046_s23 }
  0x11   : > { %v190_v0 = vld [vmem:[%s177_s26] sm:$0xff] (%p50_p3)  ;;  %v192_v1 = vld [vmem:[%s177_s26 + $0x8] sm:$0xff] (%p50_p3)  ;;  %v194_v2 = vld [vmem:[%s177_s26 + $0x30] sm:$0xff] (%p50_p3) }
  0x12   : > { %191 = vst [vmem:[%s171_s27] sm:$0xff] (%p50_p3), %v190_v0  ;;  %193 = vst [vmem:[%s171_s27 + $0x8] sm:$0xff] (%p50_p3), %v192_v1  ;;  %v196_v3 = vld [vmem:[%s177_s26 + $0x38] sm:$0xff] (%p50_p3)  ;;  %v198_v4 = vld [vmem:[%s177_s26 + $0x60] sm:$0xff] (%p50_p3) }
  0x13   : > { %195 = vst [vmem:[%s171_s27 + $0x10] sm:$0xff] (%p50_p3), %v194_v2  ;;  %v200_v5 = vld [vmem:[%s177_s26 + $0x68] sm:$0xff] (%p50_p3)  ;;  %197 = vst [vmem:[%s171_s27 + $0x18] sm:$0xff] (%p50_p3), %v196_v3  ;;  %v202_v6 = vld [vmem:[%s177_s26 + $0x90] sm:$0xff] (%p50_p3) }
  0x14   : > { %199 = vst [vmem:[%s171_s27 + $0x20] sm:$0xff] (%p50_p3), %v198_v4  ;;  %201 = vst [vmem:[%s171_s27 + $0x28] sm:$0xff] (%p50_p3), %v200_v5  ;;  %v204_v7 = vld [vmem:[%s177_s26 + $0x98] sm:$0xff] (%p50_p3) }
  0x15   : > { %203 = vst [vmem:[%s171_s27 + $0x30] sm:$0xff] %v202_v6  ;;  %205 = vst [vmem:[%s171_s27 + $0x38] sm:$0xff] %v204_v7 }
  0x16 PF: > { %p1049_p6 = scmp.ge.s32.totalorder %s1329_s16, 1  ;;  %p225_p7 = scmp.lt.s32.totalorder %s1329_s16, 4 }
  0x18   : > { %p226_p8 = pnand %p1049_p6, %p225_p7 }
  0x19   : > { %s232_s28 = sand.u32 (!%p226_p8), 1, %s1313_s12   ;;  %s1051_s29 = sshll.u32 (!%p226_p8), %s1321_s14, 6 }
  0x1a   : > { %229 = sbr.rel (%p226_p8) target bundleno = 344 (0x158), region = 51  ;;  %s1050_s30 = sshll.u32 (!%p226_p8), %s232_s28, 6 }
  0x1b   : > { %p278_p9 = scmp.lt.s32.totalorder (!%p226_p8), %s1051_s29, 191  ;;  %s1404_s8 = scalar_lea.vmem (!%p226_p8), [#allocation2], %s1050_s30 }
  0x1c   : > { %p1054_p10 = scmp.ne.s32.totalorder (!%p226_p8), %s1321_s14, 0 }
  0x21   : > { %s1629_s29 = smov (!%p278_p9, %s1051_s29), 191  ;;  %308 = sbr.rel (%p1054_p10) target bundleno = 40 (0x28), region = 59 }
  0x22   : > { %s1133_s4 = sshll.u32 %s1629_s29, 3  ;;  %v1331_v8 = vmov (!%p1054_p10), 0.0  }
  0x23   : > { %s1402_s7 = scalar_lea.vmem %s1619_s1, %s1133_s4  ;;  %309 = vst [vmem:[%s1621_s3] sm:$0xff] (!%p1054_p10), %v1331_v8  ;;  %310 = vst [vmem:[%s1621_s3 + $0x8] sm:$0xff] (!%p1054_p10), %v1331_v8 }
  0x24   : > { %311 = vst [vmem:[%s1621_s3 + $0x10] sm:$0xff] (!%p1054_p10), %v1331_v8  ;;  %312 = vst [vmem:[%s1621_s3 + $0x18] sm:$0xff] (!%p1054_p10), %v1331_v8 }
  0x25   : > { %313 = vst [vmem:[%s1621_s3 + $0x20] sm:$0xff] (!%p1054_p10), %v1331_v8  ;;  %314 = vst [vmem:[%s1621_s3 + $0x28] sm:$0xff] (!%p1054_p10), %v1331_v8 }
  0x26   : > { %315 = vst [vmem:[%s1621_s3 + $0x30] sm:$0xff] (!%p1054_p10), %v1331_v8  ;;  %316 = vst [vmem:[%s1621_s3 + $0x38] sm:$0xff] (!%p1054_p10), %v1331_v8 }
  0x28 PF: > { %v1183_v9 = vld [vmem:[%s1402_s7 + $0x4] ss:$8 sps:$4 sm:$0xff]   ;;  %v1187_v11 = vld [vmem:[%s1402_s7] ss:$8 sps:$4 sm:$0xff]   ;;  %v1189_v13 = vld [vmem:[%s1402_s7 + $0x14] ss:$8 sps:$4 sm:$0xff]  }
  0x29   : > { %v1185_v10 = vld [vmem:[%s1402_s7 + $0x104] ss:$8 sps:$4 sm:$0xff]   ;;  %757 = vmatprep.subr.bf16.mxu1 %v1183_v9  ;;  %v1188_v12 = vld [vmem:[%s1402_s7 + $0x100] ss:$8 sps:$4 sm:$0xff]   ;;  %v1191_v14 = vld [vmem:[%s1402_s7 + $0x114] ss:$8 sps:$4 sm:$0xff]  }
  0x2a   : > { %810 = vmatprep.subr.bf16.mxu0 %v1185_v10  ;;  %758 = vmatpush1.bf16.msra.mxu1 %v1187_v11  ;;  %v1193_v15 = vld [vmem:[%s1402_s7 + $0x10] ss:$8 sps:$4 sm:$0xff]   ;;  %v1195_v17 = vld [vmem:[%s1402_s7 + $0x24] ss:$8 sps:$4 sm:$0xff]   ;;  %v1199_v19 = vld [vmem:[%s1402_s7 + $0x20] ss:$8 sps:$4 sm:$0xff]  }
  0x2b   : > { %811 = vmatpush1.bf16.msra.mxu0 %v1188_v12  ;;  %759 = vmatprep.subr.bf16.mxu1 %v1189_v13  ;;  %v1194_v16 = vld [vmem:[%s1402_s7 + $0x110] ss:$8 sps:$4 sm:$0xff]   ;;  %v1197_v18 = vld [vmem:[%s1402_s7 + $0x124] ss:$8 sps:$4 sm:$0xff]   ;;  %v1200_v20 = vld [vmem:[%s1402_s7 + $0x120] ss:$8 sps:$4 sm:$0xff]  }
  0x2c   : > { %812 = vmatprep.subr.bf16.mxu0 %v1191_v14  ;;  %v1201_v21 = vld [vmem:[%s1402_s7 + $0x34] ss:$8 sps:$4 sm:$0xff]   ;;  %v1205_v23 = vld [vmem:[%s1402_s7 + $0x30] ss:$8 sps:$4 sm:$0xff]   ;;  %v1207_v25 = vld [vmem:[%s1402_s7 + $0x44] ss:$8 sps:$4 sm:$0xff]  }
  0x2d   : > { %v1203_v22 = vld [vmem:[%s1402_s7 + $0x134] ss:$8 sps:$4 sm:$0xff]   ;;  %v1206_v24 = vld [vmem:[%s1402_s7 + $0x130] ss:$8 sps:$4 sm:$0xff]   ;;  %v1209_v26 = vld [vmem:[%s1402_s7 + $0x144] ss:$8 sps:$4 sm:$0xff]  }
  0x2e   : > { %760 = vmatpush1.bf16.msra.mxu1 %v1193_v15  ;;  %v1211_v27 = vld [vmem:[%s1402_s7 + $0x40] ss:$8 sps:$4 sm:$0xff]   ;;  %v1213_v29 = vld [vmem:[%s1402_s7 + $0x54] ss:$8 sps:$4 sm:$0xff]   ;;  %v1217_v31 = vld [vmem:[%s1402_s7 + $0x50] ss:$8 sps:$4 sm:$0xff]  }
  0x2f   : > { %813 = vmatpush1.bf16.msra.mxu0 %v1194_v16  ;;  %761 = vmatprep.subr.bf16.mxu1 %v1195_v17  ;;  %v1212_v28 = vld [vmem:[%s1402_s7 + $0x140] ss:$8 sps:$4 sm:$0xff]   ;;  %v1215_v30 = vld [vmem:[%s1402_s7 + $0x154] ss:$8 sps:$4 sm:$0xff]   ;;  %v1218_v32 = vld [vmem:[%s1402_s7 + $0x150] ss:$8 sps:$4 sm:$0xff]  }
  0x30   : > { %814 = vmatprep.subr.bf16.mxu0 %v1197_v18  ;;  %v1219_v33 = vld [vmem:[%s1402_s7 + $0x64] ss:$8 sps:$4 sm:$0xff]   ;;  %v1223_v35 = vld [vmem:[%s1402_s7 + $0x60] ss:$8 sps:$4 sm:$0xff]   ;;  %v1225_v37 = vld [vmem:[%s1402_s7 + $0x74] ss:$8 sps:$4 sm:$0xff]  }
  0x31   : > { %v1221_v34 = vld [vmem:[%s1402_s7 + $0x164] ss:$8 sps:$4 sm:$0xff]   ;;  %v1224_v36 = vld [vmem:[%s1402_s7 + $0x160] ss:$8 sps:$4 sm:$0xff]   ;;  %v1227_v38 = vld [vmem:[%s1402_s7 + $0x174] ss:$8 sps:$4 sm:$0xff]  }
  0x32   : > { %762 = vmatpush1.bf16.msra.mxu1 %v1199_v19  ;;  %v1229_v39 = vld [vmem:[%s1402_s7 + $0x70] ss:$8 sps:$4 sm:$0xff]   ;;  %v1231_v41 = vld [vmem:[%s1402_s7 + $0x84] ss:$8 sps:$4 sm:$0xff]   ;;  %v1235_v43 = vld [vmem:[%s1402_s7 + $0x80] ss:$8 sps:$4 sm:$0xff]  }
  0x33   : > { %815 = vmatpush1.bf16.msra.mxu0 %v1200_v20  ;;  %763 = vmatprep.subr.bf16.mxu1 %v1201_v21  ;;  %v1230_v40 = vld [vmem:[%s1402_s7 + $0x170] ss:$8 sps:$4 sm:$0xff]   ;;  %v1233_v42 = vld [vmem:[%s1402_s7 + $0x184] ss:$8 sps:$4 sm:$0xff]   ;;  %v1236_v44 = vld [vmem:[%s1402_s7 + $0x180] ss:$8 sps:$4 sm:$0xff]  }
  0x34   : > { %816 = vmatprep.subr.bf16.mxu0 %v1203_v22  ;;  %v1237_v45 = vld [vmem:[%s1402_s7 + $0x94] ss:$8 sps:$4 sm:$0xff]   ;;  %v1241_v47 = vld [vmem:[%s1402_s7 + $0x90] ss:$8 sps:$4 sm:$0xff]   ;;  %v1243_v49 = vld [vmem:[%s1402_s7 + $0xa4] ss:$8 sps:$4 sm:$0xff]  }
  0x35   : > { %v1239_v46 = vld [vmem:[%s1402_s7 + $0x194] ss:$8 sps:$4 sm:$0xff]   ;;  %v1242_v48 = vld [vmem:[%s1402_s7 + $0x190] ss:$8 sps:$4 sm:$0xff]   ;;  %v1245_v50 = vld [vmem:[%s1402_s7 + $0x1a4] ss:$8 sps:$4 sm:$0xff]  }
  0x36   : > { %764 = vmatpush1.bf16.msra.mxu1 %v1205_v23  ;;  %v1247_v51 = vld [vmem:[%s1402_s7 + $0xa0] ss:$8 sps:$4 sm:$0xff]   ;;  %v1249_v53 = vld [vmem:[%s1402_s7 + $0xb4] ss:$8 sps:$4 sm:$0xff]   ;;  %v1253_v55 = vld [vmem:[%s1402_s7 + $0xb0] ss:$8 sps:$4 sm:$0xff]  }
  0x37   : > { %817 = vmatpush1.bf16.msra.mxu0 %v1206_v24  ;;  %765 = vmatprep.subr.bf16.mxu1 %v1207_v25  ;;  %v1248_v52 = vld [vmem:[%s1402_s7 + $0x1a0] ss:$8 sps:$4 sm:$0xff]   ;;  %v1251_v54 = vld [vmem:[%s1402_s7 + $0x1b4] ss:$8 sps:$4 sm:$0xff]   ;;  %v1254_v56 = vld [vmem:[%s1402_s7 + $0x1b0] ss:$8 sps:$4 sm:$0xff]  }
  0x38   : > { %818 = vmatprep.subr.bf16.mxu0 %v1209_v26  ;;  %v1255_v57 = vld [vmem:[%s1402_s7 + $0xc4] ss:$8 sps:$4 sm:$0xff]   ;;  %v1259_v61 = vld [vmem:[%s1402_s7 + $0xc0] ss:$8 sps:$4 sm:$0xff]   ;;  %v1261_v63 = vld [vmem:[%s1402_s7 + $0xd4] ss:$8 sps:$4 sm:$0xff]  }
  0x39   : > { %v1281_v58 = vld [vmem:[%s1404_s8 + $0x4] ss:$16 sps:$4 sm:$0xff]   ;;  %v1284_v60 = vld [vmem:[%s1404_s8 + $0xc] ss:$16 sps:$4 sm:$0xff]   ;;  %v1260_v62 = vld [vmem:[%s1402_s7 + $0x1c0] ss:$8 sps:$4 sm:$0xff]  }
  0x3a   : > { %766 = vmatpush1.bf16.msra.mxu1 %v1211_v27  ;;  %v1257_v59 = vld [vmem:[%s1402_s7 + $0x1c4] ss:$8 sps:$4 sm:$0xff]   ;;  %789 = vmatprep.mubr.bf16.mxu1 %v1281_v58  ;;  %v1263_v0 = vld [vmem:[%s1402_s7 + $0x1d4] ss:$8 sps:$4 sm:$0xff]   ;;  %v1265_v1 = vld [vmem:[%s1402_s7 + $0xd0] ss:$8 sps:$4 sm:$0xff]  }
  0x3b   : > { %819 = vmatpush1.bf16.msra.mxu0 %v1212_v28  ;;  %767 = vmatprep.subr.bf16.mxu1 %v1213_v29  ;;  %v1266_v2 = vld [vmem:[%s1402_s7 + $0x1d0] ss:$8 sps:$4 sm:$0xff]   ;;  %v1267_v3 = vld [vmem:[%s1402_s7 + $0xe4] ss:$8 sps:$4 sm:$0xff]   ;;  %v1271_v5 = vld [vmem:[%s1402_s7 + $0xe0] ss:$8 sps:$4 sm:$0xff]  }
  0x3c   : > { %820 = vmatprep.subr.bf16.mxu0 %v1215_v30  ;;  %842 = vmatprep.mubr.bf16.mxu0 %v1284_v60  ;;  %v1269_v4 = vld [vmem:[%s1402_s7 + $0x1e4] ss:$8 sps:$4 sm:$0xff]   ;;  %v1272_v6 = vld [vmem:[%s1402_s7 + $0x1e0] ss:$8 sps:$4 sm:$0xff]   ;;  %v1273_v7 = vld [vmem:[%s1402_s7 + $0xf4] ss:$8 sps:$4 sm:$0xff]  }
  0x3d   : > { %v1275_v8 = vld [vmem:[%s1402_s7 + $0x1f4] ss:$8 sps:$4 sm:$0xff]   ;;  %v1277_v9 = vld [vmem:[%s1402_s7 + $0xf0] ss:$8 sps:$4 sm:$0xff]   ;;  %v317_v18 = vld [vmem:[%s1621_s3] sm:$0xff]  ;;  %p1127_p11 = scmp.ne.s32.totalorder %s1321_s14, 2 }
  0x3e   : > { %768 = vmatpush1.bf16.msra.mxu1 %v1217_v31  ;;  %v1278_v10 = vld [vmem:[%s1402_s7 + $0x1f0] ss:$8 sps:$4 sm:$0xff]   ;;  %v1285_v13 = vld [vmem:[%s1404_s8 + $0x24] ss:$16 sps:$4 sm:$0xff]   ;;  %v1287_v14 = vld [vmem:[%s1404_s8 + $0x2c] ss:$16 sps:$4 sm:$0xff]  }
  0x3f   : > { %821 = vmatpush1.bf16.msra.mxu0 %v1218_v32  ;;  %769 = vmatprep.subr.bf16.mxu1 %v1219_v33  ;;  %v1279_v11 = vld [vmem:[%s1404_s8] ss:$16 sps:$4 sm:$0xff]   ;;  %v1282_v12 = vld [vmem:[%s1404_s8 + $0x8] ss:$16 sps:$4 sm:$0xff]  }
  0x40   : > { %822 = vmatprep.subr.bf16.mxu0 %v1221_v34  ;;  %v1289_v15 = vld [vmem:[%s1404_s8 + $0x20] ss:$16 sps:$4 sm:$0xff]   ;;  %v1290_v16 = vld [vmem:[%s1404_s8 + $0x28] ss:$16 sps:$4 sm:$0xff]  }
  0x41   : > { %v318_v22 = vld [vmem:[%s1621_s3 + $0x8] sm:$0xff]  ;;  %v319_v26 = vld [vmem:[%s1621_s3 + $0x10] sm:$0xff]  ;;  %v320_v31 = vld [vmem:[%s1621_s3 + $0x18] sm:$0xff] }
  0x42   : > { %770 = vmatpush1.bf16.msra.mxu1 %v1223_v35 }
  0x43   : > { %823 = vmatpush1.bf16.msra.mxu0 %v1224_v36  ;;  %771 = vmatprep.subr.bf16.mxu1 %v1225_v37 }
  0x44   : > { %824 = vmatprep.subr.bf16.mxu0 %v1227_v38  ;;  %v321_v38 = vld [vmem:[%s1621_s3 + $0x20] sm:$0xff] }
  0x46   : > { %772 = vmatpush1.bf16.msra.mxu1 %v1229_v39 }
  0x47   : > { %825 = vmatpush1.bf16.msra.mxu0 %v1230_v40  ;;  %773 = vmatprep.subr.bf16.mxu1 %v1231_v41 }
  0x48   : > { %826 = vmatprep.subr.bf16.mxu0 %v1233_v42  ;;  %v322_v42 = vld [vmem:[%s1621_s3 + $0x28] sm:$0xff] }
  0x4a   : > { %774 = vmatpush1.bf16.msra.mxu1 %v1235_v43 }
  0x4b   : > { %827 = vmatpush1.bf16.msra.mxu0 %v1236_v44  ;;  %775 = vmatprep.subr.bf16.mxu1 %v1237_v45 }
  0x4c   : > { %828 = vmatprep.subr.bf16.mxu0 %v1239_v46  ;;  %v323_v46 = vld [vmem:[%s1621_s3 + $0x30] sm:$0xff] }
  0x4e   : > { %776 = vmatpush1.bf16.msra.mxu1 %v1241_v47 }
  0x4f   : > { %829 = vmatpush1.bf16.msra.mxu0 %v1242_v48  ;;  %777 = vmatprep.subr.bf16.mxu1 %v1243_v49 }
  0x50   : > { %830 = vmatprep.subr.bf16.mxu0 %v1245_v50 }
  0x52   : > { %778 = vmatpush1.bf16.msra.mxu1 %v1247_v51  ;;  %v324_v51 = vld [vmem:[%s1621_s3 + $0x38] sm:$0xff] }
  0x53   : > { %831 = vmatpush1.bf16.msra.mxu0 %v1248_v52  ;;  %779 = vmatprep.subr.bf16.mxu1 %v1249_v53 }
  0x54   : > { %832 = vmatprep.subr.bf16.mxu0 %v1251_v54 }
  0x56   : > { %780 = vmatpush1.bf16.msra.mxu1 %v1253_v55 }
  0x57   : > { %833 = vmatpush1.bf16.msra.mxu0 %v1254_v56  ;;  %781 = vmatprep.subr.bf16.mxu1 %v1255_v57  ;;  %v893_v57 = vlaneseq (!%p1127_p11) }
  0x58   : > { %834 = vmatprep.subr.bf16.mxu0 %v1257_v59  ;;  %v891_v59 = vld [vmem:[%s1620_s2] sm:$0x3] (!%p1127_p11) }
  0x59   : > { %v894_v58 = vshrl.u32 (!%p1127_p11), %v893_v57, 7 }
  0x5a   : > { %782 = vmatpush1.bf16.msra.mxu1 %v1259_v61 }
  0x5b   : > { %835 = vmatpush1.bf16.msra.mxu0 %v1260_v62  ;;  %783 = vmatprep.subr.bf16.mxu1 %v1261_v63  ;;  %v895_v61 = vsub.s32 (!%p1127_p11), 0, %v894_v58  ;;  %v899_v63 = vsub.s32 (!%p1127_p11), 1, %v894_v58 }
  0x5c   : > { %836 = vmatprep.subr.bf16.mxu0 %v1263_v0 }
  0x5e   : > { %784 = vmatpush1.bf16.msra.mxu1 %v1265_v1 }
  0x5f   : > { %837 = vmatpush1.bf16.msra.mxu0 %v1266_v2  ;;  %785 = vmatprep.subr.bf16.mxu1 %v1267_v3  ;;  %v896_v3 = vrot.slane (!%p1127_p11), %v891_v59, %v895_v61 }
  0x60   : > { %838 = vmatprep.subr.bf16.mxu0 %v1269_v4  ;;  %v900_v4 = vrot.slane (!%p1127_p11), %v891_v59, %v899_v63 }
  0x62   : > { %786 = vmatpush1.bf16.msra.mxu1 %v1271_v5 }
  0x63   : > { %839 = vmatpush1.bf16.msra.mxu0 %v1272_v6  ;;  %787 = vmatprep.subr.bf16.mxu1 %v1273_v7 }
  0x64   : > { %840 = vmatprep.subr.bf16.mxu0 %v1275_v8 }
  0x66   : > { %788 = vmatpush1.bf16.msra.mxu1 %v1277_v9 }
  0x67   : > { %841 = vmatpush1.bf16.msra.mxu0 %v1278_v10 }
  0x69   : > { %790 = vmatmul.mubr.bf16.vlgmr.msra.gmra.mrb[0].mxu1 %v1279_v11 }
  0x6a   : > { %843 = vmatmul.mubr.bf16.vlgmr.msra.gmra.mrb[0].mxu0 %v1282_v12  ;;  %799 = vmatprep.mubr.bf16.mxu1 %v1285_v13 }
  0x6b   : > { %852 = vmatprep.mubr.bf16.mxu0 %v1287_v14 }
  0x71   : > { %800 = vmatmul.mubr.bf16.gmra.mrb[4].mxu1 %v1289_v15 }
  0x72   : > { %853 = vmatmul.mubr.bf16.gmra.mrb[4].mxu0 %v1290_v16 }
 0x13c   : > { %v791_v17 = vpop.f32.mrb[0].mxu1 }
 0x13d   : > { %v844_v19 = vpop.f32.mrb[0].mxu0  ;;  %v793_v21 = vpop.f32.mrb[1].mxu1 }
 0x13e   : > { %v845_v20 = vadd.f32 %v844_v19, %v791_v17  ;;  %v846_v23 = vpop.f32.mrb[1].mxu0  ;;  %v795_v25 = vpop.f32.mrb[2].mxu1 }
 0x13f   : > { %v847_v24 = vadd.f32 %v846_v23, %v793_v21  ;;  %v848_v27 = vpop.f32.mrb[2].mxu0  ;;  %v797_v30 = vpop.f32.mrb[3].mxu1 }
 0x140   : > { %v863_v28 = vadd.f32 %v845_v20, %v317_v18  ;;  %v849_v29 = vadd.f32 %v848_v27, %v795_v25  ;;  %v850_v32 = vpop.f32.mrb[3].mxu0 }
 0x141   : > { %v864_v33 = vadd.f32 %v847_v24, %v318_v22  ;;  %v851_v34 = vadd.f32 %v850_v32, %v797_v30 }
 0x142   : > { %871 = vst [vmem:[%s1621_s3] sm:$0xff] %v863_v28  ;;  %v865_v35 = vadd.f32 %v849_v29, %v319_v26 }
 0x143   : > { %872 = vst [vmem:[%s1621_s3 + $0x8] sm:$0xff] %v864_v33  ;;  %v866_v36 = vadd.f32 %v851_v34, %v320_v31 }
 0x144   : > { %873 = vst [vmem:[%s1621_s3 + $0x10] sm:$0xff] %v865_v35  ;;  %v801_v37 = vpop.f32.mrb[4].mxu1 }
 0x145   : > { %874 = vst [vmem:[%s1621_s3 + $0x18] sm:$0xff] %v866_v36  ;;  %v854_v39 = vpop.f32.mrb[4].mxu0  ;;  %v803_v41 = vpop.f32.mrb[5].mxu1 }
 0x146   : > { %v855_v40 = vadd.f32 %v854_v39, %v801_v37  ;;  %v856_v43 = vpop.f32.mrb[5].mxu0  ;;  %v805_v45 = vpop.f32.mrb[6].mxu1 }
 0x147   : > { %v857_v44 = vadd.f32 %v856_v43, %v803_v41  ;;  %v858_v47 = vpop.f32.mrb[6].mxu0  ;;  %v807_v50 = vpop.f32.mrb[7].mxu1  ;;  %882 = sbr.rel (%p1127_p11) target bundleno = 344 (0x158), region = 63 }
 0x148   : > { %v867_v48 = vadd.f32 %v855_v40, %v321_v38  ;;  %v859_v49 = vadd.f32 %v858_v47, %v805_v45  ;;  %v860_v52 = vpop.f32.mrb[7].mxu0 }
 0x149   : > { %v868_v53 = vadd.f32 %v857_v44, %v322_v42  ;;  %v861_v54 = vadd.f32 %v860_v52, %v807_v50  ;;  %v883_v60 = vld [vmem:[%s1621_s3] sm:$0xff] (!%p1127_p11) }
 0x14a   : > { %875 = vst [vmem:[%s1621_s3 + $0x20] sm:$0xff] %v867_v48  ;;  %v869_v55 = vadd.f32 %v859_v49, %v323_v46  ;;  %v884_v62 = vld [vmem:[%s1621_s3 + $0x8] sm:$0xff] (!%p1127_p11)  ;;  %v903_v8 = vadd.f32 (!%p1127_p11), %v896_v3, %v883_v60 }
 0x14b   : > { %876 = vst [vmem:[%s1621_s3 + $0x28] sm:$0xff] %v868_v53  ;;  %v870_v56 = vadd.f32 %v861_v54, %v324_v51  ;;  %v885_v0 = vld [vmem:[%s1621_s3 + $0x10] sm:$0xff] (!%p1127_p11)  ;;  %v904_v9 = vadd.f32 (!%p1127_p11), %v900_v4, %v884_v62 }
 0x14c   : > { %877 = vst [vmem:[%s1621_s3 + $0x30] sm:$0xff] %v869_v55  ;;  %v886_v1 = vld [vmem:[%s1621_s3 + $0x18] sm:$0xff] (!%p1127_p11)  ;;  %v905_v10 = vadd.f32 (!%p1127_p11), %v896_v3, %v885_v0  ;;  %911 = vst [vmem:[%s1621_s3] sm:$0xff] (!%p1127_p11), %v903_v8 }
 0x14d   : > { %878 = vst [vmem:[%s1621_s3 + $0x38] sm:$0xff] %v870_v56  ;;  %v906_v11 = vadd.f32 (!%p1127_p11), %v900_v4, %v886_v1  ;;  %912 = vst [vmem:[%s1621_s3 + $0x8] sm:$0xff] (!%p1127_p11), %v904_v9 }
 0x14e   : > { %913 = vst [vmem:[%s1621_s3 + $0x10] sm:$0xff] %v905_v10 }
 0x14f   : > { %914 = vst [vmem:[%s1621_s3 + $0x18] sm:$0xff] %v906_v11 }
 0x151   : > { %v887_v2 = vld [vmem:[%s1621_s3 + $0x20] sm:$0xff] }
 0x152   : > { %v888_v5 = vld [vmem:[%s1621_s3 + $0x28] sm:$0xff]  ;;  %v907_v12 = vadd.f32 %v896_v3, %v887_v2 }
 0x153   : > { %v889_v6 = vld [vmem:[%s1621_s3 + $0x30] sm:$0xff]  ;;  %v908_v13 = vadd.f32 %v900_v4, %v888_v5 }
 0x154   : > { %v890_v7 = vld [vmem:[%s1621_s3 + $0x38] sm:$0xff]  ;;  %v909_v14 = vadd.f32 %v896_v3, %v889_v6  ;;  %915 = vst [vmem:[%s1621_s3 + $0x20] sm:$0xff] %v907_v12 }
 0x155   : > { %v910_v15 = vadd.f32 %v900_v4, %v890_v7  ;;  %916 = vst [vmem:[%s1621_s3 + $0x28] sm:$0xff] %v908_v13 }
 0x156   : > { %917 = vst [vmem:[%s1621_s3 + $0x30] sm:$0xff] %v909_v14 }
 0x157   : > { %918 = vst [vmem:[%s1621_s3 + $0x38] sm:$0xff] %v910_v15 }
 0x158 PF: > { %s13_s16 = sadd.s32 1, %s1329_s16   ;;  %s1622_s12 = smov %s1317_s13 }
 0x159   : > { %p10_p12 = scmp.ge.s32.totalorder %s13_s16, 5   ;;  %s1623_s13 = smov %s1387_s20 }
 0x15a   : > { %s1624_s14 = smov %s1325_s15  ;;  %s1625_s15 = smov %s1627_s17 }
 0x15b   :  { %12 = sbr.rel (!%p10_p12) target bundleno = 3 (0x3), region = 104 }

// kernel: generator_forward.53
= control target key start
LH: loop header
LB: loop body
LE: loop exit
PB: predicated region body
PF: predicated region fallthrough
CT: control target
= control target key end

     0   :  { %s1352_s12 = smov 0   ;;  %s1354_s13 = smov 0   ;;  %s1618_s0 = inlined_call_operand.vmem [shape: bf16[32,2560], index: 0, kind: input, shape index: {}]   ;;  %s1619_s1 = inlined_call_operand.vmem [shape: bf16[2560,256], index: 1, kind: input, shape index: {}]   ;;  %s1620_s2 = inlined_call_operand.vmem [shape: f32[1,256], index: 2, kind: input, shape index: {}]   ;;  %s1621_s3 = inlined_call_operand.vmem [shape: f32[32,256], index: 3, kind: output, shape index: {}]  }
   0x1   :  { %s1356_s14 = smov 0   ;;  %s1358_s15 = smov 0  }
   0x2   :  { %s1360_s16 = smov 0  }
   0x3 LB: > { %s25_s17 = sadd.s32 1, %s1325_s15  ;;  %p48_p1 = scmp.ne.s32.totalorder %s1317_s13, %s1313_s12  ;;  %s1329_s16 = sphi %s1360_s16, %s13_s16   ;;  %s1325_s15 = sphi %s1358_s15, %s1625_s15   ;;  %s1321_s14 = sphi %s1356_s14, %s1624_s14   ;;  %s1317_s13 = sphi %s1354_s13, %s1623_s13   ;;  %s1313_s12 = sphi %s1352_s12, %s1622_s12  }
   0x4   : > { %p26_p0 = scmp.ge.s32.totalorder %s25_s17, 5  ;;  %p49_p2 = scmp.eq.s32.totalorder %s1329_s16, 0 }
   0x5   : > { %s41_s19 = sadd.s32 1, %s1317_s13  ;;  %p1045_p5 = scmp.ge.s32.totalorder %s1329_s16, 5 }
   0x6   : > { %s1627_s17 = smov (%p26_p0, %s25_s17), 0  ;;  %p50_p3 = por %p49_p2, %p48_p1 }
   0x7   : > { %s37_s18 = ssub.s32 %s1325_s15, %s1627_s17  ;;  %164 = sbr.rel (%p1045_p5) target bundleno = 22 (0x16), region = 20 }
   0x8   : > { %p39_p4 = scmp.eq.s32.totalorder %s37_s18, 0 }
   0xa   : > { %s1387_s20 = scalar_select %p39_p4, %s1317_s13, %s41_s19  }
   0xe   : > { %167 = sbr.rel (!%p50_p3) target bundleno = 22 (0x16), region = 24  ;;  %s169_s21 = sand.u32 (%p50_p3), 1, %s1317_s13  }
   0xf   : > { %s1132_s22 = sshll.u32 (%p50_p3), %s1325_s15, 4  ;;  %s1046_s23 = sshll.u32 (%p50_p3), %s169_s21, 6 }
  0x10   : > { %s177_s26 = scalar_lea.vmem (%p50_p3), %s1618_s0, %s1132_s22  ;;  %s171_s27 = scalar_lea.vmem (%p50_p3), [#allocation2], %s1046_s23 }
  0x11   : > { %v190_v0 = vld [vmem:[%s177_s26] sm:$0xff] (%p50_p3)  ;;  %v192_v1 = vld [vmem:[%s177_s26 + $0x8] sm:$0xff] (%p50_p3)  ;;  %v194_v2 = vld [vmem:[%s177_s26 + $0x50] sm:$0xff] (%p50_p3) }
  0x12   : > { %191 = vst [vmem:[%s171_s27] sm:$0xff] (%p50_p3), %v190_v0  ;;  %193 = vst [vmem:[%s171_s27 + $0x8] sm:$0xff] (%p50_p3), %v192_v1  ;;  %v196_v3 = vld [vmem:[%s177_s26 + $0x58] sm:$0xff] (%p50_p3)  ;;  %v198_v4 = vld [vmem:[%s177_s26 + $0xa0] sm:$0xff] (%p50_p3) }
  0x13   : > { %195 = vst [vmem:[%s171_s27 + $0x10] sm:$0xff] (%p50_p3), %v194_v2  ;;  %v200_v5 = vld [vmem:[%s177_s26 + $0xa8] sm:$0xff] (%p50_p3)  ;;  %197 = vst [vmem:[%s171_s27 + $0x18] sm:$0xff] (%p50_p3), %v196_v3  ;;  %v202_v6 = vld [vmem:[%s177_s26 + $0xf0] sm:$0xff] (%p50_p3) }
  0x14   : > { %199 = vst [vmem:[%s171_s27 + $0x20] sm:$0xff] (%p50_p3), %v198_v4  ;;  %201 = vst [vmem:[%s171_s27 + $0x28] sm:$0xff] (%p50_p3), %v200_v5  ;;  %v204_v7 = vld [vmem:[%s177_s26 + $0xf8] sm:$0xff] (%p50_p3) }
  0x15   : > { %203 = vst [vmem:[%s171_s27 + $0x30] sm:$0xff] %v202_v6  ;;  %205 = vst [vmem:[%s171_s27 + $0x38] sm:$0xff] %v204_v7 }
  0x16 PF: > { %p1049_p6 = scmp.ge.s32.totalorder %s1329_s16, 1  ;;  %p225_p7 = scmp.lt.s32.totalorder %s1329_s16, 6 }
  0x18   : > { %p226_p8 = pnand %p1049_p6, %p225_p7 }
  0x19   : > { %s232_s28 = sand.u32 (!%p226_p8), 1, %s1313_s12   ;;  %s1051_s29 = sshll.u32 (!%p226_p8), %s1321_s14, 6 }
  0x1a   : > { %229 = sbr.rel (%p226_p8) target bundleno = 344 (0x158), region = 51  ;;  %s1050_s30 = sshll.u32 (!%p226_p8), %s232_s28, 6 }
  0x1b   : > { %p278_p9 = scmp.lt.s32.totalorder (!%p226_p8), %s1051_s29, 319  ;;  %s1404_s8 = scalar_lea.vmem (!%p226_p8), [#allocation2], %s1050_s30 }
  0x1c   : > { %p1054_p10 = scmp.ne.s32.totalorder (!%p226_p8), %s1321_s14, 0 }
  0x21   : > { %s1629_s29 = smov (!%p278_p9, %s1051_s29), 319  ;;  %308 = sbr.rel (%p1054_p10) target bundleno = 40 (0x28), region = 59 }
  0x22   : > { %s1133_s4 = sshll.u32 %s1629_s29, 3  ;;  %v1331_v8 = vmov (!%p1054_p10), 0.0  }
  0x23   : > { %s1402_s7 = scalar_lea.vmem %s1619_s1, %s1133_s4  ;;  %309 = vst [vmem:[%s1621_s3] sm:$0xff] (!%p1054_p10), %v1331_v8  ;;  %310 = vst [vmem:[%s1621_s3 + $0x8] sm:$0xff] (!%p1054_p10), %v1331_v8 }
  0x24   : > { %311 = vst [vmem:[%s1621_s3 + $0x10] sm:$0xff] (!%p1054_p10), %v1331_v8  ;;  %312 = vst [vmem:[%s1621_s3 + $0x18] sm:$0xff] (!%p1054_p10), %v1331_v8 }
  0x25   : > { %313 = vst [vmem:[%s1621_s3 + $0x20] sm:$0xff] (!%p1054_p10), %v1331_v8  ;;  %314 = vst [vmem:[%s1621_s3 + $0x28] sm:$0xff] (!%p1054_p10), %v1331_v8 }
  0x26   : > { %315 = vst [vmem:[%s1621_s3 + $0x30] sm:$0xff] (!%p1054_p10), %v1331_v8  ;;  %316 = vst [vmem:[%s1621_s3 + $0x38] sm:$0xff] (!%p1054_p10), %v1331_v8 }
  0x28 PF: > { %v1183_v9 = vld [vmem:[%s1402_s7 + $0x4] ss:$8 sps:$4 sm:$0xff]   ;;  %v1187_v11 = vld [vmem:[%s1402_s7] ss:$8 sps:$4 sm:$0xff]   ;;  %v1189_v13 = vld [vmem:[%s1402_s7 + $0x14] ss:$8 sps:$4 sm:$0xff]  }
  0x29   : > { %v1185_v10 = vld [vmem:[%s1402_s7 + $0x104] ss:$8 sps:$4 sm:$0xff]   ;;  %757 = vmatprep.subr.bf16.mxu1 %v1183_v9  ;;  %v1188_v12 = vld [vmem:[%s1402_s7 + $0x100] ss:$8 sps:$4 sm:$0xff]   ;;  %v1191_v14 = vld [vmem:[%s1402_s7 + $0x114] ss:$8 sps:$4 sm:$0xff]  }
  0x2a   : > { %810 = vmatprep.subr.bf16.mxu0 %v1185_v10  ;;  %758 = vmatpush1.bf16.msra.mxu1 %v1187_v11  ;;  %v1193_v15 = vld [vmem:[%s1402_s7 + $0x10] ss:$8 sps:$4 sm:$0xff]   ;;  %v1195_v17 = vld [vmem:[%s1402_s7 + $0x24] ss:$8 sps:$4 sm:$0xff]   ;;  %v1199_v19 = vld [vmem:[%s1402_s7 + $0x20] ss:$8 sps:$4 sm:$0xff]  }
  0x2b   : > { %811 = vmatpush1.bf16.msra.mxu0 %v1188_v12  ;;  %759 = vmatprep.subr.bf16.mxu1 %v1189_v13  ;;  %v1194_v16 = vld [vmem:[%s1402_s7 + $0x110] ss:$8 sps:$4 sm:$0xff]   ;;  %v1197_v18 = vld [vmem:[%s1402_s7 + $0x124] ss:$8 sps:$4 sm:$0xff]   ;;  %v1200_v20 = vld [vmem:[%s1402_s7 + $0x120] ss:$8 sps:$4 sm:$0xff]  }
  0x2c   : > { %812 = vmatprep.subr.bf16.mxu0 %v1191_v14  ;;  %v1201_v21 = vld [vmem:[%s1402_s7 + $0x34] ss:$8 sps:$4 sm:$0xff]   ;;  %v1205_v23 = vld [vmem:[%s1402_s7 + $0x30] ss:$8 sps:$4 sm:$0xff]   ;;  %v1207_v25 = vld [vmem:[%s1402_s7 + $0x44] ss:$8 sps:$4 sm:$0xff]  }
  0x2d   : > { %v1203_v22 = vld [vmem:[%s1402_s7 + $0x134] ss:$8 sps:$4 sm:$0xff]   ;;  %v1206_v24 = vld [vmem:[%s1402_s7 + $0x130] ss:$8 sps:$4 sm:$0xff]   ;;  %v1209_v26 = vld [vmem:[%s1402_s7 + $0x144] ss:$8 sps:$4 sm:$0xff]  }
  0x2e   : > { %760 = vmatpush1.bf16.msra.mxu1 %v1193_v15  ;;  %v1211_v27 = vld [vmem:[%s1402_s7 + $0x40] ss:$8 sps:$4 sm:$0xff]   ;;  %v1213_v29 = vld [vmem:[%s1402_s7 + $0x54] ss:$8 sps:$4 sm:$0xff]   ;;  %v1217_v31 = vld [vmem:[%s1402_s7 + $0x50] ss:$8 sps:$4 sm:$0xff]  }
  0x2f   : > { %813 = vmatpush1.bf16.msra.mxu0 %v1194_v16  ;;  %761 = vmatprep.subr.bf16.mxu1 %v1195_v17  ;;  %v1212_v28 = vld [vmem:[%s1402_s7 + $0x140] ss:$8 sps:$4 sm:$0xff]   ;;  %v1215_v30 = vld [vmem:[%s1402_s7 + $0x154] ss:$8 sps:$4 sm:$0xff]   ;;  %v1218_v32 = vld [vmem:[%s1402_s7 + $0x150] ss:$8 sps:$4 sm:$0xff]  }
  0x30   : > { %814 = vmatprep.subr.bf16.mxu0 %v1197_v18  ;;  %v1219_v33 = vld [vmem:[%s1402_s7 + $0x64] ss:$8 sps:$4 sm:$0xff]   ;;  %v1223_v35 = vld [vmem:[%s1402_s7 + $0x60] ss:$8 sps:$4 sm:$0xff]   ;;  %v1225_v37 = vld [vmem:[%s1402_s7 + $0x74] ss:$8 sps:$4 sm:$0xff]  }
  0x31   : > { %v1221_v34 = vld [vmem:[%s1402_s7 + $0x164] ss:$8 sps:$4 sm:$0xff]   ;;  %v1224_v36 = vld [vmem:[%s1402_s7 + $0x160] ss:$8 sps:$4 sm:$0xff]   ;;  %v1227_v38 = vld [vmem:[%s1402_s7 + $0x174] ss:$8 sps:$4 sm:$0xff]  }
  0x32   : > { %762 = vmatpush1.bf16.msra.mxu1 %v1199_v19  ;;  %v1229_v39 = vld [vmem:[%s1402_s7 + $0x70] ss:$8 sps:$4 sm:$0xff]   ;;  %v1231_v41 = vld [vmem:[%s1402_s7 + $0x84] ss:$8 sps:$4 sm:$0xff]   ;;  %v1235_v43 = vld [vmem:[%s1402_s7 + $0x80] ss:$8 sps:$4 sm:$0xff]  }
  0x33   : > { %815 = vmatpush1.bf16.msra.mxu0 %v1200_v20  ;;  %763 = vmatprep.subr.bf16.mxu1 %v1201_v21  ;;  %v1230_v40 = vld [vmem:[%s1402_s7 + $0x170] ss:$8 sps:$4 sm:$0xff]   ;;  %v1233_v42 = vld [vmem:[%s1402_s7 + $0x184] ss:$8 sps:$4 sm:$0xff]   ;;  %v1236_v44 = vld [vmem:[%s1402_s7 + $0x180] ss:$8 sps:$4 sm:$0xff]  }
  0x34   : > { %816 = vmatprep.subr.bf16.mxu0 %v1203_v22  ;;  %v1237_v45 = vld [vmem:[%s1402_s7 + $0x94] ss:$8 sps:$4 sm:$0xff]   ;;  %v1241_v47 = vld [vmem:[%s1402_s7 + $0x90] ss:$8 sps:$4 sm:$0xff]   ;;  %v1243_v49 = vld [vmem:[%s1402_s7 + $0xa4] ss:$8 sps:$4 sm:$0xff]  }
  0x35   : > { %v1239_v46 = vld [vmem:[%s1402_s7 + $0x194] ss:$8 sps:$4 sm:$0xff]   ;;  %v1242_v48 = vld [vmem:[%s1402_s7 + $0x190] ss:$8 sps:$4 sm:$0xff]   ;;  %v1245_v50 = vld [vmem:[%s1402_s7 + $0x1a4] ss:$8 sps:$4 sm:$0xff]  }
  0x36   : > { %764 = vmatpush1.bf16.msra.mxu1 %v1205_v23  ;;  %v1247_v51 = vld [vmem:[%s1402_s7 + $0xa0] ss:$8 sps:$4 sm:$0xff]   ;;  %v1249_v53 = vld [vmem:[%s1402_s7 + $0xb4] ss:$8 sps:$4 sm:$0xff]   ;;  %v1253_v55 = vld [vmem:[%s1402_s7 + $0xb0] ss:$8 sps:$4 sm:$0xff]  }
  0x37   : > { %817 = vmatpush1.bf16.msra.mxu0 %v1206_v24  ;;  %765 = vmatprep.subr.bf16.mxu1 %v1207_v25  ;;  %v1248_v52 = vld [vmem:[%s1402_s7 + $0x1a0] ss:$8 sps:$4 sm:$0xff]   ;;  %v1251_v54 = vld [vmem:[%s1402_s7 + $0x1b4] ss:$8 sps:$4 sm:$0xff]   ;;  %v1254_v56 = vld [vmem:[%s1402_s7 + $0x1b0] ss:$8 sps:$4 sm:$0xff]  }
  0x38   : > { %818 = vmatprep.subr.bf16.mxu0 %v1209_v26  ;;  %v1255_v57 = vld [vmem:[%s1402_s7 + $0xc4] ss:$8 sps:$4 sm:$0xff]   ;;  %v1259_v61 = vld [vmem:[%s1402_s7 + $0xc0] ss:$8 sps:$4 sm:$0xff]   ;;  %v1261_v63 = vld [vmem:[%s1402_s7 + $0xd4] ss:$8 sps:$4 sm:$0xff]  }
  0x39   : > { %v1281_v58 = vld [vmem:[%s1404_s8 + $0x4] ss:$16 sps:$4 sm:$0xff]   ;;  %v1284_v60 = vld [vmem:[%s1404_s8 + $0xc] ss:$16 sps:$4 sm:$0xff]   ;;  %v1260_v62 = vld [vmem:[%s1402_s7 + $0x1c0] ss:$8 sps:$4 sm:$0xff]  }
  0x3a   : > { %766 = vmatpush1.bf16.msra.mxu1 %v1211_v27  ;;  %v1257_v59 = vld [vmem:[%s1402_s7 + $0x1c4] ss:$8 sps:$4 sm:$0xff]   ;;  %789 = vmatprep.mubr.bf16.mxu1 %v1281_v58  ;;  %v1263_v0 = vld [vmem:[%s1402_s7 + $0x1d4] ss:$8 sps:$4 sm:$0xff]   ;;  %v1265_v1 = vld [vmem:[%s1402_s7 + $0xd0] ss:$8 sps:$4 sm:$0xff]  }
  0x3b   : > { %819 = vmatpush1.bf16.msra.mxu0 %v1212_v28  ;;  %767 = vmatprep.subr.bf16.mxu1 %v1213_v29  ;;  %v1266_v2 = vld [vmem:[%s1402_s7 + $0x1d0] ss:$8 sps:$4 sm:$0xff]   ;;  %v1267_v3 = vld [vmem:[%s1402_s7 + $0xe4] ss:$8 sps:$4 sm:$0xff]   ;;  %v1271_v5 = vld [vmem:[%s1402_s7 + $0xe0] ss:$8 sps:$4 sm:$0xff]  }
  0x3c   : > { %820 = vmatprep.subr.bf16.mxu0 %v1215_v30  ;;  %842 = vmatprep.mubr.bf16.mxu0 %v1284_v60  ;;  %v1269_v4 = vld [vmem:[%s1402_s7 + $0x1e4] ss:$8 sps:$4 sm:$0xff]   ;;  %v1272_v6 = vld [vmem:[%s1402_s7 + $0x1e0] ss:$8 sps:$4 sm:$0xff]   ;;  %v1273_v7 = vld [vmem:[%s1402_s7 + $0xf4] ss:$8 sps:$4 sm:$0xff]  }
  0x3d   : > { %v1275_v8 = vld [vmem:[%s1402_s7 + $0x1f4] ss:$8 sps:$4 sm:$0xff]   ;;  %v1277_v9 = vld [vmem:[%s1402_s7 + $0xf0] ss:$8 sps:$4 sm:$0xff]   ;;  %v317_v18 = vld [vmem:[%s1621_s3] sm:$0xff]  ;;  %p1127_p11 = scmp.ne.s32.totalorder %s1321_s14, 4 }
  0x3e   : > { %768 = vmatpush1.bf16.msra.mxu1 %v1217_v31  ;;  %v1278_v10 = vld [vmem:[%s1402_s7 + $0x1f0] ss:$8 sps:$4 sm:$0xff]   ;;  %v1285_v13 = vld [vmem:[%s1404_s8 + $0x24] ss:$16 sps:$4 sm:$0xff]   ;;  %v1287_v14 = vld [vmem:[%s1404_s8 + $0x2c] ss:$16 sps:$4 sm:$0xff]  }
  0x3f   : > { %821 = vmatpush1.bf16.msra.mxu0 %v1218_v32  ;;  %769 = vmatprep.subr.bf16.mxu1 %v1219_v33  ;;  %v1279_v11 = vld [vmem:[%s1404_s8] ss:$16 sps:$4 sm:$0xff]   ;;  %v1282_v12 = vld [vmem:[%s1404_s8 + $0x8] ss:$16 sps:$4 sm:$0xff]  }
  0x40   : > { %822 = vmatprep.subr.bf16.mxu0 %v1221_v34  ;;  %v1289_v15 = vld [vmem:[%s1404_s8 + $0x20] ss:$16 sps:$4 sm:$0xff]   ;;  %v1290_v16 = vld [vmem:[%s1404_s8 + $0x28] ss:$16 sps:$4 sm:$0xff]  }
  0x41   : > { %v318_v22 = vld [vmem:[%s1621_s3 + $0x8] sm:$0xff]  ;;  %v319_v26 = vld [vmem:[%s1621_s3 + $0x10] sm:$0xff]  ;;  %v320_v31 = vld [vmem:[%s1621_s3 + $0x18] sm:$0xff] }
  0x42   : > { %770 = vmatpush1.bf16.msra.mxu1 %v1223_v35 }
  0x43   : > { %823 = vmatpush1.bf16.msra.mxu0 %v1224_v36  ;;  %771 = vmatprep.subr.bf16.mxu1 %v1225_v37 }
  0x44   : > { %824 = vmatprep.subr.bf16.mxu0 %v1227_v38  ;;  %v321_v38 = vld [vmem:[%s1621_s3 + $0x20] sm:$0xff] }
  0x46   : > { %772 = vmatpush1.bf16.msra.mxu1 %v1229_v39 }
  0x47   : > { %825 = vmatpush1.bf16.msra.mxu0 %v1230_v40  ;;  %773 = vmatprep.subr.bf16.mxu1 %v1231_v41 }
  0x48   : > { %826 = vmatprep.subr.bf16.mxu0 %v1233_v42  ;;  %v322_v42 = vld [vmem:[%s1621_s3 + $0x28] sm:$0xff] }
  0x4a   : > { %774 = vmatpush1.bf16.msra.mxu1 %v1235_v43 }
  0x4b   : > { %827 = vmatpush1.bf16.msra.mxu0 %v1236_v44  ;;  %775 = vmatprep.subr.bf16.mxu1 %v1237_v45 }
  0x4c   : > { %828 = vmatprep.subr.bf16.mxu0 %v1239_v46  ;;  %v323_v46 = vld [vmem:[%s1621_s3 + $0x30] sm:$0xff] }
  0x4e   : > { %776 = vmatpush1.bf16.msra.mxu1 %v1241_v47 }
  0x4f   : > { %829 = vmatpush1.bf16.msra.mxu0 %v1242_v48  ;;  %777 = vmatprep.subr.bf16.mxu1 %v1243_v49 }
  0x50   : > { %830 = vmatprep.subr.bf16.mxu0 %v1245_v50 }
  0x52   : > { %778 = vmatpush1.bf16.msra.mxu1 %v1247_v51  ;;  %v324_v51 = vld [vmem:[%s1621_s3 + $0x38] sm:$0xff] }
  0x53   : > { %831 = vmatpush1.bf16.msra.mxu0 %v1248_v52  ;;  %779 = vmatprep.subr.bf16.mxu1 %v1249_v53 }
  0x54   : > { %832 = vmatprep.subr.bf16.mxu0 %v1251_v54 }
  0x56   : > { %780 = vmatpush1.bf16.msra.mxu1 %v1253_v55 }
  0x57   : > { %833 = vmatpush1.bf16.msra.mxu0 %v1254_v56  ;;  %781 = vmatprep.subr.bf16.mxu1 %v1255_v57  ;;  %v893_v57 = vlaneseq (!%p1127_p11) }
  0x58   : > { %834 = vmatprep.subr.bf16.mxu0 %v1257_v59  ;;  %v891_v59 = vld [vmem:[%s1620_s2] sm:$0x3] (!%p1127_p11) }
  0x59   : > { %v894_v58 = vshrl.u32 (!%p1127_p11), %v893_v57, 7 }
  0x5a   : > { %782 = vmatpush1.bf16.msra.mxu1 %v1259_v61 }
  0x5b   : > { %835 = vmatpush1.bf16.msra.mxu0 %v1260_v62  ;;  %783 = vmatprep.subr.bf16.mxu1 %v1261_v63  ;;  %v895_v61 = vsub.s32 (!%p1127_p11), 0, %v894_v58  ;;  %v899_v63 = vsub.s32 (!%p1127_p11), 1, %v894_v58 }
  0x5c   : > { %836 = vmatprep.subr.bf16.mxu0 %v1263_v0 }
  0x5e   : > { %784 = vmatpush1.bf16.msra.mxu1 %v1265_v1 }
  0x5f   : > { %837 = vmatpush1.bf16.msra.mxu0 %v1266_v2  ;;  %785 = vmatprep.subr.bf16.mxu1 %v1267_v3  ;;  %v896_v3 = vrot.slane (!%p1127_p11), %v891_v59, %v895_v61 }
  0x60   : > { %838 = vmatprep.subr.bf16.mxu0 %v1269_v4  ;;  %v900_v4 = vrot.slane (!%p1127_p11), %v891_v59, %v899_v63 }
  0x62   : > { %786 = vmatpush1.bf16.msra.mxu1 %v1271_v5 }
  0x63   : > { %839 = vmatpush1.bf16.msra.mxu0 %v1272_v6  ;;  %787 = vmatprep.subr.bf16.mxu1 %v1273_v7 }
  0x64   : > { %840 = vmatprep.subr.bf16.mxu0 %v1275_v8 }
  0x66   : > { %788 = vmatpush1.bf16.msra.mxu1 %v1277_v9 }
  0x67   : > { %841 = vmatpush1.bf16.msra.mxu0 %v1278_v10 }
  0x69   : > { %790 = vmatmul.mubr.bf16.vlgmr.msra.gmra.mrb[0].mxu1 %v1279_v11 }
  0x6a   : > { %843 = vmatmul.mubr.bf16.vlgmr.msra.gmra.mrb[0].mxu0 %v1282_v12  ;;  %799 = vmatprep.mubr.bf16.mxu1 %v1285_v13 }
  0x6b   : > { %852 = vmatprep.mubr.bf16.mxu0 %v1287_v14 }
  0x71   : > { %800 = vmatmul.mubr.bf16.gmra.mrb[4].mxu1 %v1289_v15 }
  0x72   : > { %853 = vmatmul.mubr.bf16.gmra.mrb[4].mxu0 %v1290_v16 }
 0x13c   : > { %v791_v17 = vpop.f32.mrb[0].mxu1 }
 0x13d   : > { %v844_v19 = vpop.f32.mrb[0].mxu0  ;;  %v793_v21 = vpop.f32.mrb[1].mxu1 }
 0x13e   : > { %v845_v20 = vadd.f32 %v844_v19, %v791_v17  ;;  %v846_v23 = vpop.f32.mrb[1].mxu0  ;;  %v795_v25 = vpop.f32.mrb[2].mxu1 }
 0x13f   : > { %v847_v24 = vadd.f32 %v846_v23, %v793_v21  ;;  %v848_v27 = vpop.f32.mrb[2].mxu0  ;;  %v797_v30 = vpop.f32.mrb[3].mxu1 }
 0x140   : > { %v863_v28 = vadd.f32 %v845_v20, %v317_v18  ;;  %v849_v29 = vadd.f32 %v848_v27, %v795_v25  ;;  %v850_v32 = vpop.f32.mrb[3].mxu0 }
 0x141   : > { %v864_v33 = vadd.f32 %v847_v24, %v318_v22  ;;  %v851_v34 = vadd.f32 %v850_v32, %v797_v30 }
 0x142   : > { %871 = vst [vmem:[%s1621_s3] sm:$0xff] %v863_v28  ;;  %v865_v35 = vadd.f32 %v849_v29, %v319_v26 }
 0x143   : > { %872 = vst [vmem:[%s1621_s3 + $0x8] sm:$0xff] %v864_v33  ;;  %v866_v36 = vadd.f32 %v851_v34, %v320_v31 }
 0x144   : > { %873 = vst [vmem:[%s1621_s3 + $0x10] sm:$0xff] %v865_v35  ;;  %v801_v37 = vpop.f32.mrb[4].mxu1 }
 0x145   : > { %874 = vst [vmem:[%s1621_s3 + $0x18] sm:$0xff] %v866_v36  ;;  %v854_v39 = vpop.f32.mrb[4].mxu0  ;;  %v803_v41 = vpop.f32.mrb[5].mxu1 }
 0x146   : > { %v855_v40 = vadd.f32 %v854_v39, %v801_v37  ;;  %v856_v43 = vpop.f32.mrb[5].mxu0  ;;  %v805_v45 = vpop.f32.mrb[6].mxu1 }
 0x147   : > { %v857_v44 = vadd.f32 %v856_v43, %v803_v41  ;;  %v858_v47 = vpop.f32.mrb[6].mxu0  ;;  %v807_v50 = vpop.f32.mrb[7].mxu1  ;;  %882 = sbr.rel (%p1127_p11) target bundleno = 344 (0x158), region = 63 }
 0x148   : > { %v867_v48 = vadd.f32 %v855_v40, %v321_v38  ;;  %v859_v49 = vadd.f32 %v858_v47, %v805_v45  ;;  %v860_v52 = vpop.f32.mrb[7].mxu0 }
 0x149   : > { %v868_v53 = vadd.f32 %v857_v44, %v322_v42  ;;  %v861_v54 = vadd.f32 %v860_v52, %v807_v50  ;;  %v883_v60 = vld [vmem:[%s1621_s3] sm:$0xff] (!%p1127_p11) }
 0x14a   : > { %875 = vst [vmem:[%s1621_s3 + $0x20] sm:$0xff] %v867_v48  ;;  %v869_v55 = vadd.f32 %v859_v49, %v323_v46  ;;  %v884_v62 = vld [vmem:[%s1621_s3 + $0x8] sm:$0xff] (!%p1127_p11)  ;;  %v903_v8 = vadd.f32 (!%p1127_p11), %v896_v3, %v883_v60 }
 0x14b   : > { %876 = vst [vmem:[%s1621_s3 + $0x28] sm:$0xff] %v868_v53  ;;  %v870_v56 = vadd.f32 %v861_v54, %v324_v51  ;;  %v885_v0 = vld [vmem:[%s1621_s3 + $0x10] sm:$0xff] (!%p1127_p11)  ;;  %v904_v9 = vadd.f32 (!%p1127_p11), %v900_v4, %v884_v62 }
 0x14c   : > { %877 = vst [vmem:[%s1621_s3 + $0x30] sm:$0xff] %v869_v55  ;;  %v886_v1 = vld [vmem:[%s1621_s3 + $0x18] sm:$0xff] (!%p1127_p11)  ;;  %v905_v10 = vadd.f32 (!%p1127_p11), %v896_v3, %v885_v0  ;;  %911 = vst [vmem:[%s1621_s3] sm:$0xff] (!%p1127_p11), %v903_v8 }
 0x14d   : > { %878 = vst [vmem:[%s1621_s3 + $0x38] sm:$0xff] %v870_v56  ;;  %v906_v11 = vadd.f32 (!%p1127_p11), %v900_v4, %v886_v1  ;;  %912 = vst [vmem:[%s1621_s3 + $0x8] sm:$0xff] (!%p1127_p11), %v904_v9 }
 0x14e   : > { %913 = vst [vmem:[%s1621_s3 + $0x10] sm:$0xff] %v905_v10 }
 0x14f   : > { %914 = vst [vmem:[%s1621_s3 + $0x18] sm:$0xff] %v906_v11 }
 0x151   : > { %v887_v2 = vld [vmem:[%s1621_s3 + $0x20] sm:$0xff] }
 0x152   : > { %v888_v5 = vld [vmem:[%s1621_s3 + $0x28] sm:$0xff]  ;;  %v907_v12 = vadd.f32 %v896_v3, %v887_v2 }
 0x153   : > { %v889_v6 = vld [vmem:[%s1621_s3 + $0x30] sm:$0xff]  ;;  %v908_v13 = vadd.f32 %v900_v4, %v888_v5 }
 0x154   : > { %v890_v7 = vld [vmem:[%s1621_s3 + $0x38] sm:$0xff]  ;;  %v909_v14 = vadd.f32 %v896_v3, %v889_v6  ;;  %915 = vst [vmem:[%s1621_s3 + $0x20] sm:$0xff] %v907_v12 }
 0x155   : > { %v910_v15 = vadd.f32 %v900_v4, %v890_v7  ;;  %916 = vst [vmem:[%s1621_s3 + $0x28] sm:$0xff] %v908_v13 }
 0x156   : > { %917 = vst [vmem:[%s1621_s3 + $0x30] sm:$0xff] %v909_v14 }
 0x157   : > { %918 = vst [vmem:[%s1621_s3 + $0x38] sm:$0xff] %v910_v15 }
 0x158 PF: > { %s13_s16 = sadd.s32 1, %s1329_s16   ;;  %s1622_s12 = smov %s1317_s13 }
 0x159   : > { %p10_p12 = scmp.ge.s32.totalorder %s13_s16, 7   ;;  %s1623_s13 = smov %s1387_s20 }
 0x15a   : > { %s1624_s14 = smov %s1325_s15  ;;  %s1625_s15 = smov %s1627_s17 }
 0x15b   :  { %12 = sbr.rel (!%p10_p12) target bundleno = 3 (0x3), region = 104 }

// kernel: generator_forward.56
= control target key start
LH: loop header
LB: loop body
LE: loop exit
PB: predicated region body
PF: predicated region fallthrough
CT: control target
= control target key end

     0   :  { %s576_s9 = smov 0   ;;  %s578_s10 = smov 0   ;;  %s691_s0 = inlined_call_operand.vmem [shape: f32[2,16,256], index: 0, kind: input, shape index: {}]   ;;  %s692_s1 = inlined_call_operand.vmem [shape: f32[2,16,256], index: 1, kind: input, shape index: {}]   ;;  %s693_s2 = inlined_call_operand.vmem [shape: f32[2,16,256], index: 2, kind: output, shape index: {}]  }
   0x1   :  { %s580_s11 = smov 0   ;;  %s582_s12 = smov 0  }
   0x2   :  { %s584_s13 = smov 0   ;;  %s586_s14 = smov 0  }
   0x3   :  { %s588_s15 = smov 0  }
   0x4 LB: > { %s21_s16 = sadd.s32 1, %s551_s13  ;;  %s24_s17 = sadd.s32 1, %s555_s14  ;;  %s559_s15 = sphi %s588_s15, %s12_s15   ;;  %s555_s14 = sphi %s586_s14, %s701_s14   ;;  %s551_s13 = sphi %s584_s13, %s700_s13   ;;  %s547_s12 = sphi %s582_s12, %s699_s12   ;;  %s543_s11 = sphi %s580_s11, %s698_s11   ;;  %s539_s10 = sphi %s578_s10, %s697_s10   ;;  %s535_s9 = sphi %s576_s9, %s696_s9  }
   0x5   : > { %p22_p0 = scmp.ge.s32.totalorder %s21_s16, 2  ;;  %s428_s18 = sadd.s32 4294967295, %s559_s15  }
   0x6   : > { %p40_p1 = scmp.ne.s32.totalorder %s539_s10, %s535_s9  ;;  %p41_p2 = scmp.eq.s32.totalorder %s559_s15, 0 }
   0x7   : > { %s703_s16 = smov (%p22_p0, %s21_s16), 0  ;;  %s705_s17 = smov (!%p22_p0, %s24_s17), %s555_s14 }
   0x8   : > { %p26_p3 = scmp.ge.s32.totalorder %s705_s17, 2  ;;  %p100_p4 = scmp.eq.s32.totalorder %s428_s18, 3 }
   0x9   : > { %s29_s19 = ssub.s32 %s551_s13, %s703_s16  ;;  %p622_p5 = por %p41_p2, %p40_p1 }
   0xa   : > { %s707_s17 = smov (%p26_p3, %s705_s17), 0  ;;  %p628_p6 = por %p100_p4, %p40_p1 }
   0xb   : > { %s28_s22 = ssub.s32 %s555_s14, %s707_s17  ;;  %s33_s24 = sadd.s32 1, %s539_s10 }
   0xc   : > { %s30_s23 = sor.u32 %s29_s19, %s28_s22  ;;  %p431_p8 = scmp.ge.s32.totalorder %s559_s15, 4 }
   0xd   : > { %p31_p7 = scmp.eq.s32.totalorder %s30_s23, 0 }
   0xe   : > { %122 = sbr.rel (%p431_p8) target bundleno = 35 (0x23), region = 16 }
   0xf   : > { %s636_s25 = scalar_select %p31_p7, %s539_s10, %s33_s24  }
  0x15   : > { %125 = sbr.rel (!%p622_p5) target bundleno = 28 (0x1c), region = 20  ;;  %s127_s26 = sand.u32 (%p622_p5), 1, %s539_s10  }
  0x16   : > { %s433_s27 = sshll.u32 (%p622_p5), %s555_s14, 2  ;;  %s432_s28 = sshll.u32 (%p622_p5), %s127_s26, 4 }
  0x17   : > { %s131_s29 = sadd.s32 (%p622_p5), %s551_s13, %s433_s27  ;;  %s129_s6 = scalar_lea.vmem (%p622_p5), [#allocation2], %s432_s28 }
  0x18   : > { %s434_s30 = sshll.u32 (%p622_p5), %s131_s29, 3 }
  0x19   : > { %s133_s5 = scalar_lea.vmem (%p622_p5), %s691_s0, %s434_s30 }
  0x1a   : > { %v163_v0 = vld [vmem:[%s133_s5] sm:$0xff] (%p622_p5)  ;;  %v165_v1 = vld [vmem:[%s133_s5 + $0x10] sm:$0xff] (%p622_p5) }
  0x1b   : > { %164 = vst [vmem:[%s129_s6] sm:$0xff] (%p622_p5), %v163_v0  ;;  %166 = vst [vmem:[%s129_s6 + $0x8] sm:$0xff] (%p622_p5), %v165_v1 }
  0x1c PF: > { %172 = sbr.rel (!%p622_p5) target bundleno = 35 (0x23), region = 58  ;;  %s174_s7 = sand.u32 (%p622_p5), 1, %s539_s10  }
  0x1d   : > { %s436_s8 = sshll.u32 (%p622_p5), %s555_s14, 2  ;;  %s435_s18 = sshll.u32 (%p622_p5), %s174_s7, 4 }
  0x1e   : > { %s178_s19 = sadd.s32 (%p622_p5), %s551_s13, %s436_s8  ;;  %s176_s27 = scalar_lea.vmem (%p622_p5), [#allocation3], %s435_s18 }
  0x1f   : > { %s437_s22 = sshll.u32 (%p622_p5), %s178_s19, 3 }
  0x20   : > { %s180_s26 = scalar_lea.vmem (%p622_p5), %s692_s1, %s437_s22 }
  0x21   : > { %v210_v2 = vld [vmem:[%s180_s26] sm:$0xff] (%p622_p5)  ;;  %v212_v3 = vld [vmem:[%s180_s26 + $0x10] sm:$0xff] (%p622_p5) }
  0x22   : > { %211 = vst [vmem:[%s176_s27] sm:$0xff] (%p622_p5), %v210_v2  ;;  %213 = vst [vmem:[%s176_s27 + $0x8] sm:$0xff] (%p622_p5), %v212_v3 }
  0x23 PF: > { %p438_p9 = scmp.ge.s32.totalorder %s559_s15, 1  ;;  %p218_p10 = scmp.lt.s32.totalorder %s559_s15, 5 }
  0x25   : > { %p219_p11 = pnand %p438_p9, %p218_p10 }
  0x26   : > { %s225_s20 = sand.u32 (!%p219_p11), 1, %s535_s9  }
  0x27   : > { %222 = sbr.rel (%p219_p11) target bundleno = 104 (0x68), region = 96  ;;  %s658_s28 = sshll.u32 (!%p219_p11), %s225_s20, 4 }
  0x28   : > { %s227_s29 = scalar_lea.vmem (!%p219_p11), [#allocation2], %s658_s28  ;;  %s234_s9 = scalar_lea.vmem (!%p219_p11), [#allocation3], %s658_s28 }
  0x29   : > { %v256_v4 = vld [vmem:[%s227_s29] sm:$0xff] (!%p219_p11)  ;;  %v257_v5 = vld [vmem:[%s227_s29 + $0x8] sm:$0xff] (!%p219_p11)  ;;  %s255_s30 = scalar_lea.vmem (!%p219_p11), [#allocation4], %s658_s28 }
  0x2a   : > { %v258_v6 = vadd.f32 (!%p219_p11), %v257_v5, %v256_v4  ;;  %v283_v28 = vld [vmem:[%s234_s9] sm:$0xff] (!%p219_p11)  ;;  %v284_v29 = vld [vmem:[%s234_s9 + $0x8] sm:$0xff] (!%p219_p11) }
  0x2c   : > { %v259_v7 = vrot.slane (!%p219_p11), %v258_v6, 4 }
  0x2e   : > { %v260_v8 = vadd.f32 %v259_v7, %v258_v6  ;;  %s443_s3 = sshll.u32 (%p628_p6), %s547_s12, 2 }
  0x2f   : > { %s297_s4 = sadd.s32 (%p628_p6), %s543_s11, %s443_s3 }
  0x30   : > { %v261_v9 = vrot.slane %v260_v8, 2  ;;  %s444_s5 = sshll.u32 (%p628_p6), %s297_s4, 3 }
  0x31   : > { %s299_s8 = scalar_lea.vmem (%p628_p6), %s693_s2, %s444_s5 }
  0x32   : > { %v262_v10 = vadd.f32 %v261_v9, %v260_v8 }
  0x34   : > { %v263_v11 = vrot.slane %v262_v10, 1 }
  0x36   : > { %v264_v12 = vadd.f32 %v263_v11, %v262_v10 }
  0x38   : > { %v266_v13 = vmul.f32 0.0625, %v264_v12 }
  0x3a   : > { %v267_v14 = vsub.f32 %v256_v4, %v266_v13  ;;  %v268_v15 = vsub.f32 %v257_v5, %v266_v13 }
  0x3c   : > { %v269_v16 = vmul.f32 %v267_v14, %v267_v14  ;;  %v270_v17 = vmul.f32 %v268_v15, %v268_v15 }
  0x3e   : > { %v271_v18 = vadd.f32 %v270_v17, %v269_v16 }
  0x40   : > { %v272_v19 = vrot.slane %v271_v18, 4 }
  0x42   : > { %v273_v20 = vadd.f32 %v272_v19, %v271_v18 }
  0x44   : > { %v274_v21 = vrot.slane %v273_v20, 2 }
  0x46   : > { %v275_v22 = vadd.f32 %v274_v21, %v273_v20 }
  0x48   : > { %v276_v23 = vrot.slane %v275_v22, 1 }
  0x4a   : > { %v277_v24 = vadd.f32 %v276_v23, %v275_v22 }
  0x4c   : > { %v278_v25 = vmul.f32 0.0625, %v277_v24 }
  0x4e   : > { %v279_v26 = vadd.f32 1e-05, %v278_v25 }
  0x50   : > { %503 = vrsqrt.f32 %v279_v26 }
  0x59   : > { %295 = sbr.rel (!%p628_p6) target bundleno = 104 (0x68), region = 108 }
  0x5a   : > { %v504_v27 = vpop.eup %503 }
  0x5b   : > { %v281_v30 = vmul.f32 %v504_v27, %v267_v14  ;;  %v282_v31 = vmul.f32 %v504_v27, %v268_v15 }
  0x5d   : > { %v285_v32 = vadd.f32 %v283_v28, %v281_v30  ;;  %v286_v33 = vadd.f32 %v284_v29, %v282_v31 }
  0x5f   : > { %287 = vst [vmem:[%s255_s30] sm:$0xff] %v285_v32  ;;  %288 = vst [vmem:[%s255_s30 + $0x8] sm:$0xff] %v286_v33 }
  0x66   : > { %v329_v34 = vld [vmem:[%s255_s30] sm:$0xff]  ;;  %v331_v35 = vld [vmem:[%s255_s30 + $0x8] sm:$0xff] }
  0x67   : > { %330 = vst [vmem:[%s299_s8] sm:$0xff] %v329_v34  ;;  %332 = vst [vmem:[%s299_s8 + $0x10] sm:$0xff] %v331_v35 }
  0x68 PF: > { %s12_s15 = sadd.s32 1, %s559_s15   ;;  %s696_s9 = smov %s539_s10 }
  0x69   : > { %p9_p12 = scmp.ge.s32.totalorder %s12_s15, 6   ;;  %s697_s10 = smov %s636_s25 }
  0x6a   : > { %s698_s11 = smov %s551_s13  ;;  %s699_s12 = smov %s555_s14 }
  0x6b   : > { %s700_s13 = smov %s703_s16  ;;  %s701_s14 = smov %s707_s17 }
  0x6c   :  { %11 = sbr.rel (!%p9_p12) target bundleno = 4 (0x4), region = 185 }

// kernel: generator_forward.89
= control target key start
LH: loop header
LB: loop body
LE: loop exit
PB: predicated region body
PF: predicated region fallthrough
CT: control target
= control target key end

     0   :  { %s1609_s12 = smov 0   ;;  %s1611_s13 = smov 0   ;;  %s2055_s0 = inlined_call_operand.vmem [shape: bf16[128,2560], index: 0, kind: input, shape index: {}]   ;;  %s2056_s1 = inlined_call_operand.vmem [shape: bf16[2560,128], index: 1, kind: input, shape index: {}]   ;;  %s2057_s2 = inlined_call_operand.vmem [shape: f32[1,128], index: 2, kind: input, shape index: {}]   ;;  %s2058_s3 = inlined_call_operand.vmem [shape: f32[128,128], index: 3, kind: output, shape index: {}]  }
   0x1   :  { %s1613_s14 = smov 0   ;;  %s1615_s15 = smov 0  }
   0x2   :  { %s1617_s16 = smov 0  }
   0x3 LB: > { %s25_s17 = sadd.s32 1, %s1582_s15  ;;  %p48_p1 = scmp.ne.s32.totalorder %s1574_s13, %s1570_s12  ;;  %s1586_s16 = sphi %s1617_s16, %s13_s16   ;;  %s1582_s15 = sphi %s1615_s15, %s2062_s15   ;;  %s1578_s14 = sphi %s1613_s14, %s2061_s14   ;;  %s1574_s13 = sphi %s1611_s13, %s2060_s13   ;;  %s1570_s12 = sphi %s1609_s12, %s2059_s12  }
   0x4   : > { %p26_p0 = scmp.ge.s32.totalorder %s25_s17, 5  ;;  %p49_p2 = scmp.eq.s32.totalorder %s1586_s16, 0 }
   0x5   : > { %s41_s19 = sadd.s32 1, %s1574_s13  ;;  %p1219_p5 = scmp.ge.s32.totalorder %s1586_s16, 5 }
   0x6   : > { %s2064_s17 = smov (%p26_p0, %s25_s17), 0  ;;  %p50_p3 = por %p49_p2, %p48_p1 }
   0x7   : > { %s37_s18 = ssub.s32 %s1582_s15, %s2064_s17  ;;  %162 = sbr.rel (%p1219_p5) target bundleno = 34 (0x22), region = 20 }
   0x8   : > { %p39_p4 = scmp.eq.s32.totalorder %s37_s18, 0 }
   0xa   : > { %s1644_s20 = scalar_select %p39_p4, %s1574_s13, %s41_s19  }
   0xe   : > { %165 = sbr.rel (!%p50_p3) target bundleno = 34 (0x22), region = 24  ;;  %s167_s21 = sand.u32 (%p50_p3), 1, %s1574_s13  }
   0xf   : > { %s1298_s22 = sshll.u32 (%p50_p3), %s1582_s15, 4  ;;  %s1220_s23 = sshll.u32 (%p50_p3), %s167_s21, 8 }
  0x10   : > { %s1652_s26 = scalar_lea.vmem (%p50_p3), %s2055_s0, %s1298_s22  ;;  %s1657_s27 = scalar_lea.vmem (%p50_p3), [#allocation2], %s1220_s23 }
  0x11   : > { %v188_v0 = vld [vmem:[%s1652_s26] sm:$0xff] (%p50_p3)  ;;  %v190_v1 = vld [vmem:[%s1652_s26 + $0x8] sm:$0xff] (%p50_p3)  ;;  %v192_v2 = vld [vmem:[%s1652_s26 + $0x50] sm:$0xff] (%p50_p3) }
  0x12   : > { %189 = vst [vmem:[%s1657_s27] sm:$0xff] (%p50_p3), %v188_v0  ;;  %191 = vst [vmem:[%s1657_s27 + $0x8] sm:$0xff] (%p50_p3), %v190_v1  ;;  %v194_v3 = vld [vmem:[%s1652_s26 + $0x58] sm:$0xff] (%p50_p3)  ;;  %v196_v4 = vld [vmem:[%s1652_s26 + $0xa0] sm:$0xff] (%p50_p3) }
  0x13   : > { %193 = vst [vmem:[%s1657_s27 + $0x10] sm:$0xff] (%p50_p3), %v192_v2  ;;  %v198_v5 = vld [vmem:[%s1652_s26 + $0xa8] sm:$0xff] (%p50_p3)  ;;  %195 = vst [vmem:[%s1657_s27 + $0x18] sm:$0xff] (%p50_p3), %v194_v3  ;;  %v200_v6 = vld [vmem:[%s1652_s26 + $0xf0] sm:$0xff] (%p50_p3) }
  0x14   : > { %197 = vst [vmem:[%s1657_s27 + $0x20] sm:$0xff] (%p50_p3), %v196_v4  ;;  %199 = vst [vmem:[%s1657_s27 + $0x28] sm:$0xff] (%p50_p3), %v198_v5  ;;  %v202_v7 = vld [vmem:[%s1652_s26 + $0xf8] sm:$0xff] (%p50_p3)  ;;  %v204_v8 = vld [vmem:[%s1652_s26 + $0x140] sm:$0xff] (%p50_p3) }
  0x15   : > { %201 = vst [vmem:[%s1657_s27 + $0x30] sm:$0xff] %v200_v6  ;;  %203 = vst [vmem:[%s1657_s27 + $0x38] sm:$0xff] %v202_v7  ;;  %v206_v9 = vld [vmem:[%s1652_s26 + $0x148] sm:$0xff]  ;;  %v208_v10 = vld [vmem:[%s1652_s26 + $0x190] sm:$0xff] }
  0x16   : > { %205 = vst [vmem:[%s1657_s27 + $0x40] sm:$0xff] %v204_v8  ;;  %v210_v11 = vld [vmem:[%s1652_s26 + $0x198] sm:$0xff]  ;;  %207 = vst [vmem:[%s1657_s27 + $0x48] sm:$0xff] %v206_v9  ;;  %v212_v12 = vld [vmem:[%s1652_s26 + $0x1e0] sm:$0xff] }
  0x17   : > { %209 = vst [vmem:[%s1657_s27 + $0x50] sm:$0xff] %v208_v10  ;;  %211 = vst [vmem:[%s1657_s27 + $0x58] sm:$0xff] %v210_v11  ;;  %v214_v13 = vld [vmem:[%s1652_s26 + $0x1e8] sm:$0xff]  ;;  %v216_v14 = vld [vmem:[%s1652_s26 + $0x230] sm:$0xff] }
  0x18   : > { %213 = vst [vmem:[%s1657_s27 + $0x60] sm:$0xff] %v212_v12  ;;  %215 = vst [vmem:[%s1657_s27 + $0x68] sm:$0xff] %v214_v13  ;;  %v218_v15 = vld [vmem:[%s1652_s26 + $0x238] sm:$0xff]  ;;  %v220_v16 = vld [vmem:[%s1652_s26 + $0x280] sm:$0xff] }
  0x19   : > { %217 = vst [vmem:[%s1657_s27 + $0x70] sm:$0xff] %v216_v14  ;;  %v222_v17 = vld [vmem:[%s1652_s26 + $0x288] sm:$0xff]  ;;  %219 = vst [vmem:[%s1657_s27 + $0x78] sm:$0xff] %v218_v15  ;;  %v224_v18 = vld [vmem:[%s1652_s26 + $0x2d0] sm:$0xff] }
  0x1a   : > { %221 = vst [vmem:[%s1657_s27 + $0x80] sm:$0xff] %v220_v16  ;;  %223 = vst [vmem:[%s1657_s27 + $0x88] sm:$0xff] %v222_v17  ;;  %v226_v19 = vld [vmem:[%s1652_s26 + $0x2d8] sm:$0xff]  ;;  %v228_v20 = vld [vmem:[%s1652_s26 + $0x320] sm:$0xff] }
  0x1b   : > { %225 = vst [vmem:[%s1657_s27 + $0x90] sm:$0xff] %v224_v18  ;;  %227 = vst [vmem:[%s1657_s27 + $0x98] sm:$0xff] %v226_v19  ;;  %v230_v21 = vld [vmem:[%s1652_s26 + $0x328] sm:$0xff]  ;;  %v232_v22 = vld [vmem:[%s1652_s26 + $0x370] sm:$0xff] }
  0x1c   : > { %229 = vst [vmem:[%s1657_s27 + $0xa0] sm:$0xff] %v228_v20  ;;  %v234_v23 = vld [vmem:[%s1652_s26 + $0x378] sm:$0xff]  ;;  %231 = vst [vmem:[%s1657_s27 + $0xa8] sm:$0xff] %v230_v21  ;;  %v236_v24 = vld [vmem:[%s1652_s26 + $0x3c0] sm:$0xff] }
  0x1d   : > { %233 = vst [vmem:[%s1657_s27 + $0xb0] sm:$0xff] %v232_v22  ;;  %235 = vst [vmem:[%s1657_s27 + $0xb8] sm:$0xff] %v234_v23  ;;  %v238_v25 = vld [vmem:[%s1652_s26 + $0x3c8] sm:$0xff]  ;;  %v240_v26 = vld [vmem:[%s1652_s26 + $0x410] sm:$0xff] }
  0x1e   : > { %237 = vst [vmem:[%s1657_s27 + $0xc0] sm:$0xff] %v236_v24  ;;  %239 = vst [vmem:[%s1657_s27 + $0xc8] sm:$0xff] %v238_v25  ;;  %v242_v27 = vld [vmem:[%s1652_s26 + $0x418] sm:$0xff]  ;;  %v244_v28 = vld [vmem:[%s1652_s26 + $0x460] sm:$0xff] }
  0x1f   : > { %241 = vst [vmem:[%s1657_s27 + $0xd0] sm:$0xff] %v240_v26  ;;  %v246_v29 = vld [vmem:[%s1652_s26 + $0x468] sm:$0xff]  ;;  %243 = vst [vmem:[%s1657_s27 + $0xd8] sm:$0xff] %v242_v27  ;;  %v248_v30 = vld [vmem:[%s1652_s26 + $0x4b0] sm:$0xff] }
  0x20   : > { %245 = vst [vmem:[%s1657_s27 + $0xe0] sm:$0xff] %v244_v28  ;;  %247 = vst [vmem:[%s1657_s27 + $0xe8] sm:$0xff] %v246_v29  ;;  %v250_v31 = vld [vmem:[%s1652_s26 + $0x4b8] sm:$0xff] }
  0x21   : > { %249 = vst [vmem:[%s1657_s27 + $0xf0] sm:$0xff] %v248_v30  ;;  %251 = vst [vmem:[%s1657_s27 + $0xf8] sm:$0xff] %v250_v31 }
  0x22 PF: > { %p1223_p6 = scmp.ge.s32.totalorder %s1586_s16, 1  ;;  %p268_p7 = scmp.lt.s32.totalorder %s1586_s16, 6 }
  0x24   : > { %p269_p8 = pnand %p1223_p6, %p268_p7 }
  0x25   : > { %s275_s28 = sand.u32 (!%p269_p8), 1, %s1570_s12   ;;  %s1225_s29 = sshll.u32 (!%p269_p8), %s1578_s14, 6 }
  0x26   : > { %272 = sbr.rel (%p269_p8) target bundleno = 378 (0x17a), region = 51  ;;  %s1224_s30 = sshll.u32 (!%p269_p8), %s275_s28, 8 }
  0x27   : > { %p315_p9 = scmp.lt.s32.totalorder (!%p269_p8), %s1225_s29, 319  ;;  %s1729_s8 = scalar_lea.vmem (!%p269_p8), [#allocation2], %s1224_s30 }
  0x28   : > { %p1227_p10 = scmp.ne.s32.totalorder (!%p269_p8), %s1578_s14, 0 }
  0x2d   : > { %s2066_s29 = smov (!%p315_p9, %s1225_s29), 319  ;;  %339 = sbr.rel (%p1227_p10) target bundleno = 55 (0x37), region = 59 }
  0x2e   : > { %s1226_s4 = sshll.u32 %s2066_s29, 2  ;;  %v1588_v32 = vmov (!%p1227_p10), 0.0  }
  0x2f   : > { %s1727_s7 = scalar_lea.vmem %s2056_s1, %s1226_s4  ;;  %340 = vst [vmem:[%s2058_s3] sm:$0xff] (!%p1227_p10), %v1588_v32  ;;  %341 = vst [vmem:[%s2058_s3 + $0x8] sm:$0xff] (!%p1227_p10), %v1588_v32 }
  0x30   : > { %342 = vst [vmem:[%s2058_s3 + $0x10] sm:$0xff] (!%p1227_p10), %v1588_v32  ;;  %343 = vst [vmem:[%s2058_s3 + $0x18] sm:$0xff] (!%p1227_p10), %v1588_v32 }
  0x31   : > { %344 = vst [vmem:[%s2058_s3 + $0x20] sm:$0xff] (!%p1227_p10), %v1588_v32  ;;  %345 = vst [vmem:[%s2058_s3 + $0x28] sm:$0xff] (!%p1227_p10), %v1588_v32 }
  0x32   : > { %346 = vst [vmem:[%s2058_s3 + $0x30] sm:$0xff] (!%p1227_p10), %v1588_v32  ;;  %347 = vst [vmem:[%s2058_s3 + $0x38] sm:$0xff] (!%p1227_p10), %v1588_v32 }
  0x33   : > { %348 = vst [vmem:[%s2058_s3 + $0x40] sm:$0xff] (!%p1227_p10), %v1588_v32  ;;  %349 = vst [vmem:[%s2058_s3 + $0x48] sm:$0xff] (!%p1227_p10), %v1588_v32 }
  0x34   : > { %350 = vst [vmem:[%s2058_s3 + $0x50] sm:$0xff] %v1588_v32  ;;  %351 = vst [vmem:[%s2058_s3 + $0x58] sm:$0xff] %v1588_v32 }
  0x35   : > { %352 = vst [vmem:[%s2058_s3 + $0x60] sm:$0xff] %v1588_v32  ;;  %353 = vst [vmem:[%s2058_s3 + $0x68] sm:$0xff] %v1588_v32 }
  0x36   : > { %354 = vst [vmem:[%s2058_s3 + $0x70] sm:$0xff] %v1588_v32  ;;  %355 = vst [vmem:[%s2058_s3 + $0x78] sm:$0xff] %v1588_v32 }
  0x37 PF: > { %v1468_v33 = vld [vmem:[%s1727_s7 + $0x40] sm:$0xff]   ;;  %v1472_v37 = vld [vmem:[%s1727_s7 + $0x48] sm:$0xff]   ;;  %v1476_v41 = vld [vmem:[%s1727_s7 + $0x50] sm:$0xff]   ;;  %p1292_p11 = scmp.ne.s32.totalorder %s1578_s14, 4 }
  0x38   : > { %v1469_v34 = vld [vmem:[%s1727_s7 + $0xc0] sm:$0xff]   ;;  %1299 = vmatprep.subr.bf16.mxu0 %v1468_v33  ;;  %v1473_v38 = vld [vmem:[%s1727_s7 + $0xc8] sm:$0xff]   ;;  %v1477_v42 = vld [vmem:[%s1727_s7 + $0xd0] sm:$0xff]  }
  0x39   : > { %v1470_v35 = vld [vmem:[%s1727_s7] sm:$0xff]   ;;  %1363 = vmatprep.subr.bf16.mxu1 %v1469_v34  ;;  %v1474_v39 = vld [vmem:[%s1727_s7 + $0x8] sm:$0xff]   ;;  %v1478_v43 = vld [vmem:[%s1727_s7 + $0x10] sm:$0xff]  }
  0x3a   : > { %v1471_v36 = vld [vmem:[%s1727_s7 + $0x80] sm:$0xff]   ;;  %1300 = vmatpush3.bf16.msra.mxu0 %v1470_v35  ;;  %v1475_v40 = vld [vmem:[%s1727_s7 + $0x88] sm:$0xff]   ;;  %v1479_v44 = vld [vmem:[%s1727_s7 + $0x90] sm:$0xff]  }
  0x3b   : > { %1364 = vmatpush3.bf16.msra.mxu1 %v1471_v36  ;;  %1301 = vmatprep.subr.bf16.mxu0 %v1472_v37  ;;  %v1480_v45 = vld [vmem:[%s1727_s7 + $0x58] sm:$0xff]   ;;  %v1484_v49 = vld [vmem:[%s1727_s7 + $0x60] sm:$0xff]   ;;  %v1488_v53 = vld [vmem:[%s1727_s7 + $0x68] sm:$0xff]  }
  0x3c   : > { %1365 = vmatprep.subr.bf16.mxu1 %v1473_v38  ;;  %v1481_v46 = vld [vmem:[%s1727_s7 + $0xd8] sm:$0xff]   ;;  %v1485_v50 = vld [vmem:[%s1727_s7 + $0xe0] sm:$0xff]   ;;  %v1489_v54 = vld [vmem:[%s1727_s7 + $0xe8] sm:$0xff]  }
  0x3d   : > { %v1482_v47 = vld [vmem:[%s1727_s7 + $0x18] sm:$0xff]   ;;  %v1486_v51 = vld [vmem:[%s1727_s7 + $0x20] sm:$0xff]   ;;  %v1490_v55 = vld [vmem:[%s1727_s7 + $0x28] sm:$0xff]  }
  0x3e   : > { %1302 = vmatpush3.bf16.msra.mxu0 %v1474_v39  ;;  %v1483_v48 = vld [vmem:[%s1727_s7 + $0x98] sm:$0xff]   ;;  %v1487_v52 = vld [vmem:[%s1727_s7 + $0xa0] sm:$0xff]   ;;  %v1491_v56 = vld [vmem:[%s1727_s7 + $0xa8] sm:$0xff]  }
  0x3f   : > { %1366 = vmatpush3.bf16.msra.mxu1 %v1475_v40  ;;  %1303 = vmatprep.subr.bf16.mxu0 %v1476_v41  ;;  %v1492_v57 = vld [vmem:[%s1727_s7 + $0x70] sm:$0xff]   ;;  %v1496_v61 = vld [vmem:[%s1727_s7 + $0x78] sm:$0xff]  }
  0x40   : > { %1367 = vmatprep.subr.bf16.mxu1 %v1477_v42  ;;  %v1493_v58 = vld [vmem:[%s1727_s7 + $0xf0] sm:$0xff]   ;;  %v1497_v62 = vld [vmem:[%s1727_s7 + $0xf8] sm:$0xff]   ;;  %v356_v42 = vld [vmem:[%s2058_s3] sm:$0xff] }
  0x41   : > { %v1494_v59 = vld [vmem:[%s1727_s7 + $0x30] sm:$0xff]   ;;  %v1498_v63 = vld [vmem:[%s1727_s7 + $0x38] sm:$0xff]  }
  0x42   : > { %1304 = vmatpush3.bf16.msra.mxu0 %v1478_v43  ;;  %v1495_v60 = vld [vmem:[%s1727_s7 + $0xb0] sm:$0xff]   ;;  %v1499_v0 = vld [vmem:[%s1727_s7 + $0xb8] sm:$0xff]  }
  0x43   : > { %1368 = vmatpush3.bf16.msra.mxu1 %v1479_v44  ;;  %1305 = vmatprep.subr.bf16.mxu0 %v1480_v45  ;;  %v1500_v1 = vld [vmem:[%s1729_s8] ss:$16 sps:$4 sm:$0xff]   ;;  %v1502_v2 = vld [vmem:[%s1729_s8 + $0x4] ss:$16 sps:$4 sm:$0xff]   ;;  %v1503_v3 = vld [vmem:[%s1729_s8 + $0x8] ss:$16 sps:$4 sm:$0xff]  }
  0x44   : > { %1369 = vmatprep.subr.bf16.mxu1 %v1481_v46  ;;  %v1505_v4 = vld [vmem:[%s1729_s8 + $0xc] ss:$16 sps:$4 sm:$0xff]   ;;  %852 = vmatprep.mubr.bf16.mxu0 %v1502_v2  ;;  %v1506_v5 = vld [vmem:[%s1729_s8 + $0x24] ss:$16 sps:$4 sm:$0xff]   ;;  %v1510_v7 = vld [vmem:[%s1729_s8 + $0x20] ss:$16 sps:$4 sm:$0xff]  }
  0x45   : > { %949 = vmatprep.mubr.bf16.mxu1 %v1505_v4  ;;  %v1508_v6 = vld [vmem:[%s1729_s8 + $0x2c] ss:$16 sps:$4 sm:$0xff]   ;;  %v1511_v8 = vld [vmem:[%s1729_s8 + $0x28] ss:$16 sps:$4 sm:$0xff]   ;;  %v1512_v9 = vld [vmem:[%s1729_s8 + $0x44] ss:$16 sps:$4 sm:$0xff]  }
  0x46   : > { %1306 = vmatpush3.bf16.msra.mxu0 %v1482_v47  ;;  %v1514_v10 = vld [vmem:[%s1729_s8 + $0x4c] ss:$16 sps:$4 sm:$0xff]   ;;  %v1516_v11 = vld [vmem:[%s1729_s8 + $0x40] ss:$16 sps:$4 sm:$0xff]   ;;  %v1517_v12 = vld [vmem:[%s1729_s8 + $0x48] ss:$16 sps:$4 sm:$0xff]  }
  0x47   : > { %1370 = vmatpush3.bf16.msra.mxu1 %v1483_v48  ;;  %1307 = vmatprep.subr.bf16.mxu0 %v1484_v49  ;;  %v1518_v13 = vld [vmem:[%s1729_s8 + $0x64] ss:$16 sps:$4 sm:$0xff]   ;;  %v1520_v14 = vld [vmem:[%s1729_s8 + $0x6c] ss:$16 sps:$4 sm:$0xff]   ;;  %v1522_v15 = vld [vmem:[%s1729_s8 + $0x60] ss:$16 sps:$4 sm:$0xff]  }
  0x48   : > { %1371 = vmatprep.subr.bf16.mxu1 %v1485_v50  ;;  %v1523_v16 = vld [vmem:[%s1729_s8 + $0x68] ss:$16 sps:$4 sm:$0xff]   ;;  %v1524_v17 = vld [vmem:[%s1729_s8 + $0x84] ss:$16 sps:$4 sm:$0xff]   ;;  %v1526_v18 = vld [vmem:[%s1729_s8 + $0x8c] ss:$16 sps:$4 sm:$0xff]  }
  0x49   : > { %v1528_v19 = vld [vmem:[%s1729_s8 + $0x80] ss:$16 sps:$4 sm:$0xff]   ;;  %v1529_v20 = vld [vmem:[%s1729_s8 + $0x88] ss:$16 sps:$4 sm:$0xff]   ;;  %v1530_v21 = vld [vmem:[%s1729_s8 + $0xa4] ss:$16 sps:$4 sm:$0xff]  }
  0x4a   : > { %1308 = vmatpush3.bf16.msra.mxu0 %v1486_v51  ;;  %v1532_v22 = vld [vmem:[%s1729_s8 + $0xac] ss:$16 sps:$4 sm:$0xff]   ;;  %v1534_v23 = vld [vmem:[%s1729_s8 + $0xa0] ss:$16 sps:$4 sm:$0xff]   ;;  %v1535_v24 = vld [vmem:[%s1729_s8 + $0xa8] ss:$16 sps:$4 sm:$0xff]  }
  0x4b   : > { %1372 = vmatpush3.bf16.msra.mxu1 %v1487_v52  ;;  %1309 = vmatprep.subr.bf16.mxu0 %v1488_v53  ;;  %v1536_v25 = vld [vmem:[%s1729_s8 + $0xc4] ss:$16 sps:$4 sm:$0xff]   ;;  %v1538_v26 = vld [vmem:[%s1729_s8 + $0xcc] ss:$16 sps:$4 sm:$0xff]   ;;  %v1540_v27 = vld [vmem:[%s1729_s8 + $0xc0] ss:$16 sps:$4 sm:$0xff]  }
  0x4c   : > { %1373 = vmatprep.subr.bf16.mxu1 %v1489_v54  ;;  %v1541_v28 = vld [vmem:[%s1729_s8 + $0xc8] ss:$16 sps:$4 sm:$0xff]   ;;  %v1542_v29 = vld [vmem:[%s1729_s8 + $0xe4] ss:$16 sps:$4 sm:$0xff]   ;;  %v1544_v30 = vld [vmem:[%s1729_s8 + $0xec] ss:$16 sps:$4 sm:$0xff]  }
  0x4d   : > { %v1546_v31 = vld [vmem:[%s1729_s8 + $0xe0] ss:$16 sps:$4 sm:$0xff]   ;;  %v1547_v32 = vld [vmem:[%s1729_s8 + $0xe8] ss:$16 sps:$4 sm:$0xff]  }
  0x4e   : > { %1310 = vmatpush3.bf16.msra.mxu0 %v1490_v55  ;;  %v357_v47 = vld [vmem:[%s2058_s3 + $0x8] sm:$0xff] }
  0x4f   : > { %1374 = vmatpush3.bf16.msra.mxu1 %v1491_v56  ;;  %1311 = vmatprep.subr.bf16.mxu0 %v1492_v57 }
  0x50   : > { %1375 = vmatprep.subr.bf16.mxu1 %v1493_v58 }
  0x52   : > { %1312 = vmatpush3.bf16.msra.mxu0 %v1494_v59 }
  0x53   : > { %1376 = vmatpush3.bf16.msra.mxu1 %v1495_v60  ;;  %1313 = vmatprep.subr.bf16.mxu0 %v1496_v61  ;;  %v358_v60 = vld [vmem:[%s2058_s3 + $0x10] sm:$0xff] }
  0x54   : > { %1377 = vmatprep.subr.bf16.mxu1 %v1497_v62 }
  0x56   : > { %1314 = vmatpush3.bf16.msra.mxu0 %v1498_v63 }
  0x57   : > { %1378 = vmatpush3.bf16.msra.mxu1 %v1499_v0 }
  0x59   : > { %853 = vmatmul.mubr.bf16.vlgmr.msra.gmra.mrb[0].mxu0 %v1500_v1  ;;  %v359_v1 = vld [vmem:[%s2058_s3 + $0x18] sm:$0xff] }
  0x5a   : > { %950 = vmatmul.mubr.bf16.vlgmr.msra.gmra.mrb[0].mxu1 %v1503_v3  ;;  %860 = vmatprep.mubr.bf16.mxu0 %v1506_v5 }
  0x5b   : > { %957 = vmatprep.mubr.bf16.mxu1 %v1508_v6 }
  0x61   : > { %861 = vmatmul.mubr.bf16.gmra.mrb[4].mxu0 %v1510_v7 }
  0x62   : > { %958 = vmatmul.mubr.bf16.gmra.mrb[4].mxu1 %v1511_v8  ;;  %868 = vmatprep.mubr.bf16.mxu0 %v1512_v9 }
  0x63   : > { %965 = vmatprep.mubr.bf16.mxu1 %v1514_v10 }
  0x69   : > { %869 = vmatmul.mubr.bf16.gmra.mrb[8].mxu0 %v1516_v11 }
  0x6a   : > { %966 = vmatmul.mubr.bf16.gmra.mrb[8].mxu1 %v1517_v12  ;;  %876 = vmatprep.mubr.bf16.mxu0 %v1518_v13 }
  0x6b   : > { %973 = vmatprep.mubr.bf16.mxu1 %v1520_v14  ;;  %v360_v14 = vld [vmem:[%s2058_s3 + $0x20] sm:$0xff] }
  0x71   : > { %877 = vmatmul.mubr.bf16.gmra.mrb[12].mxu0 %v1522_v15 }
  0x72   : > { %974 = vmatmul.mubr.bf16.gmra.mrb[12].mxu1 %v1523_v16  ;;  %884 = vmatprep.mubr.bf16.mxu0 %v1524_v17 }
  0x73   : > { %981 = vmatprep.mubr.bf16.mxu1 %v1526_v18 }
  0x79   : > { %885 = vmatmul.mubr.bf16.gmra.mrb[16].mxu0 %v1528_v19  ;;  %v361_v19 = vld [vmem:[%s2058_s3 + $0x28] sm:$0xff] }
  0x7a   : > { %982 = vmatmul.mubr.bf16.gmra.mrb[16].mxu1 %v1529_v20  ;;  %892 = vmatprep.mubr.bf16.mxu0 %v1530_v21 }
  0x7b   : > { %989 = vmatprep.mubr.bf16.mxu1 %v1532_v22 }
  0x81   : > { %893 = vmatmul.mubr.bf16.gmra.mrb[20].mxu0 %v1534_v23 }
  0x82   : > { %990 = vmatmul.mubr.bf16.gmra.mrb[20].mxu1 %v1535_v24  ;;  %900 = vmatprep.mubr.bf16.mxu0 %v1536_v25 }
  0x83   : > { %997 = vmatprep.mubr.bf16.mxu1 %v1538_v26 }
  0x89   : > { %901 = vmatmul.mubr.bf16.gmra.mrb[24].mxu0 %v1540_v27 }
  0x8a   : > { %998 = vmatmul.mubr.bf16.gmra.mrb[24].mxu1 %v1541_v28  ;;  %908 = vmatprep.mubr.bf16.mxu0 %v1542_v29 }
  0x8b   : > { %1005 = vmatprep.mubr.bf16.mxu1 %v1544_v30 }
  0x91   : > { %909 = vmatmul.mubr.bf16.gmra.mrb[28].mxu0 %v1546_v31 }
  0x92   : > { %1006 = vmatmul.mubr.bf16.gmra.mrb[28].mxu1 %v1547_v32  ;;  %v362_v32 = vld [vmem:[%s2058_s3 + $0x30] sm:$0xff] }
 0x12c   : > { %v1315_v33 = vpop.f32.mrb[0].mxu0 }
 0x12d   : > { %v1379_v34 = vpop.f32.mrb[0].mxu1  ;;  %v1316_v35 = vpop.f32.mrb[1].mxu0 }
 0x12e   : > { %v1317_v36 = vadd.f32 %v1316_v35, %v1315_v33  ;;  %v1380_v37 = vpop.f32.mrb[1].mxu1  ;;  %v1318_v38 = vpop.f32.mrb[2].mxu0 }
 0x12f   : > { %v1381_v39 = vadd.f32 %v1380_v37, %v1379_v34  ;;  %v1382_v40 = vpop.f32.mrb[2].mxu1  ;;  %v1319_v41 = vpop.f32.mrb[3].mxu0  ;;  %v363_v37 = vld [vmem:[%s2058_s3 + $0x38] sm:$0xff] }
 0x130   : > { %v1320_v43 = vadd.f32 %v1319_v41, %v1318_v38  ;;  %v1383_v44 = vpop.f32.mrb[3].mxu1 }
 0x131   : > { %v952_v45 = vadd.f32 %v1381_v39, %v1317_v36  ;;  %v1384_v46 = vadd.f32 %v1383_v44, %v1382_v40 }
 0x133   : > { %v1014_v48 = vadd.f32 %v952_v45, %v356_v42  ;;  %v955_v49 = vadd.f32 %v1384_v46, %v1320_v43 }
 0x134   : > { %v1321_v50 = vpop.f32.mrb[4].mxu0 }
 0x135   : > { %1030 = vst [vmem:[%s2058_s3] sm:$0xff] %v1014_v48  ;;  %v1015_v51 = vadd.f32 %v955_v49, %v357_v47  ;;  %v1385_v52 = vpop.f32.mrb[4].mxu1  ;;  %v1322_v53 = vpop.f32.mrb[5].mxu0 }
 0x136   : > { %v1323_v54 = vadd.f32 %v1322_v53, %v1321_v50  ;;  %v1386_v55 = vpop.f32.mrb[5].mxu1  ;;  %v1324_v56 = vpop.f32.mrb[6].mxu0  ;;  %v364_v50 = vld [vmem:[%s2058_s3 + $0x40] sm:$0xff] }
 0x137   : > { %1031 = vst [vmem:[%s2058_s3 + $0x8] sm:$0xff] %v1015_v51  ;;  %v1387_v57 = vadd.f32 %v1386_v55, %v1385_v52  ;;  %v1388_v58 = vpop.f32.mrb[6].mxu1  ;;  %v1325_v59 = vpop.f32.mrb[7].mxu0  ;;  %v365_v55 = vld [vmem:[%s2058_s3 + $0x48] sm:$0xff] }
 0x138   : > { %v1326_v61 = vadd.f32 %v1325_v59, %v1324_v56  ;;  %v1389_v62 = vpop.f32.mrb[7].mxu1 }
 0x139   : > { %v960_v63 = vadd.f32 %v1387_v57, %v1323_v54  ;;  %v1390_v0 = vadd.f32 %v1389_v62, %v1388_v58 }
 0x13b   : > { %v1016_v2 = vadd.f32 %v960_v63, %v358_v60  ;;  %v963_v3 = vadd.f32 %v1390_v0, %v1326_v61 }
 0x13c   : > { %v1327_v4 = vpop.f32.mrb[8].mxu0 }
 0x13d   : > { %1032 = vst [vmem:[%s2058_s3 + $0x10] sm:$0xff] %v1016_v2  ;;  %v1017_v5 = vadd.f32 %v963_v3, %v359_v1  ;;  %v1391_v6 = vpop.f32.mrb[8].mxu1  ;;  %v1328_v7 = vpop.f32.mrb[9].mxu0 }
 0x13e   : > { %v1329_v8 = vadd.f32 %v1328_v7, %v1327_v4  ;;  %v1392_v9 = vpop.f32.mrb[9].mxu1  ;;  %v1330_v10 = vpop.f32.mrb[10].mxu0  ;;  %v366_v4 = vld [vmem:[%s2058_s3 + $0x50] sm:$0xff] }
 0x13f   : > { %1033 = vst [vmem:[%s2058_s3 + $0x18] sm:$0xff] %v1017_v5  ;;  %v1393_v11 = vadd.f32 %v1392_v9, %v1391_v6  ;;  %v1394_v12 = vpop.f32.mrb[10].mxu1  ;;  %v1331_v13 = vpop.f32.mrb[11].mxu0  ;;  %v367_v9 = vld [vmem:[%s2058_s3 + $0x58] sm:$0xff] }
 0x140   : > { %v1332_v15 = vadd.f32 %v1331_v13, %v1330_v10  ;;  %v1395_v16 = vpop.f32.mrb[11].mxu1 }
 0x141   : > { %v968_v17 = vadd.f32 %v1393_v11, %v1329_v8  ;;  %v1396_v18 = vadd.f32 %v1395_v16, %v1394_v12 }
 0x143   : > { %v1018_v20 = vadd.f32 %v968_v17, %v360_v14  ;;  %v971_v21 = vadd.f32 %v1396_v18, %v1332_v15 }
 0x144   : > { %v1333_v22 = vpop.f32.mrb[12].mxu0 }
 0x145   : > { %1034 = vst [vmem:[%s2058_s3 + $0x20] sm:$0xff] %v1018_v20  ;;  %v1019_v23 = vadd.f32 %v971_v21, %v361_v19  ;;  %v1397_v24 = vpop.f32.mrb[12].mxu1  ;;  %v1334_v25 = vpop.f32.mrb[13].mxu0 }
 0x146   : > { %v1335_v26 = vadd.f32 %v1334_v25, %v1333_v22  ;;  %v1398_v27 = vpop.f32.mrb[13].mxu1  ;;  %v1336_v28 = vpop.f32.mrb[14].mxu0  ;;  %v368_v22 = vld [vmem:[%s2058_s3 + $0x60] sm:$0xff] }
 0x147   : > { %1035 = vst [vmem:[%s2058_s3 + $0x28] sm:$0xff] %v1019_v23  ;;  %v1399_v29 = vadd.f32 %v1398_v27, %v1397_v24  ;;  %v1400_v30 = vpop.f32.mrb[14].mxu1  ;;  %v1337_v31 = vpop.f32.mrb[15].mxu0  ;;  %v369_v27 = vld [vmem:[%s2058_s3 + $0x68] sm:$0xff] }
 0x148   : > { %v1338_v33 = vadd.f32 %v1337_v31, %v1336_v28  ;;  %v1401_v34 = vpop.f32.mrb[15].mxu1 }
 0x149   : > { %v976_v35 = vadd.f32 %v1399_v29, %v1335_v26  ;;  %v1402_v36 = vadd.f32 %v1401_v34, %v1400_v30 }
 0x14b   : > { %v1020_v38 = vadd.f32 %v976_v35, %v362_v32  ;;  %v979_v39 = vadd.f32 %v1402_v36, %v1338_v33 }
 0x14c   : > { %v1339_v40 = vpop.f32.mrb[16].mxu0 }
 0x14d   : > { %1036 = vst [vmem:[%s2058_s3 + $0x30] sm:$0xff] %v1020_v38  ;;  %v1021_v41 = vadd.f32 %v979_v39, %v363_v37  ;;  %v1403_v42 = vpop.f32.mrb[16].mxu1  ;;  %v1340_v43 = vpop.f32.mrb[17].mxu0 }
 0x14e   : > { %v1341_v44 = vadd.f32 %v1340_v43, %v1339_v40  ;;  %v1404_v45 = vpop.f32.mrb[17].mxu1  ;;  %v1342_v46 = vpop.f32.mrb[18].mxu0  ;;  %v370_v40 = vld [vmem:[%s2058_s3 + $0x70] sm:$0xff] }
 0x14f   : > { %1037 = vst [vmem:[%s2058_s3 + $0x38] sm:$0xff] %v1021_v41  ;;  %v1405_v47 = vadd.f32 %v1404_v45, %v1403_v42  ;;  %v1406_v48 = vpop.f32.mrb[18].mxu1  ;;  %v1343_v49 = vpop.f32.mrb[19].mxu0  ;;  %v371_v45 = vld [vmem:[%s2058_s3 + $0x78] sm:$0xff] }
 0x150   : > { %v1344_v51 = vadd.f32 %v1343_v49, %v1342_v46  ;;  %v1407_v52 = vpop.f32.mrb[19].mxu1  ;;  %v1050_v49 = vld [vmem:[%s2058_s3] sm:$0xff] (!%p1292_p11) }
 0x151   : > { %v984_v53 = vadd.f32 %v1405_v47, %v1341_v44  ;;  %v1408_v54 = vadd.f32 %v1407_v52, %v1406_v48 }
 0x153   : > { %v1022_v56 = vadd.f32 %v984_v53, %v364_v50  ;;  %v987_v57 = vadd.f32 %v1408_v54, %v1344_v51  ;;  %v1293_v50 = vld [vmem:[%s2057_s2] ss:$0 sm:$0xff] (!%p1292_p11)  ;;  %v1051_v51 = vld [vmem:[%s2058_s3 + $0x8] sm:$0xff] (!%p1292_p11)  ;;  %v1052_v54 = vld [vmem:[%s2058_s3 + $0x10] sm:$0xff] (!%p1292_p11) }
 0x154   : > { %v1345_v58 = vpop.f32.mrb[20].mxu0  ;;  %v1073_v52 = vadd.f32 (!%p1292_p11), %v1293_v50, %v1050_v49  ;;  %v1074_v53 = vadd.f32 (!%p1292_p11), %v1293_v50, %v1051_v51 }
 0x155   : > { %1038 = vst [vmem:[%s2058_s3 + $0x40] sm:$0xff] %v1022_v56  ;;  %v1023_v59 = vadd.f32 %v987_v57, %v365_v55  ;;  %v1409_v60 = vpop.f32.mrb[20].mxu1  ;;  %v1346_v61 = vpop.f32.mrb[21].mxu0  ;;  %v1053_v55 = vld [vmem:[%s2058_s3 + $0x18] sm:$0xff] (!%p1292_p11)  ;;  %v1054_v56 = vld [vmem:[%s2058_s3 + $0x20] sm:$0xff] (!%p1292_p11)  ;;  %v1075_v57 = vadd.f32 (!%p1292_p11), %v1293_v50, %v1052_v54 }
 0x156   : > { %v1347_v62 = vadd.f32 %v1346_v61, %v1345_v58  ;;  %v1410_v63 = vpop.f32.mrb[21].mxu1  ;;  %v1348_v0 = vpop.f32.mrb[22].mxu0  ;;  %v1076_v58 = vadd.f32 (!%p1292_p11), %v1293_v50, %v1053_v55  ;;  %v1056_v61 = vld [vmem:[%s2058_s3 + $0x30] sm:$0xff] (!%p1292_p11)  ;;  %1089 = vst [vmem:[%s2058_s3] sm:$0xff] (!%p1292_p11), %v1073_v52  ;;  %1090 = vst [vmem:[%s2058_s3 + $0x8] sm:$0xff] (!%p1292_p11), %v1074_v53 }
 0x157   : > { %1039 = vst [vmem:[%s2058_s3 + $0x48] sm:$0xff] %v1023_v59  ;;  %v1411_v1 = vadd.f32 %v1410_v63, %v1409_v60  ;;  %v1412_v2 = vpop.f32.mrb[22].mxu1  ;;  %v1349_v3 = vpop.f32.mrb[23].mxu0  ;;  %v1077_v59 = vadd.f32 (!%p1292_p11), %v1293_v50, %v1054_v56  ;;  %v1055_v60 = vld [vmem:[%s2058_s3 + $0x28] sm:$0xff] (!%p1292_p11)  ;;  %1091 = vst [vmem:[%s2058_s3 + $0x10] sm:$0xff] (!%p1292_p11), %v1075_v57 }
 0x158   : > { %v1350_v5 = vadd.f32 %v1349_v3, %v1348_v0  ;;  %v1413_v6 = vpop.f32.mrb[23].mxu1  ;;  %v1078_v63 = vadd.f32 (!%p1292_p11), %v1293_v50, %v1055_v60  ;;  %v1079_v0 = vadd.f32 (!%p1292_p11), %v1293_v50, %v1056_v61  ;;  %1092 = vst [vmem:[%s2058_s3 + $0x18] sm:$0xff] (!%p1292_p11), %v1076_v58 }
 0x159   : > { %v992_v7 = vadd.f32 %v1411_v1, %v1347_v62  ;;  %v1414_v8 = vadd.f32 %v1413_v6, %v1412_v2  ;;  %v1057_v62 = vld [vmem:[%s2058_s3 + $0x38] sm:$0xff] (!%p1292_p11)  ;;  %1093 = vst [vmem:[%s2058_s3 + $0x20] sm:$0xff] (!%p1292_p11), %v1077_v59 }
 0x15a   : > { %v1080_v1 = vadd.f32 (!%p1292_p11), %v1293_v50, %v1057_v62  ;;  %1094 = vst [vmem:[%s2058_s3 + $0x28] sm:$0xff] (!%p1292_p11), %v1078_v63  ;;  %1095 = vst [vmem:[%s2058_s3 + $0x30] sm:$0xff] (!%p1292_p11), %v1079_v0 }
 0x15b   : > { %v1024_v10 = vadd.f32 %v992_v7, %v366_v4  ;;  %v995_v11 = vadd.f32 %v1414_v8, %v1350_v5 }
 0x15c   : > { %v1351_v12 = vpop.f32.mrb[24].mxu0  ;;  %v1058_v2 = vld [vmem:[%s2058_s3 + $0x40] sm:$0xff] (!%p1292_p11)  ;;  %1096 = vst [vmem:[%s2058_s3 + $0x38] sm:$0xff] (!%p1292_p11), %v1080_v1 }
 0x15d   : > { %1040 = vst [vmem:[%s2058_s3 + $0x50] sm:$0xff] %v1024_v10  ;;  %v1025_v13 = vadd.f32 %v995_v11, %v367_v9  ;;  %v1415_v14 = vpop.f32.mrb[24].mxu1  ;;  %v1352_v15 = vpop.f32.mrb[25].mxu0  ;;  %v1081_v5 = vadd.f32 (!%p1292_p11), %v1293_v50, %v1058_v2 }
 0x15e   : > { %v1353_v16 = vadd.f32 %v1352_v15, %v1351_v12  ;;  %v1416_v17 = vpop.f32.mrb[25].mxu1  ;;  %v1354_v18 = vpop.f32.mrb[26].mxu0  ;;  %v1059_v3 = vld [vmem:[%s2058_s3 + $0x48] sm:$0xff] (!%p1292_p11) }
 0x15f   : > { %1041 = vst [vmem:[%s2058_s3 + $0x58] sm:$0xff] %v1025_v13  ;;  %v1417_v19 = vadd.f32 %v1416_v17, %v1415_v14  ;;  %v1418_v20 = vpop.f32.mrb[26].mxu1  ;;  %v1355_v21 = vpop.f32.mrb[27].mxu0  ;;  %v1082_v6 = vadd.f32 (!%p1292_p11), %v1293_v50, %v1059_v3  ;;  %1097 = vst [vmem:[%s2058_s3 + $0x40] sm:$0xff] (!%p1292_p11), %v1081_v5 }
 0x160   : > { %v1356_v23 = vadd.f32 %v1355_v21, %v1354_v18  ;;  %v1419_v24 = vpop.f32.mrb[27].mxu1 }
 0x161   : > { %v1000_v25 = vadd.f32 %v1417_v19, %v1353_v16  ;;  %v1420_v26 = vadd.f32 %v1419_v24, %v1418_v20  ;;  %1098 = vst [vmem:[%s2058_s3 + $0x48] sm:$0xff] (!%p1292_p11), %v1082_v6 }
 0x163   : > { %v1026_v28 = vadd.f32 %v1000_v25, %v368_v22  ;;  %v1003_v29 = vadd.f32 %v1420_v26, %v1356_v23 }
 0x164   : > { %v1357_v30 = vpop.f32.mrb[28].mxu0  ;;  %v1060_v4 = vld [vmem:[%s2058_s3 + $0x50] sm:$0xff] (!%p1292_p11) }
 0x165   : > { %1042 = vst [vmem:[%s2058_s3 + $0x60] sm:$0xff] %v1026_v28  ;;  %v1027_v31 = vadd.f32 %v1003_v29, %v369_v27  ;;  %v1421_v32 = vpop.f32.mrb[28].mxu1  ;;  %v1358_v33 = vpop.f32.mrb[29].mxu0  ;;  %v1083_v7 = vadd.f32 (!%p1292_p11), %v1293_v50, %v1060_v4 }
 0x166   : > { %v1359_v34 = vadd.f32 %v1358_v33, %v1357_v30  ;;  %v1422_v35 = vpop.f32.mrb[29].mxu1  ;;  %v1360_v36 = vpop.f32.mrb[30].mxu0  ;;  %v1061_v8 = vld [vmem:[%s2058_s3 + $0x58] sm:$0xff] (!%p1292_p11) }
 0x167   : > { %1043 = vst [vmem:[%s2058_s3 + $0x68] sm:$0xff] %v1027_v31  ;;  %v1423_v37 = vadd.f32 %v1422_v35, %v1421_v32  ;;  %v1424_v38 = vpop.f32.mrb[30].mxu1  ;;  %v1361_v39 = vpop.f32.mrb[31].mxu0  ;;  %v1084_v11 = vadd.f32 (!%p1292_p11), %v1293_v50, %v1061_v8  ;;  %1099 = vst [vmem:[%s2058_s3 + $0x50] sm:$0xff] (!%p1292_p11), %v1083_v7 }
 0x168   : > { %v1362_v41 = vadd.f32 %v1361_v39, %v1360_v36  ;;  %v1425_v42 = vpop.f32.mrb[31].mxu1 }
 0x169   : > { %v1008_v43 = vadd.f32 %v1423_v37, %v1359_v34  ;;  %v1426_v44 = vadd.f32 %v1425_v42, %v1424_v38  ;;  %1049 = sbr.rel (%p1292_p11) target bundleno = 378 (0x17a), region = 63  ;;  %1100 = vst [vmem:[%s2058_s3 + $0x58] sm:$0xff] (!%p1292_p11), %v1084_v11 }
 0x16b   : > { %v1028_v46 = vadd.f32 %v1008_v43, %v370_v40  ;;  %v1011_v47 = vadd.f32 %v1426_v44, %v1362_v41 }
 0x16c   : > { %v1062_v9 = vld [vmem:[%s2058_s3 + $0x60] sm:$0xff] (!%p1292_p11) }
 0x16d   : > { %1044 = vst [vmem:[%s2058_s3 + $0x70] sm:$0xff] %v1028_v46  ;;  %v1029_v48 = vadd.f32 %v1011_v47, %v371_v45  ;;  %v1085_v12 = vadd.f32 (!%p1292_p11), %v1293_v50, %v1062_v9 }
 0x16e   : > { %v1063_v10 = vld [vmem:[%s2058_s3 + $0x68] sm:$0xff] (!%p1292_p11) }
 0x16f   : > { %1045 = vst [vmem:[%s2058_s3 + $0x78] sm:$0xff] %v1029_v48  ;;  %v1086_v13 = vadd.f32 (!%p1292_p11), %v1293_v50, %v1063_v10  ;;  %1101 = vst [vmem:[%s2058_s3 + $0x60] sm:$0xff] (!%p1292_p11), %v1085_v12 }
 0x171   : > { %1102 = vst [vmem:[%s2058_s3 + $0x68] sm:$0xff] %v1086_v13 }
 0x174   : > { %v1064_v14 = vld [vmem:[%s2058_s3 + $0x70] sm:$0xff] }
 0x175   : > { %v1087_v16 = vadd.f32 %v1293_v50, %v1064_v14 }
 0x176   : > { %v1065_v15 = vld [vmem:[%s2058_s3 + $0x78] sm:$0xff] }
 0x177   : > { %v1088_v17 = vadd.f32 %v1293_v50, %v1065_v15  ;;  %1103 = vst [vmem:[%s2058_s3 + $0x70] sm:$0xff] %v1087_v16 }
 0x179   : > { %1104 = vst [vmem:[%s2058_s3 + $0x78] sm:$0xff] %v1088_v17 }
 0x17a PF: > { %s13_s16 = sadd.s32 1, %s1586_s16   ;;  %s2059_s12 = smov %s1574_s13 }
 0x17b   : > { %p10_p12 = scmp.ge.s32.totalorder %s13_s16, 7   ;;  %s2060_s13 = smov %s1644_s20 }
 0x17c   : > { %s2061_s14 = smov %s1582_s15  ;;  %s2062_s15 = smov %s2064_s17 }
 0x17d   :  { %12 = sbr.rel (!%p10_p12) target bundleno = 3 (0x3), region = 104 }

// kernel: generator_forward.91
= control target key start
LH: loop header
LB: loop body
LE: loop exit
PB: predicated region body
PF: predicated region fallthrough
CT: control target
= control target key end

     0   :  { %s3211_s12 = smov 0   ;;  %s3213_s13 = smov 0   ;;  %s4827_s0 = inlined_call_operand.vmem [shape: bf16[512,1536], index: 0, kind: input, shape index: {}]   ;;  %s4828_s1 = inlined_call_operand.vmem [shape: bf16[1536,128], index: 1, kind: input, shape index: {}]   ;;  %s4829_s2 = inlined_call_operand.vmem [shape: f32[1,128], index: 2, kind: input, shape index: {}]   ;;  %s4830_s3 = inlined_call_operand.vmem [shape: f32[512,128], index: 3, kind: output, shape index: {}]  }
   0x1   :  { %s3215_s14 = smov 0   ;;  %s3217_s15 = smov 0  }
   0x2   :  { %s3219_s16 = smov 0  }
   0x3 LB: > { %s25_s17 = sadd.s32 1, %s3183_s15  ;;  %p48_p1 = scmp.ne.s32.totalorder %s3175_s13, %s3171_s12  ;;  %s3187_s16 = sphi %s3219_s16, %s13_s16   ;;  %s3183_s15 = sphi %s3217_s15, %s4834_s15   ;;  %s3179_s14 = sphi %s3215_s14, %s4833_s14   ;;  %s3175_s13 = sphi %s3213_s13, %s4832_s13   ;;  %s3171_s12 = sphi %s3211_s12, %s4831_s12  }
   0x4   : > { %p26_p0 = scmp.ge.s32.totalorder %s25_s17, 3  ;;  %p49_p2 = scmp.eq.s32.totalorder %s3187_s16, 0 }
   0x5   : > { %s41_s19 = sadd.s32 1, %s3175_s13  ;;  %p2707_p5 = scmp.ge.s32.totalorder %s3187_s16, 3 }
   0x6   : > { %s4836_s17 = smov (%p26_p0, %s25_s17), 0  ;;  %p50_p3 = por %p49_p2, %p48_p1 }
   0x7   : > { %s37_s18 = ssub.s32 %s3183_s15, %s4836_s17  ;;  %162 = sbr.rel (%p2707_p5) target bundleno = 82 (0x52), region = 20 }
   0x8   : > { %p39_p4 = scmp.eq.s32.totalorder %s37_s18, 0 }
   0xa   : > { %s3246_s20 = scalar_select %p39_p4, %s3175_s13, %s41_s19  }
   0xe   : > { %165 = sbr.rel (!%p50_p3) target bundleno = 82 (0x52), region = 24  ;;  %s167_s21 = sand.u32 (%p50_p3), 1, %s3175_s13  }
   0xf   : > { %s2882_s22 = sshll.u32 (%p50_p3), %s3183_s15, 4  ;;  %s2708_s23 = sshll.u32 (%p50_p3), %s167_s21, 10 }
  0x10   : > { %s3254_s26 = scalar_lea.vmem (%p50_p3), %s4827_s0, %s2882_s22  ;;  %s3259_s27 = scalar_lea.vmem (%p50_p3), [#allocation2], %s2708_s23 }
  0x11   : > { %v188_v0 = vld [vmem:[%s3254_s26] sm:$0xff] (%p50_p3)  ;;  %v190_v1 = vld [vmem:[%s3254_s26 + $0x8] sm:$0xff] (%p50_p3)  ;;  %v192_v2 = vld [vmem:[%s3254_s26 + $0x30] sm:$0xff] (%p50_p3) }
  0x12   : > { %189 = vst [vmem:[%s3259_s27] sm:$0xff] (%p50_p3), %v188_v0  ;;  %191 = vst [vmem:[%s3259_s27 + $0x8] sm:$0xff] (%p50_p3), %v190_v1  ;;  %v194_v3 = vld [vmem:[%s3254_s26 + $0x38] sm:$0xff] (%p50_p3)  ;;  %v196_v4 = vld [vmem:[%s3254_s26 + $0x60] sm:$0xff] (%p50_p3) }
  0x13   : > { %193 = vst [vmem:[%s3259_s27 + $0x10] sm:$0xff] (%p50_p3), %v192_v2  ;;  %v198_v5 = vld [vmem:[%s3254_s26 + $0x68] sm:$0xff] (%p50_p3)  ;;  %195 = vst [vmem:[%s3259_s27 + $0x18] sm:$0xff] (%p50_p3), %v194_v3  ;;  %v200_v6 = vld [vmem:[%s3254_s26 + $0x90] sm:$0xff] (%p50_p3) }
  0x14   : > { %197 = vst [vmem:[%s3259_s27 + $0x20] sm:$0xff] (%p50_p3), %v196_v4  ;;  %199 = vst [vmem:[%s3259_s27 + $0x28] sm:$0xff] (%p50_p3), %v198_v5  ;;  %v202_v7 = vld [vmem:[%s3254_s26 + $0x98] sm:$0xff] (%p50_p3)  ;;  %v204_v8 = vld [vmem:[%s3254_s26 + $0xc0] sm:$0xff] (%p50_p3) }
  0x15   : > { %201 = vst [vmem:[%s3259_s27 + $0x30] sm:$0xff] %v200_v6  ;;  %203 = vst [vmem:[%s3259_s27 + $0x38] sm:$0xff] %v202_v7  ;;  %v206_v9 = vld [vmem:[%s3254_s26 + $0xc8] sm:$0xff]  ;;  %v208_v10 = vld [vmem:[%s3254_s26 + $0xf0] sm:$0xff] }
  0x16   : > { %205 = vst [vmem:[%s3259_s27 + $0x40] sm:$0xff] %v204_v8  ;;  %v210_v11 = vld [vmem:[%s3254_s26 + $0xf8] sm:$0xff]  ;;  %207 = vst [vmem:[%s3259_s27 + $0x48] sm:$0xff] %v206_v9  ;;  %v212_v12 = vld [vmem:[%s3254_s26 + $0x120] sm:$0xff] }
  0x17   : > { %209 = vst [vmem:[%s3259_s27 + $0x50] sm:$0xff] %v208_v10  ;;  %211 = vst [vmem:[%s3259_s27 + $0x58] sm:$0xff] %v210_v11  ;;  %v214_v13 = vld [vmem:[%s3254_s26 + $0x128] sm:$0xff]  ;;  %v216_v14 = vld [vmem:[%s3254_s26 + $0x150] sm:$0xff] }
  0x18   : > { %213 = vst [vmem:[%s3259_s27 + $0x60] sm:$0xff] %v212_v12  ;;  %215 = vst [vmem:[%s3259_s27 + $0x68] sm:$0xff] %v214_v13  ;;  %v218_v15 = vld [vmem:[%s3254_s26 + $0x158] sm:$0xff]  ;;  %v220_v16 = vld [vmem:[%s3254_s26 + $0x180] sm:$0xff] }
  0x19   : > { %217 = vst [vmem:[%s3259_s27 + $0x70] sm:$0xff] %v216_v14  ;;  %v222_v17 = vld [vmem:[%s3254_s26 + $0x188] sm:$0xff]  ;;  %219 = vst [vmem:[%s3259_s27 + $0x78] sm:$0xff] %v218_v15  ;;  %v224_v18 = vld [vmem:[%s3254_s26 + $0x1b0] sm:$0xff] }
  0x1a   : > { %221 = vst [vmem:[%s3259_s27 + $0x80] sm:$0xff] %v220_v16  ;;  %223 = vst [vmem:[%s3259_s27 + $0x88] sm:$0xff] %v222_v17  ;;  %v226_v19 = vld [vmem:[%s3254_s26 + $0x1b8] sm:$0xff]  ;;  %v228_v20 = vld [vmem:[%s3254_s26 + $0x1e0] sm:$0xff] }
  0x1b   : > { %225 = vst [vmem:[%s3259_s27 + $0x90] sm:$0xff] %v224_v18  ;;  %227 = vst [vmem:[%s3259_s27 + $0x98] sm:$0xff] %v226_v19  ;;  %v230_v21 = vld [vmem:[%s3254_s26 + $0x1e8] sm:$0xff]  ;;  %v232_v22 = vld [vmem:[%s3254_s26 + $0x210] sm:$0xff] }
  0x1c   : > { %229 = vst [vmem:[%s3259_s27 + $0xa0] sm:$0xff] %v228_v20  ;;  %v234_v23 = vld [vmem:[%s3254_s26 + $0x218] sm:$0xff]  ;;  %231 = vst [vmem:[%s3259_s27 + $0xa8] sm:$0xff] %v230_v21  ;;  %v236_v24 = vld [vmem:[%s3254_s26 + $0x240] sm:$0xff] }
  0x1d   : > { %233 = vst [vmem:[%s3259_s27 + $0xb0] sm:$0xff] %v232_v22  ;;  %235 = vst [vmem:[%s3259_s27 + $0xb8] sm:$0xff] %v234_v23  ;;  %v238_v25 = vld [vmem:[%s3254_s26 + $0x248] sm:$0xff]  ;;  %v240_v26 = vld [vmem:[%s3254_s26 + $0x270] sm:$0xff] }
  0x1e   : > { %237 = vst [vmem:[%s3259_s27 + $0xc0] sm:$0xff] %v236_v24  ;;  %239 = vst [vmem:[%s3259_s27 + $0xc8] sm:$0xff] %v238_v25  ;;  %v242_v27 = vld [vmem:[%s3254_s26 + $0x278] sm:$0xff]  ;;  %v244_v28 = vld [vmem:[%s3254_s26 + $0x2a0] sm:$0xff] }
  0x1f   : > { %241 = vst [vmem:[%s3259_s27 + $0xd0] sm:$0xff] %v240_v26  ;;  %v246_v29 = vld [vmem:[%s3254_s26 + $0x2a8] sm:$0xff]  ;;  %243 = vst [vmem:[%s3259_s27 + $0xd8] sm:$0xff] %v242_v27  ;;  %v248_v30 = vld [vmem:[%s3254_s26 + $0x2d0] sm:$0xff] }
  0x20   : > { %245 = vst [vmem:[%s3259_s27 + $0xe0] sm:$0xff] %v244_v28  ;;  %247 = vst [vmem:[%s3259_s27 + $0xe8] sm:$0xff] %v246_v29  ;;  %v250_v31 = vld [vmem:[%s3254_s26 + $0x2d8] sm:$0xff]  ;;  %v252_v32 = vld [vmem:[%s3254_s26 + $0x300] sm:$0xff] }
  0x21   : > { %249 = vst [vmem:[%s3259_s27 + $0xf0] sm:$0xff] %v248_v30  ;;  %251 = vst [vmem:[%s3259_s27 + $0xf8] sm:$0xff] %v250_v31  ;;  %v254_v33 = vld [vmem:[%s3254_s26 + $0x308] sm:$0xff]  ;;  %v256_v34 = vld [vmem:[%s3254_s26 + $0x330] sm:$0xff] }
  0x22   : > { %253 = vst [vmem:[%s3259_s27 + $0x100] sm:$0xff] %v252_v32  ;;  %v258_v35 = vld [vmem:[%s3254_s26 + $0x338] sm:$0xff]  ;;  %255 = vst [vmem:[%s3259_s27 + $0x108] sm:$0xff] %v254_v33  ;;  %v260_v36 = vld [vmem:[%s3254_s26 + $0x360] sm:$0xff] }
  0x23   : > { %257 = vst [vmem:[%s3259_s27 + $0x110] sm:$0xff] %v256_v34  ;;  %259 = vst [vmem:[%s3259_s27 + $0x118] sm:$0xff] %v258_v35  ;;  %v262_v37 = vld [vmem:[%s3254_s26 + $0x368] sm:$0xff]  ;;  %v264_v38 = vld [vmem:[%s3254_s26 + $0x390] sm:$0xff] }
  0x24   : > { %261 = vst [vmem:[%s3259_s27 + $0x120] sm:$0xff] %v260_v36  ;;  %263 = vst [vmem:[%s3259_s27 + $0x128] sm:$0xff] %v262_v37  ;;  %v266_v39 = vld [vmem:[%s3254_s26 + $0x398] sm:$0xff]  ;;  %v268_v40 = vld [vmem:[%s3254_s26 + $0x3c0] sm:$0xff] }
  0x25   : > { %265 = vst [vmem:[%s3259_s27 + $0x130] sm:$0xff] %v264_v38  ;;  %v270_v41 = vld [vmem:[%s3254_s26 + $0x3c8] sm:$0xff]  ;;  %267 = vst [vmem:[%s3259_s27 + $0x138] sm:$0xff] %v266_v39  ;;  %v272_v42 = vld [vmem:[%s3254_s26 + $0x3f0] sm:$0xff] }
  0x26   : > { %269 = vst [vmem:[%s3259_s27 + $0x140] sm:$0xff] %v268_v40  ;;  %271 = vst [vmem:[%s3259_s27 + $0x148] sm:$0xff] %v270_v41  ;;  %v274_v43 = vld [vmem:[%s3254_s26 + $0x3f8] sm:$0xff]  ;;  %v276_v44 = vld [vmem:[%s3254_s26 + $0x420] sm:$0xff] }
  0x27   : > { %273 = vst [vmem:[%s3259_s27 + $0x150] sm:$0xff] %v272_v42  ;;  %275 = vst [vmem:[%s3259_s27 + $0x158] sm:$0xff] %v274_v43  ;;  %v278_v45 = vld [vmem:[%s3254_s26 + $0x428] sm:$0xff]  ;;  %v280_v46 = vld [vmem:[%s3254_s26 + $0x450] sm:$0xff] }
  0x28   : > { %277 = vst [vmem:[%s3259_s27 + $0x160] sm:$0xff] %v276_v44  ;;  %v282_v47 = vld [vmem:[%s3254_s26 + $0x458] sm:$0xff]  ;;  %279 = vst [vmem:[%s3259_s27 + $0x168] sm:$0xff] %v278_v45  ;;  %v284_v48 = vld [vmem:[%s3254_s26 + $0x480] sm:$0xff] }
  0x29   : > { %281 = vst [vmem:[%s3259_s27 + $0x170] sm:$0xff] %v280_v46  ;;  %283 = vst [vmem:[%s3259_s27 + $0x178] sm:$0xff] %v282_v47  ;;  %v286_v49 = vld [vmem:[%s3254_s26 + $0x488] sm:$0xff]  ;;  %v288_v50 = vld [vmem:[%s3254_s26 + $0x4b0] sm:$0xff] }
  0x2a   : > { %285 = vst [vmem:[%s3259_s27 + $0x180] sm:$0xff] %v284_v48  ;;  %287 = vst [vmem:[%s3259_s27 + $0x188] sm:$0xff] %v286_v49  ;;  %v290_v51 = vld [vmem:[%s3254_s26 + $0x4b8] sm:$0xff]  ;;  %v292_v52 = vld [vmem:[%s3254_s26 + $0x4e0] sm:$0xff] }
  0x2b   : > { %289 = vst [vmem:[%s3259_s27 + $0x190] sm:$0xff] %v288_v50  ;;  %v294_v53 = vld [vmem:[%s3254_s26 + $0x4e8] sm:$0xff]  ;;  %291 = vst [vmem:[%s3259_s27 + $0x198] sm:$0xff] %v290_v51  ;;  %v296_v54 = vld [vmem:[%s3254_s26 + $0x510] sm:$0xff] }
  0x2c   : > { %293 = vst [vmem:[%s3259_s27 + $0x1a0] sm:$0xff] %v292_v52  ;;  %295 = vst [vmem:[%s3259_s27 + $0x1a8] sm:$0xff] %v294_v53  ;;  %v298_v55 = vld [vmem:[%s3254_s26 + $0x518] sm:$0xff]  ;;  %v300_v56 = vld [vmem:[%s3254_s26 + $0x540] sm:$0xff] }
  0x2d   : > { %297 = vst [vmem:[%s3259_s27 + $0x1b0] sm:$0xff] %v296_v54  ;;  %299 = vst [vmem:[%s3259_s27 + $0x1b8] sm:$0xff] %v298_v55  ;;  %v302_v57 = vld [vmem:[%s3254_s26 + $0x548] sm:$0xff]  ;;  %v304_v58 = vld [vmem:[%s3254_s26 + $0x570] sm:$0xff] }
  0x2e   : > { %301 = vst [vmem:[%s3259_s27 + $0x1c0] sm:$0xff] %v300_v56  ;;  %v306_v59 = vld [vmem:[%s3254_s26 + $0x578] sm:$0xff]  ;;  %303 = vst [vmem:[%s3259_s27 + $0x1c8] sm:$0xff] %v302_v57  ;;  %v308_v60 = vld [vmem:[%s3254_s26 + $0x5a0] sm:$0xff] }
  0x2f   : > { %305 = vst [vmem:[%s3259_s27 + $0x1d0] sm:$0xff] %v304_v58  ;;  %307 = vst [vmem:[%s3259_s27 + $0x1d8] sm:$0xff] %v306_v59  ;;  %v310_v61 = vld [vmem:[%s3254_s26 + $0x5a8] sm:$0xff]  ;;  %v312_v62 = vld [vmem:[%s3254_s26 + $0x5d0] sm:$0xff] }
  0x30   : > { %309 = vst [vmem:[%s3259_s27 + $0x1e0] sm:$0xff] %v308_v60  ;;  %311 = vst [vmem:[%s3259_s27 + $0x1e8] sm:$0xff] %v310_v61  ;;  %v314_v63 = vld [vmem:[%s3254_s26 + $0x5d8] sm:$0xff]  ;;  %v316_v0 = vld [vmem:[%s3254_s26 + $0x600] sm:$0xff] }
  0x31   : > { %313 = vst [vmem:[%s3259_s27 + $0x1f0] sm:$0xff] %v312_v62  ;;  %v318_v1 = vld [vmem:[%s3254_s26 + $0x608] sm:$0xff]  ;;  %315 = vst [vmem:[%s3259_s27 + $0x1f8] sm:$0xff] %v314_v63  ;;  %v320_v2 = vld [vmem:[%s3254_s26 + $0x630] sm:$0xff] }
  0x32   : > { %317 = vst [vmem:[%s3259_s27 + $0x200] sm:$0xff] %v316_v0  ;;  %319 = vst [vmem:[%s3259_s27 + $0x208] sm:$0xff] %v318_v1  ;;  %v322_v3 = vld [vmem:[%s3254_s26 + $0x638] sm:$0xff]  ;;  %v324_v4 = vld [vmem:[%s3254_s26 + $0x660] sm:$0xff] }
  0x33   : > { %321 = vst [vmem:[%s3259_s27 + $0x210] sm:$0xff] %v320_v2  ;;  %323 = vst [vmem:[%s3259_s27 + $0x218] sm:$0xff] %v322_v3  ;;  %v326_v5 = vld [vmem:[%s3254_s26 + $0x668] sm:$0xff]  ;;  %v328_v6 = vld [vmem:[%s3254_s26 + $0x690] sm:$0xff] }
  0x34   : > { %325 = vst [vmem:[%s3259_s27 + $0x220] sm:$0xff] %v324_v4  ;;  %v330_v7 = vld [vmem:[%s3254_s26 + $0x698] sm:$0xff]  ;;  %327 = vst [vmem:[%s3259_s27 + $0x228] sm:$0xff] %v326_v5  ;;  %v332_v8 = vld [vmem:[%s3254_s26 + $0x6c0] sm:$0xff] }
  0x35   : > { %329 = vst [vmem:[%s3259_s27 + $0x230] sm:$0xff] %v328_v6  ;;  %331 = vst [vmem:[%s3259_s27 + $0x238] sm:$0xff] %v330_v7  ;;  %v334_v9 = vld [vmem:[%s3254_s26 + $0x6c8] sm:$0xff]  ;;  %v336_v10 = vld [vmem:[%s3254_s26 + $0x6f0] sm:$0xff] }
  0x36   : > { %333 = vst [vmem:[%s3259_s27 + $0x240] sm:$0xff] %v332_v8  ;;  %335 = vst [vmem:[%s3259_s27 + $0x248] sm:$0xff] %v334_v9  ;;  %v338_v11 = vld [vmem:[%s3254_s26 + $0x6f8] sm:$0xff]  ;;  %v340_v12 = vld [vmem:[%s3254_s26 + $0x720] sm:$0xff] }
  0x37   : > { %337 = vst [vmem:[%s3259_s27 + $0x250] sm:$0xff] %v336_v10  ;;  %v342_v13 = vld [vmem:[%s3254_s26 + $0x728] sm:$0xff]  ;;  %339 = vst [vmem:[%s3259_s27 + $0x258] sm:$0xff] %v338_v11  ;;  %v344_v14 = vld [vmem:[%s3254_s26 + $0x750] sm:$0xff] }
  0x38   : > { %341 = vst [vmem:[%s3259_s27 + $0x260] sm:$0xff] %v340_v12  ;;  %343 = vst [vmem:[%s3259_s27 + $0x268] sm:$0xff] %v342_v13  ;;  %v346_v15 = vld [vmem:[%s3254_s26 + $0x758] sm:$0xff]  ;;  %v348_v16 = vld [vmem:[%s3254_s26 + $0x780] sm:$0xff] }
  0x39   : > { %345 = vst [vmem:[%s3259_s27 + $0x270] sm:$0xff] %v344_v14  ;;  %347 = vst [vmem:[%s3259_s27 + $0x278] sm:$0xff] %v346_v15  ;;  %v350_v17 = vld [vmem:[%s3254_s26 + $0x788] sm:$0xff]  ;;  %v352_v18 = vld [vmem:[%s3254_s26 + $0x7b0] sm:$0xff] }
  0x3a   : > { %349 = vst [vmem:[%s3259_s27 + $0x280] sm:$0xff] %v348_v16  ;;  %v354_v19 = vld [vmem:[%s3254_s26 + $0x7b8] sm:$0xff]  ;;  %351 = vst [vmem:[%s3259_s27 + $0x288] sm:$0xff] %v350_v17  ;;  %v356_v20 = vld [vmem:[%s3254_s26 + $0x7e0] sm:$0xff] }
  0x3b   : > { %353 = vst [vmem:[%s3259_s27 + $0x290] sm:$0xff] %v352_v18  ;;  %355 = vst [vmem:[%s3259_s27 + $0x298] sm:$0xff] %v354_v19  ;;  %v358_v21 = vld [vmem:[%s3254_s26 + $0x7e8] sm:$0xff]  ;;  %v360_v22 = vld [vmem:[%s3254_s26 + $0x810] sm:$0xff] }
  0x3c   : > { %357 = vst [vmem:[%s3259_s27 + $0x2a0] sm:$0xff] %v356_v20  ;;  %359 = vst [vmem:[%s3259_s27 + $0x2a8] sm:$0xff] %v358_v21  ;;  %v362_v23 = vld [vmem:[%s3254_s26 + $0x818] sm:$0xff]  ;;  %v364_v24 = vld [vmem:[%s3254_s26 + $0x840] sm:$0xff] }
  0x3d   : > { %361 = vst [vmem:[%s3259_s27 + $0x2b0] sm:$0xff] %v360_v22  ;;  %v366_v25 = vld [vmem:[%s3254_s26 + $0x848] sm:$0xff]  ;;  %363 = vst [vmem:[%s3259_s27 + $0x2b8] sm:$0xff] %v362_v23  ;;  %v368_v26 = vld [vmem:[%s3254_s26 + $0x870] sm:$0xff] }
  0x3e   : > { %365 = vst [vmem:[%s3259_s27 + $0x2c0] sm:$0xff] %v364_v24  ;;  %367 = vst [vmem:[%s3259_s27 + $0x2c8] sm:$0xff] %v366_v25  ;;  %v370_v27 = vld [vmem:[%s3254_s26 + $0x878] sm:$0xff]  ;;  %v372_v28 = vld [vmem:[%s3254_s26 + $0x8a0] sm:$0xff] }
  0x3f   : > { %369 = vst [vmem:[%s3259_s27 + $0x2d0] sm:$0xff] %v368_v26  ;;  %371 = vst [vmem:[%s3259_s27 + $0x2d8] sm:$0xff] %v370_v27  ;;  %v374_v29 = vld [vmem:[%s3254_s26 + $0x8a8] sm:$0xff]  ;;  %v376_v30 = vld [vmem:[%s3254_s26 + $0x8d0] sm:$0xff] }
  0x40   : > { %373 = vst [vmem:[%s3259_s27 + $0x2e0] sm:$0xff] %v372_v28  ;;  %v378_v31 = vld [vmem:[%s3254_s26 + $0x8d8] sm:$0xff]  ;;  %375 = vst [vmem:[%s3259_s27 + $0x2e8] sm:$0xff] %v374_v29  ;;  %v380_v32 = vld [vmem:[%s3254_s26 + $0x900] sm:$0xff] }
  0x41   : > { %377 = vst [vmem:[%s3259_s27 + $0x2f0] sm:$0xff] %v376_v30  ;;  %379 = vst [vmem:[%s3259_s27 + $0x2f8] sm:$0xff] %v378_v31  ;;  %v382_v33 = vld [vmem:[%s3254_s26 + $0x908] sm:$0xff]  ;;  %v384_v34 = vld [vmem:[%s3254_s26 + $0x930] sm:$0xff] }
  0x42   : > { %381 = vst [vmem:[%s3259_s27 + $0x300] sm:$0xff] %v380_v32  ;;  %383 = vst [vmem:[%s3259_s27 + $0x308] sm:$0xff] %v382_v33  ;;  %v386_v35 = vld [vmem:[%s3254_s26 + $0x938] sm:$0xff]  ;;  %v388_v36 = vld [vmem:[%s3254_s26 + $0x960] sm:$0xff] }
  0x43   : > { %385 = vst [vmem:[%s3259_s27 + $0x310] sm:$0xff] %v384_v34  ;;  %v390_v37 = vld [vmem:[%s3254_s26 + $0x968] sm:$0xff]  ;;  %387 = vst [vmem:[%s3259_s27 + $0x318] sm:$0xff] %v386_v35  ;;  %v392_v38 = vld [vmem:[%s3254_s26 + $0x990] sm:$0xff] }
  0x44   : > { %389 = vst [vmem:[%s3259_s27 + $0x320] sm:$0xff] %v388_v36  ;;  %391 = vst [vmem:[%s3259_s27 + $0x328] sm:$0xff] %v390_v37  ;;  %v394_v39 = vld [vmem:[%s3254_s26 + $0x998] sm:$0xff]  ;;  %v396_v40 = vld [vmem:[%s3254_s26 + $0x9c0] sm:$0xff] }
  0x45   : > { %393 = vst [vmem:[%s3259_s27 + $0x330] sm:$0xff] %v392_v38  ;;  %395 = vst [vmem:[%s3259_s27 + $0x338] sm:$0xff] %v394_v39  ;;  %v398_v41 = vld [vmem:[%s3254_s26 + $0x9c8] sm:$0xff]  ;;  %v400_v42 = vld [vmem:[%s3254_s26 + $0x9f0] sm:$0xff] }
  0x46   : > { %397 = vst [vmem:[%s3259_s27 + $0x340] sm:$0xff] %v396_v40  ;;  %v402_v43 = vld [vmem:[%s3254_s26 + $0x9f8] sm:$0xff]  ;;  %399 = vst [vmem:[%s3259_s27 + $0x348] sm:$0xff] %v398_v41  ;;  %v404_v44 = vld [vmem:[%s3254_s26 + $0xa20] sm:$0xff] }
  0x47   : > { %401 = vst [vmem:[%s3259_s27 + $0x350] sm:$0xff] %v400_v42  ;;  %403 = vst [vmem:[%s3259_s27 + $0x358] sm:$0xff] %v402_v43  ;;  %v406_v45 = vld [vmem:[%s3254_s26 + $0xa28] sm:$0xff]  ;;  %v408_v46 = vld [vmem:[%s3254_s26 + $0xa50] sm:$0xff] }
  0x48   : > { %405 = vst [vmem:[%s3259_s27 + $0x360] sm:$0xff] %v404_v44  ;;  %407 = vst [vmem:[%s3259_s27 + $0x368] sm:$0xff] %v406_v45  ;;  %v410_v47 = vld [vmem:[%s3254_s26 + $0xa58] sm:$0xff]  ;;  %v412_v48 = vld [vmem:[%s3254_s26 + $0xa80] sm:$0xff] }
  0x49   : > { %409 = vst [vmem:[%s3259_s27 + $0x370] sm:$0xff] %v408_v46  ;;  %v414_v49 = vld [vmem:[%s3254_s26 + $0xa88] sm:$0xff]  ;;  %411 = vst [vmem:[%s3259_s27 + $0x378] sm:$0xff] %v410_v47  ;;  %v416_v50 = vld [vmem:[%s3254_s26 + $0xab0] sm:$0xff] }
  0x4a   : > { %413 = vst [vmem:[%s3259_s27 + $0x380] sm:$0xff] %v412_v48  ;;  %415 = vst [vmem:[%s3259_s27 + $0x388] sm:$0xff] %v414_v49  ;;  %v418_v51 = vld [vmem:[%s3254_s26 + $0xab8] sm:$0xff]  ;;  %v420_v52 = vld [vmem:[%s3254_s26 + $0xae0] sm:$0xff] }
  0x4b   : > { %417 = vst [vmem:[%s3259_s27 + $0x390] sm:$0xff] %v416_v50  ;;  %419 = vst [vmem:[%s3259_s27 + $0x398] sm:$0xff] %v418_v51  ;;  %v422_v53 = vld [vmem:[%s3254_s26 + $0xae8] sm:$0xff]  ;;  %v424_v54 = vld [vmem:[%s3254_s26 + $0xb10] sm:$0xff] }
  0x4c   : > { %421 = vst [vmem:[%s3259_s27 + $0x3a0] sm:$0xff] %v420_v52  ;;  %v426_v55 = vld [vmem:[%s3254_s26 + $0xb18] sm:$0xff]  ;;  %423 = vst [vmem:[%s3259_s27 + $0x3a8] sm:$0xff] %v422_v53  ;;  %v428_v56 = vld [vmem:[%s3254_s26 + $0xb40] sm:$0xff] }
  0x4d   : > { %425 = vst [vmem:[%s3259_s27 + $0x3b0] sm:$0xff] %v424_v54  ;;  %427 = vst [vmem:[%s3259_s27 + $0x3b8] sm:$0xff] %v426_v55  ;;  %v430_v57 = vld [vmem:[%s3254_s26 + $0xb48] sm:$0xff]  ;;  %v432_v58 = vld [vmem:[%s3254_s26 + $0xb70] sm:$0xff] }
  0x4e   : > { %429 = vst [vmem:[%s3259_s27 + $0x3c0] sm:$0xff] %v428_v56  ;;  %431 = vst [vmem:[%s3259_s27 + $0x3c8] sm:$0xff] %v430_v57  ;;  %v434_v59 = vld [vmem:[%s3254_s26 + $0xb78] sm:$0xff]  ;;  %v436_v60 = vld [vmem:[%s3254_s26 + $0xba0] sm:$0xff] }
  0x4f   : > { %433 = vst [vmem:[%s3259_s27 + $0x3d0] sm:$0xff] %v432_v58  ;;  %v438_v61 = vld [vmem:[%s3254_s26 + $0xba8] sm:$0xff]  ;;  %435 = vst [vmem:[%s3259_s27 + $0x3d8] sm:$0xff] %v434_v59  ;;  %v440_v62 = vld [vmem:[%s3254_s26 + $0xbd0] sm:$0xff] }
  0x50   : > { %437 = vst [vmem:[%s3259_s27 + $0x3e0] sm:$0xff] %v436_v60  ;;  %439 = vst [vmem:[%s3259_s27 + $0x3e8] sm:$0xff] %v438_v61  ;;  %v442_v63 = vld [vmem:[%s3254_s26 + $0xbd8] sm:$0xff] }
  0x51   : > { %441 = vst [vmem:[%s3259_s27 + $0x3f0] sm:$0xff] %v440_v62  ;;  %443 = vst [vmem:[%s3259_s27 + $0x3f8] sm:$0xff] %v442_v63 }
  0x52 PF: > { %p2711_p6 = scmp.ge.s32.totalorder %s3187_s16, 1  ;;  %p460_p7 = scmp.lt.s32.totalorder %s3187_s16, 4 }
  0x54   : > { %p461_p8 = pnand %p2711_p6, %p460_p7 }
  0x55   : > { %s467_s28 = sand.u32 (!%p461_p8), 1, %s3171_s12   ;;  %s2713_s29 = sshll.u32 (!%p461_p8), %s3179_s14, 6 }
  0x56   : > { %464 = sbr.rel (%p461_p8) target bundleno = 669 (0x29d), region = 51  ;;  %s2712_s30 = sshll.u32 (!%p461_p8), %s467_s28, 10 }
  0x57   : > { %p507_p9 = scmp.lt.s32.totalorder (!%p461_p8), %s2713_s29, 191  ;;  %s3523_s8 = scalar_lea.vmem (!%p461_p8), [#allocation2], %s2712_s30 }
  0x58   : > { %p2715_p10 = scmp.ne.s32.totalorder (!%p461_p8), %s3179_s14, 0 }
  0x5d   : > { %s4838_s29 = smov (!%p507_p9, %s2713_s29), 191  ;;  %531 = sbr.rel (%p2715_p10) target bundleno = 127 (0x7f), region = 59 }
  0x5e   : > { %s2714_s4 = sshll.u32 %s4838_s29, 2  ;;  %v3189_v0 = vmov (!%p2715_p10), 0.0  }
  0x5f   : > { %s3521_s7 = scalar_lea.vmem %s4828_s1, %s2714_s4  ;;  %532 = vst [vmem:[%s4830_s3] sm:$0xff] (!%p2715_p10), %v3189_v0  ;;  %533 = vst [vmem:[%s4830_s3 + $0x8] sm:$0xff] (!%p2715_p10), %v3189_v0 }
  0x60   : > { %534 = vst [vmem:[%s4830_s3 + $0x10] sm:$0xff] (!%p2715_p10), %v3189_v0  ;;  %535 = vst [vmem:[%s4830_s3 + $0x18] sm:$0xff] (!%p2715_p10), %v3189_v0 }
  0x61   : > { %536 = vst [vmem:[%s4830_s3 + $0x20] sm:$0xff] (!%p2715_p10), %v3189_v0  ;;  %537 = vst [vmem:[%s4830_s3 + $0x28] sm:$0xff] (!%p2715_p10), %v3189_v0 }
  0x62   : > { %538 = vst [vmem:[%s4830_s3 + $0x30] sm:$0xff] (!%p2715_p10), %v3189_v0  ;;  %539 = vst [vmem:[%s4830_s3 + $0x38] sm:$0xff] (!%p2715_p10), %v3189_v0 }
  0x63   : > { %540 = vst [vmem:[%s4830_s3 + $0x40] sm:$0xff] (!%p2715_p10), %v3189_v0  ;;  %541 = vst [vmem:[%s4830_s3 + $0x48] sm:$0xff] (!%p2715_p10), %v3189_v0 }
  0x64   : > { %542 = vst [vmem:[%s4830_s3 + $0x50] sm:$0xff] %v3189_v0  ;;  %543 = vst [vmem:[%s4830_s3 + $0x58] sm:$0xff] %v3189_v0 }
  0x65   : > { %544 = vst [vmem:[%s4830_s3 + $0x60] sm:$0xff] %v3189_v0  ;;  %545 = vst [vmem:[%s4830_s3 + $0x68] sm:$0xff] %v3189_v0 }
  0x66   : > { %546 = vst [vmem:[%s4830_s3 + $0x70] sm:$0xff] %v3189_v0  ;;  %547 = vst [vmem:[%s4830_s3 + $0x78] sm:$0xff] %v3189_v0 }
  0x67   : > { %548 = vst [vmem:[%s4830_s3 + $0x80] sm:$0xff] %v3189_v0  ;;  %549 = vst [vmem:[%s4830_s3 + $0x88] sm:$0xff] %v3189_v0 }
  0x68   : > { %550 = vst [vmem:[%s4830_s3 + $0x90] sm:$0xff] %v3189_v0  ;;  %551 = vst [vmem:[%s4830_s3 + $0x98] sm:$0xff] %v3189_v0 }
  0x69   : > { %552 = vst [vmem:[%s4830_s3 + $0xa0] sm:$0xff] %v3189_v0  ;;  %553 = vst [vmem:[%s4830_s3 + $0xa8] sm:$0xff] %v3189_v0 }
  0x6a   : > { %554 = vst [vmem:[%s4830_s3 + $0xb0] sm:$0xff] %v3189_v0  ;;  %555 = vst [vmem:[%s4830_s3 + $0xb8] sm:$0xff] %v3189_v0 }
  0x6b   : > { %556 = vst [vmem:[%s4830_s3 + $0xc0] sm:$0xff] %v3189_v0  ;;  %557 = vst [vmem:[%s4830_s3 + $0xc8] sm:$0xff] %v3189_v0 }
  0x6c   : > { %558 = vst [vmem:[%s4830_s3 + $0xd0] sm:$0xff] %v3189_v0  ;;  %559 = vst [vmem:[%s4830_s3 + $0xd8] sm:$0xff] %v3189_v0 }
  0x6d   : > { %560 = vst [vmem:[%s4830_s3 + $0xe0] sm:$0xff] %v3189_v0  ;;  %561 = vst [vmem:[%s4830_s3 + $0xe8] sm:$0xff] %v3189_v0 }
  0x6e   : > { %562 = vst [vmem:[%s4830_s3 + $0xf0] sm:$0xff] %v3189_v0  ;;  %563 = vst [vmem:[%s4830_s3 + $0xf8] sm:$0xff] %v3189_v0 }
  0x6f   : > { %564 = vst [vmem:[%s4830_s3 + $0x100] sm:$0xff] %v3189_v0  ;;  %565 = vst [vmem:[%s4830_s3 + $0x108] sm:$0xff] %v3189_v0 }
  0x70   : > { %566 = vst [vmem:[%s4830_s3 + $0x110] sm:$0xff] %v3189_v0  ;;  %567 = vst [vmem:[%s4830_s3 + $0x118] sm:$0xff] %v3189_v0 }
  0x71   : > { %568 = vst [vmem:[%s4830_s3 + $0x120] sm:$0xff] %v3189_v0  ;;  %569 = vst [vmem:[%s4830_s3 + $0x128] sm:$0xff] %v3189_v0 }
  0x72   : > { %570 = vst [vmem:[%s4830_s3 + $0x130] sm:$0xff] %v3189_v0  ;;  %571 = vst [vmem:[%s4830_s3 + $0x138] sm:$0xff] %v3189_v0 }
  0x73   : > { %572 = vst [vmem:[%s4830_s3 + $0x140] sm:$0xff] %v3189_v0  ;;  %573 = vst [vmem:[%s4830_s3 + $0x148] sm:$0xff] %v3189_v0 }
  0x74   : > { %574 = vst [vmem:[%s4830_s3 + $0x150] sm:$0xff] %v3189_v0  ;;  %575 = vst [vmem:[%s4830_s3 + $0x158] sm:$0xff] %v3189_v0 }
  0x75   : > { %576 = vst [vmem:[%s4830_s3 + $0x160] sm:$0xff] %v3189_v0  ;;  %577 = vst [vmem:[%s4830_s3 + $0x168] sm:$0xff] %v3189_v0 }
  0x76   : > { %578 = vst [vmem:[%s4830_s3 + $0x170] sm:$0xff] %v3189_v0  ;;  %579 = vst [vmem:[%s4830_s3 + $0x178] sm:$0xff] %v3189_v0 }
  0x77   : > { %580 = vst [vmem:[%s4830_s3 + $0x180] sm:$0xff] %v3189_v0  ;;  %581 = vst [vmem:[%s4830_s3 + $0x188] sm:$0xff] %v3189_v0 }
  0x78   : > { %582 = vst [vmem:[%s4830_s3 + $0x190] sm:$0xff] %v3189_v0  ;;  %583 = vst [vmem:[%s4830_s3 + $0x198] sm:$0xff] %v3189_v0 }
  0x79   : > { %584 = vst [vmem:[%s4830_s3 + $0x1a0] sm:$0xff] %v3189_v0  ;;  %585 = vst [vmem:[%s4830_s3 + $0x1a8] sm:$0xff] %v3189_v0 }
  0x7a   : > { %586 = vst [vmem:[%s4830_s3 + $0x1b0] sm:$0xff] %v3189_v0  ;;  %587 = vst [vmem:[%s4830_s3 + $0x1b8] sm:$0xff] %v3189_v0 }
  0x7b   : > { %588 = vst [vmem:[%s4830_s3 + $0x1c0] sm:$0xff] %v3189_v0  ;;  %589 = vst [vmem:[%s4830_s3 + $0x1c8] sm:$0xff] %v3189_v0 }
  0x7c   : > { %590 = vst [vmem:[%s4830_s3 + $0x1d0] sm:$0xff] %v3189_v0  ;;  %591 = vst [vmem:[%s4830_s3 + $0x1d8] sm:$0xff] %v3189_v0 }
  0x7d   : > { %592 = vst [vmem:[%s4830_s3 + $0x1e0] sm:$0xff] %v3189_v0  ;;  %593 = vst [vmem:[%s4830_s3 + $0x1e8] sm:$0xff] %v3189_v0 }
  0x7e   : > { %594 = vst [vmem:[%s4830_s3 + $0x1f0] sm:$0xff] %v3189_v0  ;;  %595 = vst [vmem:[%s4830_s3 + $0x1f8] sm:$0xff] %v3189_v0 }
  0x7f PF: > { %v2925_v1 = vld [vmem:[%s3521_s7] sm:$0xff]   ;;  %v3190_v2 = vmov 0   ;;  %v2927_v4 = vld [vmem:[%s3521_s7 + $0x8] sm:$0xff]   ;;  %v2929_v6 = vld [vmem:[%s3521_s7 + $0x10] sm:$0xff]   ;;  %p2876_p11 = scmp.ne.s32.totalorder %s3179_s14, 2 }
  0x80   : > { %1684 = vmatprep.subr.bf16.mxu0 %v3190_v2  ;;  %1973 = vmatprep.subr.bf16.mxu1 %v3190_v2  ;;  %v2926_v3 = vld [vmem:[%s3521_s7 + $0x80] sm:$0xff]   ;;  %v2928_v5 = vld [vmem:[%s3521_s7 + $0x88] sm:$0xff]   ;;  %v2930_v7 = vld [vmem:[%s3521_s7 + $0x90] sm:$0xff]  }
  0x81   : > { %1685 = vmatpush1.bf16.msra.mxu0 %v2925_v1  ;;  %1974 = vmatpush1.bf16.msra.mxu1 %v2926_v3  ;;  %v2931_v8 = vld [vmem:[%s3521_s7 + $0x18] sm:$0xff]   ;;  %v2933_v10 = vld [vmem:[%s3521_s7 + $0x20] sm:$0xff]   ;;  %v2935_v12 = vld [vmem:[%s3521_s7 + $0x28] sm:$0xff]  }
  0x82   : > { %1686 = vmatprep.subr.bf16.mxu0 %v3190_v2  ;;  %1975 = vmatprep.subr.bf16.mxu1 %v3190_v2  ;;  %v2932_v9 = vld [vmem:[%s3521_s7 + $0x98] sm:$0xff]   ;;  %v2934_v11 = vld [vmem:[%s3521_s7 + $0xa0] sm:$0xff]   ;;  %v2936_v13 = vld [vmem:[%s3521_s7 + $0xa8] sm:$0xff]  }
  0x83   : > { %v2937_v14 = vld [vmem:[%s3521_s7 + $0x30] sm:$0xff]   ;;  %v2939_v16 = vld [vmem:[%s3521_s7 + $0x38] sm:$0xff]   ;;  %v2941_v18 = vld [vmem:[%s3521_s7 + $0x40] sm:$0xff]  }
  0x84   : > { %v2938_v15 = vld [vmem:[%s3521_s7 + $0xb0] sm:$0xff]   ;;  %v2940_v17 = vld [vmem:[%s3521_s7 + $0xb8] sm:$0xff]   ;;  %v2942_v19 = vld [vmem:[%s3521_s7 + $0xc0] sm:$0xff]  }
  0x85   : > { %1687 = vmatpush1.bf16.msra.mxu0 %v2927_v4  ;;  %1976 = vmatpush1.bf16.msra.mxu1 %v2928_v5  ;;  %v2959_v20 = vld [vmem:[%s3523_s8 + $0x4] ss:$16 sps:$4 sm:$0xff]   ;;  %v2943_v21 = vld [vmem:[%s3521_s7 + $0x48] sm:$0xff]   ;;  %v2947_v26 = vld [vmem:[%s3521_s7 + $0x58] sm:$0xff]  }
  0x86   : > { %1688 = vmatprep.subr.bf16.mxu0 %v3190_v2  ;;  %1977 = vmatprep.subr.bf16.mxu1 %v3190_v2  ;;  %v2962_v22 = vld [vmem:[%s3523_s8 + $0xc] ss:$16 sps:$4 sm:$0xff]   ;;  %v2945_v24 = vld [vmem:[%s3521_s7 + $0x50] sm:$0xff]   ;;  %v2949_v28 = vld [vmem:[%s3521_s7 + $0x60] sm:$0xff]  }
  0x87   : > { %v2944_v23 = vld [vmem:[%s3521_s7 + $0xc8] sm:$0xff]   ;;  %1716 = vmatprep.mubr.bf16.mxu0 %v2959_v20  ;;  %2005 = vmatprep.mubr.bf16.mxu1 %v2962_v22  ;;  %v2946_v25 = vld [vmem:[%s3521_s7 + $0xd0] sm:$0xff]   ;;  %v2948_v27 = vld [vmem:[%s3521_s7 + $0xd8] sm:$0xff]  }
  0x88   : > { %v2950_v29 = vld [vmem:[%s3521_s7 + $0xe0] sm:$0xff]   ;;  %v2951_v30 = vld [vmem:[%s3521_s7 + $0x68] sm:$0xff]   ;;  %v2953_v32 = vld [vmem:[%s3521_s7 + $0x70] sm:$0xff]  }
  0x89   : > { %1689 = vmatpush1.bf16.msra.mxu0 %v2929_v6  ;;  %1978 = vmatpush1.bf16.msra.mxu1 %v2930_v7  ;;  %v2952_v31 = vld [vmem:[%s3521_s7 + $0xe8] sm:$0xff]   ;;  %v2954_v33 = vld [vmem:[%s3521_s7 + $0xf0] sm:$0xff]   ;;  %v2955_v34 = vld [vmem:[%s3521_s7 + $0x78] sm:$0xff]  }
  0x8a   : > { %1690 = vmatprep.subr.bf16.mxu0 %v3190_v2  ;;  %1979 = vmatprep.subr.bf16.mxu1 %v3190_v2  ;;  %v2956_v35 = vld [vmem:[%s3521_s7 + $0xf8] sm:$0xff]   ;;  %v2957_v36 = vld [vmem:[%s3523_s8] ss:$16 sps:$4 sm:$0xff]   ;;  %v2963_v38 = vld [vmem:[%s3523_s8 + $0x24] ss:$16 sps:$4 sm:$0xff]  }
  0x8b   : > { %v2960_v37 = vld [vmem:[%s3523_s8 + $0x8] ss:$16 sps:$4 sm:$0xff]   ;;  %v2965_v39 = vld [vmem:[%s3523_s8 + $0x2c] ss:$16 sps:$4 sm:$0xff]   ;;  %v2967_v40 = vld [vmem:[%s3523_s8 + $0x20] ss:$16 sps:$4 sm:$0xff]  }
  0x8c   : > { %v2968_v41 = vld [vmem:[%s3523_s8 + $0x28] ss:$16 sps:$4 sm:$0xff]   ;;  %v2969_v42 = vld [vmem:[%s3523_s8 + $0x44] ss:$16 sps:$4 sm:$0xff]   ;;  %v2971_v43 = vld [vmem:[%s3523_s8 + $0x4c] ss:$16 sps:$4 sm:$0xff]  }
  0x8d   : > { %1691 = vmatpush1.bf16.msra.mxu0 %v2931_v8  ;;  %1980 = vmatpush1.bf16.msra.mxu1 %v2932_v9  ;;  %v2973_v44 = vld [vmem:[%s3523_s8 + $0x40] ss:$16 sps:$4 sm:$0xff]   ;;  %v2974_v45 = vld [vmem:[%s3523_s8 + $0x48] ss:$16 sps:$4 sm:$0xff]   ;;  %v2975_v46 = vld [vmem:[%s3523_s8 + $0x64] ss:$16 sps:$4 sm:$0xff]  }
  0x8e   : > { %1692 = vmatprep.subr.bf16.mxu0 %v3190_v2  ;;  %1981 = vmatprep.subr.bf16.mxu1 %v3190_v2  ;;  %v2977_v47 = vld [vmem:[%s3523_s8 + $0x6c] ss:$16 sps:$4 sm:$0xff]   ;;  %v2979_v48 = vld [vmem:[%s3523_s8 + $0x60] ss:$16 sps:$4 sm:$0xff]   ;;  %v2980_v49 = vld [vmem:[%s3523_s8 + $0x68] ss:$16 sps:$4 sm:$0xff]  }
  0x8f   : > { %v2981_v50 = vld [vmem:[%s3523_s8 + $0x84] ss:$16 sps:$4 sm:$0xff]   ;;  %v2983_v51 = vld [vmem:[%s3523_s8 + $0x8c] ss:$16 sps:$4 sm:$0xff]   ;;  %v2985_v52 = vld [vmem:[%s3523_s8 + $0x80] ss:$16 sps:$4 sm:$0xff]  }
  0x90   : > { %v2986_v53 = vld [vmem:[%s3523_s8 + $0x88] ss:$16 sps:$4 sm:$0xff]   ;;  %v2987_v54 = vld [vmem:[%s3523_s8 + $0xa4] ss:$16 sps:$4 sm:$0xff]   ;;  %v2989_v55 = vld [vmem:[%s3523_s8 + $0xac] ss:$16 sps:$4 sm:$0xff]  }
  0x91   : > { %1693 = vmatpush1.bf16.msra.mxu0 %v2933_v10  ;;  %1982 = vmatpush1.bf16.msra.mxu1 %v2934_v11  ;;  %v2991_v56 = vld [vmem:[%s3523_s8 + $0xa0] ss:$16 sps:$4 sm:$0xff]   ;;  %v2992_v57 = vld [vmem:[%s3523_s8 + $0xa8] ss:$16 sps:$4 sm:$0xff]   ;;  %v2993_v58 = vld [vmem:[%s3523_s8 + $0xc4] ss:$16 sps:$4 sm:$0xff]  }
  0x92   : > { %1694 = vmatprep.subr.bf16.mxu0 %v3190_v2  ;;  %1983 = vmatprep.subr.bf16.mxu1 %v3190_v2  ;;  %v2995_v59 = vld [vmem:[%s3523_s8 + $0xcc] ss:$16 sps:$4 sm:$0xff]   ;;  %v2997_v60 = vld [vmem:[%s3523_s8 + $0xc0] ss:$16 sps:$4 sm:$0xff]   ;;  %v2998_v61 = vld [vmem:[%s3523_s8 + $0xc8] ss:$16 sps:$4 sm:$0xff]  }
  0x93   : > { %v2999_v62 = vld [vmem:[%s3523_s8 + $0xe4] ss:$16 sps:$4 sm:$0xff]   ;;  %v3001_v63 = vld [vmem:[%s3523_s8 + $0xec] ss:$16 sps:$4 sm:$0xff]   ;;  %v3003_v0 = vld [vmem:[%s3523_s8 + $0xe0] ss:$16 sps:$4 sm:$0xff]  }
  0x94   : > { %v3004_v1 = vld [vmem:[%s3523_s8 + $0xe8] ss:$16 sps:$4 sm:$0xff]   ;;  %v3007_v3 = vld [vmem:[%s3523_s8 + $0x10c] ss:$16 sps:$4 sm:$0xff]   ;;  %v3009_v4 = vld [vmem:[%s3523_s8 + $0x100] ss:$16 sps:$4 sm:$0xff]  }
  0x95   : > { %1695 = vmatpush1.bf16.msra.mxu0 %v2935_v12  ;;  %1984 = vmatpush1.bf16.msra.mxu1 %v2936_v13  ;;  %v3010_v5 = vld [vmem:[%s3523_s8 + $0x108] ss:$16 sps:$4 sm:$0xff]   ;;  %v3011_v6 = vld [vmem:[%s3523_s8 + $0x124] ss:$16 sps:$4 sm:$0xff]   ;;  %v3013_v7 = vld [vmem:[%s3523_s8 + $0x12c] ss:$16 sps:$4 sm:$0xff]  }
  0x96   : > { %1696 = vmatprep.subr.bf16.mxu0 %v3190_v2  ;;  %1985 = vmatprep.subr.bf16.mxu1 %v3190_v2  ;;  %v3015_v8 = vld [vmem:[%s3523_s8 + $0x120] ss:$16 sps:$4 sm:$0xff]   ;;  %v3016_v9 = vld [vmem:[%s3523_s8 + $0x128] ss:$16 sps:$4 sm:$0xff]   ;;  %v3017_v10 = vld [vmem:[%s3523_s8 + $0x144] ss:$16 sps:$4 sm:$0xff]  }
  0x97   : > { %v3019_v11 = vld [vmem:[%s3523_s8 + $0x14c] ss:$16 sps:$4 sm:$0xff]   ;;  %v3021_v12 = vld [vmem:[%s3523_s8 + $0x140] ss:$16 sps:$4 sm:$0xff]   ;;  %v3022_v13 = vld [vmem:[%s3523_s8 + $0x148] ss:$16 sps:$4 sm:$0xff]  }
  0x98   : > { %v3033_v20 = vld [vmem:[%s3523_s8 + $0x180] ss:$16 sps:$4 sm:$0xff]   ;;  %v3035_v22 = vld [vmem:[%s3523_s8 + $0x1a4] ss:$16 sps:$4 sm:$0xff]  }
  0x99   : > { %1697 = vmatpush1.bf16.msra.mxu0 %v2937_v14  ;;  %1986 = vmatpush1.bf16.msra.mxu1 %v2938_v15  ;;  %v3023_v14 = vld [vmem:[%s3523_s8 + $0x164] ss:$16 sps:$4 sm:$0xff]   ;;  %v3025_v15 = vld [vmem:[%s3523_s8 + $0x16c] ss:$16 sps:$4 sm:$0xff]  }
  0x9a   : > { %1698 = vmatprep.subr.bf16.mxu0 %v3190_v2  ;;  %1987 = vmatprep.subr.bf16.mxu1 %v3190_v2 }
  0x9d   : > { %1699 = vmatpush1.bf16.msra.mxu0 %v2939_v16  ;;  %1988 = vmatpush1.bf16.msra.mxu1 %v2940_v17  ;;  %v3027_v16 = vld [vmem:[%s3523_s8 + $0x160] ss:$16 sps:$4 sm:$0xff]   ;;  %v3028_v17 = vld [vmem:[%s3523_s8 + $0x168] ss:$16 sps:$4 sm:$0xff]  }
  0x9e   : > { %1700 = vmatprep.subr.bf16.mxu0 %v3190_v2  ;;  %1989 = vmatprep.subr.bf16.mxu1 %v3190_v2 }
  0xa1   : > { %1701 = vmatpush1.bf16.msra.mxu0 %v2941_v18  ;;  %1990 = vmatpush1.bf16.msra.mxu1 %v2942_v19  ;;  %v3029_v18 = vld [vmem:[%s3523_s8 + $0x184] ss:$16 sps:$4 sm:$0xff]   ;;  %v3031_v19 = vld [vmem:[%s3523_s8 + $0x18c] ss:$16 sps:$4 sm:$0xff]  }
  0xa2   : > { %1702 = vmatprep.subr.bf16.mxu0 %v3190_v2  ;;  %1991 = vmatprep.subr.bf16.mxu1 %v3190_v2 }
  0xa5   : > { %1703 = vmatpush1.bf16.msra.mxu0 %v2943_v21  ;;  %1992 = vmatpush1.bf16.msra.mxu1 %v2944_v23  ;;  %v3034_v21 = vld [vmem:[%s3523_s8 + $0x188] ss:$16 sps:$4 sm:$0xff]   ;;  %v3037_v23 = vld [vmem:[%s3523_s8 + $0x1ac] ss:$16 sps:$4 sm:$0xff]  }
  0xa6   : > { %1704 = vmatprep.subr.bf16.mxu0 %v3190_v2  ;;  %1993 = vmatprep.subr.bf16.mxu1 %v3190_v2 }
  0xa9   : > { %1705 = vmatpush1.bf16.msra.mxu0 %v2945_v24  ;;  %1994 = vmatpush1.bf16.msra.mxu1 %v2946_v25  ;;  %v3039_v24 = vld [vmem:[%s3523_s8 + $0x1a0] ss:$16 sps:$4 sm:$0xff]   ;;  %v3040_v25 = vld [vmem:[%s3523_s8 + $0x1a8] ss:$16 sps:$4 sm:$0xff]  }
  0xaa   : > { %1706 = vmatprep.subr.bf16.mxu0 %v3190_v2  ;;  %1995 = vmatprep.subr.bf16.mxu1 %v3190_v2 }
  0xad   : > { %1707 = vmatpush1.bf16.msra.mxu0 %v2947_v26  ;;  %1996 = vmatpush1.bf16.msra.mxu1 %v2948_v27  ;;  %v3041_v26 = vld [vmem:[%s3523_s8 + $0x1c4] ss:$16 sps:$4 sm:$0xff]   ;;  %v3043_v27 = vld [vmem:[%s3523_s8 + $0x1cc] ss:$16 sps:$4 sm:$0xff]  }
  0xae   : > { %1708 = vmatprep.subr.bf16.mxu0 %v3190_v2  ;;  %1997 = vmatprep.subr.bf16.mxu1 %v3190_v2 }
  0xb1   : > { %1709 = vmatpush1.bf16.msra.mxu0 %v2949_v28  ;;  %1998 = vmatpush1.bf16.msra.mxu1 %v2950_v29  ;;  %v3045_v28 = vld [vmem:[%s3523_s8 + $0x1c0] ss:$16 sps:$4 sm:$0xff]   ;;  %v3046_v29 = vld [vmem:[%s3523_s8 + $0x1c8] ss:$16 sps:$4 sm:$0xff]  }
  0xb2   : > { %1710 = vmatprep.subr.bf16.mxu0 %v3190_v2  ;;  %1999 = vmatprep.subr.bf16.mxu1 %v3190_v2 }
  0xb5   : > { %1711 = vmatpush1.bf16.msra.mxu0 %v2951_v30  ;;  %2000 = vmatpush1.bf16.msra.mxu1 %v2952_v31  ;;  %v3047_v30 = vld [vmem:[%s3523_s8 + $0x1e4] ss:$16 sps:$4 sm:$0xff]   ;;  %v3049_v31 = vld [vmem:[%s3523_s8 + $0x1ec] ss:$16 sps:$4 sm:$0xff]  }
  0xb6   : > { %1712 = vmatprep.subr.bf16.mxu0 %v3190_v2  ;;  %2001 = vmatprep.subr.bf16.mxu1 %v3190_v2 }
  0xb9   : > { %1713 = vmatpush1.bf16.msra.mxu0 %v2953_v32  ;;  %2002 = vmatpush1.bf16.msra.mxu1 %v2954_v33  ;;  %v3051_v32 = vld [vmem:[%s3523_s8 + $0x1e0] ss:$16 sps:$4 sm:$0xff]   ;;  %v3052_v33 = vld [vmem:[%s3523_s8 + $0x1e8] ss:$16 sps:$4 sm:$0xff]  }
  0xba   : > { %1714 = vmatprep.subr.bf16.mxu0 %v3190_v2  ;;  %2003 = vmatprep.subr.bf16.mxu1 %v3190_v2  ;;  %v3005_v2 = vld [vmem:[%s3523_s8 + $0x104] ss:$16 sps:$4 sm:$0xff]  }
  0xbd   : > { %1715 = vmatpush1.bf16.msra.mxu0 %v2955_v34  ;;  %2004 = vmatpush1.bf16.msra.mxu1 %v2956_v35  ;;  %v3053_v34 = vld [vmem:[%s3523_s8 + $0x204] ss:$16 sps:$4 sm:$0xff]   ;;  %v3055_v35 = vld [vmem:[%s3523_s8 + $0x20c] ss:$16 sps:$4 sm:$0xff]  }
  0xc0   : > { %1717 = vmatmul.mubr.bf16.vlgmr.msra.gmra.mrb[0].mxu0 %v2957_v36  ;;  %2006 = vmatmul.mubr.bf16.vlgmr.msra.gmra.mrb[0].mxu1 %v2960_v37  ;;  %v3057_v36 = vld [vmem:[%s3523_s8 + $0x200] ss:$16 sps:$4 sm:$0xff]   ;;  %v3058_v37 = vld [vmem:[%s3523_s8 + $0x208] ss:$16 sps:$4 sm:$0xff]  }
  0xc1   : > { %1724 = vmatprep.mubr.bf16.mxu0 %v2963_v38  ;;  %2013 = vmatprep.mubr.bf16.mxu1 %v2965_v39  ;;  %v3059_v38 = vld [vmem:[%s3523_s8 + $0x224] ss:$16 sps:$4 sm:$0xff]   ;;  %v3061_v39 = vld [vmem:[%s3523_s8 + $0x22c] ss:$16 sps:$4 sm:$0xff]  }
  0xc8   : > { %1725 = vmatmul.mubr.bf16.gmra.mrb[4].mxu0 %v2967_v40  ;;  %2014 = vmatmul.mubr.bf16.gmra.mrb[4].mxu1 %v2968_v41  ;;  %v3063_v40 = vld [vmem:[%s3523_s8 + $0x220] ss:$16 sps:$4 sm:$0xff]   ;;  %v3064_v41 = vld [vmem:[%s3523_s8 + $0x228] ss:$16 sps:$4 sm:$0xff]  }
  0xc9   : > { %1732 = vmatprep.mubr.bf16.mxu0 %v2969_v42  ;;  %2021 = vmatprep.mubr.bf16.mxu1 %v2971_v43  ;;  %v3065_v42 = vld [vmem:[%s3523_s8 + $0x244] ss:$16 sps:$4 sm:$0xff]   ;;  %v3067_v43 = vld [vmem:[%s3523_s8 + $0x24c] ss:$16 sps:$4 sm:$0xff]  }
  0xd0   : > { %1733 = vmatmul.mubr.bf16.gmra.mrb[8].mxu0 %v2973_v44  ;;  %2022 = vmatmul.mubr.bf16.gmra.mrb[8].mxu1 %v2974_v45  ;;  %v3069_v44 = vld [vmem:[%s3523_s8 + $0x240] ss:$16 sps:$4 sm:$0xff]   ;;  %v3070_v45 = vld [vmem:[%s3523_s8 + $0x248] ss:$16 sps:$4 sm:$0xff]  }
  0xd1   : > { %1740 = vmatprep.mubr.bf16.mxu0 %v2975_v46  ;;  %2029 = vmatprep.mubr.bf16.mxu1 %v2977_v47  ;;  %v3071_v46 = vld [vmem:[%s3523_s8 + $0x264] ss:$16 sps:$4 sm:$0xff]   ;;  %v3073_v47 = vld [vmem:[%s3523_s8 + $0x26c] ss:$16 sps:$4 sm:$0xff]  }
  0xd8   : > { %1741 = vmatmul.mubr.bf16.gmra.mrb[12].mxu0 %v2979_v48  ;;  %2030 = vmatmul.mubr.bf16.gmra.mrb[12].mxu1 %v2980_v49  ;;  %v3075_v48 = vld [vmem:[%s3523_s8 + $0x260] ss:$16 sps:$4 sm:$0xff]   ;;  %v3076_v49 = vld [vmem:[%s3523_s8 + $0x268] ss:$16 sps:$4 sm:$0xff]  }
  0xd9   : > { %1748 = vmatprep.mubr.bf16.mxu0 %v2981_v50  ;;  %2037 = vmatprep.mubr.bf16.mxu1 %v2983_v51  ;;  %v3077_v50 = vld [vmem:[%s3523_s8 + $0x284] ss:$16 sps:$4 sm:$0xff]   ;;  %v3079_v51 = vld [vmem:[%s3523_s8 + $0x28c] ss:$16 sps:$4 sm:$0xff]  }
  0xe0   : > { %1749 = vmatmul.mubr.bf16.gmra.mrb[16].mxu0 %v2985_v52  ;;  %2038 = vmatmul.mubr.bf16.gmra.mrb[16].mxu1 %v2986_v53  ;;  %v3081_v52 = vld [vmem:[%s3523_s8 + $0x280] ss:$16 sps:$4 sm:$0xff]   ;;  %v3082_v53 = vld [vmem:[%s3523_s8 + $0x288] ss:$16 sps:$4 sm:$0xff]  }
  0xe1   : > { %1756 = vmatprep.mubr.bf16.mxu0 %v2987_v54  ;;  %2045 = vmatprep.mubr.bf16.mxu1 %v2989_v55  ;;  %v3083_v54 = vld [vmem:[%s3523_s8 + $0x2a4] ss:$16 sps:$4 sm:$0xff]   ;;  %v3085_v55 = vld [vmem:[%s3523_s8 + $0x2ac] ss:$16 sps:$4 sm:$0xff]  }
  0xe8   : > { %1757 = vmatmul.mubr.bf16.gmra.mrb[20].mxu0 %v2991_v56  ;;  %2046 = vmatmul.mubr.bf16.gmra.mrb[20].mxu1 %v2992_v57  ;;  %v3087_v56 = vld [vmem:[%s3523_s8 + $0x2a0] ss:$16 sps:$4 sm:$0xff]   ;;  %v3088_v57 = vld [vmem:[%s3523_s8 + $0x2a8] ss:$16 sps:$4 sm:$0xff]  }
  0xe9   : > { %1764 = vmatprep.mubr.bf16.mxu0 %v2993_v58  ;;  %2053 = vmatprep.mubr.bf16.mxu1 %v2995_v59  ;;  %v3089_v58 = vld [vmem:[%s3523_s8 + $0x2c4] ss:$16 sps:$4 sm:$0xff]   ;;  %v3091_v59 = vld [vmem:[%s3523_s8 + $0x2cc] ss:$16 sps:$4 sm:$0xff]  }
  0xf0   : > { %1765 = vmatmul.mubr.bf16.gmra.mrb[24].mxu0 %v2997_v60  ;;  %2054 = vmatmul.mubr.bf16.gmra.mrb[24].mxu1 %v2998_v61  ;;  %v3093_v60 = vld [vmem:[%s3523_s8 + $0x2c0] ss:$16 sps:$4 sm:$0xff]   ;;  %v3094_v61 = vld [vmem:[%s3523_s8 + $0x2c8] ss:$16 sps:$4 sm:$0xff]  }
  0xf1   : > { %1772 = vmatprep.mubr.bf16.mxu0 %v2999_v62  ;;  %2061 = vmatprep.mubr.bf16.mxu1 %v3001_v63  ;;  %v3095_v62 = vld [vmem:[%s3523_s8 + $0x2e4] ss:$16 sps:$4 sm:$0xff]   ;;  %v3097_v63 = vld [vmem:[%s3523_s8 + $0x2ec] ss:$16 sps:$4 sm:$0xff]  }
  0xf8   : > { %1773 = vmatmul.mubr.bf16.gmra.mrb[28].mxu0 %v3003_v0  ;;  %2062 = vmatmul.mubr.bf16.gmra.mrb[28].mxu1 %v3004_v1  ;;  %v3099_v0 = vld [vmem:[%s3523_s8 + $0x2e0] ss:$16 sps:$4 sm:$0xff]   ;;  %v3100_v1 = vld [vmem:[%s3523_s8 + $0x2e8] ss:$16 sps:$4 sm:$0xff]  }
  0xf9   : > { %1780 = vmatprep.mubr.bf16.mxu0 %v3005_v2  ;;  %2069 = vmatprep.mubr.bf16.mxu1 %v3007_v3  ;;  %v3101_v2 = vld [vmem:[%s3523_s8 + $0x304] ss:$16 sps:$4 sm:$0xff]   ;;  %v3103_v3 = vld [vmem:[%s3523_s8 + $0x30c] ss:$16 sps:$4 sm:$0xff]  }
 0x100   : > { %1781 = vmatmul.mubr.bf16.gmra.mrb[32].mxu0 %v3009_v4  ;;  %2070 = vmatmul.mubr.bf16.gmra.mrb[32].mxu1 %v3010_v5  ;;  %v3105_v4 = vld [vmem:[%s3523_s8 + $0x300] ss:$16 sps:$4 sm:$0xff]   ;;  %v3106_v5 = vld [vmem:[%s3523_s8 + $0x308] ss:$16 sps:$4 sm:$0xff]  }
 0x101   : > { %1788 = vmatprep.mubr.bf16.mxu0 %v3011_v6  ;;  %2077 = vmatprep.mubr.bf16.mxu1 %v3013_v7  ;;  %v3107_v6 = vld [vmem:[%s3523_s8 + $0x324] ss:$16 sps:$4 sm:$0xff]   ;;  %v3109_v7 = vld [vmem:[%s3523_s8 + $0x32c] ss:$16 sps:$4 sm:$0xff]  }
 0x108   : > { %1789 = vmatmul.mubr.bf16.gmra.mrb[36].mxu0 %v3015_v8  ;;  %2078 = vmatmul.mubr.bf16.gmra.mrb[36].mxu1 %v3016_v9  ;;  %v3111_v8 = vld [vmem:[%s3523_s8 + $0x320] ss:$16 sps:$4 sm:$0xff]   ;;  %v3112_v9 = vld [vmem:[%s3523_s8 + $0x328] ss:$16 sps:$4 sm:$0xff]  }
 0x109   : > { %1796 = vmatprep.mubr.bf16.mxu0 %v3017_v10  ;;  %2085 = vmatprep.mubr.bf16.mxu1 %v3019_v11  ;;  %v3113_v10 = vld [vmem:[%s3523_s8 + $0x344] ss:$16 sps:$4 sm:$0xff]   ;;  %v3115_v11 = vld [vmem:[%s3523_s8 + $0x34c] ss:$16 sps:$4 sm:$0xff]  }
 0x110   : > { %1797 = vmatmul.mubr.bf16.gmra.mrb[40].mxu0 %v3021_v12  ;;  %2086 = vmatmul.mubr.bf16.gmra.mrb[40].mxu1 %v3022_v13  ;;  %v3117_v12 = vld [vmem:[%s3523_s8 + $0x340] ss:$16 sps:$4 sm:$0xff]   ;;  %v3118_v13 = vld [vmem:[%s3523_s8 + $0x348] ss:$16 sps:$4 sm:$0xff]  }
 0x111   : > { %1804 = vmatprep.mubr.bf16.mxu0 %v3023_v14  ;;  %2093 = vmatprep.mubr.bf16.mxu1 %v3025_v15  ;;  %v3119_v14 = vld [vmem:[%s3523_s8 + $0x364] ss:$16 sps:$4 sm:$0xff]   ;;  %v3121_v15 = vld [vmem:[%s3523_s8 + $0x36c] ss:$16 sps:$4 sm:$0xff]  }
 0x118   : > { %1805 = vmatmul.mubr.bf16.gmra.mrb[44].mxu0 %v3027_v16  ;;  %2094 = vmatmul.mubr.bf16.gmra.mrb[44].mxu1 %v3028_v17  ;;  %v596_v17 = vld [vmem:[%s4830_s3] sm:$0xff] }
 0x119   : > { %1812 = vmatprep.mubr.bf16.mxu0 %v3029_v18  ;;  %2101 = vmatprep.mubr.bf16.mxu1 %v3031_v19 }
 0x120   : > { %1813 = vmatmul.mubr.bf16.gmra.mrb[48].mxu0 %v3033_v20  ;;  %2102 = vmatmul.mubr.bf16.gmra.mrb[48].mxu1 %v3034_v21  ;;  %v3123_v20 = vld [vmem:[%s3523_s8 + $0x360] ss:$16 sps:$4 sm:$0xff]  }
 0x121   : > { %1820 = vmatprep.mubr.bf16.mxu0 %v3035_v22  ;;  %2109 = vmatprep.mubr.bf16.mxu1 %v3037_v23 }
 0x128   : > { %1821 = vmatmul.mubr.bf16.gmra.mrb[52].mxu0 %v3039_v24  ;;  %2110 = vmatmul.mubr.bf16.gmra.mrb[52].mxu1 %v3040_v25  ;;  %v3124_v24 = vld [vmem:[%s3523_s8 + $0x368] ss:$16 sps:$4 sm:$0xff]   ;;  %v3125_v25 = vld [vmem:[%s3523_s8 + $0x384] ss:$16 sps:$4 sm:$0xff]  }
 0x129   : > { %1828 = vmatprep.mubr.bf16.mxu0 %v3041_v26  ;;  %2117 = vmatprep.mubr.bf16.mxu1 %v3043_v27  ;;  %v597_v26 = vld [vmem:[%s4830_s3 + $0x8] sm:$0xff] }
 0x130   : > { %1829 = vmatmul.mubr.bf16.gmra.mrb[56].mxu0 %v3045_v28  ;;  %2118 = vmatmul.mubr.bf16.gmra.mrb[56].mxu1 %v3046_v29  ;;  %v3127_v29 = vld [vmem:[%s3523_s8 + $0x38c] ss:$16 sps:$4 sm:$0xff]  }
 0x131   : > { %1836 = vmatprep.mubr.bf16.mxu0 %v3047_v30  ;;  %2125 = vmatprep.mubr.bf16.mxu1 %v3049_v31 }
 0x138   : > { %1837 = vmatmul.mubr.bf16.gmra.mrb[60].mxu0 %v3051_v32  ;;  %2126 = vmatmul.mubr.bf16.gmra.mrb[60].mxu1 %v3052_v33 }
 0x139   : > { %1844 = vmatprep.mubr.bf16.mxu0 %v3053_v34  ;;  %2133 = vmatprep.mubr.bf16.mxu1 %v3055_v35  ;;  %v598_v35 = vld [vmem:[%s4830_s3 + $0x10] sm:$0xff] }
 0x140   : > { %1845 = vmatmul.mubr.bf16.gmra.mrb[64].mxu0 %v3057_v36  ;;  %2134 = vmatmul.mubr.bf16.gmra.mrb[64].mxu1 %v3058_v37 }
 0x141   : > { %1852 = vmatprep.mubr.bf16.mxu0 %v3059_v38  ;;  %2141 = vmatprep.mubr.bf16.mxu1 %v3061_v39  ;;  %v3129_v38 = vld [vmem:[%s3523_s8 + $0x380] ss:$16 sps:$4 sm:$0xff]  }
 0x148   : > { %1853 = vmatmul.mubr.bf16.gmra.mrb[68].mxu0 %v3063_v40  ;;  %2142 = vmatmul.mubr.bf16.gmra.mrb[68].mxu1 %v3064_v41 }
 0x149   : > { %1860 = vmatprep.mubr.bf16.mxu0 %v3065_v42  ;;  %2149 = vmatprep.mubr.bf16.mxu1 %v3067_v43  ;;  %v3130_v42 = vld [vmem:[%s3523_s8 + $0x388] ss:$16 sps:$4 sm:$0xff]   ;;  %v3131_v43 = vld [vmem:[%s3523_s8 + $0x3a4] ss:$16 sps:$4 sm:$0xff]  }
 0x150   : > { %1861 = vmatmul.mubr.bf16.gmra.mrb[72].mxu0 %v3069_v44  ;;  %2150 = vmatmul.mubr.bf16.gmra.mrb[72].mxu1 %v3070_v45  ;;  %v599_v44 = vld [vmem:[%s4830_s3 + $0x18] sm:$0xff] }
 0x151   : > { %1868 = vmatprep.mubr.bf16.mxu0 %v3071_v46  ;;  %2157 = vmatprep.mubr.bf16.mxu1 %v3073_v47  ;;  %v3133_v47 = vld [vmem:[%s3523_s8 + $0x3ac] ss:$16 sps:$4 sm:$0xff]  }
 0x158   : > { %1869 = vmatmul.mubr.bf16.gmra.mrb[76].mxu0 %v3075_v48  ;;  %2158 = vmatmul.mubr.bf16.gmra.mrb[76].mxu1 %v3076_v49 }
 0x159   : > { %1876 = vmatprep.mubr.bf16.mxu0 %v3077_v50  ;;  %2165 = vmatprep.mubr.bf16.mxu1 %v3079_v51 }
 0x160   : > { %1877 = vmatmul.mubr.bf16.gmra.mrb[80].mxu0 %v3081_v52  ;;  %2166 = vmatmul.mubr.bf16.gmra.mrb[80].mxu1 %v3082_v53  ;;  %v600_v53 = vld [vmem:[%s4830_s3 + $0x20] sm:$0xff] }
 0x161   : > { %1884 = vmatprep.mubr.bf16.mxu0 %v3083_v54  ;;  %2173 = vmatprep.mubr.bf16.mxu1 %v3085_v55 }
 0x168   : > { %1885 = vmatmul.mubr.bf16.gmra.mrb[84].mxu0 %v3087_v56  ;;  %2174 = vmatmul.mubr.bf16.gmra.mrb[84].mxu1 %v3088_v57  ;;  %v3135_v56 = vld [vmem:[%s3523_s8 + $0x3a0] ss:$16 sps:$4 sm:$0xff]  }
 0x169   : > { %1892 = vmatprep.mubr.bf16.mxu0 %v3089_v58  ;;  %2181 = vmatprep.mubr.bf16.mxu1 %v3091_v59 }
 0x170   : > { %1893 = vmatmul.mubr.bf16.gmra.mrb[88].mxu0 %v3093_v60  ;;  %2182 = vmatmul.mubr.bf16.gmra.mrb[88].mxu1 %v3094_v61  ;;  %v3136_v60 = vld [vmem:[%s3523_s8 + $0x3a8] ss:$16 sps:$4 sm:$0xff]   ;;  %v3137_v61 = vld [vmem:[%s3523_s8 + $0x3c4] ss:$16 sps:$4 sm:$0xff]  }
 0x171   : > { %1900 = vmatprep.mubr.bf16.mxu0 %v3095_v62  ;;  %2189 = vmatprep.mubr.bf16.mxu1 %v3097_v63  ;;  %v601_v62 = vld [vmem:[%s4830_s3 + $0x28] sm:$0xff] }
 0x178   : > { %1901 = vmatmul.mubr.bf16.gmra.mrb[92].mxu0 %v3099_v0  ;;  %2190 = vmatmul.mubr.bf16.gmra.mrb[92].mxu1 %v3100_v1  ;;  %v3139_v1 = vld [vmem:[%s3523_s8 + $0x3cc] ss:$16 sps:$4 sm:$0xff]  }
 0x179   : > { %1908 = vmatprep.mubr.bf16.mxu0 %v3101_v2  ;;  %2197 = vmatprep.mubr.bf16.mxu1 %v3103_v3 }
 0x180   : > { %1909 = vmatmul.mubr.bf16.gmra.mrb[96].mxu0 %v3105_v4  ;;  %2198 = vmatmul.mubr.bf16.gmra.mrb[96].mxu1 %v3106_v5 }
 0x181   : > { %1916 = vmatprep.mubr.bf16.mxu0 %v3107_v6  ;;  %2205 = vmatprep.mubr.bf16.mxu1 %v3109_v7  ;;  %v602_v7 = vld [vmem:[%s4830_s3 + $0x30] sm:$0xff] }
 0x188   : > { %1917 = vmatmul.mubr.bf16.gmra.mrb[100].mxu0 %v3111_v8  ;;  %2206 = vmatmul.mubr.bf16.gmra.mrb[100].mxu1 %v3112_v9 }
 0x189   : > { %1924 = vmatprep.mubr.bf16.mxu0 %v3113_v10  ;;  %2213 = vmatprep.mubr.bf16.mxu1 %v3115_v11  ;;  %v3141_v10 = vld [vmem:[%s3523_s8 + $0x3c0] ss:$16 sps:$4 sm:$0xff]  }
 0x190   : > { %1925 = vmatmul.mubr.bf16.gmra.mrb[104].mxu0 %v3117_v12  ;;  %2214 = vmatmul.mubr.bf16.gmra.mrb[104].mxu1 %v3118_v13 }
 0x191   : > { %1932 = vmatprep.mubr.bf16.mxu0 %v3119_v14  ;;  %2221 = vmatprep.mubr.bf16.mxu1 %v3121_v15  ;;  %v3142_v14 = vld [vmem:[%s3523_s8 + $0x3c8] ss:$16 sps:$4 sm:$0xff]   ;;  %v3143_v15 = vld [vmem:[%s3523_s8 + $0x3e4] ss:$16 sps:$4 sm:$0xff]  }
 0x193   : > { %v1718_v16 = vpop.f32.mrb[0].mxu0  ;;  %v2007_v18 = vpop.f32.mrb[0].mxu1 }
 0x194   : > { %v1720_v19 = vpop.f32.mrb[1].mxu0  ;;  %v2008_v21 = vadd.f32 %v2007_v18, %v1718_v16  ;;  %v2009_v22 = vpop.f32.mrb[1].mxu1  ;;  %v603_v16 = vld [vmem:[%s4830_s3 + $0x38] sm:$0xff] }
 0x195   : > { %v1721_v23 = vpop.f32.mrb[2].mxu0  ;;  %v2010_v27 = vpop.f32.mrb[2].mxu1  ;;  %v3145_v19 = vld [vmem:[%s3523_s8 + $0x3ec] ss:$16 sps:$4 sm:$0xff]  }
 0x196   : > { %v1723_v28 = vpop.f32.mrb[3].mxu0  ;;  %v2262_v30 = vadd.f32 %v2008_v21, %v596_v17  ;;  %v2011_v31 = vadd.f32 %v2010_v27, %v1721_v23  ;;  %v2012_v32 = vpop.f32.mrb[3].mxu1 }
 0x197   : > { %v3147_v28 = vld [vmem:[%s3523_s8 + $0x3e0] ss:$16 sps:$4 sm:$0xff]   ;;  %v3148_v32 = vld [vmem:[%s3523_s8 + $0x3e8] ss:$16 sps:$4 sm:$0xff]  }
 0x198   : > { %1933 = vmatmul.mubr.bf16.gmra.mrb[108].mxu0 %v3123_v20  ;;  %2326 = vst [vmem:[%s4830_s3] sm:$0xff] %v2262_v30  ;;  %v2263_v33 = vadd.f32 %v2011_v31, %v597_v26  ;;  %2222 = vmatmul.mubr.bf16.gmra.mrb[108].mxu1 %v3124_v24 }
 0x199   : > { %1940 = vmatprep.mubr.bf16.mxu0 %v3125_v25  ;;  %2229 = vmatprep.mubr.bf16.mxu1 %v3127_v29  ;;  %v604_v25 = vld [vmem:[%s4830_s3 + $0x40] sm:$0xff] }
 0x19a   : > { %2327 = vst [vmem:[%s4830_s3 + $0x8] sm:$0xff] %v2263_v33  ;;  %v605_v33 = vld [vmem:[%s4830_s3 + $0x48] sm:$0xff] }
 0x19b   : > { %v1726_v34 = vpop.f32.mrb[4].mxu0  ;;  %v2015_v36 = vpop.f32.mrb[4].mxu1 }
 0x19c   : > { %v1728_v37 = vpop.f32.mrb[5].mxu0  ;;  %v2016_v39 = vadd.f32 %v2015_v36, %v1726_v34  ;;  %v2017_v40 = vpop.f32.mrb[5].mxu1 }
 0x19d   : > { %v1729_v41 = vpop.f32.mrb[6].mxu0  ;;  %v2018_v45 = vpop.f32.mrb[6].mxu1 }
 0x19e   : > { %v1731_v46 = vpop.f32.mrb[7].mxu0  ;;  %v2264_v48 = vadd.f32 %v2016_v39, %v598_v35  ;;  %v2019_v49 = vadd.f32 %v2018_v45, %v1729_v41  ;;  %v2020_v50 = vpop.f32.mrb[7].mxu1  ;;  %v606_v41 = vld [vmem:[%s4830_s3 + $0x50] sm:$0xff] }
 0x1a0   : > { %1941 = vmatmul.mubr.bf16.gmra.mrb[112].mxu0 %v3129_v38  ;;  %2328 = vst [vmem:[%s4830_s3 + $0x10] sm:$0xff] %v2264_v48  ;;  %v2265_v51 = vadd.f32 %v2019_v49, %v599_v44  ;;  %2230 = vmatmul.mubr.bf16.gmra.mrb[112].mxu1 %v3130_v42 }
 0x1a1   : > { %1948 = vmatprep.mubr.bf16.mxu0 %v3131_v43  ;;  %2237 = vmatprep.mubr.bf16.mxu1 %v3133_v47  ;;  %v607_v47 = vld [vmem:[%s4830_s3 + $0x58] sm:$0xff] }
 0x1a2   : > { %2329 = vst [vmem:[%s4830_s3 + $0x18] sm:$0xff] %v2265_v51 }
 0x1a3   : > { %v1734_v52 = vpop.f32.mrb[8].mxu0  ;;  %v2023_v54 = vpop.f32.mrb[8].mxu1 }
 0x1a4   : > { %v1736_v55 = vpop.f32.mrb[9].mxu0  ;;  %v2024_v57 = vadd.f32 %v2023_v54, %v1734_v52  ;;  %v2025_v58 = vpop.f32.mrb[9].mxu1 }
 0x1a5   : > { %v1737_v59 = vpop.f32.mrb[10].mxu0  ;;  %v2026_v63 = vpop.f32.mrb[10].mxu1  ;;  %v608_v55 = vld [vmem:[%s4830_s3 + $0x60] sm:$0xff] }
 0x1a6   : > { %v1739_v0 = vpop.f32.mrb[11].mxu0  ;;  %v2266_v2 = vadd.f32 %v2024_v57, %v600_v53  ;;  %v2027_v3 = vadd.f32 %v2026_v63, %v1737_v59  ;;  %v2028_v4 = vpop.f32.mrb[11].mxu1 }
 0x1a8   : > { %1949 = vmatmul.mubr.bf16.gmra.mrb[116].mxu0 %v3135_v56  ;;  %2330 = vst [vmem:[%s4830_s3 + $0x20] sm:$0xff] %v2266_v2  ;;  %v2267_v5 = vadd.f32 %v2027_v3, %v601_v62  ;;  %2238 = vmatmul.mubr.bf16.gmra.mrb[116].mxu1 %v3136_v60 }
 0x1a9   : > { %1956 = vmatprep.mubr.bf16.mxu0 %v3137_v61  ;;  %2245 = vmatprep.mubr.bf16.mxu1 %v3139_v1  ;;  %v609_v61 = vld [vmem:[%s4830_s3 + $0x68] sm:$0xff] }
 0x1aa   : > { %2331 = vst [vmem:[%s4830_s3 + $0x28] sm:$0xff] %v2267_v5  ;;  %v610_v5 = vld [vmem:[%s4830_s3 + $0x70] sm:$0xff] }
 0x1ab   : > { %v1742_v6 = vpop.f32.mrb[12].mxu0  ;;  %v2031_v8 = vpop.f32.mrb[12].mxu1 }
 0x1ac   : > { %v1744_v9 = vpop.f32.mrb[13].mxu0  ;;  %v2032_v11 = vadd.f32 %v2031_v8, %v1742_v6  ;;  %v2033_v12 = vpop.f32.mrb[13].mxu1 }
 0x1ad   : > { %v1745_v13 = vpop.f32.mrb[14].mxu0  ;;  %v2034_v17 = vpop.f32.mrb[14].mxu1 }
 0x1ae   : > { %v1747_v18 = vpop.f32.mrb[15].mxu0  ;;  %v2268_v20 = vadd.f32 %v2032_v11, %v602_v7  ;;  %v2035_v21 = vadd.f32 %v2034_v17, %v1745_v13  ;;  %v2036_v22 = vpop.f32.mrb[15].mxu1  ;;  %v611_v11 = vld [vmem:[%s4830_s3 + $0x78] sm:$0xff] }
 0x1b0   : > { %1957 = vmatmul.mubr.bf16.gmra.mrb[120].mxu0 %v3141_v10  ;;  %2332 = vst [vmem:[%s4830_s3 + $0x30] sm:$0xff] %v2268_v20  ;;  %v2269_v23 = vadd.f32 %v2035_v21, %v603_v16  ;;  %2246 = vmatmul.mubr.bf16.gmra.mrb[120].mxu1 %v3142_v14 }
 0x1b1   : > { %1964 = vmatprep.mubr.bf16.mxu0 %v3143_v15  ;;  %2253 = vmatprep.mubr.bf16.mxu1 %v3145_v19  ;;  %v612_v19 = vld [vmem:[%s4830_s3 + $0x80] sm:$0xff] }
 0x1b2   : > { %2333 = vst [vmem:[%s4830_s3 + $0x38] sm:$0xff] %v2269_v23 }
 0x1b3   : > { %v1750_v24 = vpop.f32.mrb[16].mxu0  ;;  %v2039_v26 = vpop.f32.mrb[16].mxu1 }
 0x1b4   : > { %v1752_v27 = vpop.f32.mrb[17].mxu0  ;;  %v2040_v29 = vadd.f32 %v2039_v26, %v1750_v24  ;;  %v2041_v30 = vpop.f32.mrb[17].mxu1 }
 0x1b5   : > { %v1753_v31 = vpop.f32.mrb[18].mxu0  ;;  %v2042_v34 = vpop.f32.mrb[18].mxu1 }
 0x1b6   : > { %v1755_v35 = vpop.f32.mrb[19].mxu0  ;;  %v2270_v36 = vadd.f32 %v2040_v29, %v604_v25  ;;  %v2043_v37 = vadd.f32 %v2042_v34, %v1753_v31  ;;  %v2044_v38 = vpop.f32.mrb[19].mxu1  ;;  %v613_v25 = vld [vmem:[%s4830_s3 + $0x88] sm:$0xff] }
 0x1b8   : > { %1965 = vmatmul.mubr.bf16.gmra.mrb[124].mxu0 %v3147_v28  ;;  %2334 = vst [vmem:[%s4830_s3 + $0x40] sm:$0xff] %v2270_v36  ;;  %v2271_v39 = vadd.f32 %v2043_v37, %v605_v33  ;;  %2254 = vmatmul.mubr.bf16.gmra.mrb[124].mxu1 %v3148_v32  ;;  %v614_v33 = vld [vmem:[%s4830_s3 + $0x90] sm:$0xff] }
 0x1ba   : > { %2335 = vst [vmem:[%s4830_s3 + $0x48] sm:$0xff] %v2271_v39  ;;  %v615_v39 = vld [vmem:[%s4830_s3 + $0x98] sm:$0xff] }
 0x1bb   : > { %v1758_v40 = vpop.f32.mrb[20].mxu0  ;;  %v2047_v42 = vpop.f32.mrb[20].mxu1 }
 0x1bc   : > { %v1760_v43 = vpop.f32.mrb[21].mxu0  ;;  %v2048_v44 = vadd.f32 %v2047_v42, %v1758_v40  ;;  %v2049_v45 = vpop.f32.mrb[21].mxu1 }
 0x1bd   : > { %v1761_v46 = vpop.f32.mrb[22].mxu0  ;;  %v2050_v48 = vpop.f32.mrb[22].mxu1 }
 0x1be   : > { %v1763_v49 = vpop.f32.mrb[23].mxu0  ;;  %v2272_v50 = vadd.f32 %v2048_v44, %v606_v41  ;;  %v2051_v51 = vadd.f32 %v2050_v48, %v1761_v46  ;;  %v2052_v52 = vpop.f32.mrb[23].mxu1 }
 0x1c0   : > { %2336 = vst [vmem:[%s4830_s3 + $0x50] sm:$0xff] %v2272_v50  ;;  %v2273_v53 = vadd.f32 %v2051_v51, %v607_v47  ;;  %v616_v47 = vld [vmem:[%s4830_s3 + $0xa0] sm:$0xff] }
 0x1c2   : > { %2337 = vst [vmem:[%s4830_s3 + $0x58] sm:$0xff] %v2273_v53  ;;  %v617_v53 = vld [vmem:[%s4830_s3 + $0xa8] sm:$0xff] }
 0x1c3   : > { %v1766_v54 = vpop.f32.mrb[24].mxu0  ;;  %v2055_v56 = vpop.f32.mrb[24].mxu1 }
 0x1c4   : > { %v1768_v57 = vpop.f32.mrb[25].mxu0  ;;  %v2056_v58 = vadd.f32 %v2055_v56, %v1766_v54  ;;  %v2057_v59 = vpop.f32.mrb[25].mxu1 }
 0x1c5   : > { %v1769_v60 = vpop.f32.mrb[26].mxu0  ;;  %v2058_v62 = vpop.f32.mrb[26].mxu1 }
 0x1c6   : > { %v1771_v63 = vpop.f32.mrb[27].mxu0  ;;  %v2274_v0 = vadd.f32 %v2056_v58, %v608_v55  ;;  %v2059_v1 = vadd.f32 %v2058_v62, %v1769_v60  ;;  %v2060_v2 = vpop.f32.mrb[27].mxu1 }
 0x1c8   : > { %2338 = vst [vmem:[%s4830_s3 + $0x60] sm:$0xff] %v2274_v0  ;;  %v2275_v3 = vadd.f32 %v2059_v1, %v609_v61  ;;  %v618_v61 = vld [vmem:[%s4830_s3 + $0xb0] sm:$0xff] }
 0x1ca   : > { %2339 = vst [vmem:[%s4830_s3 + $0x68] sm:$0xff] %v2275_v3  ;;  %v619_v3 = vld [vmem:[%s4830_s3 + $0xb8] sm:$0xff] }
 0x1cb   : > { %v1774_v4 = vpop.f32.mrb[28].mxu0  ;;  %v2063_v6 = vpop.f32.mrb[28].mxu1 }
 0x1cc   : > { %v1776_v7 = vpop.f32.mrb[29].mxu0  ;;  %v2064_v8 = vadd.f32 %v2063_v6, %v1774_v4  ;;  %v2065_v9 = vpop.f32.mrb[29].mxu1 }
 0x1cd   : > { %v1777_v10 = vpop.f32.mrb[30].mxu0  ;;  %v2066_v12 = vpop.f32.mrb[30].mxu1 }
 0x1ce   : > { %v1779_v13 = vpop.f32.mrb[31].mxu0  ;;  %v2276_v14 = vadd.f32 %v2064_v8, %v610_v5  ;;  %v2067_v15 = vadd.f32 %v2066_v12, %v1777_v10  ;;  %v2068_v16 = vpop.f32.mrb[31].mxu1 }
 0x1d0   : > { %2340 = vst [vmem:[%s4830_s3 + $0x70] sm:$0xff] %v2276_v14  ;;  %v2277_v17 = vadd.f32 %v2067_v15, %v611_v11  ;;  %v620_v11 = vld [vmem:[%s4830_s3 + $0xc0] sm:$0xff] }
 0x1d2   : > { %2341 = vst [vmem:[%s4830_s3 + $0x78] sm:$0xff] %v2277_v17  ;;  %v621_v17 = vld [vmem:[%s4830_s3 + $0xc8] sm:$0xff] }
 0x1d3   : > { %v1782_v18 = vpop.f32.mrb[32].mxu0  ;;  %v2071_v20 = vpop.f32.mrb[32].mxu1 }
 0x1d4   : > { %v1784_v21 = vpop.f32.mrb[33].mxu0  ;;  %v2072_v22 = vadd.f32 %v2071_v20, %v1782_v18  ;;  %v2073_v23 = vpop.f32.mrb[33].mxu1 }
 0x1d5   : > { %v1785_v24 = vpop.f32.mrb[34].mxu0  ;;  %v2074_v26 = vpop.f32.mrb[34].mxu1 }
 0x1d6   : > { %v1787_v27 = vpop.f32.mrb[35].mxu0  ;;  %v2278_v28 = vadd.f32 %v2072_v22, %v612_v19  ;;  %v2075_v29 = vadd.f32 %v2074_v26, %v1785_v24  ;;  %v2076_v30 = vpop.f32.mrb[35].mxu1 }
 0x1d8   : > { %2342 = vst [vmem:[%s4830_s3 + $0x80] sm:$0xff] %v2278_v28  ;;  %v2279_v31 = vadd.f32 %v2075_v29, %v613_v25  ;;  %v622_v25 = vld [vmem:[%s4830_s3 + $0xd0] sm:$0xff] }
 0x1da   : > { %2343 = vst [vmem:[%s4830_s3 + $0x88] sm:$0xff] %v2279_v31  ;;  %v623_v31 = vld [vmem:[%s4830_s3 + $0xd8] sm:$0xff] }
 0x1db   : > { %v1790_v32 = vpop.f32.mrb[36].mxu0  ;;  %v2079_v34 = vpop.f32.mrb[36].mxu1 }
 0x1dc   : > { %v1792_v35 = vpop.f32.mrb[37].mxu0  ;;  %v2080_v36 = vadd.f32 %v2079_v34, %v1790_v32  ;;  %v2081_v37 = vpop.f32.mrb[37].mxu1 }
 0x1dd   : > { %v1793_v38 = vpop.f32.mrb[38].mxu0  ;;  %v2082_v40 = vpop.f32.mrb[38].mxu1 }
 0x1de   : > { %v1795_v41 = vpop.f32.mrb[39].mxu0  ;;  %v2280_v42 = vadd.f32 %v2080_v36, %v614_v33  ;;  %v2083_v43 = vadd.f32 %v2082_v40, %v1793_v38  ;;  %v2084_v44 = vpop.f32.mrb[39].mxu1 }
 0x1e0   : > { %2344 = vst [vmem:[%s4830_s3 + $0x90] sm:$0xff] %v2280_v42  ;;  %v2281_v45 = vadd.f32 %v2083_v43, %v615_v39  ;;  %v624_v39 = vld [vmem:[%s4830_s3 + $0xe0] sm:$0xff] }
 0x1e2   : > { %2345 = vst [vmem:[%s4830_s3 + $0x98] sm:$0xff] %v2281_v45  ;;  %v625_v45 = vld [vmem:[%s4830_s3 + $0xe8] sm:$0xff] }
 0x1e3   : > { %v1798_v46 = vpop.f32.mrb[40].mxu0  ;;  %v2087_v48 = vpop.f32.mrb[40].mxu1 }
 0x1e4   : > { %v1800_v49 = vpop.f32.mrb[41].mxu0  ;;  %v2088_v50 = vadd.f32 %v2087_v48, %v1798_v46  ;;  %v2089_v51 = vpop.f32.mrb[41].mxu1 }
 0x1e5   : > { %v1801_v52 = vpop.f32.mrb[42].mxu0  ;;  %v2090_v54 = vpop.f32.mrb[42].mxu1 }
 0x1e6   : > { %v1803_v55 = vpop.f32.mrb[43].mxu0  ;;  %v2282_v56 = vadd.f32 %v2088_v50, %v616_v47  ;;  %v2091_v57 = vadd.f32 %v2090_v54, %v1801_v52  ;;  %v2092_v58 = vpop.f32.mrb[43].mxu1 }
 0x1e8   : > { %2346 = vst [vmem:[%s4830_s3 + $0xa0] sm:$0xff] %v2282_v56  ;;  %v2283_v59 = vadd.f32 %v2091_v57, %v617_v53  ;;  %v626_v53 = vld [vmem:[%s4830_s3 + $0xf0] sm:$0xff] }
 0x1ea   : > { %2347 = vst [vmem:[%s4830_s3 + $0xa8] sm:$0xff] %v2283_v59  ;;  %v627_v59 = vld [vmem:[%s4830_s3 + $0xf8] sm:$0xff] }
 0x1eb   : > { %v1806_v60 = vpop.f32.mrb[44].mxu0  ;;  %v2095_v62 = vpop.f32.mrb[44].mxu1 }
 0x1ec   : > { %v1808_v63 = vpop.f32.mrb[45].mxu0  ;;  %v2096_v0 = vadd.f32 %v2095_v62, %v1806_v60  ;;  %v2097_v1 = vpop.f32.mrb[45].mxu1 }
 0x1ed   : > { %v1809_v2 = vpop.f32.mrb[46].mxu0  ;;  %v2098_v4 = vpop.f32.mrb[46].mxu1 }
 0x1ee   : > { %v1811_v5 = vpop.f32.mrb[47].mxu0  ;;  %v2284_v6 = vadd.f32 %v2096_v0, %v618_v61  ;;  %v2099_v7 = vadd.f32 %v2098_v4, %v1809_v2  ;;  %v2100_v8 = vpop.f32.mrb[47].mxu1 }
 0x1f0   : > { %2348 = vst [vmem:[%s4830_s3 + $0xb0] sm:$0xff] %v2284_v6  ;;  %v2285_v9 = vadd.f32 %v2099_v7, %v619_v3  ;;  %v628_v3 = vld [vmem:[%s4830_s3 + $0x100] sm:$0xff] }
 0x1f2   : > { %2349 = vst [vmem:[%s4830_s3 + $0xb8] sm:$0xff] %v2285_v9  ;;  %v629_v9 = vld [vmem:[%s4830_s3 + $0x108] sm:$0xff] }
 0x1f3   : > { %v1814_v10 = vpop.f32.mrb[48].mxu0  ;;  %v2103_v12 = vpop.f32.mrb[48].mxu1 }
 0x1f4   : > { %v1816_v13 = vpop.f32.mrb[49].mxu0  ;;  %v2104_v14 = vadd.f32 %v2103_v12, %v1814_v10  ;;  %v2105_v15 = vpop.f32.mrb[49].mxu1 }
 0x1f5   : > { %v1817_v16 = vpop.f32.mrb[50].mxu0  ;;  %v2106_v18 = vpop.f32.mrb[50].mxu1 }
 0x1f6   : > { %v1819_v19 = vpop.f32.mrb[51].mxu0  ;;  %v2286_v20 = vadd.f32 %v2104_v14, %v620_v11  ;;  %v2107_v21 = vadd.f32 %v2106_v18, %v1817_v16  ;;  %v2108_v22 = vpop.f32.mrb[51].mxu1 }
 0x1f8   : > { %2350 = vst [vmem:[%s4830_s3 + $0xc0] sm:$0xff] %v2286_v20  ;;  %v2287_v23 = vadd.f32 %v2107_v21, %v621_v17  ;;  %v630_v17 = vld [vmem:[%s4830_s3 + $0x110] sm:$0xff] }
 0x1fa   : > { %2351 = vst [vmem:[%s4830_s3 + $0xc8] sm:$0xff] %v2287_v23  ;;  %v631_v23 = vld [vmem:[%s4830_s3 + $0x118] sm:$0xff] }
 0x1fb   : > { %v1822_v24 = vpop.f32.mrb[52].mxu0  ;;  %v2111_v26 = vpop.f32.mrb[52].mxu1 }
 0x1fc   : > { %v1824_v27 = vpop.f32.mrb[53].mxu0  ;;  %v2112_v28 = vadd.f32 %v2111_v26, %v1822_v24  ;;  %v2113_v29 = vpop.f32.mrb[53].mxu1 }
 0x1fd   : > { %v1825_v30 = vpop.f32.mrb[54].mxu0  ;;  %v2114_v32 = vpop.f32.mrb[54].mxu1 }
 0x1fe   : > { %v1827_v33 = vpop.f32.mrb[55].mxu0  ;;  %v2288_v34 = vadd.f32 %v2112_v28, %v622_v25  ;;  %v2115_v35 = vadd.f32 %v2114_v32, %v1825_v30  ;;  %v2116_v36 = vpop.f32.mrb[55].mxu1 }
 0x200   : > { %2352 = vst [vmem:[%s4830_s3 + $0xd0] sm:$0xff] %v2288_v34  ;;  %v2289_v37 = vadd.f32 %v2115_v35, %v623_v31  ;;  %v632_v31 = vld [vmem:[%s4830_s3 + $0x120] sm:$0xff] }
 0x202   : > { %2353 = vst [vmem:[%s4830_s3 + $0xd8] sm:$0xff] %v2289_v37  ;;  %v633_v37 = vld [vmem:[%s4830_s3 + $0x128] sm:$0xff] }
 0x203   : > { %v1830_v38 = vpop.f32.mrb[56].mxu0  ;;  %v2119_v40 = vpop.f32.mrb[56].mxu1 }
 0x204   : > { %v1832_v41 = vpop.f32.mrb[57].mxu0  ;;  %v2120_v42 = vadd.f32 %v2119_v40, %v1830_v38  ;;  %v2121_v43 = vpop.f32.mrb[57].mxu1 }
 0x205   : > { %v1833_v44 = vpop.f32.mrb[58].mxu0  ;;  %v2122_v46 = vpop.f32.mrb[58].mxu1 }
 0x206   : > { %v1835_v47 = vpop.f32.mrb[59].mxu0  ;;  %v2290_v48 = vadd.f32 %v2120_v42, %v624_v39  ;;  %v2123_v49 = vadd.f32 %v2122_v46, %v1833_v44  ;;  %v2124_v50 = vpop.f32.mrb[59].mxu1 }
 0x208   : > { %2354 = vst [vmem:[%s4830_s3 + $0xe0] sm:$0xff] %v2290_v48  ;;  %v2291_v51 = vadd.f32 %v2123_v49, %v625_v45  ;;  %v634_v45 = vld [vmem:[%s4830_s3 + $0x130] sm:$0xff] }
 0x20a   : > { %2355 = vst [vmem:[%s4830_s3 + $0xe8] sm:$0xff] %v2291_v51  ;;  %v635_v51 = vld [vmem:[%s4830_s3 + $0x138] sm:$0xff] }
 0x20b   : > { %v1838_v52 = vpop.f32.mrb[60].mxu0  ;;  %v2127_v54 = vpop.f32.mrb[60].mxu1 }
 0x20c   : > { %v1840_v55 = vpop.f32.mrb[61].mxu0  ;;  %v2128_v56 = vadd.f32 %v2127_v54, %v1838_v52  ;;  %v2129_v57 = vpop.f32.mrb[61].mxu1 }
 0x20d   : > { %v1841_v58 = vpop.f32.mrb[62].mxu0  ;;  %v2130_v60 = vpop.f32.mrb[62].mxu1 }
 0x20e   : > { %v1843_v61 = vpop.f32.mrb[63].mxu0  ;;  %v2292_v62 = vadd.f32 %v2128_v56, %v626_v53  ;;  %v2131_v63 = vadd.f32 %v2130_v60, %v1841_v58  ;;  %v2132_v0 = vpop.f32.mrb[63].mxu1 }
 0x210   : > { %2356 = vst [vmem:[%s4830_s3 + $0xf0] sm:$0xff] %v2292_v62  ;;  %v2293_v1 = vadd.f32 %v2131_v63, %v627_v59  ;;  %v636_v59 = vld [vmem:[%s4830_s3 + $0x140] sm:$0xff] }
 0x212   : > { %2357 = vst [vmem:[%s4830_s3 + $0xf8] sm:$0xff] %v2293_v1  ;;  %v637_v1 = vld [vmem:[%s4830_s3 + $0x148] sm:$0xff] }
 0x213   : > { %v1846_v2 = vpop.f32.mrb[64].mxu0  ;;  %v2135_v4 = vpop.f32.mrb[64].mxu1 }
 0x214   : > { %v1848_v5 = vpop.f32.mrb[65].mxu0  ;;  %v2136_v6 = vadd.f32 %v2135_v4, %v1846_v2  ;;  %v2137_v7 = vpop.f32.mrb[65].mxu1 }
 0x215   : > { %v1849_v8 = vpop.f32.mrb[66].mxu0  ;;  %v2138_v10 = vpop.f32.mrb[66].mxu1 }
 0x216   : > { %v1851_v11 = vpop.f32.mrb[67].mxu0  ;;  %v2294_v12 = vadd.f32 %v2136_v6, %v628_v3  ;;  %v2139_v13 = vadd.f32 %v2138_v10, %v1849_v8  ;;  %v2140_v14 = vpop.f32.mrb[67].mxu1 }
 0x218   : > { %2358 = vst [vmem:[%s4830_s3 + $0x100] sm:$0xff] %v2294_v12  ;;  %v2295_v15 = vadd.f32 %v2139_v13, %v629_v9  ;;  %v638_v9 = vld [vmem:[%s4830_s3 + $0x150] sm:$0xff] }
 0x21a   : > { %2359 = vst [vmem:[%s4830_s3 + $0x108] sm:$0xff] %v2295_v15  ;;  %v639_v15 = vld [vmem:[%s4830_s3 + $0x158] sm:$0xff] }
 0x21b   : > { %v1854_v16 = vpop.f32.mrb[68].mxu0  ;;  %v2143_v18 = vpop.f32.mrb[68].mxu1 }
 0x21c   : > { %v1856_v19 = vpop.f32.mrb[69].mxu0  ;;  %v2144_v20 = vadd.f32 %v2143_v18, %v1854_v16  ;;  %v2145_v21 = vpop.f32.mrb[69].mxu1 }
 0x21d   : > { %v1857_v22 = vpop.f32.mrb[70].mxu0  ;;  %v2146_v24 = vpop.f32.mrb[70].mxu1 }
 0x21e   : > { %v1859_v25 = vpop.f32.mrb[71].mxu0  ;;  %v2296_v26 = vadd.f32 %v2144_v20, %v630_v17  ;;  %v2147_v27 = vadd.f32 %v2146_v24, %v1857_v22  ;;  %v2148_v28 = vpop.f32.mrb[71].mxu1 }
 0x220   : > { %2360 = vst [vmem:[%s4830_s3 + $0x110] sm:$0xff] %v2296_v26  ;;  %v2297_v29 = vadd.f32 %v2147_v27, %v631_v23  ;;  %v640_v23 = vld [vmem:[%s4830_s3 + $0x160] sm:$0xff] }
 0x222   : > { %2361 = vst [vmem:[%s4830_s3 + $0x118] sm:$0xff] %v2297_v29  ;;  %v641_v29 = vld [vmem:[%s4830_s3 + $0x168] sm:$0xff] }
 0x223   : > { %v1862_v30 = vpop.f32.mrb[72].mxu0  ;;  %v2151_v32 = vpop.f32.mrb[72].mxu1 }
 0x224   : > { %v1864_v33 = vpop.f32.mrb[73].mxu0  ;;  %v2152_v34 = vadd.f32 %v2151_v32, %v1862_v30  ;;  %v2153_v35 = vpop.f32.mrb[73].mxu1 }
 0x225   : > { %v1865_v36 = vpop.f32.mrb[74].mxu0  ;;  %v2154_v38 = vpop.f32.mrb[74].mxu1 }
 0x226   : > { %v1867_v39 = vpop.f32.mrb[75].mxu0  ;;  %v2298_v40 = vadd.f32 %v2152_v34, %v632_v31  ;;  %v2155_v41 = vadd.f32 %v2154_v38, %v1865_v36  ;;  %v2156_v42 = vpop.f32.mrb[75].mxu1 }
 0x228   : > { %2362 = vst [vmem:[%s4830_s3 + $0x120] sm:$0xff] %v2298_v40  ;;  %v2299_v43 = vadd.f32 %v2155_v41, %v633_v37  ;;  %v642_v37 = vld [vmem:[%s4830_s3 + $0x170] sm:$0xff] }
 0x22a   : > { %2363 = vst [vmem:[%s4830_s3 + $0x128] sm:$0xff] %v2299_v43  ;;  %v643_v43 = vld [vmem:[%s4830_s3 + $0x178] sm:$0xff] }
 0x22b   : > { %v1870_v44 = vpop.f32.mrb[76].mxu0  ;;  %v2159_v46 = vpop.f32.mrb[76].mxu1 }
 0x22c   : > { %v1872_v47 = vpop.f32.mrb[77].mxu0  ;;  %v2160_v48 = vadd.f32 %v2159_v46, %v1870_v44  ;;  %v2161_v49 = vpop.f32.mrb[77].mxu1 }
 0x22d   : > { %v1873_v50 = vpop.f32.mrb[78].mxu0  ;;  %v2162_v52 = vpop.f32.mrb[78].mxu1 }
 0x22e   : > { %v1875_v53 = vpop.f32.mrb[79].mxu0  ;;  %v2300_v54 = vadd.f32 %v2160_v48, %v634_v45  ;;  %v2163_v55 = vadd.f32 %v2162_v52, %v1873_v50  ;;  %v2164_v56 = vpop.f32.mrb[79].mxu1 }
 0x230   : > { %2364 = vst [vmem:[%s4830_s3 + $0x130] sm:$0xff] %v2300_v54  ;;  %v2301_v57 = vadd.f32 %v2163_v55, %v635_v51  ;;  %v644_v51 = vld [vmem:[%s4830_s3 + $0x180] sm:$0xff] }
 0x232   : > { %2365 = vst [vmem:[%s4830_s3 + $0x138] sm:$0xff] %v2301_v57  ;;  %v645_v57 = vld [vmem:[%s4830_s3 + $0x188] sm:$0xff] }
 0x233   : > { %v1878_v58 = vpop.f32.mrb[80].mxu0  ;;  %v2167_v60 = vpop.f32.mrb[80].mxu1 }
 0x234   : > { %v1880_v61 = vpop.f32.mrb[81].mxu0  ;;  %v2168_v62 = vadd.f32 %v2167_v60, %v1878_v58  ;;  %v2169_v63 = vpop.f32.mrb[81].mxu1 }
 0x235   : > { %v1881_v0 = vpop.f32.mrb[82].mxu0  ;;  %v2170_v2 = vpop.f32.mrb[82].mxu1 }
 0x236   : > { %v1883_v3 = vpop.f32.mrb[83].mxu0  ;;  %v2302_v4 = vadd.f32 %v2168_v62, %v636_v59  ;;  %v2171_v5 = vadd.f32 %v2170_v2, %v1881_v0  ;;  %v2172_v6 = vpop.f32.mrb[83].mxu1 }
 0x238   : > { %2366 = vst [vmem:[%s4830_s3 + $0x140] sm:$0xff] %v2302_v4  ;;  %v2303_v7 = vadd.f32 %v2171_v5, %v637_v1  ;;  %v646_v1 = vld [vmem:[%s4830_s3 + $0x190] sm:$0xff] }
 0x23a   : > { %2367 = vst [vmem:[%s4830_s3 + $0x148] sm:$0xff] %v2303_v7  ;;  %v647_v7 = vld [vmem:[%s4830_s3 + $0x198] sm:$0xff] }
 0x23b   : > { %v1886_v8 = vpop.f32.mrb[84].mxu0  ;;  %v2175_v10 = vpop.f32.mrb[84].mxu1 }
 0x23c   : > { %v1888_v11 = vpop.f32.mrb[85].mxu0  ;;  %v2176_v12 = vadd.f32 %v2175_v10, %v1886_v8  ;;  %v2177_v13 = vpop.f32.mrb[85].mxu1 }
 0x23d   : > { %v1889_v14 = vpop.f32.mrb[86].mxu0  ;;  %v2178_v16 = vpop.f32.mrb[86].mxu1 }
 0x23e   : > { %v1891_v17 = vpop.f32.mrb[87].mxu0  ;;  %v2304_v18 = vadd.f32 %v2176_v12, %v638_v9  ;;  %v2179_v19 = vadd.f32 %v2178_v16, %v1889_v14  ;;  %v2180_v20 = vpop.f32.mrb[87].mxu1 }
 0x240   : > { %2368 = vst [vmem:[%s4830_s3 + $0x150] sm:$0xff] %v2304_v18  ;;  %v2305_v21 = vadd.f32 %v2179_v19, %v639_v15  ;;  %v648_v15 = vld [vmem:[%s4830_s3 + $0x1a0] sm:$0xff] }
 0x242   : > { %2369 = vst [vmem:[%s4830_s3 + $0x158] sm:$0xff] %v2305_v21  ;;  %v649_v21 = vld [vmem:[%s4830_s3 + $0x1a8] sm:$0xff] }
 0x243   : > { %v1894_v22 = vpop.f32.mrb[88].mxu0  ;;  %v2183_v24 = vpop.f32.mrb[88].mxu1 }
 0x244   : > { %v1896_v25 = vpop.f32.mrb[89].mxu0  ;;  %v2184_v26 = vadd.f32 %v2183_v24, %v1894_v22  ;;  %v2185_v27 = vpop.f32.mrb[89].mxu1 }
 0x245   : > { %v1897_v28 = vpop.f32.mrb[90].mxu0  ;;  %v2186_v30 = vpop.f32.mrb[90].mxu1 }
 0x246   : > { %v1899_v31 = vpop.f32.mrb[91].mxu0  ;;  %v2306_v32 = vadd.f32 %v2184_v26, %v640_v23  ;;  %v2187_v33 = vadd.f32 %v2186_v30, %v1897_v28  ;;  %v2188_v34 = vpop.f32.mrb[91].mxu1 }
 0x248   : > { %2370 = vst [vmem:[%s4830_s3 + $0x160] sm:$0xff] %v2306_v32  ;;  %v2307_v35 = vadd.f32 %v2187_v33, %v641_v29  ;;  %v650_v29 = vld [vmem:[%s4830_s3 + $0x1b0] sm:$0xff] }
 0x24a   : > { %2371 = vst [vmem:[%s4830_s3 + $0x168] sm:$0xff] %v2307_v35  ;;  %v651_v35 = vld [vmem:[%s4830_s3 + $0x1b8] sm:$0xff] }
 0x24b   : > { %v1902_v36 = vpop.f32.mrb[92].mxu0  ;;  %v2191_v38 = vpop.f32.mrb[92].mxu1 }
 0x24c   : > { %v1904_v39 = vpop.f32.mrb[93].mxu0  ;;  %v2192_v40 = vadd.f32 %v2191_v38, %v1902_v36  ;;  %v2193_v41 = vpop.f32.mrb[93].mxu1 }
 0x24d   : > { %v1905_v42 = vpop.f32.mrb[94].mxu0  ;;  %v2194_v44 = vpop.f32.mrb[94].mxu1 }
 0x24e   : > { %v1907_v45 = vpop.f32.mrb[95].mxu0  ;;  %v2308_v46 = vadd.f32 %v2192_v40, %v642_v37  ;;  %v2195_v47 = vadd.f32 %v2194_v44, %v1905_v42  ;;  %v2196_v48 = vpop.f32.mrb[95].mxu1 }
 0x250   : > { %2372 = vst [vmem:[%s4830_s3 + $0x170] sm:$0xff] %v2308_v46  ;;  %v2309_v49 = vadd.f32 %v2195_v47, %v643_v43  ;;  %v652_v43 = vld [vmem:[%s4830_s3 + $0x1c0] sm:$0xff] }
 0x252   : > { %2373 = vst [vmem:[%s4830_s3 + $0x178] sm:$0xff] %v2309_v49  ;;  %v653_v49 = vld [vmem:[%s4830_s3 + $0x1c8] sm:$0xff] }
 0x253   : > { %v1910_v50 = vpop.f32.mrb[96].mxu0  ;;  %v2199_v52 = vpop.f32.mrb[96].mxu1 }
 0x254   : > { %v1912_v53 = vpop.f32.mrb[97].mxu0  ;;  %v2200_v54 = vadd.f32 %v2199_v52, %v1910_v50  ;;  %v2201_v55 = vpop.f32.mrb[97].mxu1 }
 0x255   : > { %v1913_v56 = vpop.f32.mrb[98].mxu0  ;;  %v2202_v58 = vpop.f32.mrb[98].mxu1 }
 0x256   : > { %v1915_v59 = vpop.f32.mrb[99].mxu0  ;;  %v2310_v60 = vadd.f32 %v2200_v54, %v644_v51  ;;  %v2203_v61 = vadd.f32 %v2202_v58, %v1913_v56  ;;  %v2204_v62 = vpop.f32.mrb[99].mxu1 }
 0x258   : > { %2374 = vst [vmem:[%s4830_s3 + $0x180] sm:$0xff] %v2310_v60  ;;  %v2311_v63 = vadd.f32 %v2203_v61, %v645_v57  ;;  %v654_v57 = vld [vmem:[%s4830_s3 + $0x1d0] sm:$0xff] }
 0x25a   : > { %2375 = vst [vmem:[%s4830_s3 + $0x188] sm:$0xff] %v2311_v63  ;;  %v655_v63 = vld [vmem:[%s4830_s3 + $0x1d8] sm:$0xff] }
 0x25b   : > { %v1918_v0 = vpop.f32.mrb[100].mxu0  ;;  %v2207_v2 = vpop.f32.mrb[100].mxu1 }
 0x25c   : > { %v1920_v3 = vpop.f32.mrb[101].mxu0  ;;  %v2208_v4 = vadd.f32 %v2207_v2, %v1918_v0  ;;  %v2209_v5 = vpop.f32.mrb[101].mxu1 }
 0x25d   : > { %v1921_v6 = vpop.f32.mrb[102].mxu0  ;;  %v2210_v8 = vpop.f32.mrb[102].mxu1 }
 0x25e   : > { %v1923_v9 = vpop.f32.mrb[103].mxu0  ;;  %v2312_v10 = vadd.f32 %v2208_v4, %v646_v1  ;;  %v2211_v11 = vadd.f32 %v2210_v8, %v1921_v6  ;;  %v2212_v12 = vpop.f32.mrb[103].mxu1 }
 0x260   : > { %2376 = vst [vmem:[%s4830_s3 + $0x190] sm:$0xff] %v2312_v10  ;;  %v2313_v13 = vadd.f32 %v2211_v11, %v647_v7  ;;  %v656_v7 = vld [vmem:[%s4830_s3 + $0x1e0] sm:$0xff] }
 0x262   : > { %2377 = vst [vmem:[%s4830_s3 + $0x198] sm:$0xff] %v2313_v13  ;;  %v657_v13 = vld [vmem:[%s4830_s3 + $0x1e8] sm:$0xff] }
 0x263   : > { %v1926_v14 = vpop.f32.mrb[104].mxu0  ;;  %v2215_v16 = vpop.f32.mrb[104].mxu1 }
 0x264   : > { %v1928_v17 = vpop.f32.mrb[105].mxu0  ;;  %v2216_v18 = vadd.f32 %v2215_v16, %v1926_v14  ;;  %v2217_v19 = vpop.f32.mrb[105].mxu1 }
 0x265   : > { %v1929_v20 = vpop.f32.mrb[106].mxu0  ;;  %v2218_v22 = vpop.f32.mrb[106].mxu1 }
 0x266   : > { %v1931_v23 = vpop.f32.mrb[107].mxu0  ;;  %v2314_v24 = vadd.f32 %v2216_v18, %v648_v15  ;;  %v2219_v25 = vadd.f32 %v2218_v22, %v1929_v20  ;;  %v2220_v26 = vpop.f32.mrb[107].mxu1 }
 0x268   : > { %2378 = vst [vmem:[%s4830_s3 + $0x1a0] sm:$0xff] %v2314_v24  ;;  %v2315_v27 = vadd.f32 %v2219_v25, %v649_v21  ;;  %v658_v21 = vld [vmem:[%s4830_s3 + $0x1f0] sm:$0xff] }
 0x26a   : > { %2379 = vst [vmem:[%s4830_s3 + $0x1a8] sm:$0xff] %v2315_v27  ;;  %v659_v27 = vld [vmem:[%s4830_s3 + $0x1f8] sm:$0xff] }
 0x26b   : > { %v1934_v28 = vpop.f32.mrb[108].mxu0  ;;  %v2223_v30 = vpop.f32.mrb[108].mxu1 }
 0x26c   : > { %v1936_v31 = vpop.f32.mrb[109].mxu0  ;;  %v2224_v32 = vadd.f32 %v2223_v30, %v1934_v28  ;;  %v2225_v33 = vpop.f32.mrb[109].mxu1 }
 0x26d   : > { %v1937_v34 = vpop.f32.mrb[110].mxu0  ;;  %v2226_v36 = vpop.f32.mrb[110].mxu1 }
 0x26e   : > { %v1939_v37 = vpop.f32.mrb[111].mxu0  ;;  %v2316_v38 = vadd.f32 %v2224_v32, %v650_v29  ;;  %v2227_v39 = vadd.f32 %v2226_v36, %v1937_v34  ;;  %v2228_v40 = vpop.f32.mrb[111].mxu1  ;;  %v2394_v34 = vld [vmem:[%s4830_s3] sm:$0xff] (!%p2876_p11)  ;;  %v2395_v36 = vld [vmem:[%s4830_s3 + $0x8] sm:$0xff] (!%p2876_p11) }
 0x26f   : > { %v2397_v40 = vld [vmem:[%s4830_s3 + $0x18] sm:$0xff] (!%p2876_p11) }
 0x270   : > { %2380 = vst [vmem:[%s4830_s3 + $0x1b0] sm:$0xff] %v2316_v38  ;;  %v2317_v41 = vadd.f32 %v2227_v39, %v651_v35  ;;  %v4365_v35 = vld [vmem:[%s4829_s2] ss:$0 sm:$0xff] (!%p2876_p11)  ;;  %v2396_v39 = vld [vmem:[%s4830_s3 + $0x10] sm:$0xff] (!%p2876_p11) }
 0x271   : > { %v2465_v37 = vadd.f32 (!%p2876_p11), %v4365_v35, %v2394_v34  ;;  %v2466_v38 = vadd.f32 (!%p2876_p11), %v4365_v35, %v2395_v36  ;;  %v2426_v36 = vld [vmem:[%s4830_s3 + $0x100] sm:$0xff] (!%p2876_p11) }
 0x272   : > { %2381 = vst [vmem:[%s4830_s3 + $0x1b8] sm:$0xff] %v2317_v41  ;;  %v2398_v41 = vld [vmem:[%s4830_s3 + $0x20] sm:$0xff] (!%p2876_p11) }
 0x273   : > { %v1942_v42 = vpop.f32.mrb[112].mxu0  ;;  %v2231_v44 = vpop.f32.mrb[112].mxu1  ;;  %2529 = vst [vmem:[%s4830_s3] sm:$0xff] (!%p2876_p11), %v2465_v37  ;;  %2530 = vst [vmem:[%s4830_s3 + $0x8] sm:$0xff] (!%p2876_p11), %v2466_v38  ;;  %v2427_v37 = vld [vmem:[%s4830_s3 + $0x108] sm:$0xff] (!%p2876_p11)  ;;  %v2428_v38 = vld [vmem:[%s4830_s3 + $0x110] sm:$0xff] (!%p2876_p11) }
 0x274   : > { %v1944_v45 = vpop.f32.mrb[113].mxu0  ;;  %v2232_v46 = vadd.f32 %v2231_v44, %v1942_v42  ;;  %v2233_v47 = vpop.f32.mrb[113].mxu1  ;;  %v2467_v42 = vadd.f32 (!%p2876_p11), %v4365_v35, %v2396_v39  ;;  %v2469_v44 = vadd.f32 (!%p2876_p11), %v4365_v35, %v2398_v41  ;;  %v2497_v39 = vadd.f32 (!%p2876_p11), %v4365_v35, %v2426_v36 }
 0x275   : > { %v1945_v48 = vpop.f32.mrb[114].mxu0  ;;  %v2234_v50 = vpop.f32.mrb[114].mxu1  ;;  %v2399_v45 = vld [vmem:[%s4830_s3 + $0x28] sm:$0xff] (!%p2876_p11)  ;;  %v2401_v47 = vld [vmem:[%s4830_s3 + $0x38] sm:$0xff] (!%p2876_p11)  ;;  %v2499_v41 = vadd.f32 (!%p2876_p11), %v4365_v35, %v2428_v38 }
 0x276   : > { %v1947_v51 = vpop.f32.mrb[115].mxu0  ;;  %v2318_v52 = vadd.f32 %v2232_v46, %v652_v43  ;;  %v2235_v53 = vadd.f32 %v2234_v50, %v1945_v48  ;;  %v2236_v54 = vpop.f32.mrb[115].mxu1  ;;  %v2468_v43 = vadd.f32 (!%p2876_p11), %v4365_v35, %v2397_v40  ;;  %v2400_v46 = vld [vmem:[%s4830_s3 + $0x30] sm:$0xff] (!%p2876_p11)  ;;  %v2470_v48 = vadd.f32 (!%p2876_p11), %v4365_v35, %v2399_v45  ;;  %2531 = vst [vmem:[%s4830_s3 + $0x10] sm:$0xff] (!%p2876_p11), %v2467_v42  ;;  %v2429_v42 = vld [vmem:[%s4830_s3 + $0x118] sm:$0xff] (!%p2876_p11) }
 0x277   : > { %v2472_v50 = vadd.f32 (!%p2876_p11), %v4365_v35, %v2401_v47  ;;  %v2402_v51 = vld [vmem:[%s4830_s3 + $0x40] sm:$0xff] (!%p2876_p11)  ;;  %2533 = vst [vmem:[%s4830_s3 + $0x20] sm:$0xff] (!%p2876_p11), %v2469_v44  ;;  %v2498_v40 = vadd.f32 (!%p2876_p11), %v4365_v35, %v2427_v37  ;;  %v2431_v44 = vld [vmem:[%s4830_s3 + $0x128] sm:$0xff] (!%p2876_p11)  ;;  %v2500_v45 = vadd.f32 (!%p2876_p11), %v4365_v35, %v2429_v42  ;;  %2561 = vst [vmem:[%s4830_s3 + $0x100] sm:$0xff] (!%p2876_p11), %v2497_v39 }
 0x278   : > { %2382 = vst [vmem:[%s4830_s3 + $0x1c0] sm:$0xff] %v2318_v52  ;;  %v2319_v55 = vadd.f32 %v2235_v53, %v653_v49  ;;  %v2471_v49 = vadd.f32 (!%p2876_p11), %v4365_v35, %v2400_v46  ;;  %v2403_v52 = vld [vmem:[%s4830_s3 + $0x48] sm:$0xff] (!%p2876_p11)  ;;  %v2404_v53 = vld [vmem:[%s4830_s3 + $0x50] sm:$0xff] (!%p2876_p11)  ;;  %2532 = vst [vmem:[%s4830_s3 + $0x18] sm:$0xff] (!%p2876_p11), %v2468_v43  ;;  %v2473_v54 = vadd.f32 (!%p2876_p11), %v4365_v35, %v2402_v51 }
 0x279   : > { %2534 = vst [vmem:[%s4830_s3 + $0x28] sm:$0xff] (!%p2876_p11), %v2470_v48  ;;  %2536 = vst [vmem:[%s4830_s3 + $0x38] sm:$0xff] (!%p2876_p11), %v2472_v50  ;;  %v2430_v43 = vld [vmem:[%s4830_s3 + $0x120] sm:$0xff] (!%p2876_p11)  ;;  %v2502_v47 = vadd.f32 (!%p2876_p11), %v4365_v35, %v2431_v44  ;;  %v2432_v48 = vld [vmem:[%s4830_s3 + $0x130] sm:$0xff] (!%p2876_p11) }
 0x27a   : > { %2383 = vst [vmem:[%s4830_s3 + $0x1c8] sm:$0xff] %v2319_v55  ;;  %v2474_v55 = vadd.f32 (!%p2876_p11), %v4365_v35, %v2403_v52  ;;  %2535 = vst [vmem:[%s4830_s3 + $0x30] sm:$0xff] (!%p2876_p11), %v2471_v49  ;;  %v2501_v46 = vadd.f32 (!%p2876_p11), %v4365_v35, %v2430_v43  ;;  %v2433_v49 = vld [vmem:[%s4830_s3 + $0x138] sm:$0xff] (!%p2876_p11)  ;;  %v2434_v50 = vld [vmem:[%s4830_s3 + $0x140] sm:$0xff] (!%p2876_p11)  ;;  %v2503_v51 = vadd.f32 (!%p2876_p11), %v4365_v35, %v2432_v48 }
 0x27b   : > { %v1950_v56 = vpop.f32.mrb[116].mxu0  ;;  %v2239_v58 = vpop.f32.mrb[116].mxu1  ;;  %2537 = vst [vmem:[%s4830_s3 + $0x40] sm:$0xff] (!%p2876_p11), %v2473_v54  ;;  %2562 = vst [vmem:[%s4830_s3 + $0x108] sm:$0xff] (!%p2876_p11), %v2498_v40  ;;  %v2504_v52 = vadd.f32 (!%p2876_p11), %v4365_v35, %v2433_v49  ;;  %v2435_v54 = vld [vmem:[%s4830_s3 + $0x148] sm:$0xff] (!%p2876_p11) }
 0x27c   : > { %v1952_v59 = vpop.f32.mrb[117].mxu0  ;;  %v2240_v60 = vadd.f32 %v2239_v58, %v1950_v56  ;;  %v2241_v61 = vpop.f32.mrb[117].mxu1  ;;  %v2475_v56 = vadd.f32 (!%p2876_p11), %v4365_v35, %v2404_v53  ;;  %v2406_v58 = vld [vmem:[%s4830_s3 + $0x60] sm:$0xff] (!%p2876_p11)  ;;  %2538 = vst [vmem:[%s4830_s3 + $0x48] sm:$0xff] (!%p2876_p11), %v2474_v55  ;;  %2563 = vst [vmem:[%s4830_s3 + $0x110] sm:$0xff] (!%p2876_p11), %v2499_v41  ;;  %v2505_v53 = vadd.f32 (!%p2876_p11), %v4365_v35, %v2434_v50  ;;  %v2436_v55 = vld [vmem:[%s4830_s3 + $0x150] sm:$0xff] (!%p2876_p11) }
 0x27d   : > { %v1953_v62 = vpop.f32.mrb[118].mxu0  ;;  %v2242_v0 = vpop.f32.mrb[118].mxu1  ;;  %v2407_v59 = vld [vmem:[%s4830_s3 + $0x68] sm:$0xff] (!%p2876_p11)  ;;  %v2477_v61 = vadd.f32 (!%p2876_p11), %v4365_v35, %v2406_v58  ;;  %2564 = vst [vmem:[%s4830_s3 + $0x118] sm:$0xff] (!%p2876_p11), %v2500_v45  ;;  %2565 = vst [vmem:[%s4830_s3 + $0x120] sm:$0xff] (!%p2876_p11), %v2501_v46  ;;  %v2507_v58 = vadd.f32 (!%p2876_p11), %v4365_v35, %v2436_v55 }
 0x27e   : > { %v1955_v1 = vpop.f32.mrb[119].mxu0  ;;  %v2320_v2 = vadd.f32 %v2240_v60, %v654_v57  ;;  %v2243_v3 = vadd.f32 %v2242_v0, %v1953_v62  ;;  %v2244_v4 = vpop.f32.mrb[119].mxu1  ;;  %v2405_v57 = vld [vmem:[%s4830_s3 + $0x58] sm:$0xff] (!%p2876_p11)  ;;  %v2478_v62 = vadd.f32 (!%p2876_p11), %v4365_v35, %v2407_v59  ;;  %2539 = vst [vmem:[%s4830_s3 + $0x50] sm:$0xff] (!%p2876_p11), %v2475_v56  ;;  %2566 = vst [vmem:[%s4830_s3 + $0x128] sm:$0xff] (!%p2876_p11), %v2502_v47 }
 0x27f   : > { %v2476_v60 = vadd.f32 (!%p2876_p11), %v4365_v35, %v2405_v57  ;;  %v2409_v0 = vld [vmem:[%s4830_s3 + $0x78] sm:$0xff] (!%p2876_p11)  ;;  %v2410_v1 = vld [vmem:[%s4830_s3 + $0x80] sm:$0xff] (!%p2876_p11)  ;;  %2541 = vst [vmem:[%s4830_s3 + $0x60] sm:$0xff] (!%p2876_p11), %v2477_v61  ;;  %v2506_v57 = vadd.f32 (!%p2876_p11), %v4365_v35, %v2435_v54  ;;  %v2439_v61 = vld [vmem:[%s4830_s3 + $0x168] sm:$0xff] (!%p2876_p11) }
 0x280   : > { %2384 = vst [vmem:[%s4830_s3 + $0x1d0] sm:$0xff] %v2320_v2  ;;  %v2321_v5 = vadd.f32 %v2243_v3, %v655_v63  ;;  %v2408_v63 = vld [vmem:[%s4830_s3 + $0x70] sm:$0xff] (!%p2876_p11)  ;;  %v2480_v3 = vadd.f32 (!%p2876_p11), %v4365_v35, %v2409_v0  ;;  %v2481_v4 = vadd.f32 (!%p2876_p11), %v4365_v35, %v2410_v1  ;;  %2542 = vst [vmem:[%s4830_s3 + $0x68] sm:$0xff] (!%p2876_p11), %v2478_v62  ;;  %v2437_v56 = vld [vmem:[%s4830_s3 + $0x158] sm:$0xff] (!%p2876_p11) }
 0x281   : > { %v2479_v2 = vadd.f32 (!%p2876_p11), %v4365_v35, %v2408_v63  ;;  %2540 = vst [vmem:[%s4830_s3 + $0x58] sm:$0xff] (!%p2876_p11), %v2476_v60  ;;  %v2508_v59 = vadd.f32 (!%p2876_p11), %v4365_v35, %v2437_v56  ;;  %v2438_v60 = vld [vmem:[%s4830_s3 + $0x160] sm:$0xff] (!%p2876_p11)  ;;  %v2440_v62 = vld [vmem:[%s4830_s3 + $0x170] sm:$0xff] (!%p2876_p11)  ;;  %2567 = vst [vmem:[%s4830_s3 + $0x130] sm:$0xff] (!%p2876_p11), %v2503_v51  ;;  %v2510_v0 = vadd.f32 (!%p2876_p11), %v4365_v35, %v2439_v61 }
 0x282   : > { %2385 = vst [vmem:[%s4830_s3 + $0x1d8] sm:$0xff] %v2321_v5  ;;  %v2411_v5 = vld [vmem:[%s4830_s3 + $0x88] sm:$0xff] (!%p2876_p11)  ;;  %2544 = vst [vmem:[%s4830_s3 + $0x78] sm:$0xff] (!%p2876_p11), %v2480_v3  ;;  %v2509_v63 = vadd.f32 (!%p2876_p11), %v4365_v35, %v2438_v60  ;;  %v2511_v1 = vadd.f32 (!%p2876_p11), %v4365_v35, %v2440_v62  ;;  %v2442_v3 = vld [vmem:[%s4830_s3 + $0x180] sm:$0xff] (!%p2876_p11) }
 0x283   : > { %v1958_v6 = vpop.f32.mrb[120].mxu0  ;;  %v2247_v8 = vpop.f32.mrb[120].mxu1  ;;  %2543 = vst [vmem:[%s4830_s3 + $0x70] sm:$0xff] (!%p2876_p11), %v2479_v2  ;;  %2545 = vst [vmem:[%s4830_s3 + $0x80] sm:$0xff] (!%p2876_p11), %v2481_v4  ;;  %v2441_v2 = vld [vmem:[%s4830_s3 + $0x178] sm:$0xff] (!%p2876_p11)  ;;  %v2443_v4 = vld [vmem:[%s4830_s3 + $0x188] sm:$0xff] (!%p2876_p11) }
 0x284   : > { %v1960_v9 = vpop.f32.mrb[121].mxu0  ;;  %v2248_v10 = vadd.f32 %v2247_v8, %v1958_v6  ;;  %v2249_v11 = vpop.f32.mrb[121].mxu1  ;;  %v2412_v6 = vld [vmem:[%s4830_s3 + $0x90] sm:$0xff] (!%p2876_p11)  ;;  %v2482_v8 = vadd.f32 (!%p2876_p11), %v4365_v35, %v2411_v5  ;;  %2568 = vst [vmem:[%s4830_s3 + $0x138] sm:$0xff] (!%p2876_p11), %v2504_v52  ;;  %2569 = vst [vmem:[%s4830_s3 + $0x140] sm:$0xff] (!%p2876_p11), %v2505_v53  ;;  %v2512_v5 = vadd.f32 (!%p2876_p11), %v4365_v35, %v2441_v2 }
 0x285   : > { %v1961_v12 = vpop.f32.mrb[122].mxu0  ;;  %v2250_v14 = vpop.f32.mrb[122].mxu1  ;;  %v2483_v9 = vadd.f32 (!%p2876_p11), %v4365_v35, %v2412_v6  ;;  %v2414_v11 = vld [vmem:[%s4830_s3 + $0xa0] sm:$0xff] (!%p2876_p11)  ;;  %2570 = vst [vmem:[%s4830_s3 + $0x148] sm:$0xff] (!%p2876_p11), %v2506_v57  ;;  %2571 = vst [vmem:[%s4830_s3 + $0x150] sm:$0xff] (!%p2876_p11), %v2507_v58  ;;  %v2513_v6 = vadd.f32 (!%p2876_p11), %v4365_v35, %v2442_v3 }
 0x286   : > { %v1963_v15 = vpop.f32.mrb[123].mxu0  ;;  %v2322_v16 = vadd.f32 %v2248_v10, %v656_v7  ;;  %v2251_v17 = vadd.f32 %v2250_v14, %v1961_v12  ;;  %v2252_v18 = vpop.f32.mrb[123].mxu1  ;;  %v2413_v7 = vld [vmem:[%s4830_s3 + $0x98] sm:$0xff] (!%p2876_p11)  ;;  %v2415_v12 = vld [vmem:[%s4830_s3 + $0xa8] sm:$0xff] (!%p2876_p11)  ;;  %v2485_v14 = vadd.f32 (!%p2876_p11), %v4365_v35, %v2414_v11  ;;  %2546 = vst [vmem:[%s4830_s3 + $0x88] sm:$0xff] (!%p2876_p11), %v2482_v8  ;;  %2572 = vst [vmem:[%s4830_s3 + $0x158] sm:$0xff] (!%p2876_p11), %v2508_v59 }
 0x287   : > { %v2484_v10 = vadd.f32 (!%p2876_p11), %v4365_v35, %v2413_v7  ;;  %v2486_v15 = vadd.f32 (!%p2876_p11), %v4365_v35, %v2415_v12  ;;  %v2418_v18 = vld [vmem:[%s4830_s3 + $0xc0] sm:$0xff] (!%p2876_p11)  ;;  %2547 = vst [vmem:[%s4830_s3 + $0x90] sm:$0xff] (!%p2876_p11), %v2483_v9  ;;  %v2514_v7 = vadd.f32 (!%p2876_p11), %v4365_v35, %v2443_v4  ;;  %v2444_v8 = vld [vmem:[%s4830_s3 + $0x190] sm:$0xff] (!%p2876_p11)  ;;  %v2445_v9 = vld [vmem:[%s4830_s3 + $0x198] sm:$0xff] (!%p2876_p11) }
 0x288   : > { %2386 = vst [vmem:[%s4830_s3 + $0x1e0] sm:$0xff] %v2322_v16  ;;  %v2323_v19 = vadd.f32 %v2251_v17, %v657_v13  ;;  %v2416_v13 = vld [vmem:[%s4830_s3 + $0xb0] sm:$0xff] (!%p2876_p11)  ;;  %v2417_v17 = vld [vmem:[%s4830_s3 + $0xb8] sm:$0xff] (!%p2876_p11)  ;;  %2549 = vst [vmem:[%s4830_s3 + $0xa0] sm:$0xff] (!%p2876_p11), %v2485_v14  ;;  %v2515_v11 = vadd.f32 (!%p2876_p11), %v4365_v35, %v2444_v8  ;;  %v2516_v12 = vadd.f32 (!%p2876_p11), %v4365_v35, %v2445_v9 }
 0x289   : > { %v2487_v16 = vadd.f32 (!%p2876_p11), %v4365_v35, %v2416_v13  ;;  %2548 = vst [vmem:[%s4830_s3 + $0x98] sm:$0xff] (!%p2876_p11), %v2484_v10  ;;  %2550 = vst [vmem:[%s4830_s3 + $0xa8] sm:$0xff] (!%p2876_p11), %v2486_v15  ;;  %v2446_v10 = vld [vmem:[%s4830_s3 + $0x1a0] sm:$0xff] (!%p2876_p11)  ;;  %v2447_v14 = vld [vmem:[%s4830_s3 + $0x1a8] sm:$0xff] (!%p2876_p11) }
 0x28a   : > { %2387 = vst [vmem:[%s4830_s3 + $0x1e8] sm:$0xff] %v2323_v19  ;;  %v2419_v19 = vld [vmem:[%s4830_s3 + $0xc8] sm:$0xff] (!%p2876_p11)  ;;  %2573 = vst [vmem:[%s4830_s3 + $0x160] sm:$0xff] (!%p2876_p11), %v2509_v63  ;;  %v2517_v13 = vadd.f32 (!%p2876_p11), %v4365_v35, %v2446_v10  ;;  %v2448_v15 = vld [vmem:[%s4830_s3 + $0x1b0] sm:$0xff] (!%p2876_p11) }
 0x28b   : > { %v1966_v20 = vpop.f32.mrb[124].mxu0  ;;  %v2255_v22 = vpop.f32.mrb[124].mxu1  ;;  %2551 = vst [vmem:[%s4830_s3 + $0xb0] sm:$0xff] (!%p2876_p11), %v2487_v16  ;;  %2574 = vst [vmem:[%s4830_s3 + $0x168] sm:$0xff] (!%p2876_p11), %v2510_v0  ;;  %v2449_v16 = vld [vmem:[%s4830_s3 + $0x1b8] sm:$0xff] (!%p2876_p11) }
 0x28c   : > { %v1968_v23 = vpop.f32.mrb[125].mxu0  ;;  %v2256_v24 = vadd.f32 %v2255_v22, %v1966_v20  ;;  %v2257_v25 = vpop.f32.mrb[125].mxu1  ;;  %2393 = sbr.rel (%p2876_p11) target bundleno = 669 (0x29d), region = 63  ;;  %v2488_v20 = vadd.f32 (!%p2876_p11), %v4365_v35, %v2417_v17  ;;  %v2490_v22 = vadd.f32 (!%p2876_p11), %v4365_v35, %v2419_v19  ;;  %2575 = vst [vmem:[%s4830_s3 + $0x170] sm:$0xff] (!%p2876_p11), %v2511_v1  ;;  %2576 = vst [vmem:[%s4830_s3 + $0x178] sm:$0xff] (!%p2876_p11), %v2512_v5 }
 0x28d   : > { %v1969_v26 = vpop.f32.mrb[126].mxu0  ;;  %v2258_v28 = vpop.f32.mrb[126].mxu1  ;;  %v2420_v23 = vld [vmem:[%s4830_s3 + $0xd0] sm:$0xff] (!%p2876_p11)  ;;  %v2422_v25 = vld [vmem:[%s4830_s3 + $0xe0] sm:$0xff] (!%p2876_p11)  ;;  %2577 = vst [vmem:[%s4830_s3 + $0x180] sm:$0xff] (!%p2876_p11), %v2513_v6  ;;  %2578 = vst [vmem:[%s4830_s3 + $0x188] sm:$0xff] (!%p2876_p11), %v2514_v7  ;;  %v2518_v17 = vadd.f32 (!%p2876_p11), %v4365_v35, %v2447_v14  ;;  %v2520_v19 = vadd.f32 (!%p2876_p11), %v4365_v35, %v2449_v16 }
 0x28e   : > { %v1971_v29 = vpop.f32.mrb[127].mxu0  ;;  %v2324_v30 = vadd.f32 %v2256_v24, %v658_v21  ;;  %v2259_v31 = vadd.f32 %v2258_v28, %v1969_v26  ;;  %v2260_v32 = vpop.f32.mrb[127].mxu1  ;;  %v2489_v21 = vadd.f32 (!%p2876_p11), %v4365_v35, %v2418_v18  ;;  %v2421_v24 = vld [vmem:[%s4830_s3 + $0xd8] sm:$0xff] (!%p2876_p11)  ;;  %v2491_v26 = vadd.f32 (!%p2876_p11), %v4365_v35, %v2420_v23  ;;  %2552 = vst [vmem:[%s4830_s3 + $0xb8] sm:$0xff] (!%p2876_p11), %v2488_v20  ;;  %v2450_v20 = vld [vmem:[%s4830_s3 + $0x1c0] sm:$0xff] (!%p2876_p11) }
 0x28f   : > { %v2493_v28 = vadd.f32 (!%p2876_p11), %v4365_v35, %v2422_v25  ;;  %v2423_v29 = vld [vmem:[%s4830_s3 + $0xe8] sm:$0xff] (!%p2876_p11)  ;;  %2554 = vst [vmem:[%s4830_s3 + $0xc8] sm:$0xff] (!%p2876_p11), %v2490_v22  ;;  %v2519_v18 = vadd.f32 (!%p2876_p11), %v4365_v35, %v2448_v15  ;;  %v2452_v22 = vld [vmem:[%s4830_s3 + $0x1d0] sm:$0xff] (!%p2876_p11)  ;;  %2579 = vst [vmem:[%s4830_s3 + $0x190] sm:$0xff] (!%p2876_p11), %v2515_v11  ;;  %v2521_v23 = vadd.f32 (!%p2876_p11), %v4365_v35, %v2450_v20 }
 0x290   : > { %2388 = vst [vmem:[%s4830_s3 + $0x1f0] sm:$0xff] %v2324_v30  ;;  %v2325_v33 = vadd.f32 %v2259_v31, %v659_v27  ;;  %v2492_v27 = vadd.f32 (!%p2876_p11), %v4365_v35, %v2421_v24  ;;  %v2424_v30 = vld [vmem:[%s4830_s3 + $0xf0] sm:$0xff] (!%p2876_p11)  ;;  %v2425_v31 = vld [vmem:[%s4830_s3 + $0xf8] sm:$0xff] (!%p2876_p11)  ;;  %2553 = vst [vmem:[%s4830_s3 + $0xc0] sm:$0xff] (!%p2876_p11), %v2489_v21  ;;  %v2494_v32 = vadd.f32 (!%p2876_p11), %v4365_v35, %v2423_v29 }
 0x291   : > { %v2496_v34 = vadd.f32 (!%p2876_p11), %v4365_v35, %v2425_v31  ;;  %2555 = vst [vmem:[%s4830_s3 + $0xd0] sm:$0xff] (!%p2876_p11), %v2491_v26  ;;  %2557 = vst [vmem:[%s4830_s3 + $0xe0] sm:$0xff] (!%p2876_p11), %v2493_v28  ;;  %v2451_v21 = vld [vmem:[%s4830_s3 + $0x1c8] sm:$0xff] (!%p2876_p11)  ;;  %v2523_v25 = vadd.f32 (!%p2876_p11), %v4365_v35, %v2452_v22  ;;  %v2453_v26 = vld [vmem:[%s4830_s3 + $0x1d8] sm:$0xff] (!%p2876_p11) }
 0x292   : > { %2389 = vst [vmem:[%s4830_s3 + $0x1f8] sm:$0xff] %v2325_v33  ;;  %v2495_v33 = vadd.f32 (!%p2876_p11), %v4365_v35, %v2424_v30  ;;  %2556 = vst [vmem:[%s4830_s3 + $0xd8] sm:$0xff] (!%p2876_p11), %v2492_v27  ;;  %v2522_v24 = vadd.f32 (!%p2876_p11), %v4365_v35, %v2451_v21  ;;  %v2454_v27 = vld [vmem:[%s4830_s3 + $0x1e0] sm:$0xff] (!%p2876_p11)  ;;  %v2455_v28 = vld [vmem:[%s4830_s3 + $0x1e8] sm:$0xff] (!%p2876_p11)  ;;  %v2524_v29 = vadd.f32 (!%p2876_p11), %v4365_v35, %v2453_v26 }
 0x293   : > { %2558 = vst [vmem:[%s4830_s3 + $0xe8] sm:$0xff] %v2494_v32  ;;  %2560 = vst [vmem:[%s4830_s3 + $0xf8] sm:$0xff] %v2496_v34  ;;  %v2525_v30 = vadd.f32 %v4365_v35, %v2454_v27  ;;  %v2526_v31 = vadd.f32 %v4365_v35, %v2455_v28 }
 0x294   : > { %2559 = vst [vmem:[%s4830_s3 + $0xf0] sm:$0xff] %v2495_v33  ;;  %2580 = vst [vmem:[%s4830_s3 + $0x198] sm:$0xff] %v2516_v12 }
 0x295   : > { %2581 = vst [vmem:[%s4830_s3 + $0x1a0] sm:$0xff] %v2517_v13  ;;  %2582 = vst [vmem:[%s4830_s3 + $0x1a8] sm:$0xff] %v2518_v17 }
 0x296   : > { %2583 = vst [vmem:[%s4830_s3 + $0x1b0] sm:$0xff] %v2519_v18  ;;  %2584 = vst [vmem:[%s4830_s3 + $0x1b8] sm:$0xff] %v2520_v19 }
 0x297   : > { %v2456_v32 = vld [vmem:[%s4830_s3 + $0x1f0] sm:$0xff]  ;;  %2585 = vst [vmem:[%s4830_s3 + $0x1c0] sm:$0xff] %v2521_v23  ;;  %2586 = vst [vmem:[%s4830_s3 + $0x1c8] sm:$0xff] %v2522_v24 }
 0x298   : > { %2587 = vst [vmem:[%s4830_s3 + $0x1d0] sm:$0xff] %v2523_v25  ;;  %v2527_v34 = vadd.f32 %v4365_v35, %v2456_v32  ;;  %2588 = vst [vmem:[%s4830_s3 + $0x1d8] sm:$0xff] %v2524_v29 }
 0x299   : > { %v2457_v33 = vld [vmem:[%s4830_s3 + $0x1f8] sm:$0xff]  ;;  %2589 = vst [vmem:[%s4830_s3 + $0x1e0] sm:$0xff] %v2525_v30  ;;  %2590 = vst [vmem:[%s4830_s3 + $0x1e8] sm:$0xff] %v2526_v31 }
 0x29a   : > { %v2528_v36 = vadd.f32 %v4365_v35, %v2457_v33  ;;  %2591 = vst [vmem:[%s4830_s3 + $0x1f0] sm:$0xff] %v2527_v34 }
 0x29c   : > { %2592 = vst [vmem:[%s4830_s3 + $0x1f8] sm:$0xff] %v2528_v36 }
 0x29d PF: > { %s13_s16 = sadd.s32 1, %s3187_s16   ;;  %s4831_s12 = smov %s3175_s13 }
 0x29e   : > { %p10_p12 = scmp.ge.s32.totalorder %s13_s16, 5   ;;  %s4832_s13 = smov %s3246_s20 }
 0x29f   : > { %s4833_s14 = smov %s3183_s15  ;;  %s4834_s15 = smov %s4836_s17 }
 0x2a0   :  { %12 = sbr.rel (!%p10_p12) target bundleno = 3 (0x3), region = 104 }

// kernel: generator_forward.93
= control target key start
LH: loop header
LB: loop body
LE: loop exit
PB: predicated region body
PF: predicated region fallthrough
CT: control target
= control target key end

     0   :  { %s3403_s12 = smov 0   ;;  %s3405_s13 = smov 0   ;;  %s5019_s0 = inlined_call_operand.vmem [shape: bf16[512,3584], index: 0, kind: input, shape index: {}]   ;;  %s5020_s1 = inlined_call_operand.vmem [shape: bf16[3584,128], index: 1, kind: input, shape index: {}]   ;;  %s5021_s2 = inlined_call_operand.vmem [shape: f32[1,128], index: 2, kind: input, shape index: {}]   ;;  %s5022_s3 = inlined_call_operand.vmem [shape: f32[512,128], index: 3, kind: output, shape index: {}]  }
   0x1   :  { %s3407_s14 = smov 0   ;;  %s3409_s15 = smov 0  }
   0x2   :  { %s3411_s16 = smov 0  }
   0x3 LB: > { %s25_s17 = sadd.s32 1, %s3375_s15  ;;  %p48_p1 = scmp.ne.s32.totalorder %s3367_s13, %s3363_s12  ;;  %s3379_s16 = sphi %s3411_s16, %s13_s16   ;;  %s3375_s15 = sphi %s3409_s15, %s5026_s15   ;;  %s3371_s14 = sphi %s3407_s14, %s5025_s14   ;;  %s3367_s13 = sphi %s3405_s13, %s5024_s13   ;;  %s3363_s12 = sphi %s3403_s12, %s5023_s12  }
   0x4   : > { %p26_p0 = scmp.ge.s32.totalorder %s25_s17, 7  ;;  %p49_p2 = scmp.eq.s32.totalorder %s3379_s16, 0 }
   0x5   : > { %s41_s19 = sadd.s32 1, %s3367_s13  ;;  %p2771_p5 = scmp.ge.s32.totalorder %s3379_s16, 7 }
   0x6   : > { %s5028_s17 = smov (%p26_p0, %s25_s17), 0  ;;  %p50_p3 = por %p49_p2, %p48_p1 }
   0x7   : > { %s37_s18 = ssub.s32 %s3375_s15, %s5028_s17  ;;  %162 = sbr.rel (%p2771_p5) target bundleno = 82 (0x52), region = 20 }
   0x8   : > { %p39_p4 = scmp.eq.s32.totalorder %s37_s18, 0 }
   0xa   : > { %s3438_s20 = scalar_select %p39_p4, %s3367_s13, %s41_s19  }
   0xe   : > { %165 = sbr.rel (!%p50_p3) target bundleno = 82 (0x52), region = 24  ;;  %s167_s21 = sand.u32 (%p50_p3), 1, %s3367_s13  }
   0xf   : > { %s2946_s22 = sshll.u32 (%p50_p3), %s3375_s15, 4  ;;  %s2772_s23 = sshll.u32 (%p50_p3), %s167_s21, 10 }
  0x10   : > { %s3446_s26 = scalar_lea.vmem (%p50_p3), %s5019_s0, %s2946_s22  ;;  %s3451_s27 = scalar_lea.vmem (%p50_p3), [#allocation2], %s2772_s23 }
  0x11   : > { %v188_v0 = vld [vmem:[%s3446_s26] sm:$0xff] (%p50_p3)  ;;  %v190_v1 = vld [vmem:[%s3446_s26 + $0x8] sm:$0xff] (%p50_p3)  ;;  %v192_v2 = vld [vmem:[%s3446_s26 + $0x70] sm:$0xff] (%p50_p3) }
  0x12   : > { %189 = vst [vmem:[%s3451_s27] sm:$0xff] (%p50_p3), %v188_v0  ;;  %191 = vst [vmem:[%s3451_s27 + $0x8] sm:$0xff] (%p50_p3), %v190_v1  ;;  %v194_v3 = vld [vmem:[%s3446_s26 + $0x78] sm:$0xff] (%p50_p3)  ;;  %v196_v4 = vld [vmem:[%s3446_s26 + $0xe0] sm:$0xff] (%p50_p3) }
  0x13   : > { %193 = vst [vmem:[%s3451_s27 + $0x10] sm:$0xff] (%p50_p3), %v192_v2  ;;  %v198_v5 = vld [vmem:[%s3446_s26 + $0xe8] sm:$0xff] (%p50_p3)  ;;  %195 = vst [vmem:[%s3451_s27 + $0x18] sm:$0xff] (%p50_p3), %v194_v3  ;;  %v200_v6 = vld [vmem:[%s3446_s26 + $0x150] sm:$0xff] (%p50_p3) }
  0x14   : > { %197 = vst [vmem:[%s3451_s27 + $0x20] sm:$0xff] (%p50_p3), %v196_v4  ;;  %199 = vst [vmem:[%s3451_s27 + $0x28] sm:$0xff] (%p50_p3), %v198_v5  ;;  %v202_v7 = vld [vmem:[%s3446_s26 + $0x158] sm:$0xff] (%p50_p3)  ;;  %v204_v8 = vld [vmem:[%s3446_s26 + $0x1c0] sm:$0xff] (%p50_p3) }
  0x15   : > { %201 = vst [vmem:[%s3451_s27 + $0x30] sm:$0xff] %v200_v6  ;;  %203 = vst [vmem:[%s3451_s27 + $0x38] sm:$0xff] %v202_v7  ;;  %v206_v9 = vld [vmem:[%s3446_s26 + $0x1c8] sm:$0xff]  ;;  %v208_v10 = vld [vmem:[%s3446_s26 + $0x230] sm:$0xff] }
  0x16   : > { %205 = vst [vmem:[%s3451_s27 + $0x40] sm:$0xff] %v204_v8  ;;  %v210_v11 = vld [vmem:[%s3446_s26 + $0x238] sm:$0xff]  ;;  %207 = vst [vmem:[%s3451_s27 + $0x48] sm:$0xff] %v206_v9  ;;  %v212_v12 = vld [vmem:[%s3446_s26 + $0x2a0] sm:$0xff] }
  0x17   : > { %209 = vst [vmem:[%s3451_s27 + $0x50] sm:$0xff] %v208_v10  ;;  %211 = vst [vmem:[%s3451_s27 + $0x58] sm:$0xff] %v210_v11  ;;  %v214_v13 = vld [vmem:[%s3446_s26 + $0x2a8] sm:$0xff]  ;;  %v216_v14 = vld [vmem:[%s3446_s26 + $0x310] sm:$0xff] }
  0x18   : > { %213 = vst [vmem:[%s3451_s27 + $0x60] sm:$0xff] %v212_v12  ;;  %215 = vst [vmem:[%s3451_s27 + $0x68] sm:$0xff] %v214_v13  ;;  %v218_v15 = vld [vmem:[%s3446_s26 + $0x318] sm:$0xff]  ;;  %v220_v16 = vld [vmem:[%s3446_s26 + $0x380] sm:$0xff] }
  0x19   : > { %217 = vst [vmem:[%s3451_s27 + $0x70] sm:$0xff] %v216_v14  ;;  %v222_v17 = vld [vmem:[%s3446_s26 + $0x388] sm:$0xff]  ;;  %219 = vst [vmem:[%s3451_s27 + $0x78] sm:$0xff] %v218_v15  ;;  %v224_v18 = vld [vmem:[%s3446_s26 + $0x3f0] sm:$0xff] }
  0x1a   : > { %221 = vst [vmem:[%s3451_s27 + $0x80] sm:$0xff] %v220_v16  ;;  %223 = vst [vmem:[%s3451_s27 + $0x88] sm:$0xff] %v222_v17  ;;  %v226_v19 = vld [vmem:[%s3446_s26 + $0x3f8] sm:$0xff]  ;;  %v228_v20 = vld [vmem:[%s3446_s26 + $0x460] sm:$0xff] }
  0x1b   : > { %225 = vst [vmem:[%s3451_s27 + $0x90] sm:$0xff] %v224_v18  ;;  %227 = vst [vmem:[%s3451_s27 + $0x98] sm:$0xff] %v226_v19  ;;  %v230_v21 = vld [vmem:[%s3446_s26 + $0x468] sm:$0xff]  ;;  %v232_v22 = vld [vmem:[%s3446_s26 + $0x4d0] sm:$0xff] }
  0x1c   : > { %229 = vst [vmem:[%s3451_s27 + $0xa0] sm:$0xff] %v228_v20  ;;  %v234_v23 = vld [vmem:[%s3446_s26 + $0x4d8] sm:$0xff]  ;;  %231 = vst [vmem:[%s3451_s27 + $0xa8] sm:$0xff] %v230_v21  ;;  %v236_v24 = vld [vmem:[%s3446_s26 + $0x540] sm:$0xff] }
  0x1d   : > { %233 = vst [vmem:[%s3451_s27 + $0xb0] sm:$0xff] %v232_v22  ;;  %235 = vst [vmem:[%s3451_s27 + $0xb8] sm:$0xff] %v234_v23  ;;  %v238_v25 = vld [vmem:[%s3446_s26 + $0x548] sm:$0xff]  ;;  %v240_v26 = vld [vmem:[%s3446_s26 + $0x5b0] sm:$0xff] }
  0x1e   : > { %237 = vst [vmem:[%s3451_s27 + $0xc0] sm:$0xff] %v236_v24  ;;  %239 = vst [vmem:[%s3451_s27 + $0xc8] sm:$0xff] %v238_v25  ;;  %v242_v27 = vld [vmem:[%s3446_s26 + $0x5b8] sm:$0xff]  ;;  %v244_v28 = vld [vmem:[%s3446_s26 + $0x620] sm:$0xff] }
  0x1f   : > { %241 = vst [vmem:[%s3451_s27 + $0xd0] sm:$0xff] %v240_v26  ;;  %v246_v29 = vld [vmem:[%s3446_s26 + $0x628] sm:$0xff]  ;;  %243 = vst [vmem:[%s3451_s27 + $0xd8] sm:$0xff] %v242_v27  ;;  %v248_v30 = vld [vmem:[%s3446_s26 + $0x690] sm:$0xff] }
  0x20   : > { %245 = vst [vmem:[%s3451_s27 + $0xe0] sm:$0xff] %v244_v28  ;;  %247 = vst [vmem:[%s3451_s27 + $0xe8] sm:$0xff] %v246_v29  ;;  %v250_v31 = vld [vmem:[%s3446_s26 + $0x698] sm:$0xff]  ;;  %v252_v32 = vld [vmem:[%s3446_s26 + $0x700] sm:$0xff] }
  0x21   : > { %249 = vst [vmem:[%s3451_s27 + $0xf0] sm:$0xff] %v248_v30  ;;  %251 = vst [vmem:[%s3451_s27 + $0xf8] sm:$0xff] %v250_v31  ;;  %v254_v33 = vld [vmem:[%s3446_s26 + $0x708] sm:$0xff]  ;;  %v256_v34 = vld [vmem:[%s3446_s26 + $0x770] sm:$0xff] }
  0x22   : > { %253 = vst [vmem:[%s3451_s27 + $0x100] sm:$0xff] %v252_v32  ;;  %v258_v35 = vld [vmem:[%s3446_s26 + $0x778] sm:$0xff]  ;;  %255 = vst [vmem:[%s3451_s27 + $0x108] sm:$0xff] %v254_v33  ;;  %v260_v36 = vld [vmem:[%s3446_s26 + $0x7e0] sm:$0xff] }
  0x23   : > { %257 = vst [vmem:[%s3451_s27 + $0x110] sm:$0xff] %v256_v34  ;;  %259 = vst [vmem:[%s3451_s27 + $0x118] sm:$0xff] %v258_v35  ;;  %v262_v37 = vld [vmem:[%s3446_s26 + $0x7e8] sm:$0xff]  ;;  %v264_v38 = vld [vmem:[%s3446_s26 + $0x850] sm:$0xff] }
  0x24   : > { %261 = vst [vmem:[%s3451_s27 + $0x120] sm:$0xff] %v260_v36  ;;  %263 = vst [vmem:[%s3451_s27 + $0x128] sm:$0xff] %v262_v37  ;;  %v266_v39 = vld [vmem:[%s3446_s26 + $0x858] sm:$0xff]  ;;  %v268_v40 = vld [vmem:[%s3446_s26 + $0x8c0] sm:$0xff] }
  0x25   : > { %265 = vst [vmem:[%s3451_s27 + $0x130] sm:$0xff] %v264_v38  ;;  %v270_v41 = vld [vmem:[%s3446_s26 + $0x8c8] sm:$0xff]  ;;  %267 = vst [vmem:[%s3451_s27 + $0x138] sm:$0xff] %v266_v39  ;;  %v272_v42 = vld [vmem:[%s3446_s26 + $0x930] sm:$0xff] }
  0x26   : > { %269 = vst [vmem:[%s3451_s27 + $0x140] sm:$0xff] %v268_v40  ;;  %271 = vst [vmem:[%s3451_s27 + $0x148] sm:$0xff] %v270_v41  ;;  %v274_v43 = vld [vmem:[%s3446_s26 + $0x938] sm:$0xff]  ;;  %v276_v44 = vld [vmem:[%s3446_s26 + $0x9a0] sm:$0xff] }
  0x27   : > { %273 = vst [vmem:[%s3451_s27 + $0x150] sm:$0xff] %v272_v42  ;;  %275 = vst [vmem:[%s3451_s27 + $0x158] sm:$0xff] %v274_v43  ;;  %v278_v45 = vld [vmem:[%s3446_s26 + $0x9a8] sm:$0xff]  ;;  %v280_v46 = vld [vmem:[%s3446_s26 + $0xa10] sm:$0xff] }
  0x28   : > { %277 = vst [vmem:[%s3451_s27 + $0x160] sm:$0xff] %v276_v44  ;;  %v282_v47 = vld [vmem:[%s3446_s26 + $0xa18] sm:$0xff]  ;;  %279 = vst [vmem:[%s3451_s27 + $0x168] sm:$0xff] %v278_v45  ;;  %v284_v48 = vld [vmem:[%s3446_s26 + $0xa80] sm:$0xff] }
  0x29   : > { %281 = vst [vmem:[%s3451_s27 + $0x170] sm:$0xff] %v280_v46  ;;  %283 = vst [vmem:[%s3451_s27 + $0x178] sm:$0xff] %v282_v47  ;;  %v286_v49 = vld [vmem:[%s3446_s26 + $0xa88] sm:$0xff]  ;;  %v288_v50 = vld [vmem:[%s3446_s26 + $0xaf0] sm:$0xff] }
  0x2a   : > { %285 = vst [vmem:[%s3451_s27 + $0x180] sm:$0xff] %v284_v48  ;;  %287 = vst [vmem:[%s3451_s27 + $0x188] sm:$0xff] %v286_v49  ;;  %v290_v51 = vld [vmem:[%s3446_s26 + $0xaf8] sm:$0xff]  ;;  %v292_v52 = vld [vmem:[%s3446_s26 + $0xb60] sm:$0xff] }
  0x2b   : > { %289 = vst [vmem:[%s3451_s27 + $0x190] sm:$0xff] %v288_v50  ;;  %v294_v53 = vld [vmem:[%s3446_s26 + $0xb68] sm:$0xff]  ;;  %291 = vst [vmem:[%s3451_s27 + $0x198] sm:$0xff] %v290_v51  ;;  %v296_v54 = vld [vmem:[%s3446_s26 + $0xbd0] sm:$0xff] }
  0x2c   : > { %293 = vst [vmem:[%s3451_s27 + $0x1a0] sm:$0xff] %v292_v52  ;;  %295 = vst [vmem:[%s3451_s27 + $0x1a8] sm:$0xff] %v294_v53  ;;  %v298_v55 = vld [vmem:[%s3446_s26 + $0xbd8] sm:$0xff]  ;;  %v300_v56 = vld [vmem:[%s3446_s26 + $0xc40] sm:$0xff] }
  0x2d   : > { %297 = vst [vmem:[%s3451_s27 + $0x1b0] sm:$0xff] %v296_v54  ;;  %299 = vst [vmem:[%s3451_s27 + $0x1b8] sm:$0xff] %v298_v55  ;;  %v302_v57 = vld [vmem:[%s3446_s26 + $0xc48] sm:$0xff]  ;;  %v304_v58 = vld [vmem:[%s3446_s26 + $0xcb0] sm:$0xff] }
  0x2e   : > { %301 = vst [vmem:[%s3451_s27 + $0x1c0] sm:$0xff] %v300_v56  ;;  %v306_v59 = vld [vmem:[%s3446_s26 + $0xcb8] sm:$0xff]  ;;  %303 = vst [vmem:[%s3451_s27 + $0x1c8] sm:$0xff] %v302_v57  ;;  %v308_v60 = vld [vmem:[%s3446_s26 + $0xd20] sm:$0xff] }
  0x2f   : > { %305 = vst [vmem:[%s3451_s27 + $0x1d0] sm:$0xff] %v304_v58  ;;  %307 = vst [vmem:[%s3451_s27 + $0x1d8] sm:$0xff] %v306_v59  ;;  %v310_v61 = vld [vmem:[%s3446_s26 + $0xd28] sm:$0xff]  ;;  %v312_v62 = vld [vmem:[%s3446_s26 + $0xd90] sm:$0xff] }
  0x30   : > { %309 = vst [vmem:[%s3451_s27 + $0x1e0] sm:$0xff] %v308_v60  ;;  %311 = vst [vmem:[%s3451_s27 + $0x1e8] sm:$0xff] %v310_v61  ;;  %v314_v63 = vld [vmem:[%s3446_s26 + $0xd98] sm:$0xff]  ;;  %v316_v0 = vld [vmem:[%s3446_s26 + $0xe00] sm:$0xff] }
  0x31   : > { %313 = vst [vmem:[%s3451_s27 + $0x1f0] sm:$0xff] %v312_v62  ;;  %v318_v1 = vld [vmem:[%s3446_s26 + $0xe08] sm:$0xff]  ;;  %315 = vst [vmem:[%s3451_s27 + $0x1f8] sm:$0xff] %v314_v63  ;;  %v320_v2 = vld [vmem:[%s3446_s26 + $0xe70] sm:$0xff] }
  0x32   : > { %317 = vst [vmem:[%s3451_s27 + $0x200] sm:$0xff] %v316_v0  ;;  %319 = vst [vmem:[%s3451_s27 + $0x208] sm:$0xff] %v318_v1  ;;  %v322_v3 = vld [vmem:[%s3446_s26 + $0xe78] sm:$0xff]  ;;  %v324_v4 = vld [vmem:[%s3446_s26 + $0xee0] sm:$0xff] }
  0x33   : > { %321 = vst [vmem:[%s3451_s27 + $0x210] sm:$0xff] %v320_v2  ;;  %323 = vst [vmem:[%s3451_s27 + $0x218] sm:$0xff] %v322_v3  ;;  %v326_v5 = vld [vmem:[%s3446_s26 + $0xee8] sm:$0xff]  ;;  %v328_v6 = vld [vmem:[%s3446_s26 + $0xf50] sm:$0xff] }
  0x34   : > { %325 = vst [vmem:[%s3451_s27 + $0x220] sm:$0xff] %v324_v4  ;;  %v330_v7 = vld [vmem:[%s3446_s26 + $0xf58] sm:$0xff]  ;;  %327 = vst [vmem:[%s3451_s27 + $0x228] sm:$0xff] %v326_v5  ;;  %v332_v8 = vld [vmem:[%s3446_s26 + $0xfc0] sm:$0xff] }
  0x35   : > { %329 = vst [vmem:[%s3451_s27 + $0x230] sm:$0xff] %v328_v6  ;;  %331 = vst [vmem:[%s3451_s27 + $0x238] sm:$0xff] %v330_v7  ;;  %v334_v9 = vld [vmem:[%s3446_s26 + $0xfc8] sm:$0xff]  ;;  %v336_v10 = vld [vmem:[%s3446_s26 + $0x1030] sm:$0xff] }
  0x36   : > { %333 = vst [vmem:[%s3451_s27 + $0x240] sm:$0xff] %v332_v8  ;;  %335 = vst [vmem:[%s3451_s27 + $0x248] sm:$0xff] %v334_v9  ;;  %v338_v11 = vld [vmem:[%s3446_s26 + $0x1038] sm:$0xff]  ;;  %v340_v12 = vld [vmem:[%s3446_s26 + $0x10a0] sm:$0xff] }
  0x37   : > { %337 = vst [vmem:[%s3451_s27 + $0x250] sm:$0xff] %v336_v10  ;;  %v342_v13 = vld [vmem:[%s3446_s26 + $0x10a8] sm:$0xff]  ;;  %339 = vst [vmem:[%s3451_s27 + $0x258] sm:$0xff] %v338_v11  ;;  %v344_v14 = vld [vmem:[%s3446_s26 + $0x1110] sm:$0xff] }
  0x38   : > { %341 = vst [vmem:[%s3451_s27 + $0x260] sm:$0xff] %v340_v12  ;;  %343 = vst [vmem:[%s3451_s27 + $0x268] sm:$0xff] %v342_v13  ;;  %v346_v15 = vld [vmem:[%s3446_s26 + $0x1118] sm:$0xff]  ;;  %v348_v16 = vld [vmem:[%s3446_s26 + $0x1180] sm:$0xff] }
  0x39   : > { %345 = vst [vmem:[%s3451_s27 + $0x270] sm:$0xff] %v344_v14  ;;  %347 = vst [vmem:[%s3451_s27 + $0x278] sm:$0xff] %v346_v15  ;;  %v350_v17 = vld [vmem:[%s3446_s26 + $0x1188] sm:$0xff]  ;;  %v352_v18 = vld [vmem:[%s3446_s26 + $0x11f0] sm:$0xff] }
  0x3a   : > { %349 = vst [vmem:[%s3451_s27 + $0x280] sm:$0xff] %v348_v16  ;;  %v354_v19 = vld [vmem:[%s3446_s26 + $0x11f8] sm:$0xff]  ;;  %351 = vst [vmem:[%s3451_s27 + $0x288] sm:$0xff] %v350_v17  ;;  %v356_v20 = vld [vmem:[%s3446_s26 + $0x1260] sm:$0xff] }
  0x3b   : > { %353 = vst [vmem:[%s3451_s27 + $0x290] sm:$0xff] %v352_v18  ;;  %355 = vst [vmem:[%s3451_s27 + $0x298] sm:$0xff] %v354_v19  ;;  %v358_v21 = vld [vmem:[%s3446_s26 + $0x1268] sm:$0xff]  ;;  %v360_v22 = vld [vmem:[%s3446_s26 + $0x12d0] sm:$0xff] }
  0x3c   : > { %357 = vst [vmem:[%s3451_s27 + $0x2a0] sm:$0xff] %v356_v20  ;;  %359 = vst [vmem:[%s3451_s27 + $0x2a8] sm:$0xff] %v358_v21  ;;  %v362_v23 = vld [vmem:[%s3446_s26 + $0x12d8] sm:$0xff]  ;;  %v364_v24 = vld [vmem:[%s3446_s26 + $0x1340] sm:$0xff] }
  0x3d   : > { %361 = vst [vmem:[%s3451_s27 + $0x2b0] sm:$0xff] %v360_v22  ;;  %v366_v25 = vld [vmem:[%s3446_s26 + $0x1348] sm:$0xff]  ;;  %363 = vst [vmem:[%s3451_s27 + $0x2b8] sm:$0xff] %v362_v23  ;;  %v368_v26 = vld [vmem:[%s3446_s26 + $0x13b0] sm:$0xff] }
  0x3e   : > { %365 = vst [vmem:[%s3451_s27 + $0x2c0] sm:$0xff] %v364_v24  ;;  %367 = vst [vmem:[%s3451_s27 + $0x2c8] sm:$0xff] %v366_v25  ;;  %v370_v27 = vld [vmem:[%s3446_s26 + $0x13b8] sm:$0xff]  ;;  %v372_v28 = vld [vmem:[%s3446_s26 + $0x1420] sm:$0xff] }
  0x3f   : > { %369 = vst [vmem:[%s3451_s27 + $0x2d0] sm:$0xff] %v368_v26  ;;  %371 = vst [vmem:[%s3451_s27 + $0x2d8] sm:$0xff] %v370_v27  ;;  %v374_v29 = vld [vmem:[%s3446_s26 + $0x1428] sm:$0xff]  ;;  %v376_v30 = vld [vmem:[%s3446_s26 + $0x1490] sm:$0xff] }
  0x40   : > { %373 = vst [vmem:[%s3451_s27 + $0x2e0] sm:$0xff] %v372_v28  ;;  %v378_v31 = vld [vmem:[%s3446_s26 + $0x1498] sm:$0xff]  ;;  %375 = vst [vmem:[%s3451_s27 + $0x2e8] sm:$0xff] %v374_v29  ;;  %v380_v32 = vld [vmem:[%s3446_s26 + $0x1500] sm:$0xff] }
  0x41   : > { %377 = vst [vmem:[%s3451_s27 + $0x2f0] sm:$0xff] %v376_v30  ;;  %379 = vst [vmem:[%s3451_s27 + $0x2f8] sm:$0xff] %v378_v31  ;;  %v382_v33 = vld [vmem:[%s3446_s26 + $0x1508] sm:$0xff]  ;;  %v384_v34 = vld [vmem:[%s3446_s26 + $0x1570] sm:$0xff] }
  0x42   : > { %381 = vst [vmem:[%s3451_s27 + $0x300] sm:$0xff] %v380_v32  ;;  %383 = vst [vmem:[%s3451_s27 + $0x308] sm:$0xff] %v382_v33  ;;  %v386_v35 = vld [vmem:[%s3446_s26 + $0x1578] sm:$0xff]  ;;  %v388_v36 = vld [vmem:[%s3446_s26 + $0x15e0] sm:$0xff] }
  0x43   : > { %385 = vst [vmem:[%s3451_s27 + $0x310] sm:$0xff] %v384_v34  ;;  %v390_v37 = vld [vmem:[%s3446_s26 + $0x15e8] sm:$0xff]  ;;  %387 = vst [vmem:[%s3451_s27 + $0x318] sm:$0xff] %v386_v35  ;;  %v392_v38 = vld [vmem:[%s3446_s26 + $0x1650] sm:$0xff] }
  0x44   : > { %389 = vst [vmem:[%s3451_s27 + $0x320] sm:$0xff] %v388_v36  ;;  %391 = vst [vmem:[%s3451_s27 + $0x328] sm:$0xff] %v390_v37  ;;  %v394_v39 = vld [vmem:[%s3446_s26 + $0x1658] sm:$0xff]  ;;  %v396_v40 = vld [vmem:[%s3446_s26 + $0x16c0] sm:$0xff] }
  0x45   : > { %393 = vst [vmem:[%s3451_s27 + $0x330] sm:$0xff] %v392_v38  ;;  %395 = vst [vmem:[%s3451_s27 + $0x338] sm:$0xff] %v394_v39  ;;  %v398_v41 = vld [vmem:[%s3446_s26 + $0x16c8] sm:$0xff]  ;;  %v400_v42 = vld [vmem:[%s3446_s26 + $0x1730] sm:$0xff] }
  0x46   : > { %397 = vst [vmem:[%s3451_s27 + $0x340] sm:$0xff] %v396_v40  ;;  %v402_v43 = vld [vmem:[%s3446_s26 + $0x1738] sm:$0xff]  ;;  %399 = vst [vmem:[%s3451_s27 + $0x348] sm:$0xff] %v398_v41  ;;  %v404_v44 = vld [vmem:[%s3446_s26 + $0x17a0] sm:$0xff] }
  0x47   : > { %401 = vst [vmem:[%s3451_s27 + $0x350] sm:$0xff] %v400_v42  ;;  %403 = vst [vmem:[%s3451_s27 + $0x358] sm:$0xff] %v402_v43  ;;  %v406_v45 = vld [vmem:[%s3446_s26 + $0x17a8] sm:$0xff]  ;;  %v408_v46 = vld [vmem:[%s3446_s26 + $0x1810] sm:$0xff] }
  0x48   : > { %405 = vst [vmem:[%s3451_s27 + $0x360] sm:$0xff] %v404_v44  ;;  %407 = vst [vmem:[%s3451_s27 + $0x368] sm:$0xff] %v406_v45  ;;  %v410_v47 = vld [vmem:[%s3446_s26 + $0x1818] sm:$0xff]  ;;  %v412_v48 = vld [vmem:[%s3446_s26 + $0x1880] sm:$0xff] }
  0x49   : > { %409 = vst [vmem:[%s3451_s27 + $0x370] sm:$0xff] %v408_v46  ;;  %v414_v49 = vld [vmem:[%s3446_s26 + $0x1888] sm:$0xff]  ;;  %411 = vst [vmem:[%s3451_s27 + $0x378] sm:$0xff] %v410_v47  ;;  %v416_v50 = vld [vmem:[%s3446_s26 + $0x18f0] sm:$0xff] }
  0x4a   : > { %413 = vst [vmem:[%s3451_s27 + $0x380] sm:$0xff] %v412_v48  ;;  %415 = vst [vmem:[%s3451_s27 + $0x388] sm:$0xff] %v414_v49  ;;  %v418_v51 = vld [vmem:[%s3446_s26 + $0x18f8] sm:$0xff]  ;;  %v420_v52 = vld [vmem:[%s3446_s26 + $0x1960] sm:$0xff] }
  0x4b   : > { %417 = vst [vmem:[%s3451_s27 + $0x390] sm:$0xff] %v416_v50  ;;  %419 = vst [vmem:[%s3451_s27 + $0x398] sm:$0xff] %v418_v51  ;;  %v422_v53 = vld [vmem:[%s3446_s26 + $0x1968] sm:$0xff]  ;;  %v424_v54 = vld [vmem:[%s3446_s26 + $0x19d0] sm:$0xff] }
  0x4c   : > { %421 = vst [vmem:[%s3451_s27 + $0x3a0] sm:$0xff] %v420_v52  ;;  %v426_v55 = vld [vmem:[%s3446_s26 + $0x19d8] sm:$0xff]  ;;  %423 = vst [vmem:[%s3451_s27 + $0x3a8] sm:$0xff] %v422_v53  ;;  %v428_v56 = vld [vmem:[%s3446_s26 + $0x1a40] sm:$0xff] }
  0x4d   : > { %425 = vst [vmem:[%s3451_s27 + $0x3b0] sm:$0xff] %v424_v54  ;;  %427 = vst [vmem:[%s3451_s27 + $0x3b8] sm:$0xff] %v426_v55  ;;  %v430_v57 = vld [vmem:[%s3446_s26 + $0x1a48] sm:$0xff]  ;;  %v432_v58 = vld [vmem:[%s3446_s26 + $0x1ab0] sm:$0xff] }
  0x4e   : > { %429 = vst [vmem:[%s3451_s27 + $0x3c0] sm:$0xff] %v428_v56  ;;  %431 = vst [vmem:[%s3451_s27 + $0x3c8] sm:$0xff] %v430_v57  ;;  %v434_v59 = vld [vmem:[%s3446_s26 + $0x1ab8] sm:$0xff]  ;;  %v436_v60 = vld [vmem:[%s3446_s26 + $0x1b20] sm:$0xff] }
  0x4f   : > { %433 = vst [vmem:[%s3451_s27 + $0x3d0] sm:$0xff] %v432_v58  ;;  %v438_v61 = vld [vmem:[%s3446_s26 + $0x1b28] sm:$0xff]  ;;  %435 = vst [vmem:[%s3451_s27 + $0x3d8] sm:$0xff] %v434_v59  ;;  %v440_v62 = vld [vmem:[%s3446_s26 + $0x1b90] sm:$0xff] }
  0x50   : > { %437 = vst [vmem:[%s3451_s27 + $0x3e0] sm:$0xff] %v436_v60  ;;  %439 = vst [vmem:[%s3451_s27 + $0x3e8] sm:$0xff] %v438_v61  ;;  %v442_v63 = vld [vmem:[%s3446_s26 + $0x1b98] sm:$0xff] }
  0x51   : > { %441 = vst [vmem:[%s3451_s27 + $0x3f0] sm:$0xff] %v440_v62  ;;  %443 = vst [vmem:[%s3451_s27 + $0x3f8] sm:$0xff] %v442_v63 }
  0x52 PF: > { %p2775_p6 = scmp.ge.s32.totalorder %s3379_s16, 1  ;;  %p460_p7 = scmp.lt.s32.totalorder %s3379_s16, 8 }
  0x54   : > { %p461_p8 = pnand %p2775_p6, %p460_p7 }
  0x55   : > { %s467_s28 = sand.u32 (!%p461_p8), 1, %s3363_s12   ;;  %s2777_s29 = sshll.u32 (!%p461_p8), %s3371_s14, 6 }
  0x56   : > { %464 = sbr.rel (%p461_p8) target bundleno = 714 (0x2ca), region = 51  ;;  %s2776_s30 = sshll.u32 (!%p461_p8), %s467_s28, 10 }
  0x57   : > { %p507_p9 = scmp.lt.s32.totalorder (!%p461_p8), %s2777_s29, 447  ;;  %s3715_s8 = scalar_lea.vmem (!%p461_p8), [#allocation2], %s2776_s30 }
  0x58   : > { %p2779_p10 = scmp.ne.s32.totalorder (!%p461_p8), %s3371_s14, 0 }
  0x5d   : > { %s5030_s29 = smov (!%p507_p9, %s2777_s29), 447  ;;  %531 = sbr.rel (%p2779_p10) target bundleno = 127 (0x7f), region = 59 }
  0x5e   : > { %s2778_s4 = sshll.u32 %s5030_s29, 2  ;;  %v3381_v0 = vmov (!%p2779_p10), 0.0  }
  0x5f   : > { %s3713_s7 = scalar_lea.vmem %s5020_s1, %s2778_s4  ;;  %532 = vst [vmem:[%s5022_s3] sm:$0xff] (!%p2779_p10), %v3381_v0  ;;  %533 = vst [vmem:[%s5022_s3 + $0x8] sm:$0xff] (!%p2779_p10), %v3381_v0 }
  0x60   : > { %534 = vst [vmem:[%s5022_s3 + $0x10] sm:$0xff] (!%p2779_p10), %v3381_v0  ;;  %535 = vst [vmem:[%s5022_s3 + $0x18] sm:$0xff] (!%p2779_p10), %v3381_v0 }
  0x61   : > { %536 = vst [vmem:[%s5022_s3 + $0x20] sm:$0xff] (!%p2779_p10), %v3381_v0  ;;  %537 = vst [vmem:[%s5022_s3 + $0x28] sm:$0xff] (!%p2779_p10), %v3381_v0 }
  0x62   : > { %538 = vst [vmem:[%s5022_s3 + $0x30] sm:$0xff] (!%p2779_p10), %v3381_v0  ;;  %539 = vst [vmem:[%s5022_s3 + $0x38] sm:$0xff] (!%p2779_p10), %v3381_v0 }
  0x63   : > { %540 = vst [vmem:[%s5022_s3 + $0x40] sm:$0xff] (!%p2779_p10), %v3381_v0  ;;  %541 = vst [vmem:[%s5022_s3 + $0x48] sm:$0xff] (!%p2779_p10), %v3381_v0 }
  0x64   : > { %542 = vst [vmem:[%s5022_s3 + $0x50] sm:$0xff] %v3381_v0  ;;  %543 = vst [vmem:[%s5022_s3 + $0x58] sm:$0xff] %v3381_v0 }
  0x65   : > { %544 = vst [vmem:[%s5022_s3 + $0x60] sm:$0xff] %v3381_v0  ;;  %545 = vst [vmem:[%s5022_s3 + $0x68] sm:$0xff] %v3381_v0 }
  0x66   : > { %546 = vst [vmem:[%s5022_s3 + $0x70] sm:$0xff] %v3381_v0  ;;  %547 = vst [vmem:[%s5022_s3 + $0x78] sm:$0xff] %v3381_v0 }
  0x67   : > { %548 = vst [vmem:[%s5022_s3 + $0x80] sm:$0xff] %v3381_v0  ;;  %549 = vst [vmem:[%s5022_s3 + $0x88] sm:$0xff] %v3381_v0 }
  0x68   : > { %550 = vst [vmem:[%s5022_s3 + $0x90] sm:$0xff] %v3381_v0  ;;  %551 = vst [vmem:[%s5022_s3 + $0x98] sm:$0xff] %v3381_v0 }
  0x69   : > { %552 = vst [vmem:[%s5022_s3 + $0xa0] sm:$0xff] %v3381_v0  ;;  %553 = vst [vmem:[%s5022_s3 + $0xa8] sm:$0xff] %v3381_v0 }
  0x6a   : > { %554 = vst [vmem:[%s5022_s3 + $0xb0] sm:$0xff] %v3381_v0  ;;  %555 = vst [vmem:[%s5022_s3 + $0xb8] sm:$0xff] %v3381_v0 }
  0x6b   : > { %556 = vst [vmem:[%s5022_s3 + $0xc0] sm:$0xff] %v3381_v0  ;;  %557 = vst [vmem:[%s5022_s3 + $0xc8] sm:$0xff] %v3381_v0 }
  0x6c   : > { %558 = vst [vmem:[%s5022_s3 + $0xd0] sm:$0xff] %v3381_v0  ;;  %559 = vst [vmem:[%s5022_s3 + $0xd8] sm:$0xff] %v3381_v0 }
  0x6d   : > { %560 = vst [vmem:[%s5022_s3 + $0xe0] sm:$0xff] %v3381_v0  ;;  %561 = vst [vmem:[%s5022_s3 + $0xe8] sm:$0xff] %v3381_v0 }
  0x6e   : > { %562 = vst [vmem:[%s5022_s3 + $0xf0] sm:$0xff] %v3381_v0  ;;  %563 = vst [vmem:[%s5022_s3 + $0xf8] sm:$0xff] %v3381_v0 }
  0x6f   : > { %564 = vst [vmem:[%s5022_s3 + $0x100] sm:$0xff] %v3381_v0  ;;  %565 = vst [vmem:[%s5022_s3 + $0x108] sm:$0xff] %v3381_v0 }
  0x70   : > { %566 = vst [vmem:[%s5022_s3 + $0x110] sm:$0xff] %v3381_v0  ;;  %567 = vst [vmem:[%s5022_s3 + $0x118] sm:$0xff] %v3381_v0 }
  0x71   : > { %568 = vst [vmem:[%s5022_s3 + $0x120] sm:$0xff] %v3381_v0  ;;  %569 = vst [vmem:[%s5022_s3 + $0x128] sm:$0xff] %v3381_v0 }
  0x72   : > { %570 = vst [vmem:[%s5022_s3 + $0x130] sm:$0xff] %v3381_v0  ;;  %571 = vst [vmem:[%s5022_s3 + $0x138] sm:$0xff] %v3381_v0 }
  0x73   : > { %572 = vst [vmem:[%s5022_s3 + $0x140] sm:$0xff] %v3381_v0  ;;  %573 = vst [vmem:[%s5022_s3 + $0x148] sm:$0xff] %v3381_v0 }
  0x74   : > { %574 = vst [vmem:[%s5022_s3 + $0x150] sm:$0xff] %v3381_v0  ;;  %575 = vst [vmem:[%s5022_s3 + $0x158] sm:$0xff] %v3381_v0 }
  0x75   : > { %576 = vst [vmem:[%s5022_s3 + $0x160] sm:$0xff] %v3381_v0  ;;  %577 = vst [vmem:[%s5022_s3 + $0x168] sm:$0xff] %v3381_v0 }
  0x76   : > { %578 = vst [vmem:[%s5022_s3 + $0x170] sm:$0xff] %v3381_v0  ;;  %579 = vst [vmem:[%s5022_s3 + $0x178] sm:$0xff] %v3381_v0 }
  0x77   : > { %580 = vst [vmem:[%s5022_s3 + $0x180] sm:$0xff] %v3381_v0  ;;  %581 = vst [vmem:[%s5022_s3 + $0x188] sm:$0xff] %v3381_v0 }
  0x78   : > { %582 = vst [vmem:[%s5022_s3 + $0x190] sm:$0xff] %v3381_v0  ;;  %583 = vst [vmem:[%s5022_s3 + $0x198] sm:$0xff] %v3381_v0 }
  0x79   : > { %584 = vst [vmem:[%s5022_s3 + $0x1a0] sm:$0xff] %v3381_v0  ;;  %585 = vst [vmem:[%s5022_s3 + $0x1a8] sm:$0xff] %v3381_v0 }
  0x7a   : > { %586 = vst [vmem:[%s5022_s3 + $0x1b0] sm:$0xff] %v3381_v0  ;;  %587 = vst [vmem:[%s5022_s3 + $0x1b8] sm:$0xff] %v3381_v0 }
  0x7b   : > { %588 = vst [vmem:[%s5022_s3 + $0x1c0] sm:$0xff] %v3381_v0  ;;  %589 = vst [vmem:[%s5022_s3 + $0x1c8] sm:$0xff] %v3381_v0 }
  0x7c   : > { %590 = vst [vmem:[%s5022_s3 + $0x1d0] sm:$0xff] %v3381_v0  ;;  %591 = vst [vmem:[%s5022_s3 + $0x1d8] sm:$0xff] %v3381_v0 }
  0x7d   : > { %592 = vst [vmem:[%s5022_s3 + $0x1e0] sm:$0xff] %v3381_v0  ;;  %593 = vst [vmem:[%s5022_s3 + $0x1e8] sm:$0xff] %v3381_v0 }
  0x7e   : > { %594 = vst [vmem:[%s5022_s3 + $0x1f0] sm:$0xff] %v3381_v0  ;;  %595 = vst [vmem:[%s5022_s3 + $0x1f8] sm:$0xff] %v3381_v0 }
  0x7f PF: > { %v2989_v1 = vld [vmem:[%s3713_s7] sm:$0xff]   ;;  %v3382_v2 = vmov 0   ;;  %v2991_v4 = vld [vmem:[%s3713_s7 + $0x8] sm:$0xff]   ;;  %v2993_v6 = vld [vmem:[%s3713_s7 + $0x10] sm:$0xff]   ;;  %p2940_p11 = scmp.ne.s32.totalorder %s3371_s14, 6 }
  0x80   : > { %1684 = vmatprep.subr.bf16.mxu0 %v3382_v2  ;;  %1973 = vmatprep.subr.bf16.mxu1 %v3382_v2  ;;  %v2990_v3 = vld [vmem:[%s3713_s7 + $0x80] sm:$0xff]   ;;  %v2992_v5 = vld [vmem:[%s3713_s7 + $0x88] sm:$0xff]   ;;  %v2994_v7 = vld [vmem:[%s3713_s7 + $0x90] sm:$0xff]  }
  0x81   : > { %1685 = vmatpush1.bf16.msra.mxu0 %v2989_v1  ;;  %1974 = vmatpush1.bf16.msra.mxu1 %v2990_v3  ;;  %v2995_v8 = vld [vmem:[%s3713_s7 + $0x18] sm:$0xff]   ;;  %v2997_v10 = vld [vmem:[%s3713_s7 + $0x20] sm:$0xff]   ;;  %v2999_v12 = vld [vmem:[%s3713_s7 + $0x28] sm:$0xff]  }
  0x82   : > { %1686 = vmatprep.subr.bf16.mxu0 %v3382_v2  ;;  %1975 = vmatprep.subr.bf16.mxu1 %v3382_v2  ;;  %v2996_v9 = vld [vmem:[%s3713_s7 + $0x98] sm:$0xff]   ;;  %v2998_v11 = vld [vmem:[%s3713_s7 + $0xa0] sm:$0xff]   ;;  %v3000_v13 = vld [vmem:[%s3713_s7 + $0xa8] sm:$0xff]  }
  0x83   : > { %v3001_v14 = vld [vmem:[%s3713_s7 + $0x30] sm:$0xff]   ;;  %v3003_v16 = vld [vmem:[%s3713_s7 + $0x38] sm:$0xff]   ;;  %v3005_v18 = vld [vmem:[%s3713_s7 + $0x40] sm:$0xff]  }
  0x84   : > { %v3002_v15 = vld [vmem:[%s3713_s7 + $0xb0] sm:$0xff]   ;;  %v3004_v17 = vld [vmem:[%s3713_s7 + $0xb8] sm:$0xff]   ;;  %v3006_v19 = vld [vmem:[%s3713_s7 + $0xc0] sm:$0xff]  }
  0x85   : > { %1687 = vmatpush1.bf16.msra.mxu0 %v2991_v4  ;;  %1976 = vmatpush1.bf16.msra.mxu1 %v2992_v5  ;;  %v3023_v20 = vld [vmem:[%s3715_s8 + $0x4] ss:$16 sps:$4 sm:$0xff]   ;;  %v3007_v21 = vld [vmem:[%s3713_s7 + $0x48] sm:$0xff]   ;;  %v3011_v26 = vld [vmem:[%s3713_s7 + $0x58] sm:$0xff]  }
  0x86   : > { %1688 = vmatprep.subr.bf16.mxu0 %v3382_v2  ;;  %1977 = vmatprep.subr.bf16.mxu1 %v3382_v2  ;;  %v3026_v22 = vld [vmem:[%s3715_s8 + $0xc] ss:$16 sps:$4 sm:$0xff]   ;;  %v3009_v24 = vld [vmem:[%s3713_s7 + $0x50] sm:$0xff]   ;;  %v3013_v28 = vld [vmem:[%s3713_s7 + $0x60] sm:$0xff]  }
  0x87   : > { %v3008_v23 = vld [vmem:[%s3713_s7 + $0xc8] sm:$0xff]   ;;  %1716 = vmatprep.mubr.bf16.mxu0 %v3023_v20  ;;  %2005 = vmatprep.mubr.bf16.mxu1 %v3026_v22  ;;  %v3010_v25 = vld [vmem:[%s3713_s7 + $0xd0] sm:$0xff]   ;;  %v3012_v27 = vld [vmem:[%s3713_s7 + $0xd8] sm:$0xff]  }
  0x88   : > { %v3014_v29 = vld [vmem:[%s3713_s7 + $0xe0] sm:$0xff]   ;;  %v3015_v30 = vld [vmem:[%s3713_s7 + $0x68] sm:$0xff]   ;;  %v3017_v32 = vld [vmem:[%s3713_s7 + $0x70] sm:$0xff]  }
  0x89   : > { %1689 = vmatpush1.bf16.msra.mxu0 %v2993_v6  ;;  %1978 = vmatpush1.bf16.msra.mxu1 %v2994_v7  ;;  %v3016_v31 = vld [vmem:[%s3713_s7 + $0xe8] sm:$0xff]   ;;  %v3018_v33 = vld [vmem:[%s3713_s7 + $0xf0] sm:$0xff]   ;;  %v3019_v34 = vld [vmem:[%s3713_s7 + $0x78] sm:$0xff]  }
  0x8a   : > { %1690 = vmatprep.subr.bf16.mxu0 %v3382_v2  ;;  %1979 = vmatprep.subr.bf16.mxu1 %v3382_v2  ;;  %v3020_v35 = vld [vmem:[%s3713_s7 + $0xf8] sm:$0xff]   ;;  %v3021_v36 = vld [vmem:[%s3715_s8] ss:$16 sps:$4 sm:$0xff]   ;;  %v3027_v38 = vld [vmem:[%s3715_s8 + $0x24] ss:$16 sps:$4 sm:$0xff]  }
  0x8b   : > { %v3024_v37 = vld [vmem:[%s3715_s8 + $0x8] ss:$16 sps:$4 sm:$0xff]   ;;  %v3029_v39 = vld [vmem:[%s3715_s8 + $0x2c] ss:$16 sps:$4 sm:$0xff]   ;;  %v3031_v40 = vld [vmem:[%s3715_s8 + $0x20] ss:$16 sps:$4 sm:$0xff]  }
  0x8c   : > { %v3032_v41 = vld [vmem:[%s3715_s8 + $0x28] ss:$16 sps:$4 sm:$0xff]   ;;  %v3033_v42 = vld [vmem:[%s3715_s8 + $0x44] ss:$16 sps:$4 sm:$0xff]   ;;  %v3035_v43 = vld [vmem:[%s3715_s8 + $0x4c] ss:$16 sps:$4 sm:$0xff]  }
  0x8d   : > { %1691 = vmatpush1.bf16.msra.mxu0 %v2995_v8  ;;  %1980 = vmatpush1.bf16.msra.mxu1 %v2996_v9  ;;  %v3037_v44 = vld [vmem:[%s3715_s8 + $0x40] ss:$16 sps:$4 sm:$0xff]   ;;  %v3038_v45 = vld [vmem:[%s3715_s8 + $0x48] ss:$16 sps:$4 sm:$0xff]   ;;  %v3039_v46 = vld [vmem:[%s3715_s8 + $0x64] ss:$16 sps:$4 sm:$0xff]  }
  0x8e   : > { %1692 = vmatprep.subr.bf16.mxu0 %v3382_v2  ;;  %1981 = vmatprep.subr.bf16.mxu1 %v3382_v2  ;;  %v3041_v47 = vld [vmem:[%s3715_s8 + $0x6c] ss:$16 sps:$4 sm:$0xff]   ;;  %v3043_v48 = vld [vmem:[%s3715_s8 + $0x60] ss:$16 sps:$4 sm:$0xff]   ;;  %v3044_v49 = vld [vmem:[%s3715_s8 + $0x68] ss:$16 sps:$4 sm:$0xff]  }
  0x8f   : > { %v3045_v50 = vld [vmem:[%s3715_s8 + $0x84] ss:$16 sps:$4 sm:$0xff]   ;;  %v3047_v51 = vld [vmem:[%s3715_s8 + $0x8c] ss:$16 sps:$4 sm:$0xff]   ;;  %v3049_v52 = vld [vmem:[%s3715_s8 + $0x80] ss:$16 sps:$4 sm:$0xff]  }
  0x90   : > { %v3050_v53 = vld [vmem:[%s3715_s8 + $0x88] ss:$16 sps:$4 sm:$0xff]   ;;  %v3051_v54 = vld [vmem:[%s3715_s8 + $0xa4] ss:$16 sps:$4 sm:$0xff]   ;;  %v3053_v55 = vld [vmem:[%s3715_s8 + $0xac] ss:$16 sps:$4 sm:$0xff]  }
  0x91   : > { %1693 = vmatpush1.bf16.msra.mxu0 %v2997_v10  ;;  %1982 = vmatpush1.bf16.msra.mxu1 %v2998_v11  ;;  %v3055_v56 = vld [vmem:[%s3715_s8 + $0xa0] ss:$16 sps:$4 sm:$0xff]   ;;  %v3056_v57 = vld [vmem:[%s3715_s8 + $0xa8] ss:$16 sps:$4 sm:$0xff]   ;;  %v3057_v58 = vld [vmem:[%s3715_s8 + $0xc4] ss:$16 sps:$4 sm:$0xff]  }
  0x92   : > { %1694 = vmatprep.subr.bf16.mxu0 %v3382_v2  ;;  %1983 = vmatprep.subr.bf16.mxu1 %v3382_v2  ;;  %v3059_v59 = vld [vmem:[%s3715_s8 + $0xcc] ss:$16 sps:$4 sm:$0xff]   ;;  %v3061_v60 = vld [vmem:[%s3715_s8 + $0xc0] ss:$16 sps:$4 sm:$0xff]   ;;  %v3062_v61 = vld [vmem:[%s3715_s8 + $0xc8] ss:$16 sps:$4 sm:$0xff]  }
  0x93   : > { %v3063_v62 = vld [vmem:[%s3715_s8 + $0xe4] ss:$16 sps:$4 sm:$0xff]   ;;  %v3065_v63 = vld [vmem:[%s3715_s8 + $0xec] ss:$16 sps:$4 sm:$0xff]   ;;  %v3067_v0 = vld [vmem:[%s3715_s8 + $0xe0] ss:$16 sps:$4 sm:$0xff]  }
  0x94   : > { %v3068_v1 = vld [vmem:[%s3715_s8 + $0xe8] ss:$16 sps:$4 sm:$0xff]   ;;  %v3071_v3 = vld [vmem:[%s3715_s8 + $0x10c] ss:$16 sps:$4 sm:$0xff]   ;;  %v3073_v4 = vld [vmem:[%s3715_s8 + $0x100] ss:$16 sps:$4 sm:$0xff]  }
  0x95   : > { %1695 = vmatpush1.bf16.msra.mxu0 %v2999_v12  ;;  %1984 = vmatpush1.bf16.msra.mxu1 %v3000_v13  ;;  %v3074_v5 = vld [vmem:[%s3715_s8 + $0x108] ss:$16 sps:$4 sm:$0xff]   ;;  %v3075_v6 = vld [vmem:[%s3715_s8 + $0x124] ss:$16 sps:$4 sm:$0xff]   ;;  %v3077_v7 = vld [vmem:[%s3715_s8 + $0x12c] ss:$16 sps:$4 sm:$0xff]  }
  0x96   : > { %1696 = vmatprep.subr.bf16.mxu0 %v3382_v2  ;;  %1985 = vmatprep.subr.bf16.mxu1 %v3382_v2  ;;  %v3079_v8 = vld [vmem:[%s3715_s8 + $0x120] ss:$16 sps:$4 sm:$0xff]   ;;  %v3080_v9 = vld [vmem:[%s3715_s8 + $0x128] ss:$16 sps:$4 sm:$0xff]   ;;  %v3081_v10 = vld [vmem:[%s3715_s8 + $0x144] ss:$16 sps:$4 sm:$0xff]  }
  0x97   : > { %v3083_v11 = vld [vmem:[%s3715_s8 + $0x14c] ss:$16 sps:$4 sm:$0xff]   ;;  %v3085_v12 = vld [vmem:[%s3715_s8 + $0x140] ss:$16 sps:$4 sm:$0xff]   ;;  %v3086_v13 = vld [vmem:[%s3715_s8 + $0x148] ss:$16 sps:$4 sm:$0xff]  }
  0x98   : > { %v3097_v20 = vld [vmem:[%s3715_s8 + $0x180] ss:$16 sps:$4 sm:$0xff]   ;;  %v3099_v22 = vld [vmem:[%s3715_s8 + $0x1a4] ss:$16 sps:$4 sm:$0xff]  }
  0x99   : > { %1697 = vmatpush1.bf16.msra.mxu0 %v3001_v14  ;;  %1986 = vmatpush1.bf16.msra.mxu1 %v3002_v15  ;;  %v3087_v14 = vld [vmem:[%s3715_s8 + $0x164] ss:$16 sps:$4 sm:$0xff]   ;;  %v3089_v15 = vld [vmem:[%s3715_s8 + $0x16c] ss:$16 sps:$4 sm:$0xff]  }
  0x9a   : > { %1698 = vmatprep.subr.bf16.mxu0 %v3382_v2  ;;  %1987 = vmatprep.subr.bf16.mxu1 %v3382_v2 }
  0x9d   : > { %1699 = vmatpush1.bf16.msra.mxu0 %v3003_v16  ;;  %1988 = vmatpush1.bf16.msra.mxu1 %v3004_v17  ;;  %v3091_v16 = vld [vmem:[%s3715_s8 + $0x160] ss:$16 sps:$4 sm:$0xff]   ;;  %v3092_v17 = vld [vmem:[%s3715_s8 + $0x168] ss:$16 sps:$4 sm:$0xff]  }
  0x9e   : > { %1700 = vmatprep.subr.bf16.mxu0 %v3382_v2  ;;  %1989 = vmatprep.subr.bf16.mxu1 %v3382_v2 }
  0xa1   : > { %1701 = vmatpush1.bf16.msra.mxu0 %v3005_v18  ;;  %1990 = vmatpush1.bf16.msra.mxu1 %v3006_v19  ;;  %v3093_v18 = vld [vmem:[%s3715_s8 + $0x184] ss:$16 sps:$4 sm:$0xff]   ;;  %v3095_v19 = vld [vmem:[%s3715_s8 + $0x18c] ss:$16 sps:$4 sm:$0xff]  }
  0xa2   : > { %1702 = vmatprep.subr.bf16.mxu0 %v3382_v2  ;;  %1991 = vmatprep.subr.bf16.mxu1 %v3382_v2 }
  0xa5   : > { %1703 = vmatpush1.bf16.msra.mxu0 %v3007_v21  ;;  %1992 = vmatpush1.bf16.msra.mxu1 %v3008_v23  ;;  %v3098_v21 = vld [vmem:[%s3715_s8 + $0x188] ss:$16 sps:$4 sm:$0xff]   ;;  %v3101_v23 = vld [vmem:[%s3715_s8 + $0x1ac] ss:$16 sps:$4 sm:$0xff]  }
  0xa6   : > { %1704 = vmatprep.subr.bf16.mxu0 %v3382_v2  ;;  %1993 = vmatprep.subr.bf16.mxu1 %v3382_v2 }
  0xa9   : > { %1705 = vmatpush1.bf16.msra.mxu0 %v3009_v24  ;;  %1994 = vmatpush1.bf16.msra.mxu1 %v3010_v25  ;;  %v3103_v24 = vld [vmem:[%s3715_s8 + $0x1a0] ss:$16 sps:$4 sm:$0xff]   ;;  %v3104_v25 = vld [vmem:[%s3715_s8 + $0x1a8] ss:$16 sps:$4 sm:$0xff]  }
  0xaa   : > { %1706 = vmatprep.subr.bf16.mxu0 %v3382_v2  ;;  %1995 = vmatprep.subr.bf16.mxu1 %v3382_v2 }
  0xad   : > { %1707 = vmatpush1.bf16.msra.mxu0 %v3011_v26  ;;  %1996 = vmatpush1.bf16.msra.mxu1 %v3012_v27  ;;  %v3105_v26 = vld [vmem:[%s3715_s8 + $0x1c4] ss:$16 sps:$4 sm:$0xff]   ;;  %v3107_v27 = vld [vmem:[%s3715_s8 + $0x1cc] ss:$16 sps:$4 sm:$0xff]  }
  0xae   : > { %1708 = vmatprep.subr.bf16.mxu0 %v3382_v2  ;;  %1997 = vmatprep.subr.bf16.mxu1 %v3382_v2 }
  0xb1   : > { %1709 = vmatpush1.bf16.msra.mxu0 %v3013_v28  ;;  %1998 = vmatpush1.bf16.msra.mxu1 %v3014_v29  ;;  %v3109_v28 = vld [vmem:[%s3715_s8 + $0x1c0] ss:$16 sps:$4 sm:$0xff]   ;;  %v3110_v29 = vld [vmem:[%s3715_s8 + $0x1c8] ss:$16 sps:$4 sm:$0xff]  }
  0xb2   : > { %1710 = vmatprep.subr.bf16.mxu0 %v3382_v2  ;;  %1999 = vmatprep.subr.bf16.mxu1 %v3382_v2 }
  0xb5   : > { %1711 = vmatpush1.bf16.msra.mxu0 %v3015_v30  ;;  %2000 = vmatpush1.bf16.msra.mxu1 %v3016_v31  ;;  %v3111_v30 = vld [vmem:[%s3715_s8 + $0x1e4] ss:$16 sps:$4 sm:$0xff]   ;;  %v3113_v31 = vld [vmem:[%s3715_s8 + $0x1ec] ss:$16 sps:$4 sm:$0xff]  }
  0xb6   : > { %1712 = vmatprep.subr.bf16.mxu0 %v3382_v2  ;;  %2001 = vmatprep.subr.bf16.mxu1 %v3382_v2 }
  0xb9   : > { %1713 = vmatpush1.bf16.msra.mxu0 %v3017_v32  ;;  %2002 = vmatpush1.bf16.msra.mxu1 %v3018_v33  ;;  %v3115_v32 = vld [vmem:[%s3715_s8 + $0x1e0] ss:$16 sps:$4 sm:$0xff]   ;;  %v3116_v33 = vld [vmem:[%s3715_s8 + $0x1e8] ss:$16 sps:$4 sm:$0xff]  }
  0xba   : > { %1714 = vmatprep.subr.bf16.mxu0 %v3382_v2  ;;  %2003 = vmatprep.subr.bf16.mxu1 %v3382_v2  ;;  %v3069_v2 = vld [vmem:[%s3715_s8 + $0x104] ss:$16 sps:$4 sm:$0xff]  }
  0xbd   : > { %1715 = vmatpush1.bf16.msra.mxu0 %v3019_v34  ;;  %2004 = vmatpush1.bf16.msra.mxu1 %v3020_v35  ;;  %v3117_v34 = vld [vmem:[%s3715_s8 + $0x204] ss:$16 sps:$4 sm:$0xff]   ;;  %v3119_v35 = vld [vmem:[%s3715_s8 + $0x20c] ss:$16 sps:$4 sm:$0xff]  }
  0xc0   : > { %1717 = vmatmul.mubr.bf16.vlgmr.msra.gmra.mrb[0].mxu0 %v3021_v36  ;;  %2006 = vmatmul.mubr.bf16.vlgmr.msra.gmra.mrb[0].mxu1 %v3024_v37  ;;  %v3121_v36 = vld [vmem:[%s3715_s8 + $0x200] ss:$16 sps:$4 sm:$0xff]   ;;  %v3122_v37 = vld [vmem:[%s3715_s8 + $0x208] ss:$16 sps:$4 sm:$0xff]  }
  0xc1   : > { %1724 = vmatprep.mubr.bf16.mxu0 %v3027_v38  ;;  %2013 = vmatprep.mubr.bf16.mxu1 %v3029_v39  ;;  %v3123_v38 = vld [vmem:[%s3715_s8 + $0x224] ss:$16 sps:$4 sm:$0xff]   ;;  %v3125_v39 = vld [vmem:[%s3715_s8 + $0x22c] ss:$16 sps:$4 sm:$0xff]  }
  0xc8   : > { %1725 = vmatmul.mubr.bf16.gmra.mrb[4].mxu0 %v3031_v40  ;;  %2014 = vmatmul.mubr.bf16.gmra.mrb[4].mxu1 %v3032_v41  ;;  %v3127_v40 = vld [vmem:[%s3715_s8 + $0x220] ss:$16 sps:$4 sm:$0xff]   ;;  %v3128_v41 = vld [vmem:[%s3715_s8 + $0x228] ss:$16 sps:$4 sm:$0xff]  }
  0xc9   : > { %1732 = vmatprep.mubr.bf16.mxu0 %v3033_v42  ;;  %2021 = vmatprep.mubr.bf16.mxu1 %v3035_v43  ;;  %v3129_v42 = vld [vmem:[%s3715_s8 + $0x244] ss:$16 sps:$4 sm:$0xff]   ;;  %v3131_v43 = vld [vmem:[%s3715_s8 + $0x24c] ss:$16 sps:$4 sm:$0xff]  }
  0xd0   : > { %1733 = vmatmul.mubr.bf16.gmra.mrb[8].mxu0 %v3037_v44  ;;  %2022 = vmatmul.mubr.bf16.gmra.mrb[8].mxu1 %v3038_v45  ;;  %v3133_v44 = vld [vmem:[%s3715_s8 + $0x240] ss:$16 sps:$4 sm:$0xff]   ;;  %v3134_v45 = vld [vmem:[%s3715_s8 + $0x248] ss:$16 sps:$4 sm:$0xff]  }
  0xd1   : > { %1740 = vmatprep.mubr.bf16.mxu0 %v3039_v46  ;;  %2029 = vmatprep.mubr.bf16.mxu1 %v3041_v47  ;;  %v3135_v46 = vld [vmem:[%s3715_s8 + $0x264] ss:$16 sps:$4 sm:$0xff]   ;;  %v3137_v47 = vld [vmem:[%s3715_s8 + $0x26c] ss:$16 sps:$4 sm:$0xff]  }
  0xd8   : > { %1741 = vmatmul.mubr.bf16.gmra.mrb[12].mxu0 %v3043_v48  ;;  %2030 = vmatmul.mubr.bf16.gmra.mrb[12].mxu1 %v3044_v49  ;;  %v3139_v48 = vld [vmem:[%s3715_s8 + $0x260] ss:$16 sps:$4 sm:$0xff]   ;;  %v3140_v49 = vld [vmem:[%s3715_s8 + $0x268] ss:$16 sps:$4 sm:$0xff]  }
  0xd9   : > { %1748 = vmatprep.mubr.bf16.mxu0 %v3045_v50  ;;  %2037 = vmatprep.mubr.bf16.mxu1 %v3047_v51  ;;  %v3141_v50 = vld [vmem:[%s3715_s8 + $0x284] ss:$16 sps:$4 sm:$0xff]   ;;  %v3143_v51 = vld [vmem:[%s3715_s8 + $0x28c] ss:$16 sps:$4 sm:$0xff]  }
  0xe0   : > { %1749 = vmatmul.mubr.bf16.gmra.mrb[16].mxu0 %v3049_v52  ;;  %2038 = vmatmul.mubr.bf16.gmra.mrb[16].mxu1 %v3050_v53  ;;  %v3145_v52 = vld [vmem:[%s3715_s8 + $0x280] ss:$16 sps:$4 sm:$0xff]   ;;  %v3146_v53 = vld [vmem:[%s3715_s8 + $0x288] ss:$16 sps:$4 sm:$0xff]  }
  0xe1   : > { %1756 = vmatprep.mubr.bf16.mxu0 %v3051_v54  ;;  %2045 = vmatprep.mubr.bf16.mxu1 %v3053_v55  ;;  %v3147_v54 = vld [vmem:[%s3715_s8 + $0x2a4] ss:$16 sps:$4 sm:$0xff]   ;;  %v3149_v55 = vld [vmem:[%s3715_s8 + $0x2ac] ss:$16 sps:$4 sm:$0xff]  }
  0xe8   : > { %1757 = vmatmul.mubr.bf16.gmra.mrb[20].mxu0 %v3055_v56  ;;  %2046 = vmatmul.mubr.bf16.gmra.mrb[20].mxu1 %v3056_v57  ;;  %v3151_v56 = vld [vmem:[%s3715_s8 + $0x2a0] ss:$16 sps:$4 sm:$0xff]   ;;  %v3152_v57 = vld [vmem:[%s3715_s8 + $0x2a8] ss:$16 sps:$4 sm:$0xff]  }
  0xe9   : > { %1764 = vmatprep.mubr.bf16.mxu0 %v3057_v58  ;;  %2053 = vmatprep.mubr.bf16.mxu1 %v3059_v59  ;;  %v3153_v58 = vld [vmem:[%s3715_s8 + $0x2c4] ss:$16 sps:$4 sm:$0xff]   ;;  %v3155_v59 = vld [vmem:[%s3715_s8 + $0x2cc] ss:$16 sps:$4 sm:$0xff]  }
  0xf0   : > { %1765 = vmatmul.mubr.bf16.gmra.mrb[24].mxu0 %v3061_v60  ;;  %2054 = vmatmul.mubr.bf16.gmra.mrb[24].mxu1 %v3062_v61  ;;  %v3157_v60 = vld [vmem:[%s3715_s8 + $0x2c0] ss:$16 sps:$4 sm:$0xff]   ;;  %v3158_v61 = vld [vmem:[%s3715_s8 + $0x2c8] ss:$16 sps:$4 sm:$0xff]  }
  0xf1   : > { %1772 = vmatprep.mubr.bf16.mxu0 %v3063_v62  ;;  %2061 = vmatprep.mubr.bf16.mxu1 %v3065_v63  ;;  %v3159_v62 = vld [vmem:[%s3715_s8 + $0x2e4] ss:$16 sps:$4 sm:$0xff]   ;;  %v3161_v63 = vld [vmem:[%s3715_s8 + $0x2ec] ss:$16 sps:$4 sm:$0xff]  }
  0xf8   : > { %1773 = vmatmul.mubr.bf16.gmra.mrb[28].mxu0 %v3067_v0  ;;  %2062 = vmatmul.mubr.bf16.gmra.mrb[28].mxu1 %v3068_v1  ;;  %v3163_v0 = vld [vmem:[%s3715_s8 + $0x2e0] ss:$16 sps:$4 sm:$0xff]   ;;  %v3164_v1 = vld [vmem:[%s3715_s8 + $0x2e8] ss:$16 sps:$4 sm:$0xff]  }
  0xf9   : > { %1780 = vmatprep.mubr.bf16.mxu0 %v3069_v2  ;;  %2069 = vmatprep.mubr.bf16.mxu1 %v3071_v3  ;;  %v3165_v2 = vld [vmem:[%s3715_s8 + $0x304] ss:$16 sps:$4 sm:$0xff]   ;;  %v3167_v3 = vld [vmem:[%s3715_s8 + $0x30c] ss:$16 sps:$4 sm:$0xff]  }
 0x100   : > { %1781 = vmatmul.mubr.bf16.gmra.mrb[32].mxu0 %v3073_v4  ;;  %2070 = vmatmul.mubr.bf16.gmra.mrb[32].mxu1 %v3074_v5  ;;  %v3169_v4 = vld [vmem:[%s3715_s8 + $0x300] ss:$16 sps:$4 sm:$0xff]   ;;  %v3170_v5 = vld [vmem:[%s3715_s8 + $0x308] ss:$16 sps:$4 sm:$0xff]  }
 0x101   : > { %1788 = vmatprep.mubr.bf16.mxu0 %v3075_v6  ;;  %2077 = vmatprep.mubr.bf16.mxu1 %v3077_v7  ;;  %v3171_v6 = vld [vmem:[%s3715_s8 + $0x324] ss:$16 sps:$4 sm:$0xff]   ;;  %v3173_v7 = vld [vmem:[%s3715_s8 + $0x32c] ss:$16 sps:$4 sm:$0xff]  }
 0x108   : > { %1789 = vmatmul.mubr.bf16.gmra.mrb[36].mxu0 %v3079_v8  ;;  %2078 = vmatmul.mubr.bf16.gmra.mrb[36].mxu1 %v3080_v9  ;;  %v3175_v8 = vld [vmem:[%s3715_s8 + $0x320] ss:$16 sps:$4 sm:$0xff]   ;;  %v3176_v9 = vld [vmem:[%s3715_s8 + $0x328] ss:$16 sps:$4 sm:$0xff]  }
 0x109   : > { %1796 = vmatprep.mubr.bf16.mxu0 %v3081_v10  ;;  %2085 = vmatprep.mubr.bf16.mxu1 %v3083_v11  ;;  %v3177_v10 = vld [vmem:[%s3715_s8 + $0x344] ss:$16 sps:$4 sm:$0xff]   ;;  %v3179_v11 = vld [vmem:[%s3715_s8 + $0x34c] ss:$16 sps:$4 sm:$0xff]  }
 0x110   : > { %1797 = vmatmul.mubr.bf16.gmra.mrb[40].mxu0 %v3085_v12  ;;  %2086 = vmatmul.mubr.bf16.gmra.mrb[40].mxu1 %v3086_v13  ;;  %v3181_v12 = vld [vmem:[%s3715_s8 + $0x340] ss:$16 sps:$4 sm:$0xff]   ;;  %v3182_v13 = vld [vmem:[%s3715_s8 + $0x348] ss:$16 sps:$4 sm:$0xff]  }
 0x111   : > { %1804 = vmatprep.mubr.bf16.mxu0 %v3087_v14  ;;  %2093 = vmatprep.mubr.bf16.mxu1 %v3089_v15  ;;  %v3183_v14 = vld [vmem:[%s3715_s8 + $0x364] ss:$16 sps:$4 sm:$0xff]   ;;  %v3185_v15 = vld [vmem:[%s3715_s8 + $0x36c] ss:$16 sps:$4 sm:$0xff]  }
 0x118   : > { %1805 = vmatmul.mubr.bf16.gmra.mrb[44].mxu0 %v3091_v16  ;;  %2094 = vmatmul.mubr.bf16.gmra.mrb[44].mxu1 %v3092_v17  ;;  %v596_v17 = vld [vmem:[%s5022_s3] sm:$0xff] }
 0x119   : > { %1812 = vmatprep.mubr.bf16.mxu0 %v3093_v18  ;;  %2101 = vmatprep.mubr.bf16.mxu1 %v3095_v19 }
 0x120   : > { %1813 = vmatmul.mubr.bf16.gmra.mrb[48].mxu0 %v3097_v20  ;;  %2102 = vmatmul.mubr.bf16.gmra.mrb[48].mxu1 %v3098_v21  ;;  %v3187_v20 = vld [vmem:[%s3715_s8 + $0x360] ss:$16 sps:$4 sm:$0xff]  }
 0x121   : > { %1820 = vmatprep.mubr.bf16.mxu0 %v3099_v22  ;;  %2109 = vmatprep.mubr.bf16.mxu1 %v3101_v23 }
 0x128   : > { %1821 = vmatmul.mubr.bf16.gmra.mrb[52].mxu0 %v3103_v24  ;;  %2110 = vmatmul.mubr.bf16.gmra.mrb[52].mxu1 %v3104_v25  ;;  %v3188_v24 = vld [vmem:[%s3715_s8 + $0x368] ss:$16 sps:$4 sm:$0xff]   ;;  %v3189_v25 = vld [vmem:[%s3715_s8 + $0x384] ss:$16 sps:$4 sm:$0xff]  }
 0x129   : > { %1828 = vmatprep.mubr.bf16.mxu0 %v3105_v26  ;;  %2117 = vmatprep.mubr.bf16.mxu1 %v3107_v27  ;;  %v597_v26 = vld [vmem:[%s5022_s3 + $0x8] sm:$0xff] }
 0x130   : > { %1829 = vmatmul.mubr.bf16.gmra.mrb[56].mxu0 %v3109_v28  ;;  %2118 = vmatmul.mubr.bf16.gmra.mrb[56].mxu1 %v3110_v29  ;;  %v3191_v29 = vld [vmem:[%s3715_s8 + $0x38c] ss:$16 sps:$4 sm:$0xff]  }
 0x131   : > { %1836 = vmatprep.mubr.bf16.mxu0 %v3111_v30  ;;  %2125 = vmatprep.mubr.bf16.mxu1 %v3113_v31 }
 0x138   : > { %1837 = vmatmul.mubr.bf16.gmra.mrb[60].mxu0 %v3115_v32  ;;  %2126 = vmatmul.mubr.bf16.gmra.mrb[60].mxu1 %v3116_v33 }
 0x139   : > { %1844 = vmatprep.mubr.bf16.mxu0 %v3117_v34  ;;  %2133 = vmatprep.mubr.bf16.mxu1 %v3119_v35  ;;  %v598_v35 = vld [vmem:[%s5022_s3 + $0x10] sm:$0xff] }
 0x140   : > { %1845 = vmatmul.mubr.bf16.gmra.mrb[64].mxu0 %v3121_v36  ;;  %2134 = vmatmul.mubr.bf16.gmra.mrb[64].mxu1 %v3122_v37 }
 0x141   : > { %1852 = vmatprep.mubr.bf16.mxu0 %v3123_v38  ;;  %2141 = vmatprep.mubr.bf16.mxu1 %v3125_v39  ;;  %v3193_v38 = vld [vmem:[%s3715_s8 + $0x380] ss:$16 sps:$4 sm:$0xff]  }
 0x148   : > { %1853 = vmatmul.mubr.bf16.gmra.mrb[68].mxu0 %v3127_v40  ;;  %2142 = vmatmul.mubr.bf16.gmra.mrb[68].mxu1 %v3128_v41 }
 0x149   : > { %1860 = vmatprep.mubr.bf16.mxu0 %v3129_v42  ;;  %2149 = vmatprep.mubr.bf16.mxu1 %v3131_v43  ;;  %v3194_v42 = vld [vmem:[%s3715_s8 + $0x388] ss:$16 sps:$4 sm:$0xff]   ;;  %v3195_v43 = vld [vmem:[%s3715_s8 + $0x3a4] ss:$16 sps:$4 sm:$0xff]  }
 0x150   : > { %1861 = vmatmul.mubr.bf16.gmra.mrb[72].mxu0 %v3133_v44  ;;  %2150 = vmatmul.mubr.bf16.gmra.mrb[72].mxu1 %v3134_v45  ;;  %v599_v44 = vld [vmem:[%s5022_s3 + $0x18] sm:$0xff] }
 0x151   : > { %1868 = vmatprep.mubr.bf16.mxu0 %v3135_v46  ;;  %2157 = vmatprep.mubr.bf16.mxu1 %v3137_v47  ;;  %v3197_v47 = vld [vmem:[%s3715_s8 + $0x3ac] ss:$16 sps:$4 sm:$0xff]  }
 0x158   : > { %1869 = vmatmul.mubr.bf16.gmra.mrb[76].mxu0 %v3139_v48  ;;  %2158 = vmatmul.mubr.bf16.gmra.mrb[76].mxu1 %v3140_v49 }
 0x159   : > { %1876 = vmatprep.mubr.bf16.mxu0 %v3141_v50  ;;  %2165 = vmatprep.mubr.bf16.mxu1 %v3143_v51 }
 0x160   : > { %1877 = vmatmul.mubr.bf16.gmra.mrb[80].mxu0 %v3145_v52  ;;  %2166 = vmatmul.mubr.bf16.gmra.mrb[80].mxu1 %v3146_v53  ;;  %v600_v53 = vld [vmem:[%s5022_s3 + $0x20] sm:$0xff] }
 0x161   : > { %1884 = vmatprep.mubr.bf16.mxu0 %v3147_v54  ;;  %2173 = vmatprep.mubr.bf16.mxu1 %v3149_v55 }
 0x168   : > { %1885 = vmatmul.mubr.bf16.gmra.mrb[84].mxu0 %v3151_v56  ;;  %2174 = vmatmul.mubr.bf16.gmra.mrb[84].mxu1 %v3152_v57  ;;  %v3199_v56 = vld [vmem:[%s3715_s8 + $0x3a0] ss:$16 sps:$4 sm:$0xff]  }
 0x169   : > { %1892 = vmatprep.mubr.bf16.mxu0 %v3153_v58  ;;  %2181 = vmatprep.mubr.bf16.mxu1 %v3155_v59 }
 0x170   : > { %1893 = vmatmul.mubr.bf16.gmra.mrb[88].mxu0 %v3157_v60  ;;  %2182 = vmatmul.mubr.bf16.gmra.mrb[88].mxu1 %v3158_v61  ;;  %v3200_v60 = vld [vmem:[%s3715_s8 + $0x3a8] ss:$16 sps:$4 sm:$0xff]   ;;  %v3201_v61 = vld [vmem:[%s3715_s8 + $0x3c4] ss:$16 sps:$4 sm:$0xff]  }
 0x171   : > { %1900 = vmatprep.mubr.bf16.mxu0 %v3159_v62  ;;  %2189 = vmatprep.mubr.bf16.mxu1 %v3161_v63  ;;  %v601_v62 = vld [vmem:[%s5022_s3 + $0x28] sm:$0xff] }
 0x178   : > { %1901 = vmatmul.mubr.bf16.gmra.mrb[92].mxu0 %v3163_v0  ;;  %2190 = vmatmul.mubr.bf16.gmra.mrb[92].mxu1 %v3164_v1  ;;  %v3203_v1 = vld [vmem:[%s3715_s8 + $0x3cc] ss:$16 sps:$4 sm:$0xff]  }
 0x179   : > { %1908 = vmatprep.mubr.bf16.mxu0 %v3165_v2  ;;  %2197 = vmatprep.mubr.bf16.mxu1 %v3167_v3 }
 0x180   : > { %1909 = vmatmul.mubr.bf16.gmra.mrb[96].mxu0 %v3169_v4  ;;  %2198 = vmatmul.mubr.bf16.gmra.mrb[96].mxu1 %v3170_v5 }
 0x181   : > { %1916 = vmatprep.mubr.bf16.mxu0 %v3171_v6  ;;  %2205 = vmatprep.mubr.bf16.mxu1 %v3173_v7  ;;  %v602_v7 = vld [vmem:[%s5022_s3 + $0x30] sm:$0xff] }
 0x188   : > { %1917 = vmatmul.mubr.bf16.gmra.mrb[100].mxu0 %v3175_v8  ;;  %2206 = vmatmul.mubr.bf16.gmra.mrb[100].mxu1 %v3176_v9 }
 0x189   : > { %1924 = vmatprep.mubr.bf16.mxu0 %v3177_v10  ;;  %2213 = vmatprep.mubr.bf16.mxu1 %v3179_v11  ;;  %v3205_v10 = vld [vmem:[%s3715_s8 + $0x3c0] ss:$16 sps:$4 sm:$0xff]  }
 0x190   : > { %1925 = vmatmul.mubr.bf16.gmra.mrb[104].mxu0 %v3181_v12  ;;  %2214 = vmatmul.mubr.bf16.gmra.mrb[104].mxu1 %v3182_v13 }
 0x191   : > { %1932 = vmatprep.mubr.bf16.mxu0 %v3183_v14  ;;  %2221 = vmatprep.mubr.bf16.mxu1 %v3185_v15  ;;  %v3206_v14 = vld [vmem:[%s3715_s8 + $0x3c8] ss:$16 sps:$4 sm:$0xff]   ;;  %v3207_v15 = vld [vmem:[%s3715_s8 + $0x3e4] ss:$16 sps:$4 sm:$0xff]  }
 0x193   : > { %v1718_v16 = vpop.f32.mrb[0].mxu0  ;;  %v2007_v18 = vpop.f32.mrb[0].mxu1 }
 0x194   : > { %v1720_v19 = vpop.f32.mrb[1].mxu0  ;;  %v2008_v21 = vadd.f32 %v2007_v18, %v1718_v16  ;;  %v2009_v22 = vpop.f32.mrb[1].mxu1  ;;  %v603_v16 = vld [vmem:[%s5022_s3 + $0x38] sm:$0xff] }
 0x195   : > { %v1721_v23 = vpop.f32.mrb[2].mxu0  ;;  %v2010_v27 = vpop.f32.mrb[2].mxu1  ;;  %v3209_v19 = vld [vmem:[%s3715_s8 + $0x3ec] ss:$16 sps:$4 sm:$0xff]  }
 0x196   : > { %v1723_v28 = vpop.f32.mrb[3].mxu0  ;;  %v2262_v30 = vadd.f32 %v2008_v21, %v596_v17  ;;  %v2011_v31 = vadd.f32 %v2010_v27, %v1721_v23  ;;  %v2012_v32 = vpop.f32.mrb[3].mxu1 }
 0x197   : > { %v3211_v28 = vld [vmem:[%s3715_s8 + $0x3e0] ss:$16 sps:$4 sm:$0xff]   ;;  %v3212_v32 = vld [vmem:[%s3715_s8 + $0x3e8] ss:$16 sps:$4 sm:$0xff]  }
 0x198   : > { %1933 = vmatmul.mubr.bf16.gmra.mrb[108].mxu0 %v3187_v20  ;;  %2326 = vst [vmem:[%s5022_s3] sm:$0xff] %v2262_v30  ;;  %v2263_v33 = vadd.f32 %v2011_v31, %v597_v26  ;;  %2222 = vmatmul.mubr.bf16.gmra.mrb[108].mxu1 %v3188_v24 }
 0x199   : > { %1940 = vmatprep.mubr.bf16.mxu0 %v3189_v25  ;;  %2229 = vmatprep.mubr.bf16.mxu1 %v3191_v29  ;;  %v604_v25 = vld [vmem:[%s5022_s3 + $0x40] sm:$0xff] }
 0x19a   : > { %2327 = vst [vmem:[%s5022_s3 + $0x8] sm:$0xff] %v2263_v33  ;;  %v605_v33 = vld [vmem:[%s5022_s3 + $0x48] sm:$0xff] }
 0x19b   : > { %v1726_v34 = vpop.f32.mrb[4].mxu0  ;;  %v2015_v36 = vpop.f32.mrb[4].mxu1 }
 0x19c   : > { %v1728_v37 = vpop.f32.mrb[5].mxu0  ;;  %v2016_v39 = vadd.f32 %v2015_v36, %v1726_v34  ;;  %v2017_v40 = vpop.f32.mrb[5].mxu1 }
 0x19d   : > { %v1729_v41 = vpop.f32.mrb[6].mxu0  ;;  %v2018_v45 = vpop.f32.mrb[6].mxu1 }
 0x19e   : > { %v1731_v46 = vpop.f32.mrb[7].mxu0  ;;  %v2264_v48 = vadd.f32 %v2016_v39, %v598_v35  ;;  %v2019_v49 = vadd.f32 %v2018_v45, %v1729_v41  ;;  %v2020_v50 = vpop.f32.mrb[7].mxu1  ;;  %v606_v41 = vld [vmem:[%s5022_s3 + $0x50] sm:$0xff] }
 0x1a0   : > { %1941 = vmatmul.mubr.bf16.gmra.mrb[112].mxu0 %v3193_v38  ;;  %2328 = vst [vmem:[%s5022_s3 + $0x10] sm:$0xff] %v2264_v48  ;;  %v2265_v51 = vadd.f32 %v2019_v49, %v599_v44  ;;  %2230 = vmatmul.mubr.bf16.gmra.mrb[112].mxu1 %v3194_v42 }
 0x1a1   : > { %1948 = vmatprep.mubr.bf16.mxu0 %v3195_v43  ;;  %2237 = vmatprep.mubr.bf16.mxu1 %v3197_v47  ;;  %v607_v47 = vld [vmem:[%s5022_s3 + $0x58] sm:$0xff] }
 0x1a2   : > { %2329 = vst [vmem:[%s5022_s3 + $0x18] sm:$0xff] %v2265_v51 }
 0x1a3   : > { %v1734_v52 = vpop.f32.mrb[8].mxu0  ;;  %v2023_v54 = vpop.f32.mrb[8].mxu1 }
 0x1a4   : > { %v1736_v55 = vpop.f32.mrb[9].mxu0  ;;  %v2024_v57 = vadd.f32 %v2023_v54, %v1734_v52  ;;  %v2025_v58 = vpop.f32.mrb[9].mxu1 }
 0x1a5   : > { %v1737_v59 = vpop.f32.mrb[10].mxu0  ;;  %v2026_v63 = vpop.f32.mrb[10].mxu1  ;;  %v608_v55 = vld [vmem:[%s5022_s3 + $0x60] sm:$0xff] }
 0x1a6   : > { %v1739_v0 = vpop.f32.mrb[11].mxu0  ;;  %v2266_v2 = vadd.f32 %v2024_v57, %v600_v53  ;;  %v2027_v3 = vadd.f32 %v2026_v63, %v1737_v59  ;;  %v2028_v4 = vpop.f32.mrb[11].mxu1 }
 0x1a8   : > { %1949 = vmatmul.mubr.bf16.gmra.mrb[116].mxu0 %v3199_v56  ;;  %2330 = vst [vmem:[%s5022_s3 + $0x20] sm:$0xff] %v2266_v2  ;;  %v2267_v5 = vadd.f32 %v2027_v3, %v601_v62  ;;  %2238 = vmatmul.mubr.bf16.gmra.mrb[116].mxu1 %v3200_v60 }
 0x1a9   : > { %1956 = vmatprep.mubr.bf16.mxu0 %v3201_v61  ;;  %2245 = vmatprep.mubr.bf16.mxu1 %v3203_v1  ;;  %v609_v61 = vld [vmem:[%s5022_s3 + $0x68] sm:$0xff] }
 0x1aa   : > { %2331 = vst [vmem:[%s5022_s3 + $0x28] sm:$0xff] %v2267_v5  ;;  %v610_v5 = vld [vmem:[%s5022_s3 + $0x70] sm:$0xff] }
 0x1ab   : > { %v1742_v6 = vpop.f32.mrb[12].mxu0  ;;  %v2031_v8 = vpop.f32.mrb[12].mxu1 }
 0x1ac   : > { %v1744_v9 = vpop.f32.mrb[13].mxu0  ;;  %v2032_v11 = vadd.f32 %v2031_v8, %v1742_v6  ;;  %v2033_v12 = vpop.f32.mrb[13].mxu1 }
 0x1ad   : > { %v1745_v13 = vpop.f32.mrb[14].mxu0  ;;  %v2034_v17 = vpop.f32.mrb[14].mxu1 }
 0x1ae   : > { %v1747_v18 = vpop.f32.mrb[15].mxu0  ;;  %v2268_v20 = vadd.f32 %v2032_v11, %v602_v7  ;;  %v2035_v21 = vadd.f32 %v2034_v17, %v1745_v13  ;;  %v2036_v22 = vpop.f32.mrb[15].mxu1  ;;  %v611_v11 = vld [vmem:[%s5022_s3 + $0x78] sm:$0xff] }
 0x1b0   : > { %1957 = vmatmul.mubr.bf16.gmra.mrb[120].mxu0 %v3205_v10  ;;  %2332 = vst [vmem:[%s5022_s3 + $0x30] sm:$0xff] %v2268_v20  ;;  %v2269_v23 = vadd.f32 %v2035_v21, %v603_v16  ;;  %2246 = vmatmul.mubr.bf16.gmra.mrb[120].mxu1 %v3206_v14 }
 0x1b1   : > { %1964 = vmatprep.mubr.bf16.mxu0 %v3207_v15  ;;  %2253 = vmatprep.mubr.bf16.mxu1 %v3209_v19  ;;  %v612_v19 = vld [vmem:[%s5022_s3 + $0x80] sm:$0xff] }
 0x1b2   : > { %2333 = vst [vmem:[%s5022_s3 + $0x38] sm:$0xff] %v2269_v23 }
 0x1b3   : > { %v1750_v24 = vpop.f32.mrb[16].mxu0  ;;  %v2039_v26 = vpop.f32.mrb[16].mxu1 }
 0x1b4   : > { %v1752_v27 = vpop.f32.mrb[17].mxu0  ;;  %v2040_v29 = vadd.f32 %v2039_v26, %v1750_v24  ;;  %v2041_v30 = vpop.f32.mrb[17].mxu1 }
 0x1b5   : > { %v1753_v31 = vpop.f32.mrb[18].mxu0  ;;  %v2042_v34 = vpop.f32.mrb[18].mxu1 }
 0x1b6   : > { %v1755_v35 = vpop.f32.mrb[19].mxu0  ;;  %v2270_v36 = vadd.f32 %v2040_v29, %v604_v25  ;;  %v2043_v37 = vadd.f32 %v2042_v34, %v1753_v31  ;;  %v2044_v38 = vpop.f32.mrb[19].mxu1  ;;  %v613_v25 = vld [vmem:[%s5022_s3 + $0x88] sm:$0xff] }
 0x1b8   : > { %1965 = vmatmul.mubr.bf16.gmra.mrb[124].mxu0 %v3211_v28  ;;  %2334 = vst [vmem:[%s5022_s3 + $0x40] sm:$0xff] %v2270_v36  ;;  %v2271_v39 = vadd.f32 %v2043_v37, %v605_v33  ;;  %2254 = vmatmul.mubr.bf16.gmra.mrb[124].mxu1 %v3212_v32  ;;  %v614_v33 = vld [vmem:[%s5022_s3 + $0x90] sm:$0xff] }
 0x1ba   : > { %2335 = vst [vmem:[%s5022_s3 + $0x48] sm:$0xff] %v2271_v39  ;;  %v615_v39 = vld [vmem:[%s5022_s3 + $0x98] sm:$0xff] }
 0x1bb   : > { %v1758_v40 = vpop.f32.mrb[20].mxu0  ;;  %v2047_v42 = vpop.f32.mrb[20].mxu1 }
 0x1bc   : > { %v1760_v43 = vpop.f32.mrb[21].mxu0  ;;  %v2048_v44 = vadd.f32 %v2047_v42, %v1758_v40  ;;  %v2049_v45 = vpop.f32.mrb[21].mxu1 }
 0x1bd   : > { %v1761_v46 = vpop.f32.mrb[22].mxu0  ;;  %v2050_v48 = vpop.f32.mrb[22].mxu1 }
 0x1be   : > { %v1763_v49 = vpop.f32.mrb[23].mxu0  ;;  %v2272_v50 = vadd.f32 %v2048_v44, %v606_v41  ;;  %v2051_v51 = vadd.f32 %v2050_v48, %v1761_v46  ;;  %v2052_v52 = vpop.f32.mrb[23].mxu1 }
 0x1c0   : > { %2336 = vst [vmem:[%s5022_s3 + $0x50] sm:$0xff] %v2272_v50  ;;  %v2273_v53 = vadd.f32 %v2051_v51, %v607_v47  ;;  %v616_v47 = vld [vmem:[%s5022_s3 + $0xa0] sm:$0xff] }
 0x1c2   : > { %2337 = vst [vmem:[%s5022_s3 + $0x58] sm:$0xff] %v2273_v53  ;;  %v617_v53 = vld [vmem:[%s5022_s3 + $0xa8] sm:$0xff] }
 0x1c3   : > { %v1766_v54 = vpop.f32.mrb[24].mxu0  ;;  %v2055_v56 = vpop.f32.mrb[24].mxu1 }
 0x1c4   : > { %v1768_v57 = vpop.f32.mrb[25].mxu0  ;;  %v2056_v58 = vadd.f32 %v2055_v56, %v1766_v54  ;;  %v2057_v59 = vpop.f32.mrb[25].mxu1 }
 0x1c5   : > { %v1769_v60 = vpop.f32.mrb[26].mxu0  ;;  %v2058_v62 = vpop.f32.mrb[26].mxu1 }
 0x1c6   : > { %v1771_v63 = vpop.f32.mrb[27].mxu0  ;;  %v2274_v0 = vadd.f32 %v2056_v58, %v608_v55  ;;  %v2059_v1 = vadd.f32 %v2058_v62, %v1769_v60  ;;  %v2060_v2 = vpop.f32.mrb[27].mxu1 }
 0x1c8   : > { %2338 = vst [vmem:[%s5022_s3 + $0x60] sm:$0xff] %v2274_v0  ;;  %v2275_v3 = vadd.f32 %v2059_v1, %v609_v61  ;;  %v618_v61 = vld [vmem:[%s5022_s3 + $0xb0] sm:$0xff] }
 0x1ca   : > { %2339 = vst [vmem:[%s5022_s3 + $0x68] sm:$0xff] %v2275_v3  ;;  %v619_v3 = vld [vmem:[%s5022_s3 + $0xb8] sm:$0xff] }
 0x1cb   : > { %v1774_v4 = vpop.f32.mrb[28].mxu0  ;;  %v2063_v6 = vpop.f32.mrb[28].mxu1 }
 0x1cc   : > { %v1776_v7 = vpop.f32.mrb[29].mxu0  ;;  %v2064_v8 = vadd.f32 %v2063_v6, %v1774_v4  ;;  %v2065_v9 = vpop.f32.mrb[29].mxu1 }
 0x1cd   : > { %v1777_v10 = vpop.f32.mrb[30].mxu0  ;;  %v2066_v12 = vpop.f32.mrb[30].mxu1 }
 0x1ce   : > { %v1779_v13 = vpop.f32.mrb[31].mxu0  ;;  %v2276_v14 = vadd.f32 %v2064_v8, %v610_v5  ;;  %v2067_v15 = vadd.f32 %v2066_v12, %v1777_v10  ;;  %v2068_v16 = vpop.f32.mrb[31].mxu1 }
 0x1d0   : > { %2340 = vst [vmem:[%s5022_s3 + $0x70] sm:$0xff] %v2276_v14  ;;  %v2277_v17 = vadd.f32 %v2067_v15, %v611_v11  ;;  %v620_v11 = vld [vmem:[%s5022_s3 + $0xc0] sm:$0xff] }
 0x1d2   : > { %2341 = vst [vmem:[%s5022_s3 + $0x78] sm:$0xff] %v2277_v17  ;;  %v621_v17 = vld [vmem:[%s5022_s3 + $0xc8] sm:$0xff] }
 0x1d3   : > { %v1782_v18 = vpop.f32.mrb[32].mxu0  ;;  %v2071_v20 = vpop.f32.mrb[32].mxu1 }
 0x1d4   : > { %v1784_v21 = vpop.f32.mrb[33].mxu0  ;;  %v2072_v22 = vadd.f32 %v2071_v20, %v1782_v18  ;;  %v2073_v23 = vpop.f32.mrb[33].mxu1 }
 0x1d5   : > { %v1785_v24 = vpop.f32.mrb[34].mxu0  ;;  %v2074_v26 = vpop.f32.mrb[34].mxu1 }
 0x1d6   : > { %v1787_v27 = vpop.f32.mrb[35].mxu0  ;;  %v2278_v28 = vadd.f32 %v2072_v22, %v612_v19  ;;  %v2075_v29 = vadd.f32 %v2074_v26, %v1785_v24  ;;  %v2076_v30 = vpop.f32.mrb[35].mxu1 }
 0x1d8   : > { %2342 = vst [vmem:[%s5022_s3 + $0x80] sm:$0xff] %v2278_v28  ;;  %v2279_v31 = vadd.f32 %v2075_v29, %v613_v25  ;;  %v622_v25 = vld [vmem:[%s5022_s3 + $0xd0] sm:$0xff] }
 0x1da   : > { %2343 = vst [vmem:[%s5022_s3 + $0x88] sm:$0xff] %v2279_v31  ;;  %v623_v31 = vld [vmem:[%s5022_s3 + $0xd8] sm:$0xff] }
 0x1db   : > { %v1790_v32 = vpop.f32.mrb[36].mxu0  ;;  %v2079_v34 = vpop.f32.mrb[36].mxu1 }
 0x1dc   : > { %v1792_v35 = vpop.f32.mrb[37].mxu0  ;;  %v2080_v36 = vadd.f32 %v2079_v34, %v1790_v32  ;;  %v2081_v37 = vpop.f32.mrb[37].mxu1 }
 0x1dd   : > { %v1793_v38 = vpop.f32.mrb[38].mxu0  ;;  %v2082_v40 = vpop.f32.mrb[38].mxu1 }
 0x1de   : > { %v1795_v41 = vpop.f32.mrb[39].mxu0  ;;  %v2280_v42 = vadd.f32 %v2080_v36, %v614_v33  ;;  %v2083_v43 = vadd.f32 %v2082_v40, %v1793_v38  ;;  %v2084_v44 = vpop.f32.mrb[39].mxu1 }
 0x1e0   : > { %2344 = vst [vmem:[%s5022_s3 + $0x90] sm:$0xff] %v2280_v42  ;;  %v2281_v45 = vadd.f32 %v2083_v43, %v615_v39  ;;  %v624_v39 = vld [vmem:[%s5022_s3 + $0xe0] sm:$0xff] }
 0x1e2   : > { %2345 = vst [vmem:[%s5022_s3 + $0x98] sm:$0xff] %v2281_v45  ;;  %v625_v45 = vld [vmem:[%s5022_s3 + $0xe8] sm:$0xff] }
 0x1e3   : > { %v1798_v46 = vpop.f32.mrb[40].mxu0  ;;  %v2087_v48 = vpop.f32.mrb[40].mxu1 }
 0x1e4   : > { %v1800_v49 = vpop.f32.mrb[41].mxu0  ;;  %v2088_v50 = vadd.f32 %v2087_v48, %v1798_v46  ;;  %v2089_v51 = vpop.f32.mrb[41].mxu1 }
 0x1e5   : > { %v1801_v52 = vpop.f32.mrb[42].mxu0  ;;  %v2090_v54 = vpop.f32.mrb[42].mxu1 }
 0x1e6   : > { %v1803_v55 = vpop.f32.mrb[43].mxu0  ;;  %v2282_v56 = vadd.f32 %v2088_v50, %v616_v47  ;;  %v2091_v57 = vadd.f32 %v2090_v54, %v1801_v52  ;;  %v2092_v58 = vpop.f32.mrb[43].mxu1 }
 0x1e8   : > { %2346 = vst [vmem:[%s5022_s3 + $0xa0] sm:$0xff] %v2282_v56  ;;  %v2283_v59 = vadd.f32 %v2091_v57, %v617_v53  ;;  %v626_v53 = vld [vmem:[%s5022_s3 + $0xf0] sm:$0xff] }
 0x1ea   : > { %2347 = vst [vmem:[%s5022_s3 + $0xa8] sm:$0xff] %v2283_v59  ;;  %v627_v59 = vld [vmem:[%s5022_s3 + $0xf8] sm:$0xff] }
 0x1eb   : > { %v1806_v60 = vpop.f32.mrb[44].mxu0  ;;  %v2095_v62 = vpop.f32.mrb[44].mxu1 }
 0x1ec   : > { %v1808_v63 = vpop.f32.mrb[45].mxu0  ;;  %v2096_v0 = vadd.f32 %v2095_v62, %v1806_v60  ;;  %v2097_v1 = vpop.f32.mrb[45].mxu1 }
 0x1ed   : > { %v1809_v2 = vpop.f32.mrb[46].mxu0  ;;  %v2098_v4 = vpop.f32.mrb[46].mxu1 }
 0x1ee   : > { %v1811_v5 = vpop.f32.mrb[47].mxu0  ;;  %v2284_v6 = vadd.f32 %v2096_v0, %v618_v61  ;;  %v2099_v7 = vadd.f32 %v2098_v4, %v1809_v2  ;;  %v2100_v8 = vpop.f32.mrb[47].mxu1 }
 0x1f0   : > { %2348 = vst [vmem:[%s5022_s3 + $0xb0] sm:$0xff] %v2284_v6  ;;  %v2285_v9 = vadd.f32 %v2099_v7, %v619_v3  ;;  %v628_v3 = vld [vmem:[%s5022_s3 + $0x100] sm:$0xff] }
 0x1f2   : > { %2349 = vst [vmem:[%s5022_s3 + $0xb8] sm:$0xff] %v2285_v9  ;;  %v629_v9 = vld [vmem:[%s5022_s3 + $0x108] sm:$0xff] }
 0x1f3   : > { %v1814_v10 = vpop.f32.mrb[48].mxu0  ;;  %v2103_v12 = vpop.f32.mrb[48].mxu1 }
 0x1f4   : > { %v1816_v13 = vpop.f32.mrb[49].mxu0  ;;  %v2104_v14 = vadd.f32 %v2103_v12, %v1814_v10  ;;  %v2105_v15 = vpop.f32.mrb[49].mxu1 }
 0x1f5   : > { %v1817_v16 = vpop.f32.mrb[50].mxu0  ;;  %v2106_v18 = vpop.f32.mrb[50].mxu1 }
 0x1f6   : > { %v1819_v19 = vpop.f32.mrb[51].mxu0  ;;  %v2286_v20 = vadd.f32 %v2104_v14, %v620_v11  ;;  %v2107_v21 = vadd.f32 %v2106_v18, %v1817_v16  ;;  %v2108_v22 = vpop.f32.mrb[51].mxu1 }
 0x1f8   : > { %2350 = vst [vmem:[%s5022_s3 + $0xc0] sm:$0xff] %v2286_v20  ;;  %v2287_v23 = vadd.f32 %v2107_v21, %v621_v17  ;;  %v630_v17 = vld [vmem:[%s5022_s3 + $0x110] sm:$0xff] }
 0x1fa   : > { %2351 = vst [vmem:[%s5022_s3 + $0xc8] sm:$0xff] %v2287_v23  ;;  %v631_v23 = vld [vmem:[%s5022_s3 + $0x118] sm:$0xff] }
 0x1fb   : > { %v1822_v24 = vpop.f32.mrb[52].mxu0  ;;  %v2111_v26 = vpop.f32.mrb[52].mxu1 }
 0x1fc   : > { %v1824_v27 = vpop.f32.mrb[53].mxu0  ;;  %v2112_v28 = vadd.f32 %v2111_v26, %v1822_v24  ;;  %v2113_v29 = vpop.f32.mrb[53].mxu1 }
 0x1fd   : > { %v1825_v30 = vpop.f32.mrb[54].mxu0  ;;  %v2114_v32 = vpop.f32.mrb[54].mxu1 }
 0x1fe   : > { %v1827_v33 = vpop.f32.mrb[55].mxu0  ;;  %v2288_v34 = vadd.f32 %v2112_v28, %v622_v25  ;;  %v2115_v35 = vadd.f32 %v2114_v32, %v1825_v30  ;;  %v2116_v36 = vpop.f32.mrb[55].mxu1 }
 0x200   : > { %2352 = vst [vmem:[%s5022_s3 + $0xd0] sm:$0xff] %v2288_v34  ;;  %v2289_v37 = vadd.f32 %v2115_v35, %v623_v31  ;;  %v632_v31 = vld [vmem:[%s5022_s3 + $0x120] sm:$0xff] }
 0x202   : > { %2353 = vst [vmem:[%s5022_s3 + $0xd8] sm:$0xff] %v2289_v37  ;;  %v633_v37 = vld [vmem:[%s5022_s3 + $0x128] sm:$0xff] }
 0x203   : > { %v1830_v38 = vpop.f32.mrb[56].mxu0  ;;  %v2119_v40 = vpop.f32.mrb[56].mxu1 }
 0x204   : > { %v1832_v41 = vpop.f32.mrb[57].mxu0  ;;  %v2120_v42 = vadd.f32 %v2119_v40, %v1830_v38  ;;  %v2121_v43 = vpop.f32.mrb[57].mxu1 }
 0x205   : > { %v1833_v44 = vpop.f32.mrb[58].mxu0  ;;  %v2122_v46 = vpop.f32.mrb[58].mxu1 }
 0x206   : > { %v1835_v47 = vpop.f32.mrb[59].mxu0  ;;  %v2290_v48 = vadd.f32 %v2120_v42, %v624_v39  ;;  %v2123_v49 = vadd.f32 %v2122_v46, %v1833_v44  ;;  %v2124_v50 = vpop.f32.mrb[59].mxu1 }
 0x208   : > { %2354 = vst [vmem:[%s5022_s3 + $0xe0] sm:$0xff] %v2290_v48  ;;  %v2291_v51 = vadd.f32 %v2123_v49, %v625_v45  ;;  %v634_v45 = vld [vmem:[%s5022_s3 + $0x130] sm:$0xff] }
 0x20a   : > { %2355 = vst [vmem:[%s5022_s3 + $0xe8] sm:$0xff] %v2291_v51  ;;  %v635_v51 = vld [vmem:[%s5022_s3 + $0x138] sm:$0xff] }
 0x20b   : > { %v1838_v52 = vpop.f32.mrb[60].mxu0  ;;  %v2127_v54 = vpop.f32.mrb[60].mxu1 }
 0x20c   : > { %v1840_v55 = vpop.f32.mrb[61].mxu0  ;;  %v2128_v56 = vadd.f32 %v2127_v54, %v1838_v52  ;;  %v2129_v57 = vpop.f32.mrb[61].mxu1 }
 0x20d   : > { %v1841_v58 = vpop.f32.mrb[62].mxu0  ;;  %v2130_v60 = vpop.f32.mrb[62].mxu1 }
 0x20e   : > { %v1843_v61 = vpop.f32.mrb[63].mxu0  ;;  %v2292_v62 = vadd.f32 %v2128_v56, %v626_v53  ;;  %v2131_v63 = vadd.f32 %v2130_v60, %v1841_v58  ;;  %v2132_v0 = vpop.f32.mrb[63].mxu1 }
 0x210   : > { %2356 = vst [vmem:[%s5022_s3 + $0xf0] sm:$0xff] %v2292_v62  ;;  %v2293_v1 = vadd.f32 %v2131_v63, %v627_v59  ;;  %v636_v59 = vld [vmem:[%s5022_s3 + $0x140] sm:$0xff] }
 0x212   : > { %2357 = vst [vmem:[%s5022_s3 + $0xf8] sm:$0xff] %v2293_v1  ;;  %v637_v1 = vld [vmem:[%s5022_s3 + $0x148] sm:$0xff] }
 0x213   : > { %v1846_v2 = vpop.f32.mrb[64].mxu0  ;;  %v2135_v4 = vpop.f32.mrb[64].mxu1 }
 0x214   : > { %v1848_v5 = vpop.f32.mrb[65].mxu0  ;;  %v2136_v6 = vadd.f32 %v2135_v4, %v1846_v2  ;;  %v2137_v7 = vpop.f32.mrb[65].mxu1 }
 0x215   : > { %v1849_v8 = vpop.f32.mrb[66].mxu0  ;;  %v2138_v10 = vpop.f32.mrb[66].mxu1 }
 0x216   : > { %v1851_v11 = vpop.f32.mrb[67].mxu0  ;;  %v2294_v12 = vadd.f32 %v2136_v6, %v628_v3  ;;  %v2139_v13 = vadd.f32 %v2138_v10, %v1849_v8  ;;  %v2140_v14 = vpop.f32.mrb[67].mxu1 }
 0x218   : > { %2358 = vst [vmem:[%s5022_s3 + $0x100] sm:$0xff] %v2294_v12  ;;  %v2295_v15 = vadd.f32 %v2139_v13, %v629_v9  ;;  %v638_v9 = vld [vmem:[%s5022_s3 + $0x150] sm:$0xff] }
 0x21a   : > { %2359 = vst [vmem:[%s5022_s3 + $0x108] sm:$0xff] %v2295_v15  ;;  %v639_v15 = vld [vmem:[%s5022_s3 + $0x158] sm:$0xff] }
 0x21b   : > { %v1854_v16 = vpop.f32.mrb[68].mxu0  ;;  %v2143_v18 = vpop.f32.mrb[68].mxu1 }
 0x21c   : > { %v1856_v19 = vpop.f32.mrb[69].mxu0  ;;  %v2144_v20 = vadd.f32 %v2143_v18, %v1854_v16  ;;  %v2145_v21 = vpop.f32.mrb[69].mxu1 }
 0x21d   : > { %v1857_v22 = vpop.f32.mrb[70].mxu0  ;;  %v2146_v24 = vpop.f32.mrb[70].mxu1 }
 0x21e   : > { %v1859_v25 = vpop.f32.mrb[71].mxu0  ;;  %v2296_v26 = vadd.f32 %v2144_v20, %v630_v17  ;;  %v2147_v27 = vadd.f32 %v2146_v24, %v1857_v22  ;;  %v2148_v28 = vpop.f32.mrb[71].mxu1 }
 0x220   : > { %2360 = vst [vmem:[%s5022_s3 + $0x110] sm:$0xff] %v2296_v26  ;;  %v2297_v29 = vadd.f32 %v2147_v27, %v631_v23  ;;  %v640_v23 = vld [vmem:[%s5022_s3 + $0x160] sm:$0xff] }
 0x222   : > { %2361 = vst [vmem:[%s5022_s3 + $0x118] sm:$0xff] %v2297_v29  ;;  %v641_v29 = vld [vmem:[%s5022_s3 + $0x168] sm:$0xff] }
 0x223   : > { %v1862_v30 = vpop.f32.mrb[72].mxu0  ;;  %v2151_v32 = vpop.f32.mrb[72].mxu1 }
 0x224   : > { %v1864_v33 = vpop.f32.mrb[73].mxu0  ;;  %v2152_v34 = vadd.f32 %v2151_v32, %v1862_v30  ;;  %v2153_v35 = vpop.f32.mrb[73].mxu1 }
 0x225   : > { %v1865_v36 = vpop.f32.mrb[74].mxu0  ;;  %v2154_v38 = vpop.f32.mrb[74].mxu1 }
 0x226   : > { %v1867_v39 = vpop.f32.mrb[75].mxu0  ;;  %v2298_v40 = vadd.f32 %v2152_v34, %v632_v31  ;;  %v2155_v41 = vadd.f32 %v2154_v38, %v1865_v36  ;;  %v2156_v42 = vpop.f32.mrb[75].mxu1 }
 0x228   : > { %2362 = vst [vmem:[%s5022_s3 + $0x120] sm:$0xff] %v2298_v40  ;;  %v2299_v43 = vadd.f32 %v2155_v41, %v633_v37  ;;  %v642_v37 = vld [vmem:[%s5022_s3 + $0x170] sm:$0xff] }
 0x22a   : > { %2363 = vst [vmem:[%s5022_s3 + $0x128] sm:$0xff] %v2299_v43  ;;  %v643_v43 = vld [vmem:[%s5022_s3 + $0x178] sm:$0xff] }
 0x22b   : > { %v1870_v44 = vpop.f32.mrb[76].mxu0  ;;  %v2159_v46 = vpop.f32.mrb[76].mxu1 }
 0x22c   : > { %v1872_v47 = vpop.f32.mrb[77].mxu0  ;;  %v2160_v48 = vadd.f32 %v2159_v46, %v1870_v44  ;;  %v2161_v49 = vpop.f32.mrb[77].mxu1 }
 0x22d   : > { %v1873_v50 = vpop.f32.mrb[78].mxu0  ;;  %v2162_v52 = vpop.f32.mrb[78].mxu1 }
 0x22e   : > { %v1875_v53 = vpop.f32.mrb[79].mxu0  ;;  %v2300_v54 = vadd.f32 %v2160_v48, %v634_v45  ;;  %v2163_v55 = vadd.f32 %v2162_v52, %v1873_v50  ;;  %v2164_v56 = vpop.f32.mrb[79].mxu1 }
 0x230   : > { %2364 = vst [vmem:[%s5022_s3 + $0x130] sm:$0xff] %v2300_v54  ;;  %v2301_v57 = vadd.f32 %v2163_v55, %v635_v51  ;;  %v644_v51 = vld [vmem:[%s5022_s3 + $0x180] sm:$0xff] }
 0x232   : > { %2365 = vst [vmem:[%s5022_s3 + $0x138] sm:$0xff] %v2301_v57  ;;  %v645_v57 = vld [vmem:[%s5022_s3 + $0x188] sm:$0xff] }
 0x233   : > { %v1878_v58 = vpop.f32.mrb[80].mxu0  ;;  %v2167_v60 = vpop.f32.mrb[80].mxu1 }
 0x234   : > { %v1880_v61 = vpop.f32.mrb[81].mxu0  ;;  %v2168_v62 = vadd.f32 %v2167_v60, %v1878_v58  ;;  %v2169_v63 = vpop.f32.mrb[81].mxu1 }
 0x235   : > { %v1881_v0 = vpop.f32.mrb[82].mxu0  ;;  %v2170_v2 = vpop.f32.mrb[82].mxu1 }
 0x236   : > { %v1883_v3 = vpop.f32.mrb[83].mxu0  ;;  %v2302_v4 = vadd.f32 %v2168_v62, %v636_v59  ;;  %v2171_v5 = vadd.f32 %v2170_v2, %v1881_v0  ;;  %v2172_v6 = vpop.f32.mrb[83].mxu1 }
 0x238   : > { %2366 = vst [vmem:[%s5022_s3 + $0x140] sm:$0xff] %v2302_v4  ;;  %v2303_v7 = vadd.f32 %v2171_v5, %v637_v1  ;;  %v646_v1 = vld [vmem:[%s5022_s3 + $0x190] sm:$0xff] }
 0x23a   : > { %2367 = vst [vmem:[%s5022_s3 + $0x148] sm:$0xff] %v2303_v7  ;;  %v647_v7 = vld [vmem:[%s5022_s3 + $0x198] sm:$0xff] }
 0x23b   : > { %v1886_v8 = vpop.f32.mrb[84].mxu0  ;;  %v2175_v10 = vpop.f32.mrb[84].mxu1 }
 0x23c   : > { %v1888_v11 = vpop.f32.mrb[85].mxu0  ;;  %v2176_v12 = vadd.f32 %v2175_v10, %v1886_v8  ;;  %v2177_v13 = vpop.f32.mrb[85].mxu1 }
 0x23d   : > { %v1889_v14 = vpop.f32.mrb[86].mxu0  ;;  %v2178_v16 = vpop.f32.mrb[86].mxu1 }
 0x23e   : > { %v1891_v17 = vpop.f32.mrb[87].mxu0  ;;  %v2304_v18 = vadd.f32 %v2176_v12, %v638_v9  ;;  %v2179_v19 = vadd.f32 %v2178_v16, %v1889_v14  ;;  %v2180_v20 = vpop.f32.mrb[87].mxu1 }
 0x240   : > { %2368 = vst [vmem:[%s5022_s3 + $0x150] sm:$0xff] %v2304_v18  ;;  %v2305_v21 = vadd.f32 %v2179_v19, %v639_v15  ;;  %v648_v15 = vld [vmem:[%s5022_s3 + $0x1a0] sm:$0xff] }
 0x242   : > { %2369 = vst [vmem:[%s5022_s3 + $0x158] sm:$0xff] %v2305_v21  ;;  %v649_v21 = vld [vmem:[%s5022_s3 + $0x1a8] sm:$0xff] }
 0x243   : > { %v1894_v22 = vpop.f32.mrb[88].mxu0  ;;  %v2183_v24 = vpop.f32.mrb[88].mxu1 }
 0x244   : > { %v1896_v25 = vpop.f32.mrb[89].mxu0  ;;  %v2184_v26 = vadd.f32 %v2183_v24, %v1894_v22  ;;  %v2185_v27 = vpop.f32.mrb[89].mxu1 }
 0x245   : > { %v1897_v28 = vpop.f32.mrb[90].mxu0  ;;  %v2186_v30 = vpop.f32.mrb[90].mxu1 }
 0x246   : > { %v1899_v31 = vpop.f32.mrb[91].mxu0  ;;  %v2306_v32 = vadd.f32 %v2184_v26, %v640_v23  ;;  %v2187_v33 = vadd.f32 %v2186_v30, %v1897_v28  ;;  %v2188_v34 = vpop.f32.mrb[91].mxu1 }
 0x248   : > { %2370 = vst [vmem:[%s5022_s3 + $0x160] sm:$0xff] %v2306_v32  ;;  %v2307_v35 = vadd.f32 %v2187_v33, %v641_v29  ;;  %v650_v29 = vld [vmem:[%s5022_s3 + $0x1b0] sm:$0xff] }
 0x24a   : > { %2371 = vst [vmem:[%s5022_s3 + $0x168] sm:$0xff] %v2307_v35  ;;  %v651_v35 = vld [vmem:[%s5022_s3 + $0x1b8] sm:$0xff] }
 0x24b   : > { %v1902_v36 = vpop.f32.mrb[92].mxu0  ;;  %v2191_v38 = vpop.f32.mrb[92].mxu1 }
 0x24c   : > { %v1904_v39 = vpop.f32.mrb[93].mxu0  ;;  %v2192_v40 = vadd.f32 %v2191_v38, %v1902_v36  ;;  %v2193_v41 = vpop.f32.mrb[93].mxu1 }
 0x24d   : > { %v1905_v42 = vpop.f32.mrb[94].mxu0  ;;  %v2194_v44 = vpop.f32.mrb[94].mxu1 }
 0x24e   : > { %v1907_v45 = vpop.f32.mrb[95].mxu0  ;;  %v2308_v46 = vadd.f32 %v2192_v40, %v642_v37  ;;  %v2195_v47 = vadd.f32 %v2194_v44, %v1905_v42  ;;  %v2196_v48 = vpop.f32.mrb[95].mxu1 }
 0x250   : > { %2372 = vst [vmem:[%s5022_s3 + $0x170] sm:$0xff] %v2308_v46  ;;  %v2309_v49 = vadd.f32 %v2195_v47, %v643_v43  ;;  %v652_v43 = vld [vmem:[%s5022_s3 + $0x1c0] sm:$0xff] }
 0x252   : > { %2373 = vst [vmem:[%s5022_s3 + $0x178] sm:$0xff] %v2309_v49  ;;  %v653_v49 = vld [vmem:[%s5022_s3 + $0x1c8] sm:$0xff] }
 0x253   : > { %v1910_v50 = vpop.f32.mrb[96].mxu0  ;;  %v2199_v52 = vpop.f32.mrb[96].mxu1 }
 0x254   : > { %v1912_v53 = vpop.f32.mrb[97].mxu0  ;;  %v2200_v54 = vadd.f32 %v2199_v52, %v1910_v50  ;;  %v2201_v55 = vpop.f32.mrb[97].mxu1 }
 0x255   : > { %v1913_v56 = vpop.f32.mrb[98].mxu0  ;;  %v2202_v58 = vpop.f32.mrb[98].mxu1 }
 0x256   : > { %v1915_v59 = vpop.f32.mrb[99].mxu0  ;;  %v2310_v60 = vadd.f32 %v2200_v54, %v644_v51  ;;  %v2203_v61 = vadd.f32 %v2202_v58, %v1913_v56  ;;  %v2204_v62 = vpop.f32.mrb[99].mxu1 }
 0x258   : > { %2374 = vst [vmem:[%s5022_s3 + $0x180] sm:$0xff] %v2310_v60  ;;  %v2311_v63 = vadd.f32 %v2203_v61, %v645_v57  ;;  %v654_v57 = vld [vmem:[%s5022_s3 + $0x1d0] sm:$0xff] }
 0x25a   : > { %2375 = vst [vmem:[%s5022_s3 + $0x188] sm:$0xff] %v2311_v63  ;;  %v655_v63 = vld [vmem:[%s5022_s3 + $0x1d8] sm:$0xff] }
 0x25b   : > { %v1918_v0 = vpop.f32.mrb[100].mxu0  ;;  %v2207_v2 = vpop.f32.mrb[100].mxu1 }
 0x25c   : > { %v1920_v3 = vpop.f32.mrb[101].mxu0  ;;  %v2208_v4 = vadd.f32 %v2207_v2, %v1918_v0  ;;  %v2209_v5 = vpop.f32.mrb[101].mxu1 }
 0x25d   : > { %v1921_v6 = vpop.f32.mrb[102].mxu0  ;;  %v2210_v8 = vpop.f32.mrb[102].mxu1 }
 0x25e   : > { %v1923_v9 = vpop.f32.mrb[103].mxu0  ;;  %v2312_v10 = vadd.f32 %v2208_v4, %v646_v1  ;;  %v2211_v11 = vadd.f32 %v2210_v8, %v1921_v6  ;;  %v2212_v12 = vpop.f32.mrb[103].mxu1 }
 0x260   : > { %2376 = vst [vmem:[%s5022_s3 + $0x190] sm:$0xff] %v2312_v10  ;;  %v2313_v13 = vadd.f32 %v2211_v11, %v647_v7  ;;  %v656_v7 = vld [vmem:[%s5022_s3 + $0x1e0] sm:$0xff] }
 0x262   : > { %2377 = vst [vmem:[%s5022_s3 + $0x198] sm:$0xff] %v2313_v13  ;;  %v657_v13 = vld [vmem:[%s5022_s3 + $0x1e8] sm:$0xff] }
 0x263   : > { %v1926_v14 = vpop.f32.mrb[104].mxu0  ;;  %v2215_v16 = vpop.f32.mrb[104].mxu1 }
 0x264   : > { %v1928_v17 = vpop.f32.mrb[105].mxu0  ;;  %v2216_v18 = vadd.f32 %v2215_v16, %v1926_v14  ;;  %v2217_v19 = vpop.f32.mrb[105].mxu1 }
 0x265   : > { %v1929_v20 = vpop.f32.mrb[106].mxu0  ;;  %v2218_v22 = vpop.f32.mrb[106].mxu1 }
 0x266   : > { %v1931_v23 = vpop.f32.mrb[107].mxu0  ;;  %v2314_v24 = vadd.f32 %v2216_v18, %v648_v15  ;;  %v2219_v25 = vadd.f32 %v2218_v22, %v1929_v20  ;;  %v2220_v26 = vpop.f32.mrb[107].mxu1 }
 0x268   : > { %2378 = vst [vmem:[%s5022_s3 + $0x1a0] sm:$0xff] %v2314_v24  ;;  %v2315_v27 = vadd.f32 %v2219_v25, %v649_v21  ;;  %v658_v21 = vld [vmem:[%s5022_s3 + $0x1f0] sm:$0xff] }
 0x26a   : > { %2379 = vst [vmem:[%s5022_s3 + $0x1a8] sm:$0xff] %v2315_v27  ;;  %v659_v27 = vld [vmem:[%s5022_s3 + $0x1f8] sm:$0xff] }
 0x26b   : > { %v1934_v28 = vpop.f32.mrb[108].mxu0  ;;  %v2223_v30 = vpop.f32.mrb[108].mxu1 }
 0x26c   : > { %v1936_v31 = vpop.f32.mrb[109].mxu0  ;;  %v2224_v32 = vadd.f32 %v2223_v30, %v1934_v28  ;;  %v2225_v33 = vpop.f32.mrb[109].mxu1 }
 0x26d   : > { %v1937_v34 = vpop.f32.mrb[110].mxu0  ;;  %v2226_v36 = vpop.f32.mrb[110].mxu1 }
 0x26e   : > { %v1939_v37 = vpop.f32.mrb[111].mxu0  ;;  %v2316_v38 = vadd.f32 %v2224_v32, %v650_v29  ;;  %v2227_v39 = vadd.f32 %v2226_v36, %v1937_v34  ;;  %v2228_v40 = vpop.f32.mrb[111].mxu1  ;;  %v2394_v34 = vld [vmem:[%s5022_s3] sm:$0xff] (!%p2940_p11)  ;;  %v2395_v36 = vld [vmem:[%s5022_s3 + $0x8] sm:$0xff] (!%p2940_p11) }
 0x26f   : > { %v2397_v40 = vld [vmem:[%s5022_s3 + $0x18] sm:$0xff] (!%p2940_p11) }
 0x270   : > { %2380 = vst [vmem:[%s5022_s3 + $0x1b0] sm:$0xff] %v2316_v38  ;;  %v2317_v41 = vadd.f32 %v2227_v39, %v651_v35  ;;  %v4557_v35 = vld [vmem:[%s5021_s2] ss:$0 sm:$0xff] (!%p2940_p11)  ;;  %v2396_v39 = vld [vmem:[%s5022_s3 + $0x10] sm:$0xff] (!%p2940_p11) }
 0x271   : > { %v2465_v37 = vadd.f32 (!%p2940_p11), %v4557_v35, %v2394_v34  ;;  %v2466_v38 = vadd.f32 (!%p2940_p11), %v4557_v35, %v2395_v36  ;;  %v2421_v34 = vld [vmem:[%s5022_s3 + $0xd8] sm:$0xff] (!%p2940_p11) }
 0x272   : > { %2381 = vst [vmem:[%s5022_s3 + $0x1b8] sm:$0xff] %v2317_v41  ;;  %v2398_v41 = vld [vmem:[%s5022_s3 + $0x20] sm:$0xff] (!%p2940_p11) }
 0x273   : > { %v1942_v42 = vpop.f32.mrb[112].mxu0  ;;  %v2231_v44 = vpop.f32.mrb[112].mxu1  ;;  %3213 = vtanh.f32 (!%p2940_p11), %v2465_v37 }
 0x274   : > { %v1944_v45 = vpop.f32.mrb[113].mxu0  ;;  %v2232_v46 = vadd.f32 %v2231_v44, %v1942_v42  ;;  %v2233_v47 = vpop.f32.mrb[113].mxu1  ;;  %v2467_v42 = vadd.f32 (!%p2940_p11), %v4557_v35, %v2396_v39  ;;  %v2399_v44 = vld [vmem:[%s5022_s3 + $0x28] sm:$0xff] (!%p2940_p11)  ;;  %3215 = vtanh.f32 (!%p2940_p11), %v2466_v38  ;;  %v2422_v38 = vld [vmem:[%s5022_s3 + $0xe0] sm:$0xff] (!%p2940_p11) }
 0x275   : > { %v1945_v48 = vpop.f32.mrb[114].mxu0  ;;  %v2234_v50 = vpop.f32.mrb[114].mxu1  ;;  %v2400_v45 = vld [vmem:[%s5022_s3 + $0x30] sm:$0xff] (!%p2940_p11)  ;;  %v2401_v47 = vld [vmem:[%s5022_s3 + $0x38] sm:$0xff] (!%p2940_p11) }
 0x276   : > { %v1947_v51 = vpop.f32.mrb[115].mxu0  ;;  %v2318_v52 = vadd.f32 %v2232_v46, %v652_v43  ;;  %v2235_v53 = vadd.f32 %v2234_v50, %v1945_v48  ;;  %v2236_v54 = vpop.f32.mrb[115].mxu1  ;;  %v2468_v43 = vadd.f32 (!%p2940_p11), %v4557_v35, %v2397_v40  ;;  %v2469_v46 = vadd.f32 (!%p2940_p11), %v4557_v35, %v2398_v41  ;;  %v2423_v41 = vld [vmem:[%s5022_s3 + $0xe8] sm:$0xff] (!%p2940_p11) }
 0x277   : > { %v2470_v48 = vadd.f32 (!%p2940_p11), %v4557_v35, %v2399_v44  ;;  %3217 = vtanh.f32 (!%p2940_p11), %v2467_v42  ;;  %v2471_v50 = vadd.f32 (!%p2940_p11), %v4557_v35, %v2400_v45  ;;  %v2403_v51 = vld [vmem:[%s5022_s3 + $0x48] sm:$0xff] (!%p2940_p11)  ;;  %v2424_v44 = vld [vmem:[%s5022_s3 + $0xf0] sm:$0xff] (!%p2940_p11) }
 0x278   : > { %2382 = vst [vmem:[%s5022_s3 + $0x1c0] sm:$0xff] %v2318_v52  ;;  %v2319_v55 = vadd.f32 %v2235_v53, %v653_v49  ;;  %v2402_v49 = vld [vmem:[%s5022_s3 + $0x40] sm:$0xff] (!%p2940_p11)  ;;  %3219 = vtanh.f32 (!%p2940_p11), %v2468_v43  ;;  %v2472_v52 = vadd.f32 (!%p2940_p11), %v4557_v35, %v2401_v47  ;;  %v2404_v53 = vld [vmem:[%s5022_s3 + $0x50] sm:$0xff] (!%p2940_p11)  ;;  %v2492_v43 = vadd.f32 (!%p2940_p11), %v4557_v35, %v2421_v34  ;;  %v2425_v47 = vld [vmem:[%s5022_s3 + $0xf8] sm:$0xff] (!%p2940_p11) }
 0x279   : > { %3221 = vtanh.f32 (!%p2940_p11), %v2469_v46  ;;  %v2473_v54 = vadd.f32 (!%p2940_p11), %v4557_v35, %v2402_v49  ;;  %v2493_v46 = vadd.f32 (!%p2940_p11), %v4557_v35, %v2422_v38  ;;  %v2494_v49 = vadd.f32 (!%p2940_p11), %v4557_v35, %v2423_v41  ;;  %v2442_v34 = vld [vmem:[%s5022_s3 + $0x180] sm:$0xff] (!%p2940_p11)  ;;  %v2443_v38 = vld [vmem:[%s5022_s3 + $0x188] sm:$0xff] (!%p2940_p11)  ;;  %v2444_v41 = vld [vmem:[%s5022_s3 + $0x190] sm:$0xff] (!%p2940_p11) }
 0x27a   : > { %2383 = vst [vmem:[%s5022_s3 + $0x1c8] sm:$0xff] %v2319_v55  ;;  %v2405_v55 = vld [vmem:[%s5022_s3 + $0x58] sm:$0xff] (!%p2940_p11)  ;;  %3223 = vtanh.f32 (!%p2940_p11), %v2470_v48 }
 0x27b   : > { %v1950_v56 = vpop.f32.mrb[116].mxu0  ;;  %v2239_v58 = vpop.f32.mrb[116].mxu1  ;;  %3225 = vtanh.f32 (!%p2940_p11), %v2471_v50  ;;  %v2426_v50 = vld [vmem:[%s5022_s3 + $0x100] sm:$0xff] (!%p2940_p11) }
 0x27c   : > { %v1952_v59 = vpop.f32.mrb[117].mxu0  ;;  %v2240_v60 = vadd.f32 %v2239_v58, %v1950_v56  ;;  %v2241_v61 = vpop.f32.mrb[117].mxu1  ;;  %v2474_v56 = vadd.f32 (!%p2940_p11), %v4557_v35, %v2403_v51  ;;  %v2475_v58 = vadd.f32 (!%p2940_p11), %v4557_v35, %v2404_v53  ;;  %3227 = vtanh.f32 (!%p2940_p11), %v2472_v52  ;;  %v2427_v53 = vld [vmem:[%s5022_s3 + $0x108] sm:$0xff] (!%p2940_p11) }
 0x27d   : > { %v1953_v62 = vpop.f32.mrb[118].mxu0  ;;  %v2242_v0 = vpop.f32.mrb[118].mxu1  ;;  %v2407_v59 = vld [vmem:[%s5022_s3 + $0x68] sm:$0xff] (!%p2940_p11)  ;;  %v2408_v61 = vld [vmem:[%s5022_s3 + $0x70] sm:$0xff] (!%p2940_p11)  ;;  %3229 = vtanh.f32 (!%p2940_p11), %v2473_v54  ;;  %v2495_v52 = vadd.f32 (!%p2940_p11), %v4557_v35, %v2424_v44  ;;  %v2445_v44 = vld [vmem:[%s5022_s3 + $0x198] sm:$0xff] (!%p2940_p11) }
 0x27e   : > { %v1955_v1 = vpop.f32.mrb[119].mxu0  ;;  %v2320_v2 = vadd.f32 %v2240_v60, %v654_v57  ;;  %v2243_v3 = vadd.f32 %v2242_v0, %v1953_v62  ;;  %v2244_v4 = vpop.f32.mrb[119].mxu1  ;;  %v2406_v57 = vld [vmem:[%s5022_s3 + $0x60] sm:$0xff] (!%p2940_p11)  ;;  %v2476_v60 = vadd.f32 (!%p2940_p11), %v4557_v35, %v2405_v55  ;;  %3231 = vtanh.f32 (!%p2940_p11), %v2474_v56  ;;  %v2428_v56 = vld [vmem:[%s5022_s3 + $0x110] sm:$0xff] (!%p2940_p11) }
 0x27f   : > { %v2477_v62 = vadd.f32 (!%p2940_p11), %v4557_v35, %v2406_v57  ;;  %v2478_v0 = vadd.f32 (!%p2940_p11), %v4557_v35, %v2407_v59  ;;  %v2410_v1 = vld [vmem:[%s5022_s3 + $0x80] sm:$0xff] (!%p2940_p11)  ;;  %3233 = vtanh.f32 (!%p2940_p11), %v2475_v58  ;;  %v2411_v4 = vld [vmem:[%s5022_s3 + $0x88] sm:$0xff] (!%p2940_p11)  ;;  %v2496_v55 = vadd.f32 (!%p2940_p11), %v4557_v35, %v2425_v47  ;;  %v2429_v59 = vld [vmem:[%s5022_s3 + $0x118] sm:$0xff] (!%p2940_p11) }
 0x280   : > { %2384 = vst [vmem:[%s5022_s3 + $0x1d0] sm:$0xff] %v2320_v2  ;;  %v2321_v5 = vadd.f32 %v2243_v3, %v655_v63  ;;  %v2409_v63 = vld [vmem:[%s5022_s3 + $0x78] sm:$0xff] (!%p2940_p11)  ;;  %v3214_v2 = vpop.eup (!%p2940_p11), %3213  ;;  %v2479_v3 = vadd.f32 (!%p2940_p11), %v4557_v35, %v2408_v61  ;;  %3235 = vtanh.f32 (!%p2940_p11), %v2476_v60  ;;  %v2497_v58 = vadd.f32 (!%p2940_p11), %v4557_v35, %v2426_v50  ;;  %v2446_v47 = vld [vmem:[%s5022_s3 + $0x1a0] sm:$0xff] (!%p2940_p11)  ;;  %v2447_v50 = vld [vmem:[%s5022_s3 + $0x1a8] sm:$0xff] (!%p2940_p11) }
 0x281   : > { %2593 = vst [vmem:[%s5022_s3] sm:$0xff] (!%p2940_p11), %v3214_v2  ;;  %3237 = vtanh.f32 (!%p2940_p11), %v2477_v62  ;;  %v2498_v61 = vadd.f32 (!%p2940_p11), %v4557_v35, %v2427_v53  ;;  %v2430_v62 = vld [vmem:[%s5022_s3 + $0x120] sm:$0xff] (!%p2940_p11)  ;;  %v2448_v53 = vld [vmem:[%s5022_s3 + $0x1b0] sm:$0xff] (!%p2940_p11) }
 0x282   : > { %2385 = vst [vmem:[%s5022_s3 + $0x1d8] sm:$0xff] %v2321_v5  ;;  %v3216_v5 = vpop.eup (!%p2940_p11), %3215  ;;  %3239 = vtanh.f32 (!%p2940_p11), %v2478_v0  ;;  %v2499_v0 = vadd.f32 (!%p2940_p11), %v4557_v35, %v2428_v56  ;;  %v2449_v56 = vld [vmem:[%s5022_s3 + $0x1b8] sm:$0xff] (!%p2940_p11) }
 0x283   : > { %v1958_v6 = vpop.f32.mrb[120].mxu0  ;;  %v2247_v8 = vpop.f32.mrb[120].mxu1  ;;  %2594 = vst [vmem:[%s5022_s3 + $0x8] sm:$0xff] (!%p2940_p11), %v3216_v5  ;;  %3241 = vtanh.f32 (!%p2940_p11), %v2479_v3  ;;  %v2500_v3 = vadd.f32 (!%p2940_p11), %v4557_v35, %v2429_v59  ;;  %v2450_v59 = vld [vmem:[%s5022_s3 + $0x1c0] sm:$0xff] (!%p2940_p11) }
 0x284   : > { %v1960_v9 = vpop.f32.mrb[121].mxu0  ;;  %v2248_v10 = vadd.f32 %v2247_v8, %v1958_v6  ;;  %v2249_v11 = vpop.f32.mrb[121].mxu1  ;;  %v2480_v6 = vadd.f32 (!%p2940_p11), %v4557_v35, %v2409_v63 }
 0x285   : > { %v1961_v12 = vpop.f32.mrb[122].mxu0  ;;  %v2250_v14 = vpop.f32.mrb[122].mxu1  ;;  %v2481_v9 = vadd.f32 (!%p2940_p11), %v4557_v35, %v2410_v1  ;;  %v2431_v1 = vld [vmem:[%s5022_s3 + $0x128] sm:$0xff] (!%p2940_p11) }
 0x286   : > { %v1963_v15 = vpop.f32.mrb[123].mxu0  ;;  %v2322_v16 = vadd.f32 %v2248_v10, %v656_v7  ;;  %v2251_v17 = vadd.f32 %v2250_v14, %v1961_v12  ;;  %v2252_v18 = vpop.f32.mrb[123].mxu1  ;;  %v2412_v7 = vld [vmem:[%s5022_s3 + $0x90] sm:$0xff] (!%p2940_p11)  ;;  %v2413_v10 = vld [vmem:[%s5022_s3 + $0x98] sm:$0xff] (!%p2940_p11)  ;;  %v2482_v12 = vadd.f32 (!%p2940_p11), %v4557_v35, %v2411_v4  ;;  %3243 = vtanh.f32 (!%p2940_p11), %v2480_v6 }
 0x287   : > { %v3218_v8 = vpop.eup (!%p2940_p11), %3217  ;;  %v2483_v15 = vadd.f32 (!%p2940_p11), %v4557_v35, %v2412_v7  ;;  %v2484_v18 = vadd.f32 (!%p2940_p11), %v4557_v35, %v2413_v10  ;;  %3245 = vtanh.f32 (!%p2940_p11), %v2481_v9  ;;  %v2432_v4 = vld [vmem:[%s5022_s3 + $0x130] sm:$0xff] (!%p2940_p11)  ;;  %v2501_v6 = vadd.f32 (!%p2940_p11), %v4557_v35, %v2430_v62  ;;  %v2433_v7 = vld [vmem:[%s5022_s3 + $0x138] sm:$0xff] (!%p2940_p11)  ;;  %v2434_v10 = vld [vmem:[%s5022_s3 + $0x140] sm:$0xff] (!%p2940_p11) }
 0x288   : > { %2386 = vst [vmem:[%s5022_s3 + $0x1e0] sm:$0xff] %v2322_v16  ;;  %v2323_v19 = vadd.f32 %v2251_v17, %v657_v13  ;;  %v3220_v11 = vpop.eup (!%p2940_p11), %3219  ;;  %2595 = vst [vmem:[%s5022_s3 + $0x10] sm:$0xff] (!%p2940_p11), %v3218_v8  ;;  %v2414_v13 = vld [vmem:[%s5022_s3 + $0xa0] sm:$0xff] (!%p2940_p11)  ;;  %v2415_v16 = vld [vmem:[%s5022_s3 + $0xa8] sm:$0xff] (!%p2940_p11)  ;;  %3247 = vtanh.f32 (!%p2940_p11), %v2482_v12  ;;  %v2502_v9 = vadd.f32 (!%p2940_p11), %v4557_v35, %v2431_v1  ;;  %v2503_v12 = vadd.f32 (!%p2940_p11), %v4557_v35, %v2432_v4 }
 0x289   : > { %v3222_v14 = vpop.eup (!%p2940_p11), %3221  ;;  %2596 = vst [vmem:[%s5022_s3 + $0x18] sm:$0xff] (!%p2940_p11), %v3220_v11  ;;  %3249 = vtanh.f32 (!%p2940_p11), %v2483_v15  ;;  %v2504_v15 = vadd.f32 (!%p2940_p11), %v4557_v35, %v2433_v7  ;;  %v2451_v62 = vld [vmem:[%s5022_s3 + $0x1c8] sm:$0xff] (!%p2940_p11)  ;;  %v2452_v1 = vld [vmem:[%s5022_s3 + $0x1d0] sm:$0xff] (!%p2940_p11)  ;;  %v2453_v4 = vld [vmem:[%s5022_s3 + $0x1d8] sm:$0xff] (!%p2940_p11) }
 0x28a   : > { %2387 = vst [vmem:[%s5022_s3 + $0x1e8] sm:$0xff] %v2323_v19  ;;  %v3224_v17 = vpop.eup (!%p2940_p11), %3223  ;;  %2597 = vst [vmem:[%s5022_s3 + $0x20] sm:$0xff] (!%p2940_p11), %v3222_v14  ;;  %v2416_v19 = vld [vmem:[%s5022_s3 + $0xb0] sm:$0xff] (!%p2940_p11)  ;;  %3251 = vtanh.f32 (!%p2940_p11), %v2484_v18  ;;  %v2505_v18 = vadd.f32 (!%p2940_p11), %v4557_v35, %v2434_v10 }
 0x28b   : > { %v1966_v20 = vpop.f32.mrb[124].mxu0  ;;  %v2255_v22 = vpop.f32.mrb[124].mxu1  ;;  %2598 = vst [vmem:[%s5022_s3 + $0x28] sm:$0xff] (!%p2940_p11), %v3224_v17 }
 0x28c   : > { %v1968_v23 = vpop.f32.mrb[125].mxu0  ;;  %v2256_v24 = vadd.f32 %v2255_v22, %v1966_v20  ;;  %v2257_v25 = vpop.f32.mrb[125].mxu1  ;;  %2393 = sbr.rel (%p2940_p11) target bundleno = 714 (0x2ca), region = 63  ;;  %v2417_v22 = vld [vmem:[%s5022_s3 + $0xb8] sm:$0xff] (!%p2940_p11) }
 0x28d   : > { %v1969_v26 = vpop.f32.mrb[126].mxu0  ;;  %v2258_v28 = vpop.f32.mrb[126].mxu1  ;;  %v2418_v25 = vld [vmem:[%s5022_s3 + $0xc0] sm:$0xff] (!%p2940_p11) }
 0x28e   : > { %v1971_v29 = vpop.f32.mrb[127].mxu0  ;;  %v2324_v30 = vadd.f32 %v2256_v24, %v658_v21  ;;  %v2259_v31 = vadd.f32 %v2258_v28, %v1969_v26  ;;  %v2260_v32 = vpop.f32.mrb[127].mxu1  ;;  %v2485_v21 = vadd.f32 (!%p2940_p11), %v4557_v35, %v2414_v13  ;;  %v2486_v24 = vadd.f32 (!%p2940_p11), %v4557_v35, %v2415_v16  ;;  %v2419_v28 = vld [vmem:[%s5022_s3 + $0xc8] sm:$0xff] (!%p2940_p11)  ;;  %v2436_v16 = vld [vmem:[%s5022_s3 + $0x150] sm:$0xff] (!%p2940_p11) }
 0x28f   : > { %v3226_v20 = vpop.eup (!%p2940_p11), %3225  ;;  %v2490_v37 = vadd.f32 (!%p2940_p11), %v4557_v35, %v2419_v28  ;;  %v2435_v13 = vld [vmem:[%s5022_s3 + $0x148] sm:$0xff] (!%p2940_p11)  ;;  %v2440_v28 = vld [vmem:[%s5022_s3 + $0x170] sm:$0xff] (!%p2940_p11)  ;;  %v2454_v7 = vld [vmem:[%s5022_s3 + $0x1e0] sm:$0xff] (!%p2940_p11) }
 0x290   : > { %2388 = vst [vmem:[%s5022_s3 + $0x1f0] sm:$0xff] %v2324_v30  ;;  %v2325_v33 = vadd.f32 %v2259_v31, %v659_v27  ;;  %v3228_v23 = vpop.eup (!%p2940_p11), %3227  ;;  %2599 = vst [vmem:[%s5022_s3 + $0x30] sm:$0xff] (!%p2940_p11), %v3226_v20  ;;  %v2487_v27 = vadd.f32 (!%p2940_p11), %v4557_v35, %v2416_v19  ;;  %v2488_v30 = vadd.f32 (!%p2940_p11), %v4557_v35, %v2417_v22  ;;  %v2420_v31 = vld [vmem:[%s5022_s3 + $0xd0] sm:$0xff] (!%p2940_p11)  ;;  %3253 = vtanh.f32 (!%p2940_p11), %v2485_v21  ;;  %v2437_v19 = vld [vmem:[%s5022_s3 + $0x158] sm:$0xff] (!%p2940_p11) }
 0x291   : > { %v3230_v26 = vpop.eup (!%p2940_p11), %3229  ;;  %2600 = vst [vmem:[%s5022_s3 + $0x38] sm:$0xff] (!%p2940_p11), %v3228_v23  ;;  %3255 = vtanh.f32 (!%p2940_p11), %v2486_v24  ;;  %v2491_v40 = vadd.f32 (!%p2940_p11), %v4557_v35, %v2420_v31  ;;  %v2506_v21 = vadd.f32 (!%p2940_p11), %v4557_v35, %v2435_v13  ;;  %v2438_v22 = vld [vmem:[%s5022_s3 + $0x160] sm:$0xff] (!%p2940_p11)  ;;  %v2507_v24 = vadd.f32 (!%p2940_p11), %v4557_v35, %v2436_v16  ;;  %v2441_v31 = vld [vmem:[%s5022_s3 + $0x178] sm:$0xff] (!%p2940_p11)  ;;  %v2455_v10 = vld [vmem:[%s5022_s3 + $0x1e8] sm:$0xff] (!%p2940_p11) }
 0x292   : > { %2389 = vst [vmem:[%s5022_s3 + $0x1f8] sm:$0xff] %v2325_v33  ;;  %v3232_v29 = vpop.eup (!%p2940_p11), %3231  ;;  %2601 = vst [vmem:[%s5022_s3 + $0x40] sm:$0xff] (!%p2940_p11), %v3230_v26  ;;  %v2489_v33 = vadd.f32 (!%p2940_p11), %v4557_v35, %v2418_v25  ;;  %3257 = vtanh.f32 (!%p2940_p11), %v2487_v27  ;;  %v2439_v25 = vld [vmem:[%s5022_s3 + $0x168] sm:$0xff] (!%p2940_p11)  ;;  %v2508_v27 = vadd.f32 (!%p2940_p11), %v4557_v35, %v2437_v19 }
 0x293   : > { %v3234_v32 = vpop.eup %3233  ;;  %2602 = vst [vmem:[%s5022_s3 + $0x48] sm:$0xff] %v3232_v29  ;;  %3259 = vtanh.f32 %v2488_v30  ;;  %v2509_v30 = vadd.f32 %v4557_v35, %v2438_v22 }
 0x294   : > { %v3236_v36 = vpop.eup %3235  ;;  %2603 = vst [vmem:[%s5022_s3 + $0x50] sm:$0xff] %v3234_v32  ;;  %3261 = vtanh.f32 %v2489_v33  ;;  %v2510_v33 = vadd.f32 %v4557_v35, %v2439_v25 }
 0x295   : > { %v3238_v39 = vpop.eup %3237  ;;  %2604 = vst [vmem:[%s5022_s3 + $0x58] sm:$0xff] %v3236_v36  ;;  %3263 = vtanh.f32 %v2490_v37  ;;  %v2511_v37 = vadd.f32 %v4557_v35, %v2440_v28 }
 0x296   : > { %v3240_v42 = vpop.eup %3239  ;;  %2605 = vst [vmem:[%s5022_s3 + $0x60] sm:$0xff] %v3238_v39  ;;  %3265 = vtanh.f32 %v2491_v40  ;;  %v2512_v40 = vadd.f32 %v4557_v35, %v2441_v31 }
 0x297   : > { %v3242_v45 = vpop.eup %3241  ;;  %2606 = vst [vmem:[%s5022_s3 + $0x68] sm:$0xff] %v3240_v42  ;;  %3267 = vtanh.f32 %v2492_v43  ;;  %v2513_v43 = vadd.f32 %v4557_v35, %v2442_v34  ;;  %v2456_v13 = vld [vmem:[%s5022_s3 + $0x1f0] sm:$0xff] }
 0x298   : > { %v3244_v48 = vpop.eup %3243  ;;  %2607 = vst [vmem:[%s5022_s3 + $0x70] sm:$0xff] %v3242_v45  ;;  %3269 = vtanh.f32 %v2493_v46  ;;  %v2514_v46 = vadd.f32 %v4557_v35, %v2443_v38 }
 0x299   : > { %v3246_v51 = vpop.eup %3245  ;;  %2608 = vst [vmem:[%s5022_s3 + $0x78] sm:$0xff] %v3244_v48  ;;  %3271 = vtanh.f32 %v2494_v49  ;;  %v2515_v49 = vadd.f32 %v4557_v35, %v2444_v41  ;;  %v2457_v16 = vld [vmem:[%s5022_s3 + $0x1f8] sm:$0xff] }
 0x29a   : > { %v3248_v54 = vpop.eup %3247  ;;  %2609 = vst [vmem:[%s5022_s3 + $0x80] sm:$0xff] %v3246_v51  ;;  %3273 = vtanh.f32 %v2495_v52  ;;  %v2516_v52 = vadd.f32 %v4557_v35, %v2445_v44  ;;  %v2528_v22 = vadd.f32 %v4557_v35, %v2457_v16 }
 0x29b   : > { %v3250_v57 = vpop.eup %3249  ;;  %2610 = vst [vmem:[%s5022_s3 + $0x88] sm:$0xff] %v3248_v54  ;;  %3275 = vtanh.f32 %v2496_v55  ;;  %v2517_v55 = vadd.f32 %v4557_v35, %v2446_v47 }
 0x29c   : > { %v3252_v60 = vpop.eup %3251  ;;  %2611 = vst [vmem:[%s5022_s3 + $0x90] sm:$0xff] %v3250_v57  ;;  %3277 = vtanh.f32 %v2497_v58  ;;  %v2518_v58 = vadd.f32 %v4557_v35, %v2447_v50 }
 0x29d   : > { %v3254_v63 = vpop.eup %3253  ;;  %2612 = vst [vmem:[%s5022_s3 + $0x98] sm:$0xff] %v3252_v60  ;;  %3279 = vtanh.f32 %v2498_v61  ;;  %v2519_v61 = vadd.f32 %v4557_v35, %v2448_v53 }
 0x29e   : > { %v3256_v2 = vpop.eup %3255  ;;  %2613 = vst [vmem:[%s5022_s3 + $0xa0] sm:$0xff] %v3254_v63  ;;  %3281 = vtanh.f32 %v2499_v0  ;;  %v2520_v0 = vadd.f32 %v4557_v35, %v2449_v56 }
 0x29f   : > { %v3258_v5 = vpop.eup %3257  ;;  %2614 = vst [vmem:[%s5022_s3 + $0xa8] sm:$0xff] %v3256_v2  ;;  %3283 = vtanh.f32 %v2500_v3  ;;  %v2521_v3 = vadd.f32 %v4557_v35, %v2450_v59 }
 0x2a0   : > { %v3260_v8 = vpop.eup %3259  ;;  %2615 = vst [vmem:[%s5022_s3 + $0xb0] sm:$0xff] %v3258_v5  ;;  %3285 = vtanh.f32 %v2501_v6  ;;  %v2522_v6 = vadd.f32 %v4557_v35, %v2451_v62 }
 0x2a1   : > { %v3262_v11 = vpop.eup %3261  ;;  %2616 = vst [vmem:[%s5022_s3 + $0xb8] sm:$0xff] %v3260_v8  ;;  %3287 = vtanh.f32 %v2502_v9  ;;  %v2523_v9 = vadd.f32 %v4557_v35, %v2452_v1 }
 0x2a2   : > { %v3264_v14 = vpop.eup %3263  ;;  %2617 = vst [vmem:[%s5022_s3 + $0xc0] sm:$0xff] %v3262_v11  ;;  %3289 = vtanh.f32 %v2503_v12  ;;  %v2524_v12 = vadd.f32 %v4557_v35, %v2453_v4 }
 0x2a3   : > { %v3266_v17 = vpop.eup %3265  ;;  %2618 = vst [vmem:[%s5022_s3 + $0xc8] sm:$0xff] %v3264_v14  ;;  %3291 = vtanh.f32 %v2504_v15  ;;  %v2525_v15 = vadd.f32 %v4557_v35, %v2454_v7 }
 0x2a4   : > { %v3268_v20 = vpop.eup %3267  ;;  %2619 = vst [vmem:[%s5022_s3 + $0xd0] sm:$0xff] %v3266_v17  ;;  %3293 = vtanh.f32 %v2505_v18  ;;  %v2526_v18 = vadd.f32 %v4557_v35, %v2455_v10 }
 0x2a5   : > { %v3270_v23 = vpop.eup %3269  ;;  %2620 = vst [vmem:[%s5022_s3 + $0xd8] sm:$0xff] %v3268_v20  ;;  %3295 = vtanh.f32 %v2506_v21  ;;  %v2527_v20 = vadd.f32 %v4557_v35, %v2456_v13 }
 0x2a6   : > { %v3272_v26 = vpop.eup %3271  ;;  %2621 = vst [vmem:[%s5022_s3 + $0xe0] sm:$0xff] %v3270_v23  ;;  %3297 = vtanh.f32 %v2507_v24 }
 0x2a7   : > { %v3274_v29 = vpop.eup %3273  ;;  %2622 = vst [vmem:[%s5022_s3 + $0xe8] sm:$0xff] %v3272_v26  ;;  %3299 = vtanh.f32 %v2508_v27 }
 0x2a8   : > { %v3276_v32 = vpop.eup %3275  ;;  %2623 = vst [vmem:[%s5022_s3 + $0xf0] sm:$0xff] %v3274_v29  ;;  %3301 = vtanh.f32 %v2509_v30 }
 0x2a9   : > { %v3278_v36 = vpop.eup %3277  ;;  %2624 = vst [vmem:[%s5022_s3 + $0xf8] sm:$0xff] %v3276_v32  ;;  %3303 = vtanh.f32 %v2510_v33 }
 0x2aa   : > { %v3280_v39 = vpop.eup %3279  ;;  %2625 = vst [vmem:[%s5022_s3 + $0x100] sm:$0xff] %v3278_v36  ;;  %3305 = vtanh.f32 %v2511_v37 }
 0x2ab   : > { %v3282_v42 = vpop.eup %3281  ;;  %2626 = vst [vmem:[%s5022_s3 + $0x108] sm:$0xff] %v3280_v39  ;;  %3307 = vtanh.f32 %v2512_v40 }
 0x2ac   : > { %v3284_v45 = vpop.eup %3283  ;;  %2627 = vst [vmem:[%s5022_s3 + $0x110] sm:$0xff] %v3282_v42  ;;  %3309 = vtanh.f32 %v2513_v43 }
 0x2ad   : > { %v3286_v48 = vpop.eup %3285  ;;  %2628 = vst [vmem:[%s5022_s3 + $0x118] sm:$0xff] %v3284_v45  ;;  %3311 = vtanh.f32 %v2514_v46 }
 0x2ae   : > { %v3288_v51 = vpop.eup %3287  ;;  %2629 = vst [vmem:[%s5022_s3 + $0x120] sm:$0xff] %v3286_v48  ;;  %3313 = vtanh.f32 %v2515_v49 }
 0x2af   : > { %v3290_v54 = vpop.eup %3289  ;;  %2630 = vst [vmem:[%s5022_s3 + $0x128] sm:$0xff] %v3288_v51  ;;  %3315 = vtanh.f32 %v2516_v52 }
 0x2b0   : > { %v3292_v57 = vpop.eup %3291  ;;  %2631 = vst [vmem:[%s5022_s3 + $0x130] sm:$0xff] %v3290_v54  ;;  %3317 = vtanh.f32 %v2517_v55 }
 0x2b1   : > { %v3294_v60 = vpop.eup %3293  ;;  %2632 = vst [vmem:[%s5022_s3 + $0x138] sm:$0xff] %v3292_v57  ;;  %3319 = vtanh.f32 %v2518_v58 }
 0x2b2   : > { %v3296_v63 = vpop.eup %3295  ;;  %2633 = vst [vmem:[%s5022_s3 + $0x140] sm:$0xff] %v3294_v60  ;;  %3321 = vtanh.f32 %v2519_v61 }
 0x2b3   : > { %v3298_v2 = vpop.eup %3297  ;;  %2634 = vst [vmem:[%s5022_s3 + $0x148] sm:$0xff] %v3296_v63  ;;  %3323 = vtanh.f32 %v2520_v0 }
 0x2b4   : > { %v3300_v5 = vpop.eup %3299  ;;  %2635 = vst [vmem:[%s5022_s3 + $0x150] sm:$0xff] %v3298_v2  ;;  %3325 = vtanh.f32 %v2521_v3 }
 0x2b5   : > { %v3302_v8 = vpop.eup %3301  ;;  %2636 = vst [vmem:[%s5022_s3 + $0x158] sm:$0xff] %v3300_v5  ;;  %3327 = vtanh.f32 %v2522_v6 }
 0x2b6   : > { %v3304_v11 = vpop.eup %3303  ;;  %2637 = vst [vmem:[%s5022_s3 + $0x160] sm:$0xff] %v3302_v8  ;;  %3329 = vtanh.f32 %v2523_v9 }
 0x2b7   : > { %v3306_v14 = vpop.eup %3305  ;;  %2638 = vst [vmem:[%s5022_s3 + $0x168] sm:$0xff] %v3304_v11  ;;  %3331 = vtanh.f32 %v2524_v12 }
 0x2b8   : > { %v3308_v17 = vpop.eup %3307  ;;  %2639 = vst [vmem:[%s5022_s3 + $0x170] sm:$0xff] %v3306_v14  ;;  %3333 = vtanh.f32 %v2525_v15 }
 0x2b9   : > { %v3310_v19 = vpop.eup %3309  ;;  %2640 = vst [vmem:[%s5022_s3 + $0x178] sm:$0xff] %v3308_v17  ;;  %3335 = vtanh.f32 %v2526_v18 }
 0x2ba   : > { %v3312_v21 = vpop.eup %3311  ;;  %2641 = vst [vmem:[%s5022_s3 + $0x180] sm:$0xff] %v3310_v19  ;;  %3337 = vtanh.f32 %v2527_v20 }
 0x2bb   : > { %v3314_v23 = vpop.eup %3313  ;;  %2642 = vst [vmem:[%s5022_s3 + $0x188] sm:$0xff] %v3312_v21  ;;  %3339 = vtanh.f32 %v2528_v22 }
 0x2bc   : > { %v3316_v24 = vpop.eup %3315  ;;  %2643 = vst [vmem:[%s5022_s3 + $0x190] sm:$0xff] %v3314_v23 }
 0x2bd   : > { %v3318_v25 = vpop.eup %3317  ;;  %2644 = vst [vmem:[%s5022_s3 + $0x198] sm:$0xff] %v3316_v24 }
 0x2be   : > { %v3320_v26 = vpop.eup %3319  ;;  %2645 = vst [vmem:[%s5022_s3 + $0x1a0] sm:$0xff] %v3318_v25 }
 0x2bf   : > { %v3322_v35 = vpop.eup %3321  ;;  %2646 = vst [vmem:[%s5022_s3 + $0x1a8] sm:$0xff] %v3320_v26 }
 0x2c0   : > { %v3324_v27 = vpop.eup %3323  ;;  %2647 = vst [vmem:[%s5022_s3 + $0x1b0] sm:$0xff] %v3322_v35 }
 0x2c1   : > { %v3326_v28 = vpop.eup %3325  ;;  %2648 = vst [vmem:[%s5022_s3 + $0x1b8] sm:$0xff] %v3324_v27 }
 0x2c2   : > { %v3328_v29 = vpop.eup %3327  ;;  %2649 = vst [vmem:[%s5022_s3 + $0x1c0] sm:$0xff] %v3326_v28 }
 0x2c3   : > { %v3330_v30 = vpop.eup %3329  ;;  %2650 = vst [vmem:[%s5022_s3 + $0x1c8] sm:$0xff] %v3328_v29 }
 0x2c4   : > { %v3332_v31 = vpop.eup %3331  ;;  %2651 = vst [vmem:[%s5022_s3 + $0x1d0] sm:$0xff] %v3330_v30 }
 0x2c5   : > { %v3334_v32 = vpop.eup %3333  ;;  %2652 = vst [vmem:[%s5022_s3 + $0x1d8] sm:$0xff] %v3332_v31 }
 0x2c6   : > { %v3336_v33 = vpop.eup %3335  ;;  %2653 = vst [vmem:[%s5022_s3 + $0x1e0] sm:$0xff] %v3334_v32 }
 0x2c7   : > { %v3338_v34 = vpop.eup %3337  ;;  %2654 = vst [vmem:[%s5022_s3 + $0x1e8] sm:$0xff] %v3336_v33 }
 0x2c8   : > { %v3340_v36 = vpop.eup %3339  ;;  %2655 = vst [vmem:[%s5022_s3 + $0x1f0] sm:$0xff] %v3338_v34 }
 0x2c9   : > { %2656 = vst [vmem:[%s5022_s3 + $0x1f8] sm:$0xff] %v3340_v36 }
 0x2ca PF: > { %s13_s16 = sadd.s32 1, %s3379_s16   ;;  %s5023_s12 = smov %s3367_s13 }
 0x2cb   : > { %p10_p12 = scmp.ge.s32.totalorder %s13_s16, 9   ;;  %s5024_s13 = smov %s3438_s20 }
 0x2cc   : > { %s5025_s14 = smov %s3375_s15  ;;  %s5026_s15 = smov %s5028_s17 }
 0x2cd   :  { %12 = sbr.rel (!%p10_p12) target bundleno = 3 (0x3), region = 104 }

</bundles_post_ra>
